<compile_context>
chip_gen: v7x
topology: tpu7x:2x2x1
jax: 0.10.0
libtpu: 0.0.40
codegen_flags: <defaults>
</compile_context>

<pallas_src>
import numpy as np
import jax
import jax.numpy as jnp
from jax.experimental import pallas as pl
from jax.experimental.pallas import tpu as pltpu

# setup_filter([1,3,3,1]) -> normalized separable filter; upsampling applies gain = up**2 = 4.
_F1 = np.array([1.0, 3.0, 3.0, 1.0], dtype=np.float64)
_F1 = _F1 / _F1.sum()
FIR_TAP = _F1.astype(np.float32)                          # normalized 1-D taps
FIR_2D_G4 = (np.outer(_F1, _F1) * 4.0).astype(np.float32)  # 4x4, gain folded

LRELU_GAIN = float(np.sqrt(2.0))
CONV_CLAMP = 256.0
MATMUL_DTYPE = jnp.bfloat16       # MXU operand dtype; accumulation / demod / act stay f32
TILE_N = 1024                     # in-kernel lane-chunk for the stacked-K matmul

# conv_transpose2d(stride=2) sub-pixel phases: (weight tap t = ky*3+kx, dy, dx); flat off = dy*Wp+dx
_PHASE_TAPS = (
    ((8, 0, 0), (6, 0, 1), (2, 1, 0), (0, 1, 1)),   # even out-row, even out-col
    ((7, 0, 1), (1, 1, 1)),                          # even out-row, odd  out-col
    ((5, 1, 0), (3, 1, 1)),                          # odd  out-row, even out-col
    ((4, 1, 1),),                                    # odd  out-row, odd  out-col
)


def _ceil_to(x, m):
    return ((x + m - 1) // m) * m


def _cdiv(a, b):
    return -(-a // b)


_VMEM_LIMIT_CACHE = None


def _vmem_limit_bytes():
    global _VMEM_LIMIT_CACHE
    if _VMEM_LIMIT_CACHE is None:
        try:
            cap = int(pltpu.get_tpu_info().vmem_capacity_bytes)
        except Exception:
            cap = 64 * 1024 * 1024
        _VMEM_LIMIT_CACHE = int(min(max(cap - 16 * 1024 * 1024, 32 * 1024 * 1024),
                                    100 * 1024 * 1024))
    return _VMEM_LIMIT_CACHE


def _mosaic_params():
    return pltpu.CompilerParams(dimension_semantics=("parallel",),
                                vmem_limit_bytes=_vmem_limit_bytes())


def _pad_flatten(x, top, left, l_needed):
    """Single jnp.pad: spatial pad (top,1)/(left,1) + enough extra zero rows so that the
    flattened length covers l_needed (all in-kernel tap slices stay in-bounds)."""
    B, C, H, W = x.shape
    Wp = W + left + 1
    rows = H + top + 1
    extra = max(0, _cdiv(l_needed - rows * Wp, Wp))
    xp = jnp.pad(x, ((0, 0), (0, 0), (top, 1 + extra), (left, 1)))
    return xp.reshape(B, C, (rows + extra) * Wp), Wp


def _interleave_phases(planes, H, W, Wp):
    """planes: (B, 4, C, Qp), phase order (row-parity, col-parity), flat index a*Wp+b.
    Interleave with one transpose+reshape (no strided scatters)."""
    B, _, C, _ = planes.shape
    p = planes[:, :, :, :H * Wp].reshape(B, 2, 2, C, H, Wp)[..., :W]
    p = p.transpose(0, 3, 4, 1, 5, 2)           # (B, C, H, pr, W, pc)
    return p.reshape(B, C, 2 * H, 2 * W)


# ------------------------------------------------------------------ kernel A: conv1 (up=1) + ToRGB

def _make_conv_torgb_kernel(offsets, Pp, tile, act_gain, clamp):
    def kernel(x_ref, w_ref, s_ref, d_ref, b_ref, n_ref,
               wrgb_ref, srgb_ref, brgb_ref, act_ref, rgb_ref):
        xb = x_ref[0]                                          # (Cin, L)  f32
        s = s_ref[0]                                           # (Cin, 1)  style (modulation)
        d = d_ref[0]                                           # (Cout, 1) demod coefficient
        xsb = (xb * s).astype(MATMUL_DTYPE)                    # modulate activation once
        wst = w_ref[...]                                       # (Cout, 9*Cin) bf16
        wrgb = (wrgb_ref[...] * srgb_ref[0]).astype(MATMUL_DTYPE)   # (Crgb, Cout)
        bias = b_ref[...]                                      # (Cout, 1)
        brgb = brgb_ref[...]                                   # (Crgb, 1)
        for p0 in range(0, Pp, tile):
            ln = min(tile, Pp - p0)
            slab = jnp.concatenate(
                [xsb[:, off + p0:off + p0 + ln] for off in offsets], axis=0)  # (9*Cin, ln)
            acc = jax.lax.dot_general(wst, slab, (((1,), (0,)), ((), ())),
                                      preferred_element_type=jnp.float32)      # (Cout, ln)
            acc = acc * d + n_ref[:, p0:p0 + ln]               # demod, then noise
            acc = acc + bias
            acc = jnp.where(acc >= 0.0, acc, 0.2 * acc) * act_gain
            acc = jnp.clip(acc, -clamp, clamp)
            act_ref[0, :, p0:p0 + ln] = acc
            rgb = jax.lax.dot_general(wrgb, acc.astype(MATMUL_DTYPE),
                                      (((1,), (0,)), ((), ())),
                                      preferred_element_type=jnp.float32)      # (Crgb, ln)
            rgb = jnp.clip(rgb + brgb, -clamp, clamp)
            rgb_ref[0, :, p0:p0 + ln] = rgb
    return kernel


def fused_conv1_torgb(x, style1, d1, p1, style_rgb, p_rgb):
    """up=1 modulated 3x3 conv (+noise+bias+lrelu+clamp) fused with ToRGB (1x1, no demod)."""
    B, Cin, H, W = x.shape
    Cout = p1["weight"].shape[0]
    Crgb = p_rgb["weight"].shape[0]
    Wp = W + 2
    Pp = _ceil_to(H * Wp, 128)
    xflat, _ = _pad_flatten(x, 1, 1, Pp + 2 * Wp + 2)
    L = xflat.shape[-1]
    offsets = tuple(a * Wp + b for a in range(3) for b in range(3))
    # weight stacked along K in tap order t = ky*3+kx (matches slab concat order), bf16
    wst = p1["weight"].transpose(0, 2, 3, 1).reshape(Cout, 9 * Cin).astype(MATMUL_DTYPE)
    wrgb = p_rgb["weight"].reshape(Crgb, Cout).astype(jnp.float32)
    noise2d = p1["noise_const"] * p1["noise_strength"]                     # (H, W)
    noise_plane = jnp.pad(noise2d, ((0, 0), (0, Wp - W))).reshape(1, H * Wp)
    noise_plane = jnp.pad(noise_plane, ((0, 0), (0, Pp - H * Wp)))
    tile = min(TILE_N, Pp)
    kernel = _make_conv_torgb_kernel(offsets, Pp, tile, LRELU_GAIN, CONV_CLAMP)
    act, rgb = pl.pallas_call(
        kernel,
        out_shape=(jax.ShapeDtypeStruct((B, Cout, Pp), jnp.float32),
                   jax.ShapeDtypeStruct((B, Crgb, Pp), jnp.float32)),
        grid=(B,),
        in_specs=[
            pl.BlockSpec((1, Cin, L), lambda b: (b, 0, 0)),
            pl.BlockSpec((Cout, 9 * Cin), lambda b: (0, 0)),
            pl.BlockSpec((1, Cin, 1), lambda b: (b, 0, 0)),
            pl.BlockSpec((1, Cout, 1), lambda b: (b, 0, 0)),
            pl.BlockSpec((Cout, 1), lambda b: (0, 0)),
            pl.BlockSpec((1, Pp), lambda b: (0, 0)),
            pl.BlockSpec((Crgb, Cout), lambda b: (0, 0)),
            pl.BlockSpec((1, 1, Cout), lambda b: (b, 0, 0)),
            pl.BlockSpec((Crgb, 1), lambda b: (0, 0)),
        ],
        out_specs=(pl.BlockSpec((1, Cout, Pp), lambda b: (b, 0, 0)),
                   pl.BlockSpec((1, Crgb, Pp), lambda b: (b, 0, 0))),
        compiler_params=_mosaic_params(),
    )(xflat.astype(jnp.float32),
      wst,
      style1.reshape(B, Cin, 1).astype(jnp.float32),
      d1.reshape(B, Cout, 1).astype(jnp.float32),
      p1["bias"].reshape(Cout, 1).astype(jnp.float32),
      noise_plane.astype(jnp.float32),
      wrgb,
      style_rgb.reshape(B, 1, Cout).astype(jnp.float32),
      p_rgb["bias"].reshape(Crgb, 1).astype(jnp.float32))
    act = act[:, :, :H * Wp].reshape(B, Cout, H, Wp)[:, :, :, :W]
    rgb = rgb[:, :, :H * Wp].reshape(B, Crgb, H, Wp)[:, :, :, :W]
    return act, rgb


# ------------------------------------------------------------------ kernel B: up=2 conv + FIR (fused)

def _make_up2_fir_kernel(Wp, Qp, PW, phase_offs, act_gain, clamp):
    QV = Qp + 2 * Wp
    # gain 4 split: 2x into the horizontal pass, 2x into the vertical pass
    f0, f1, f2, f3 = [float(2.0 * FIR_TAP[i]) for i in range(4)]

    def kernel(x_ref, wee_ref, weo_ref, woe_ref, woo_ref,
               s_ref, d_ref, b_ref, n_ref, o_ref):
        xb = x_ref[0]                                          # (Cin, L)
        s = s_ref[0]                                           # (Cin, 1)
        d = d_ref[0]                                           # (Cout, 1)
        xsb = (xb * s).astype(MATMUL_DTYPE)
        wrefs = (wee_ref, weo_ref, woe_ref, woo_ref)
        planes = []
        for ph in range(4):                                    # dense sub-pixel phase convs
            offs = phase_offs[ph]
            slab = jnp.concatenate([xsb[:, off:off + PW] for off in offs], axis=0)
            p = jax.lax.dot_general(wrefs[ph][...], slab, (((1,), (0,)), ((), ())),
                                    preferred_element_type=jnp.float32)
            planes.append(p * d)                               # demod (all-tap sum of squares)
        EE, EO, OE, OO = planes                                # (Cout, PW) each

        def hpass(pe, po, pn):                                 # horizontal polyphase pass
            if pn == 0:   # even output columns
                return (f1 * pe[:, 1:1 + QV] + f3 * pe[:, 2:2 + QV]
                        + f0 * po[:, 0:QV] + f2 * po[:, 1:1 + QV])
            return (f0 * pe[:, 1:1 + QV] + f2 * pe[:, 2:2 + QV]
                    + f1 * po[:, 1:1 + QV] + f3 * po[:, 2:2 + QV])

        h_even = (hpass(EE, EO, 0), hpass(EE, EO, 1))          # even y-row intermediates
        h_odd = (hpass(OE, OO, 0), hpass(OE, OO, 1))           # odd  y-row intermediates
        bias = b_ref[...]
        for pm in range(2):
            for pn in range(2):
                e, o = h_even[pn], h_odd[pn]
                if pm == 0:   # even output rows
                    out = (f1 * e[:, Wp:Wp + Qp] + f3 * e[:, 2 * Wp:2 * Wp + Qp]
                           + f0 * o[:, 0:Qp] + f2 * o[:, Wp:Wp + Qp])
                else:
                    out = (f0 * e[:, Wp:Wp + Qp] + f2 * e[:, 2 * Wp:2 * Wp + Qp]
                           + f1 * o[:, Wp:Wp + Qp] + f3 * o[:, 2 * Wp:2 * Wp + Qp])
                ph = pm * 2 + pn
                out = out + n_ref[ph:ph + 1, :] + bias
                out = jnp.where(out >= 0.0, out, 0.2 * out) * act_gain
                out = jnp.clip(out, -clamp, clamp)
                o_ref[0, ph] = out
    return kernel


def fused_up2_layer(x, style, d, p, resolution):
    """SynthesisLayer up=2: conv_transpose(stride=2) phases + [1,3,3,1] FIR + noise+bias+lrelu+clamp,
    all in one pallas_call; 4 output phases interleaved with a single transpose."""
    B, Cin, H, W = x.shape                                     # H == W == resolution // 2
    Cout = p["weight"].shape[0]
    Wp = W + 3                                                 # 2 left pads + 1 right pad
    Qp = _ceil_to(H * Wp, 128)
    PW = _ceil_to(Qp + 2 * Wp + 2, 128)
    xflat, _ = _pad_flatten(x, 2, 2, PW + Wp + 2)              # 2 top pads -> implicit zero row r=-1
    L = xflat.shape[-1]
    w_taps = p["weight"].transpose(2, 3, 0, 1).reshape(9, Cout, Cin)
    w_ph = [jnp.concatenate([w_taps[t] for (t, _, _) in taps], axis=1).astype(MATMUL_DTYPE)
            for taps in _PHASE_TAPS]
    phase_offs = tuple(tuple(dy * Wp + dx for (_, dy, dx) in taps) for taps in _PHASE_TAPS)
    noise2d = p["noise_const"] * p["noise_strength"]           # (2H, 2W)
    nph = []
    for pm in range(2):
        for pn in range(2):
            n = noise2d[pm::2, pn::2]                          # (H, W)
            n = jnp.pad(n, ((0, 0), (0, Wp - W))).reshape(1, H * Wp)
            nph.append(jnp.pad(n, ((0, 0), (0, Qp - H * Wp))))
    noise4 = jnp.concatenate(nph, axis=0)                      # (4, Qp)
    kernel = _make_up2_fir_kernel(Wp, Qp, PW, phase_offs, LRELU_GAIN, CONV_CLAMP)
    out = pl.pallas_call(
        kernel,
        out_shape=jax.ShapeDtypeStruct((B, 4, Cout, Qp), jnp.float32),
        grid=(B,),
        in_specs=[
            pl.BlockSpec((1, Cin, L), lambda b: (b, 0, 0)),
            pl.BlockSpec(w_ph[0].shape, lambda b: (0, 0)),
            pl.BlockSpec(w_ph[1].shape, lambda b: (0, 0)),
            pl.BlockSpec(w_ph[2].shape, lambda b: (0, 0)),
            pl.BlockSpec(w_ph[3].shape, lambda b: (0, 0)),
            pl.BlockSpec((1, Cin, 1), lambda b: (b, 0, 0)),
            pl.BlockSpec((1, Cout, 1), lambda b: (b, 0, 0)),
            pl.BlockSpec((Cout, 1), lambda b: (0, 0)),
            pl.BlockSpec((4, Qp), lambda b: (0, 0)),
        ],
        out_specs=pl.BlockSpec((1, 4, Cout, Qp), lambda b: (b, 0, 0, 0)),
        compiler_params=_mosaic_params(),
    )(xflat.astype(jnp.float32), w_ph[0], w_ph[1], w_ph[2], w_ph[3],
      style.reshape(B, Cin, 1).astype(jnp.float32),
      d.reshape(B, Cout, 1).astype(jnp.float32),
      p["bias"].reshape(Cout, 1).astype(jnp.float32),
      noise4.astype(jnp.float32))
    return _interleave_phases(out, H, W, Wp)                   # (B, Cout, 2H, 2W)


# ------------------------------------------------------------------ kernel C: skip-image upsample2d

def _make_upsample_kernel(phase_taps, Qp):
    def kernel(x_ref, o_ref):
        x = x_ref[0]                                           # (C, L)
        for ph in range(4):
            acc = None
            for off, cf in phase_taps[ph]:
                term = cf * x[:, off:off + Qp]
                acc = term if acc is None else acc + term
            o_ref[0, ph] = acc
    return kernel


def upsample2d_img(img):
    """upfirdn2d.upsample2d(img, [1,3,3,1]): polyphase (4 output phases x 4 taps)."""
    B, C, H, W = img.shape
    Wp = W + 2
    Qp = _ceil_to(H * Wp, 128)
    xflat, _ = _pad_flatten(img, 1, 1, Qp + 2 * Wp + 3)
    L = xflat.shape[-1]
    phases = []
    for pr in range(2):
        for pc in range(2):
            taps = []
            for k in range(2):
                for j in range(2):
                    u, v = pr + 2 * k, pc + 2 * j
                    dy, dx = k + pr, j + pc
                    taps.append((dy * Wp + dx, float(FIR_2D_G4[u, v])))
            phases.append(tuple(taps))
    out = pl.pallas_call(
        _make_upsample_kernel(tuple(phases), Qp),
        out_shape=jax.ShapeDtypeStruct((B, 4, C, Qp), jnp.float32),
        grid=(B,),
        in_specs=[pl.BlockSpec((1, C, L), lambda b: (b, 0, 0))],
        out_specs=pl.BlockSpec((1, 4, C, Qp), lambda b: (b, 0, 0, 0)),
        compiler_params=_mosaic_params(),
    )(xflat.astype(jnp.float32))
    return _interleave_phases(out, H, W, Wp)


# ------------------------------------------------------------------ styles / demod (batched XLA)

def _collect_layers(params, block_res):
    layers = []
    for res in block_res:
        bp = params[res]
        names = (["conv0", "conv1"] if bp["in_channels"] else ["conv1"]) + ["torgb"]
        for name in names:
            p = bp[name]
            is_rgb = (name == "torgb")
            cin = int(p["affine_w"].shape[0])
            wsq = None
            if not is_rgb:
                w = p["weight"].astype(jnp.float32)
                wsq = jnp.sum(w * w, axis=(2, 3))              # (Cout, Cin): sum_t w_t^2
            layers.append({"key": (res, name),
                           "affine_w": p["affine_w"],
                           "affine_b": p["affine_b"],
                           "style_gain": (1.0 / np.sqrt(cin)) if is_rgb else 1.0,
                           "wsq": wsq})
    return layers


def compute_styles_and_demod(ws, layers, w_dim):
    """All per-layer affine FCs + all demod coefficients as two batched einsums."""
    cin_max = max(int(l["affine_w"].shape[0]) for l in layers)
    cout_max = max(int(l["wsq"].shape[0]) for l in layers if l["wsq"] is not None)
    lc = len(layers)
    wall = jnp.stack([jnp.pad(l["affine_w"], ((0, cin_max - l["affine_w"].shape[0]), (0, 0)))
                      for l in layers])
    ball = jnp.stack([jnp.pad(l["affine_b"], (0, cin_max - l["affine_b"].shape[0]))
                      for l in layers])
    gains = jnp.array([l["style_gain"] for l in layers], jnp.float32)
    wsq_all = jnp.stack([
        jnp.pad(l["wsq"], ((0, cout_max - l["wsq"].shape[0]), (0, cin_max - l["wsq"].shape[1])))
        if l["wsq"] is not None else jnp.zeros((cout_max, cin_max), jnp.float32)
        for l in layers])
    wsel = ws[:, :lc, :]
    styles = jnp.einsum("blw,lcw->blc", wsel, wall) * (1.0 / np.sqrt(w_dim)) + ball[None]
    styles = styles * gains[None, :, None]
    dcoef = jax.lax.rsqrt(jnp.einsum("blc,loc->blo", styles * styles, wsq_all) + 1e-8)
    return styles, dcoef


# ------------------------------------------------------------------ network forward

def synthesis_network_forward(ws, params, block_res, w_dim):
    ws = ws.astype(jnp.float32)
    layers = _collect_layers(params, block_res)
    styles_all, dcoef_all = compute_styles_and_demod(ws, layers, w_dim)
    idx_of = {l["key"]: i for i, l in enumerate(layers)}

    def style(res, name, c):
        return styles_all[:, idx_of[(res, name)], :c]

    def demod(res, name, c):
        return dcoef_all[:, idx_of[(res, name)], :c]

    B = ws.shape[0]
    x, img = None, None
    for res in block_res:
        bp = params[res]
        cin, cout = bp["in_channels"], bp["out_channels"]
        if cin == 0:
            x = jnp.broadcast_to(bp["const"][None], (B,) + bp["const"].shape).astype(jnp.float32)
        else:
            x = fused_up2_layer(x, style(res, "conv0", cin), demod(res, "conv0", cout),
                                bp["conv0"], res)
        x, y = fused_conv1_torgb(x, style(res, "conv1", cout), demod(res, "conv1", cout),
                                 bp["conv1"], style(res, "torgb", cout), bp["torgb"])
        img = (upsample2d_img(img) + y) if img is not None else y   # architecture='skip'
    return img


# ------------------------------------------------------------------ parameter init

def _synth_layer_params(key, in_c, out_c, w_dim, res, kernel_size=3):
    k1, k2, k3 = jax.random.split(key, 3)
    return {
        "affine_w": jax.random.normal(k1, (in_c, w_dim), jnp.float32),
        "affine_b": jnp.ones((in_c,), jnp.float32),               # bias_init=1
        "weight": jax.random.normal(k2, (out_c, in_c, kernel_size, kernel_size), jnp.float32),
        "bias": jnp.zeros((out_c,), jnp.float32),
        "noise_const": jax.random.normal(k3, (res, res), jnp.float32),
        "noise_strength": jnp.zeros((), jnp.float32),
    }


def _torgb_params(key, in_c, img_channels, w_dim):
    k1, k2 = jax.random.split(key, 2)
    return {
        "affine_w": jax.random.normal(k1, (in_c, w_dim), jnp.float32),
        "affine_b": jnp.ones((in_c,), jnp.float32),
        "weight": jax.random.normal(k2, (img_channels, in_c, 1, 1), jnp.float32),
        "bias": jnp.zeros((img_channels,), jnp.float32),
    }


def init_synthesis_network(key, w_dim, img_resolution, img_channels,
                           channel_base=32768, channel_max=512):
    assert img_resolution >= 4 and (img_resolution & (img_resolution - 1)) == 0
    log2 = int(np.log2(img_resolution))
    block_res = [2 ** i for i in range(2, log2 + 1)]
    channels = {r: min(channel_base // r, channel_max) for r in block_res}
    params, num_ws = {}, 0
    for res in block_res:
        in_c = channels[res // 2] if res > 4 else 0
        out_c = channels[res]
        key, k0, k1, k2 = jax.random.split(key, 4)
        bp = {"in_channels": in_c, "out_channels": out_c, "resolution": res}
        if in_c == 0:
            bp["const"] = jax.random.normal(k0, (out_c, res, res), jnp.float32)
            num_conv = 1
        else:
            bp["conv0"] = _synth_layer_params(k0, in_c, out_c, w_dim, res)
            num_conv = 2
        bp["conv1"] = _synth_layer_params(k1, out_c, out_c, w_dim, res)
        bp["torgb"] = _torgb_params(k2, out_c, img_channels, w_dim)
        bp["num_ws"] = num_conv + 1
        num_ws += bp["num_ws"]
        params[res] = bp
    return params, block_res, num_ws


# ------------------------------------------------------------------ main

if __name__ == "__main__":
    # Small SynthesisNetwork: w_dim=32, img_resolution=16, img_channels=4,
    # channel_base=256, channel_max=32  ->  blocks b4(32ch), b8(32ch), b16(16ch), num_ws=8.
    w_dim, img_resolution, img_channels = 32, 16, 4
    channel_base, channel_max, batch = 256, 32, 2

    key = jax.random.PRNGKey(0)
    key, kp, kw = jax.random.split(key, 3)
    params, block_res, num_ws = init_synthesis_network(
        kp, w_dim, img_resolution, img_channels, channel_base, channel_max)

    ws = jax.random.normal(kw, (batch, num_ws, w_dim), jnp.float32)

    fwd = jax.jit(lambda w: synthesis_network_forward(w, params, block_res, w_dim))
    img = fwd(ws)
    img = jax.block_until_ready(img)

    assert img.shape == (batch, img_channels, img_resolution, img_resolution), img.shape
    assert img.dtype == jnp.float32
    assert bool(jnp.all(jnp.isfinite(img)))
    print("KERNEL_OK")
</pallas_src>

<mosaic_0001>
module attributes {stable_mosaic.version = 11 : i64} {
  func.func @kernel(%arg0: i32, %arg1: memref<1x32x144xf32, #tpu.memory_space<vmem>>, %arg2: memref<32x288xbf16, #tpu.memory_space<vmem>>, %arg3: memref<1x32x1xf32, #tpu.memory_space<vmem>>, %arg4: memref<1x32x1xf32, #tpu.memory_space<vmem>>, %arg5: memref<32x1xf32, #tpu.memory_space<vmem>>, %arg6: memref<1x128xf32, #tpu.memory_space<vmem>>, %arg7: memref<4x32xf32, #tpu.memory_space<vmem>>, %arg8: memref<1x1x32xf32, #tpu.memory_space<vmem>>, %arg9: memref<4x1xf32, #tpu.memory_space<vmem>>, %arg10: memref<1x32x128xf32, #tpu.memory_space<vmem>>, %arg11: memref<1x4x128xf32, #tpu.memory_space<vmem>>) attributes {dimension_semantics = [#tpu.dimension_semantics<parallel>], iteration_bounds = array<i64: 2>, scalar_prefetch = 0 : i64, scratch_operands = 0 : i64, tpu.core_type = #tpu.core_type<tc>, window_params = [{transform_indices = @transform_0, window_bounds = array<i64: 1, 32, 144>}, {pipeline_mode = #tpu.pipeline_mode<synchronous>, transform_indices = @transform_1, window_bounds = array<i64: 32, 288>}, {transform_indices = @transform_2, window_bounds = array<i64: 1, 32, 1>}, {transform_indices = @transform_3, window_bounds = array<i64: 1, 32, 1>}, {pipeline_mode = #tpu.pipeline_mode<synchronous>, transform_indices = @transform_4, window_bounds = array<i64: 32, 1>}, {pipeline_mode = #tpu.pipeline_mode<synchronous>, transform_indices = @transform_5, window_bounds = array<i64: 1, 128>}, {pipeline_mode = #tpu.pipeline_mode<synchronous>, transform_indices = @transform_6, window_bounds = array<i64: 4, 32>}, {transform_indices = @transform_7, window_bounds = array<i64: 1, 1, 32>}, {pipeline_mode = #tpu.pipeline_mode<synchronous>, transform_indices = @transform_8, window_bounds = array<i64: 4, 1>}, {transform_indices = @transform_9, window_bounds = array<i64: 1, 32, 128>}, {transform_indices = @transform_10, window_bounds = array<i64: 1, 4, 128>}]} {
    %c0 = arith.constant 0 : index
    %c0_0 = arith.constant 0 : index
    %c0_1 = arith.constant 0 : index
    %0 = vector.load %arg1[%c0, %c0_0, %c0_1] : memref<1x32x144xf32, #tpu.memory_space<vmem>>, vector<1x32x144xf32>
    %1 = vector.shape_cast %0 : vector<1x32x144xf32> to vector<32x144xf32>
    %c0_2 = arith.constant 0 : index
    %c0_3 = arith.constant 0 : index
    %c0_4 = arith.constant 0 : index
    %2 = vector.load %arg3[%c0_2, %c0_3, %c0_4] : memref<1x32x1xf32, #tpu.memory_space<vmem>>, vector<1x32x1xf32>
    %3 = vector.shape_cast %2 : vector<1x32x1xf32> to vector<32x1xf32>
    %c0_5 = arith.constant 0 : index
    %c0_6 = arith.constant 0 : index
    %c0_7 = arith.constant 0 : index
    %4 = vector.load %arg4[%c0_5, %c0_6, %c0_7] : memref<1x32x1xf32, #tpu.memory_space<vmem>>, vector<1x32x1xf32>
    %5 = vector.shape_cast %4 : vector<1x32x1xf32> to vector<32x1xf32>
    %6 = vector.broadcast %3 : vector<32x1xf32> to vector<32x144xf32>
    %7 = arith.mulf %1, %6 : vector<32x144xf32>
    %8 = arith.truncf %7 : vector<32x144xf32> to vector<32x144xbf16>
    %c0_8 = arith.constant 0 : index
    %c0_9 = arith.constant 0 : index
    %9 = vector.load %arg2[%c0_8, %c0_9] : memref<32x288xbf16, #tpu.memory_space<vmem>>, vector<32x288xbf16>
    %c0_10 = arith.constant 0 : index
    %c0_11 = arith.constant 0 : index
    %10 = vector.load %arg7[%c0_10, %c0_11] : memref<4x32xf32, #tpu.memory_space<vmem>>, vector<4x32xf32>
    %c0_12 = arith.constant 0 : index
    %c0_13 = arith.constant 0 : index
    %c0_14 = arith.constant 0 : index
    %11 = vector.load %arg8[%c0_12, %c0_13, %c0_14] : memref<1x1x32xf32, #tpu.memory_space<vmem>>, vector<1x1x32xf32>
    %12 = vector.shape_cast %11 : vector<1x1x32xf32> to vector<1x32xf32>
    %13 = vector.broadcast %12 : vector<1x32xf32> to vector<4x32xf32>
    %14 = arith.mulf %10, %13 : vector<4x32xf32>
    %15 = arith.truncf %14 : vector<4x32xf32> to vector<4x32xbf16>
    %c0_15 = arith.constant 0 : index
    %c0_16 = arith.constant 0 : index
    %16 = vector.load %arg5[%c0_15, %c0_16] : memref<32x1xf32, #tpu.memory_space<vmem>>, vector<32x1xf32>
    %c0_17 = arith.constant 0 : index
    %c0_18 = arith.constant 0 : index
    %17 = vector.load %arg9[%c0_17, %c0_18] : memref<4x1xf32, #tpu.memory_space<vmem>>, vector<4x1xf32>
    %18 = vector.extract_strided_slice %8 {offsets = [0, 0], sizes = [32, 128], strides = [1, 1]} : vector<32x144xbf16> to vector<32x128xbf16>
    %19 = vector.extract_strided_slice %8 {offsets = [0, 1], sizes = [32, 128], strides = [1, 1]} : vector<32x144xbf16> to vector<32x128xbf16>
    %20 = vector.extract_strided_slice %8 {offsets = [0, 2], sizes = [32, 128], strides = [1, 1]} : vector<32x144xbf16> to vector<32x128xbf16>
    %21 = vector.extract_strided_slice %8 {offsets = [0, 6], sizes = [32, 128], strides = [1, 1]} : vector<32x144xbf16> to vector<32x128xbf16>
    %22 = vector.extract_strided_slice %8 {offsets = [0, 7], sizes = [32, 128], strides = [1, 1]} : vector<32x144xbf16> to vector<32x128xbf16>
    %23 = vector.extract_strided_slice %8 {offsets = [0, 8], sizes = [32, 128], strides = [1, 1]} : vector<32x144xbf16> to vector<32x128xbf16>
    %24 = vector.extract_strided_slice %8 {offsets = [0, 12], sizes = [32, 128], strides = [1, 1]} : vector<32x144xbf16> to vector<32x128xbf16>
    %25 = vector.extract_strided_slice %8 {offsets = [0, 13], sizes = [32, 128], strides = [1, 1]} : vector<32x144xbf16> to vector<32x128xbf16>
    %26 = vector.extract_strided_slice %8 {offsets = [0, 14], sizes = [32, 128], strides = [1, 1]} : vector<32x144xbf16> to vector<32x128xbf16>
    %27 = tpu.concatenate %18, %19, %20, %21, %22, %23, %24, %25, %26 in 0 : vector<32x128xbf16>, vector<32x128xbf16>, vector<32x128xbf16>, vector<32x128xbf16>, vector<32x128xbf16>, vector<32x128xbf16>, vector<32x128xbf16>, vector<32x128xbf16>, vector<32x128xbf16> -> vector<288x128xbf16>
    %cst = arith.constant dense<0.000000e+00> : vector<32x128xf32>
    %28 = tpu.matmul %9, %27, %cst {dimension_numbers = #tpu.dot_dimension_numbers<[1], [0], [0], [1], [0, 0, 1, 1], [], []>} : vector<32x288xbf16>, vector<288x128xbf16>, vector<32x128xf32> -> vector<32x128xf32>
    %29 = vector.broadcast %5 : vector<32x1xf32> to vector<32x128xf32>
    %30 = arith.mulf %28, %29 : vector<32x128xf32>
    %c0_19 = arith.constant 0 : index
    %c0_20 = arith.constant 0 : index
    %31 = vector.load %arg6[%c0_19, %c0_20] : memref<1x128xf32, #tpu.memory_space<vmem>>, vector<1x128xf32>
    %32 = vector.broadcast %31 : vector<1x128xf32> to vector<32x128xf32>
    %33 = arith.addf %30, %32 : vector<32x128xf32>
    %34 = vector.broadcast %16 : vector<32x1xf32> to vector<32x128xf32>
    %35 = arith.addf %33, %34 : vector<32x128xf32>
    %cst_21 = arith.constant 0.000000e+00 : f32
    %36 = vector.broadcast %cst_21 : f32 to vector<32x128xf32>
    %37 = arith.cmpf oge, %35, %36 : vector<32x128xf32>
    %cst_22 = arith.constant 2.000000e-01 : f32
    %38 = vector.broadcast %cst_22 : f32 to vector<32x128xf32>
    %39 = arith.mulf %38, %35 : vector<32x128xf32>
    %40 = arith.select %37, %35, %39 : vector<32x128xi1>, vector<32x128xf32>
    %cst_23 = arith.constant 1.41421354 : f32
    %41 = vector.broadcast %cst_23 : f32 to vector<32x128xf32>
    %42 = arith.mulf %40, %41 : vector<32x128xf32>
    %cst_24 = arith.constant -2.560000e+02 : f32
    %cst_25 = arith.constant 2.560000e+02 : f32
    %43 = vector.broadcast %cst_24 : f32 to vector<32x128xf32>
    %44 = arith.maximumf %43, %42 : vector<32x128xf32>
    %45 = vector.broadcast %cst_25 : f32 to vector<32x128xf32>
    %46 = arith.minimumf %45, %44 : vector<32x128xf32>
    %c0_26 = arith.constant 0 : index
    %c0_27 = arith.constant 0 : index
    %c0_28 = arith.constant 0 : index
    %47 = vector.load %arg10[%c0_26, %c0_27, %c0_28] : memref<1x32x128xf32, #tpu.memory_space<vmem>>, vector<1x32x128xf32>
    %48 = vector.shape_cast %47 : vector<1x32x128xf32> to vector<32x128xf32>
    %49 = vector.shape_cast %46 : vector<32x128xf32> to vector<1x32x128xf32>
    tpu.vector_store %arg10[%c0_26, %c0_27, %c0_28], %49 {strides = array<i32>} : memref<1x32x128xf32, #tpu.memory_space<vmem>>, vector<1x32x128xf32>,
    %50 = arith.truncf %46 : vector<32x128xf32> to vector<32x128xbf16>
    %cst_29 = arith.constant dense<0.000000e+00> : vector<4x128xf32>
    %51 = tpu.matmul %15, %50, %cst_29 {dimension_numbers = #tpu.dot_dimension_numbers<[1], [0], [0], [1], [0, 0, 1, 1], [], []>} : vector<4x32xbf16>, vector<32x128xbf16>, vector<4x128xf32> -> vector<4x128xf32>
    %52 = vector.broadcast %17 : vector<4x1xf32> to vector<4x128xf32>
    %53 = arith.addf %51, %52 : vector<4x128xf32>
    %cst_30 = arith.constant -2.560000e+02 : f32
    %cst_31 = arith.constant 2.560000e+02 : f32
    %54 = vector.broadcast %cst_30 : f32 to vector<4x128xf32>
    %55 = arith.maximumf %54, %53 : vector<4x128xf32>
    %56 = vector.broadcast %cst_31 : f32 to vector<4x128xf32>
    %57 = arith.minimumf %56, %55 : vector<4x128xf32>
    %c0_32 = arith.constant 0 : index
    %c0_33 = arith.constant 0 : index
    %c0_34 = arith.constant 0 : index
    %58 = vector.load %arg11[%c0_32, %c0_33, %c0_34] : memref<1x4x128xf32, #tpu.memory_space<vmem>>, vector<1x4x128xf32>
    %59 = vector.shape_cast %58 : vector<1x4x128xf32> to vector<4x128xf32>
    %60 = vector.shape_cast %57 : vector<4x128xf32> to vector<1x4x128xf32>
    tpu.vector_store %arg11[%c0_32, %c0_33, %c0_34], %60 {strides = array<i32>} : memref<1x4x128xf32, #tpu.memory_space<vmem>>, vector<1x4x128xf32>,
    return
  }
  func.func @transform_0(%arg0: i32) -> (i32, i32, i32) {
    %c0_i32 = arith.constant 0 : i32
    %c0_i32_0 = arith.constant 0 : i32
    %c0_i32_1 = arith.constant 0 : i32
    return %arg0, %c0_i32, %c0_i32_0 : i32, i32, i32
  }
  func.func @transform_1(%arg0: i32) -> (i32, i32) {
    %c0_i32 = arith.constant 0 : i32
    %c0_i32_0 = arith.constant 0 : i32
    %c0_i32_1 = arith.constant 0 : i32
    return %c0_i32, %c0_i32_0 : i32, i32
  }
  func.func @transform_2(%arg0: i32) -> (i32, i32, i32) {
    %c0_i32 = arith.constant 0 : i32
    %c0_i32_0 = arith.constant 0 : i32
    %c0_i32_1 = arith.constant 0 : i32
    return %arg0, %c0_i32, %c0_i32_0 : i32, i32, i32
  }
  func.func @transform_3(%arg0: i32) -> (i32, i32, i32) {
    %c0_i32 = arith.constant 0 : i32
    %c0_i32_0 = arith.constant 0 : i32
    %c0_i32_1 = arith.constant 0 : i32
    return %arg0, %c0_i32, %c0_i32_0 : i32, i32, i32
  }
  func.func @transform_4(%arg0: i32) -> (i32, i32) {
    %c0_i32 = arith.constant 0 : i32
    %c0_i32_0 = arith.constant 0 : i32
    %c0_i32_1 = arith.constant 0 : i32
    return %c0_i32, %c0_i32_0 : i32, i32
  }
  func.func @transform_5(%arg0: i32) -> (i32, i32) {
    %c0_i32 = arith.constant 0 : i32
    %c0_i32_0 = arith.constant 0 : i32
    %c0_i32_1 = arith.constant 0 : i32
    return %c0_i32, %c0_i32_0 : i32, i32
  }
  func.func @transform_6(%arg0: i32) -> (i32, i32) {
    %c0_i32 = arith.constant 0 : i32
    %c0_i32_0 = arith.constant 0 : i32
    %c0_i32_1 = arith.constant 0 : i32
    return %c0_i32, %c0_i32_0 : i32, i32
  }
  func.func @transform_7(%arg0: i32) -> (i32, i32, i32) {
    %c0_i32 = arith.constant 0 : i32
    %c0_i32_0 = arith.constant 0 : i32
    %c0_i32_1 = arith.constant 0 : i32
    return %arg0, %c0_i32, %c0_i32_0 : i32, i32, i32
  }
  func.func @transform_8(%arg0: i32) -> (i32, i32) {
    %c0_i32 = arith.constant 0 : i32
    %c0_i32_0 = arith.constant 0 : i32
    %c0_i32_1 = arith.constant 0 : i32
    return %c0_i32, %c0_i32_0 : i32, i32
  }
  func.func @transform_9(%arg0: i32) -> (i32, i32, i32) {
    %c0_i32 = arith.constant 0 : i32
    %c0_i32_0 = arith.constant 0 : i32
    %c0_i32_1 = arith.constant 0 : i32
    return %arg0, %c0_i32, %c0_i32_0 : i32, i32, i32
  }
  func.func @transform_10(%arg0: i32) -> (i32, i32, i32) {
    %c0_i32 = arith.constant 0 : i32
    %c0_i32_0 = arith.constant 0 : i32
    %c0_i32_1 = arith.constant 0 : i32
    return %arg0, %c0_i32, %c0_i32_0 : i32, i32, i32
  }
}

module attributes {stable_mosaic.version = 11 : i64} {
  func.func @kernel(%arg0: i32, %arg1: memref<1x32x266xf32, #tpu.memory_space<vmem>>, %arg2: memref<32x128xbf16, #tpu.memory_space<vmem>>, %arg3: memref<32x64xbf16, #tpu.memory_space<vmem>>, %arg4: memref<32x64xbf16, #tpu.memory_space<vmem>>, %arg5: memref<32x32xbf16, #tpu.memory_space<vmem>>, %arg6: memref<1x32x1xf32, #tpu.memory_space<vmem>>, %arg7: memref<1x32x1xf32, #tpu.memory_space<vmem>>, %arg8: memref<32x1xf32, #tpu.memory_space<vmem>>, %arg9: memref<4x128xf32, #tpu.memory_space<vmem>>, %arg10: memref<1x4x32x128xf32, #tpu.memory_space<vmem>>) attributes {dimension_semantics = [#tpu.dimension_semantics<parallel>], iteration_bounds = array<i64: 2>, scalar_prefetch = 0 : i64, scratch_operands = 0 : i64, tpu.core_type = #tpu.core_type<tc>, window_params = [{transform_indices = @transform_0, window_bounds = array<i64: 1, 32, 266>}, {pipeline_mode = #tpu.pipeline_mode<synchronous>, transform_indices = @transform_1, window_bounds = array<i64: 32, 128>}, {pipeline_mode = #tpu.pipeline_mode<synchronous>, transform_indices = @transform_2, window_bounds = array<i64: 32, 64>}, {pipeline_mode = #tpu.pipeline_mode<synchronous>, transform_indices = @transform_3, window_bounds = array<i64: 32, 64>}, {pipeline_mode = #tpu.pipeline_mode<synchronous>, transform_indices = @transform_4, window_bounds = array<i64: 32, 32>}, {transform_indices = @transform_5, window_bounds = array<i64: 1, 32, 1>}, {transform_indices = @transform_6, window_bounds = array<i64: 1, 32, 1>}, {pipeline_mode = #tpu.pipeline_mode<synchronous>, transform_indices = @transform_7, window_bounds = array<i64: 32, 1>}, {pipeline_mode = #tpu.pipeline_mode<synchronous>, transform_indices = @transform_8, window_bounds = array<i64: 4, 128>}, {transform_indices = @transform_9, window_bounds = array<i64: 1, 4, 32, 128>}]} {
    %c0 = arith.constant 0 : index
    %c0_0 = arith.constant 0 : index
    %c0_1 = arith.constant 0 : index
    %0 = vector.load %arg1[%c0, %c0_0, %c0_1] : memref<1x32x266xf32, #tpu.memory_space<vmem>>, vector<1x32x266xf32>
    %1 = vector.shape_cast %0 : vector<1x32x266xf32> to vector<32x266xf32>
    %c0_2 = arith.constant 0 : index
    %c0_3 = arith.constant 0 : index
    %c0_4 = arith.constant 0 : index
    %2 = vector.load %arg6[%c0_2, %c0_3, %c0_4] : memref<1x32x1xf32, #tpu.memory_space<vmem>>, vector<1x32x1xf32>
    %3 = vector.shape_cast %2 : vector<1x32x1xf32> to vector<32x1xf32>
    %c0_5 = arith.constant 0 : index
    %c0_6 = arith.constant 0 : index
    %c0_7 = arith.constant 0 : index
    %4 = vector.load %arg7[%c0_5, %c0_6, %c0_7] : memref<1x32x1xf32, #tpu.memory_space<vmem>>, vector<1x32x1xf32>
    %5 = vector.shape_cast %4 : vector<1x32x1xf32> to vector<32x1xf32>
    %6 = vector.broadcast %3 : vector<32x1xf32> to vector<32x266xf32>
    %7 = arith.mulf %1, %6 : vector<32x266xf32>
    %8 = arith.truncf %7 : vector<32x266xf32> to vector<32x266xbf16>
    %9 = vector.extract_strided_slice %8 {offsets = [0, 0], sizes = [32, 256], strides = [1, 1]} : vector<32x266xbf16> to vector<32x256xbf16>
    %10 = vector.extract_strided_slice %8 {offsets = [0, 1], sizes = [32, 256], strides = [1, 1]} : vector<32x266xbf16> to vector<32x256xbf16>
    %11 = vector.extract_strided_slice %8 {offsets = [0, 7], sizes = [32, 256], strides = [1, 1]} : vector<32x266xbf16> to vector<32x256xbf16>
    %12 = vector.extract_strided_slice %8 {offsets = [0, 8], sizes = [32, 256], strides = [1, 1]} : vector<32x266xbf16> to vector<32x256xbf16>
    %13 = tpu.concatenate %9, %10, %11, %12 in 0 : vector<32x256xbf16>, vector<32x256xbf16>, vector<32x256xbf16>, vector<32x256xbf16> -> vector<128x256xbf16>
    %c0_8 = arith.constant 0 : index
    %c0_9 = arith.constant 0 : index
    %14 = vector.load %arg2[%c0_8, %c0_9] : memref<32x128xbf16, #tpu.memory_space<vmem>>, vector<32x128xbf16>
    %cst = arith.constant dense<0.000000e+00> : vector<32x256xf32>
    %15 = tpu.matmul %14, %13, %cst {dimension_numbers = #tpu.dot_dimension_numbers<[1], [0], [0], [1], [0, 0, 1, 1], [], []>} : vector<32x128xbf16>, vector<128x256xbf16>, vector<32x256xf32> -> vector<32x256xf32>
    %16 = vector.broadcast %5 : vector<32x1xf32> to vector<32x256xf32>
    %17 = arith.mulf %15, %16 : vector<32x256xf32>
    %18 = vector.extract_strided_slice %8 {offsets = [0, 1], sizes = [32, 256], strides = [1, 1]} : vector<32x266xbf16> to vector<32x256xbf16>
    %19 = vector.extract_strided_slice %8 {offsets = [0, 8], sizes = [32, 256], strides = [1, 1]} : vector<32x266xbf16> to vector<32x256xbf16>
    %20 = tpu.concatenate %18, %19 in 0 : vector<32x256xbf16>, vector<32x256xbf16> -> vector<64x256xbf16>
    %c0_10 = arith.constant 0 : index
    %c0_11 = arith.constant 0 : index
    %21 = vector.load %arg3[%c0_10, %c0_11] : memref<32x64xbf16, #tpu.memory_space<vmem>>, vector<32x64xbf16>
    %cst_12 = arith.constant dense<0.000000e+00> : vector<32x256xf32>
    %22 = tpu.matmul %21, %20, %cst_12 {dimension_numbers = #tpu.dot_dimension_numbers<[1], [0], [0], [1], [0, 0, 1, 1], [], []>} : vector<32x64xbf16>, vector<64x256xbf16>, vector<32x256xf32> -> vector<32x256xf32>
    %23 = vector.broadcast %5 : vector<32x1xf32> to vector<32x256xf32>
    %24 = arith.mulf %22, %23 : vector<32x256xf32>
    %25 = vector.extract_strided_slice %8 {offsets = [0, 7], sizes = [32, 256], strides = [1, 1]} : vector<32x266xbf16> to vector<32x256xbf16>
    %26 = vector.extract_strided_slice %8 {offsets = [0, 8], sizes = [32, 256], strides = [1, 1]} : vector<32x266xbf16> to vector<32x256xbf16>
    %27 = tpu.concatenate %25, %26 in 0 : vector<32x256xbf16>, vector<32x256xbf16> -> vector<64x256xbf16>
    %c0_13 = arith.constant 0 : index
    %c0_14 = arith.constant 0 : index
    %28 = vector.load %arg4[%c0_13, %c0_14] : memref<32x64xbf16, #tpu.memory_space<vmem>>, vector<32x64xbf16>
    %cst_15 = arith.constant dense<0.000000e+00> : vector<32x256xf32>
    %29 = tpu.matmul %28, %27, %cst_15 {dimension_numbers = #tpu.dot_dimension_numbers<[1], [0], [0], [1], [0, 0, 1, 1], [], []>} : vector<32x64xbf16>, vector<64x256xbf16>, vector<32x256xf32> -> vector<32x256xf32>
    %30 = vector.broadcast %5 : vector<32x1xf32> to vector<32x256xf32>
    %31 = arith.mulf %29, %30 : vector<32x256xf32>
    %32 = vector.extract_strided_slice %8 {offsets = [0, 8], sizes = [32, 256], strides = [1, 1]} : vector<32x266xbf16> to vector<32x256xbf16>
    %c0_16 = arith.constant 0 : index
    %c0_17 = arith.constant 0 : index
    %33 = vector.load %arg5[%c0_16, %c0_17] : memref<32x32xbf16, #tpu.memory_space<vmem>>, vector<32x32xbf16>
    %cst_18 = arith.constant dense<0.000000e+00> : vector<32x256xf32>
    %34 = tpu.matmul %33, %32, %cst_18 {dimension_numbers = #tpu.dot_dimension_numbers<[1], [0], [0], [1], [0, 0, 1, 1], [], []>} : vector<32x32xbf16>, vector<32x256xbf16>, vector<32x256xf32> -> vector<32x256xf32>
    %35 = vector.broadcast %5 : vector<32x1xf32> to vector<32x256xf32>
    %36 = arith.mulf %34, %35 : vector<32x256xf32>
    %37 = vector.extract_strided_slice %17 {offsets = [0, 1], sizes = [32, 142], strides = [1, 1]} : vector<32x256xf32> to vector<32x142xf32>
    %cst_19 = arith.constant 7.500000e-01 : f32
    %38 = vector.broadcast %cst_19 : f32 to vector<32x142xf32>
    %39 = arith.mulf %38, %37 : vector<32x142xf32>
    %40 = vector.extract_strided_slice %17 {offsets = [0, 2], sizes = [32, 142], strides = [1, 1]} : vector<32x256xf32> to vector<32x142xf32>
    %cst_20 = arith.constant 2.500000e-01 : f32
    %41 = vector.broadcast %cst_20 : f32 to vector<32x142xf32>
    %42 = arith.mulf %41, %40 : vector<32x142xf32>
    %43 = arith.addf %39, %42 : vector<32x142xf32>
    %44 = vector.extract_strided_slice %24 {offsets = [0, 0], sizes = [32, 142], strides = [1, 1]} : vector<32x256xf32> to vector<32x142xf32>
    %cst_21 = arith.constant 2.500000e-01 : f32
    %45 = vector.broadcast %cst_21 : f32 to vector<32x142xf32>
    %46 = arith.mulf %45, %44 : vector<32x142xf32>
    %47 = arith.addf %43, %46 : vector<32x142xf32>
    %48 = vector.extract_strided_slice %24 {offsets = [0, 1], sizes = [32, 142], strides = [1, 1]} : vector<32x256xf32> to vector<32x142xf32>
    %cst_22 = arith.constant 7.500000e-01 : f32
    %49 = vector.broadcast %cst_22 : f32 to vector<32x142xf32>
    %50 = arith.mulf %49, %48 : vector<32x142xf32>
    %51 = arith.addf %47, %50 : vector<32x142xf32>
    %52 = vector.extract_strided_slice %17 {offsets = [0, 1], sizes = [32, 142], strides = [1, 1]} : vector<32x256xf32> to vector<32x142xf32>
    %cst_23 = arith.constant 2.500000e-01 : f32
    %53 = vector.broadcast %cst_23 : f32 to vector<32x142xf32>
    %54 = arith.mulf %53, %52 : vector<32x142xf32>
    %55 = vector.extract_strided_slice %17 {offsets = [0, 2], sizes = [32, 142], strides = [1, 1]} : vector<32x256xf32> to vector<32x142xf32>
    %cst_24 = arith.constant 7.500000e-01 : f32
    %56 = vector.broadcast %cst_24 : f32 to vector<32x142xf32>
    %57 = arith.mulf %56, %55 : vector<32x142xf32>
    %58 = arith.addf %54, %57 : vector<32x142xf32>
    %59 = vector.extract_strided_slice %24 {offsets = [0, 1], sizes = [32, 142], strides = [1, 1]} : vector<32x256xf32> to vector<32x142xf32>
    %cst_25 = arith.constant 7.500000e-01 : f32
    %60 = vector.broadcast %cst_25 : f32 to vector<32x142xf32>
    %61 = arith.mulf %60, %59 : vector<32x142xf32>
    %62 = arith.addf %58, %61 : vector<32x142xf32>
    %63 = vector.extract_strided_slice %24 {offsets = [0, 2], sizes = [32, 142], strides = [1, 1]} : vector<32x256xf32> to vector<32x142xf32>
    %cst_26 = arith.constant 2.500000e-01 : f32
    %64 = vector.broadcast %cst_26 : f32 to vector<32x142xf32>
    %65 = arith.mulf %64, %63 : vector<32x142xf32>
    %66 = arith.addf %62, %65 : vector<32x142xf32>
    %67 = vector.extract_strided_slice %31 {offsets = [0, 1], sizes = [32, 142], strides = [1, 1]} : vector<32x256xf32> to vector<32x142xf32>
    %cst_27 = arith.constant 7.500000e-01 : f32
    %68 = vector.broadcast %cst_27 : f32 to vector<32x142xf32>
    %69 = arith.mulf %68, %67 : vector<32x142xf32>
    %70 = vector.extract_strided_slice %31 {offsets = [0, 2], sizes = [32, 142], strides = [1, 1]} : vector<32x256xf32> to vector<32x142xf32>
    %cst_28 = arith.constant 2.500000e-01 : f32
    %71 = vector.broadcast %cst_28 : f32 to vector<32x142xf32>
    %72 = arith.mulf %71, %70 : vector<32x142xf32>
    %73 = arith.addf %69, %72 : vector<32x142xf32>
    %74 = vector.extract_strided_slice %36 {offsets = [0, 0], sizes = [32, 142], strides = [1, 1]} : vector<32x256xf32> to vector<32x142xf32>
    %cst_29 = arith.constant 2.500000e-01 : f32
    %75 = vector.broadcast %cst_29 : f32 to vector<32x142xf32>
    %76 = arith.mulf %75, %74 : vector<32x142xf32>
    %77 = arith.addf %73, %76 : vector<32x142xf32>
    %78 = vector.extract_strided_slice %36 {offsets = [0, 1], sizes = [32, 142], strides = [1, 1]} : vector<32x256xf32> to vector<32x142xf32>
    %cst_30 = arith.constant 7.500000e-01 : f32
    %79 = vector.broadcast %cst_30 : f32 to vector<32x142xf32>
    %80 = arith.mulf %79, %78 : vector<32x142xf32>
    %81 = arith.addf %77, %80 : vector<32x142xf32>
    %82 = vector.extract_strided_slice %31 {offsets = [0, 1], sizes = [32, 142], strides = [1, 1]} : vector<32x256xf32> to vector<32x142xf32>
    %cst_31 = arith.constant 2.500000e-01 : f32
    %83 = vector.broadcast %cst_31 : f32 to vector<32x142xf32>
    %84 = arith.mulf %83, %82 : vector<32x142xf32>
    %85 = vector.extract_strided_slice %31 {offsets = [0, 2], sizes = [32, 142], strides = [1, 1]} : vector<32x256xf32> to vector<32x142xf32>
    %cst_32 = arith.constant 7.500000e-01 : f32
    %86 = vector.broadcast %cst_32 : f32 to vector<32x142xf32>
    %87 = arith.mulf %86, %85 : vector<32x142xf32>
    %88 = arith.addf %84, %87 : vector<32x142xf32>
    %89 = vector.extract_strided_slice %36 {offsets = [0, 1], sizes = [32, 142], strides = [1, 1]} : vector<32x256xf32> to vector<32x142xf32>
    %cst_33 = arith.constant 7.500000e-01 : f32
    %90 = vector.broadcast %cst_33 : f32 to vector<32x142xf32>
    %91 = arith.mulf %90, %89 : vector<32x142xf32>
    %92 = arith.addf %88, %91 : vector<32x142xf32>
    %93 = vector.extract_strided_slice %36 {offsets = [0, 2], sizes = [32, 142], strides = [1, 1]} : vector<32x256xf32> to vector<32x142xf32>
    %cst_34 = arith.constant 2.500000e-01 : f32
    %94 = vector.broadcast %cst_34 : f32 to vector<32x142xf32>
    %95 = arith.mulf %94, %93 : vector<32x142xf32>
    %96 = arith.addf %92, %95 : vector<32x142xf32>
    %c0_35 = arith.constant 0 : index
    %c0_36 = arith.constant 0 : index
    %97 = vector.load %arg8[%c0_35, %c0_36] : memref<32x1xf32, #tpu.memory_space<vmem>>, vector<32x1xf32>
    %98 = vector.extract_strided_slice %51 {offsets = [0, 7], sizes = [32, 128], strides = [1, 1]} : vector<32x142xf32> to vector<32x128xf32>
    %cst_37 = arith.constant 7.500000e-01 : f32
    %99 = vector.broadcast %cst_37 : f32 to vector<32x128xf32>
    %100 = arith.mulf %99, %98 : vector<32x128xf32>
    %101 = vector.extract_strided_slice %51 {offsets = [0, 14], sizes = [32, 128], strides = [1, 1]} : vector<32x142xf32> to vector<32x128xf32>
    %cst_38 = arith.constant 2.500000e-01 : f32
    %102 = vector.broadcast %cst_38 : f32 to vector<32x128xf32>
    %103 = arith.mulf %102, %101 : vector<32x128xf32>
    %104 = arith.addf %100, %103 : vector<32x128xf32>
    %105 = vector.extract_strided_slice %81 {offsets = [0, 0], sizes = [32, 128], strides = [1, 1]} : vector<32x142xf32> to vector<32x128xf32>
    %cst_39 = arith.constant 2.500000e-01 : f32
    %106 = vector.broadcast %cst_39 : f32 to vector<32x128xf32>
    %107 = arith.mulf %106, %105 : vector<32x128xf32>
    %108 = arith.addf %104, %107 : vector<32x128xf32>
    %109 = vector.extract_strided_slice %81 {offsets = [0, 7], sizes = [32, 128], strides = [1, 1]} : vector<32x142xf32> to vector<32x128xf32>
    %cst_40 = arith.constant 7.500000e-01 : f32
    %110 = vector.broadcast %cst_40 : f32 to vector<32x128xf32>
    %111 = arith.mulf %110, %109 : vector<32x128xf32>
    %112 = arith.addf %108, %111 : vector<32x128xf32>
    %c0_41 = arith.constant 0 : index
    %c0_42 = arith.constant 0 : index
    %113 = vector.load %arg9[%c0_41, %c0_42] : memref<4x128xf32, #tpu.memory_space<vmem>>, vector<1x128xf32>
    %114 = vector.broadcast %113 : vector<1x128xf32> to vector<32x128xf32>
    %115 = arith.addf %112, %114 : vector<32x128xf32>
    %116 = vector.broadcast %97 : vector<32x1xf32> to vector<32x128xf32>
    %117 = arith.addf %115, %116 : vector<32x128xf32>
    %cst_43 = arith.constant 0.000000e+00 : f32
    %118 = vector.broadcast %cst_43 : f32 to vector<32x128xf32>
    %119 = arith.cmpf oge, %117, %118 : vector<32x128xf32>
    %cst_44 = arith.constant 2.000000e-01 : f32
    %120 = vector.broadcast %cst_44 : f32 to vector<32x128xf32>
    %121 = arith.mulf %120, %117 : vector<32x128xf32>
    %122 = arith.select %119, %117, %121 : vector<32x128xi1>, vector<32x128xf32>
    %cst_45 = arith.constant 1.41421354 : f32
    %123 = vector.broadcast %cst_45 : f32 to vector<32x128xf32>
    %124 = arith.mulf %122, %123 : vector<32x128xf32>
    %cst_46 = arith.constant -2.560000e+02 : f32
    %cst_47 = arith.constant 2.560000e+02 : f32
    %125 = vector.broadcast %cst_46 : f32 to vector<32x128xf32>
    %126 = arith.maximumf %125, %124 : vector<32x128xf32>
    %127 = vector.broadcast %cst_47 : f32 to vector<32x128xf32>
    %128 = arith.minimumf %127, %126 : vector<32x128xf32>
    %c0_48 = arith.constant 0 : index
    %c0_49 = arith.constant 0 : index
    %c0_50 = arith.constant 0 : index
    %c0_51 = arith.constant 0 : index
    %129 = vector.load %arg10[%c0_48, %c0_49, %c0_50, %c0_51] : memref<1x4x32x128xf32, #tpu.memory_space<vmem>>, vector<1x1x32x128xf32>
    %130 = vector.shape_cast %129 : vector<1x1x32x128xf32> to vector<32x128xf32>
    %131 = vector.shape_cast %128 : vector<32x128xf32> to vector<1x1x32x128xf32>
    tpu.vector_store %arg10[%c0_48, %c0_49, %c0_50, %c0_51], %131 {strides = array<i32>} : memref<1x4x32x128xf32, #tpu.memory_space<vmem>>, vector<1x1x32x128xf32>,
    %132 = vector.extract_strided_slice %66 {offsets = [0, 7], sizes = [32, 128], strides = [1, 1]} : vector<32x142xf32> to vector<32x128xf32>
    %cst_52 = arith.constant 7.500000e-01 : f32
    %133 = vector.broadcast %cst_52 : f32 to vector<32x128xf32>
    %134 = arith.mulf %133, %132 : vector<32x128xf32>
    %135 = vector.extract_strided_slice %66 {offsets = [0, 14], sizes = [32, 128], strides = [1, 1]} : vector<32x142xf32> to vector<32x128xf32>
    %cst_53 = arith.constant 2.500000e-01 : f32
    %136 = vector.broadcast %cst_53 : f32 to vector<32x128xf32>
    %137 = arith.mulf %136, %135 : vector<32x128xf32>
    %138 = arith.addf %134, %137 : vector<32x128xf32>
    %139 = vector.extract_strided_slice %96 {offsets = [0, 0], sizes = [32, 128], strides = [1, 1]} : vector<32x142xf32> to vector<32x128xf32>
    %cst_54 = arith.constant 2.500000e-01 : f32
    %140 = vector.broadcast %cst_54 : f32 to vector<32x128xf32>
    %141 = arith.mulf %140, %139 : vector<32x128xf32>
    %142 = arith.addf %138, %141 : vector<32x128xf32>
    %143 = vector.extract_strided_slice %96 {offsets = [0, 7], sizes = [32, 128], strides = [1, 1]} : vector<32x142xf32> to vector<32x128xf32>
    %cst_55 = arith.constant 7.500000e-01 : f32
    %144 = vector.broadcast %cst_55 : f32 to vector<32x128xf32>
    %145 = arith.mulf %144, %143 : vector<32x128xf32>
    %146 = arith.addf %142, %145 : vector<32x128xf32>
    %c1 = arith.constant 1 : index
    %c0_56 = arith.constant 0 : index
    %147 = vector.load %arg9[%c1, %c0_56] : memref<4x128xf32, #tpu.memory_space<vmem>>, vector<1x128xf32>
    %148 = vector.broadcast %147 : vector<1x128xf32> to vector<32x128xf32>
    %149 = arith.addf %146, %148 : vector<32x128xf32>
    %150 = vector.broadcast %97 : vector<32x1xf32> to vector<32x128xf32>
    %151 = arith.addf %149, %150 : vector<32x128xf32>
    %cst_57 = arith.constant 0.000000e+00 : f32
    %152 = vector.broadcast %cst_57 : f32 to vector<32x128xf32>
    %153 = arith.cmpf oge, %151, %152 : vector<32x128xf32>
    %cst_58 = arith.constant 2.000000e-01 : f32
    %154 = vector.broadcast %cst_58 : f32 to vector<32x128xf32>
    %155 = arith.mulf %154, %151 : vector<32x128xf32>
    %156 = arith.select %153, %151, %155 : vector<32x128xi1>, vector<32x128xf32>
    %cst_59 = arith.constant 1.41421354 : f32
    %157 = vector.broadcast %cst_59 : f32 to vector<32x128xf32>
    %158 = arith.mulf %156, %157 : vector<32x128xf32>
    %cst_60 = arith.constant -2.560000e+02 : f32
    %cst_61 = arith.constant 2.560000e+02 : f32
    %159 = vector.broadcast %cst_60 : f32 to vector<32x128xf32>
    %160 = arith.maximumf %159, %158 : vector<32x128xf32>
    %161 = vector.broadcast %cst_61 : f32 to vector<32x128xf32>
    %162 = arith.minimumf %161, %160 : vector<32x128xf32>
    %c0_62 = arith.constant 0 : index
    %c1_63 = arith.constant 1 : index
    %c0_64 = arith.constant 0 : index
    %c0_65 = arith.constant 0 : index
    %163 = vector.load %arg10[%c0_62, %c1_63, %c0_64, %c0_65] : memref<1x4x32x128xf32, #tpu.memory_space<vmem>>, vector<1x1x32x128xf32>
    %164 = vector.shape_cast %163 : vector<1x1x32x128xf32> to vector<32x128xf32>
    %165 = vector.shape_cast %162 : vector<32x128xf32> to vector<1x1x32x128xf32>
    tpu.vector_store %arg10[%c0_62, %c1_63, %c0_64, %c0_65], %165 {strides = array<i32>} : memref<1x4x32x128xf32, #tpu.memory_space<vmem>>, vector<1x1x32x128xf32>,
    %166 = vector.extract_strided_slice %51 {offsets = [0, 7], sizes = [32, 128], strides = [1, 1]} : vector<32x142xf32> to vector<32x128xf32>
    %cst_66 = arith.constant 2.500000e-01 : f32
    %167 = vector.broadcast %cst_66 : f32 to vector<32x128xf32>
    %168 = arith.mulf %167, %166 : vector<32x128xf32>
    %169 = vector.extract_strided_slice %51 {offsets = [0, 14], sizes = [32, 128], strides = [1, 1]} : vector<32x142xf32> to vector<32x128xf32>
    %cst_67 = arith.constant 7.500000e-01 : f32
    %170 = vector.broadcast %cst_67 : f32 to vector<32x128xf32>
    %171 = arith.mulf %170, %169 : vector<32x128xf32>
    %172 = arith.addf %168, %171 : vector<32x128xf32>
    %173 = vector.extract_strided_slice %81 {offsets = [0, 7], sizes = [32, 128], strides = [1, 1]} : vector<32x142xf32> to vector<32x128xf32>
    %cst_68 = arith.constant 7.500000e-01 : f32
    %174 = vector.broadcast %cst_68 : f32 to vector<32x128xf32>
    %175 = arith.mulf %174, %173 : vector<32x128xf32>
    %176 = arith.addf %172, %175 : vector<32x128xf32>
    %177 = vector.extract_strided_slice %81 {offsets = [0, 14], sizes = [32, 128], strides = [1, 1]} : vector<32x142xf32> to vector<32x128xf32>
    %cst_69 = arith.constant 2.500000e-01 : f32
    %178 = vector.broadcast %cst_69 : f32 to vector<32x128xf32>
    %179 = arith.mulf %178, %177 : vector<32x128xf32>
    %180 = arith.addf %176, %179 : vector<32x128xf32>
    %c2 = arith.constant 2 : index
    %c0_70 = arith.constant 0 : index
    %181 = vector.load %arg9[%c2, %c0_70] : memref<4x128xf32, #tpu.memory_space<vmem>>, vector<1x128xf32>
    %182 = vector.broadcast %181 : vector<1x128xf32> to vector<32x128xf32>
    %183 = arith.addf %180, %182 : vector<32x128xf32>
    %184 = vector.broadcast %97 : vector<32x1xf32> to vector<32x128xf32>
    %185 = arith.addf %183, %184 : vector<32x128xf32>
    %cst_71 = arith.constant 0.000000e+00 : f32
    %186 = vector.broadcast %cst_71 : f32 to vector<32x128xf32>
    %187 = arith.cmpf oge, %185, %186 : vector<32x128xf32>
    %cst_72 = arith.constant 2.000000e-01 : f32
    %188 = vector.broadcast %cst_72 : f32 to vector<32x128xf32>
    %189 = arith.mulf %188, %185 : vector<32x128xf32>
    %190 = arith.select %187, %185, %189 : vector<32x128xi1>, vector<32x128xf32>
    %cst_73 = arith.constant 1.41421354 : f32
    %191 = vector.broadcast %cst_73 : f32 to vector<32x128xf32>
    %192 = arith.mulf %190, %191 : vector<32x128xf32>
    %cst_74 = arith.constant -2.560000e+02 : f32
    %cst_75 = arith.constant 2.560000e+02 : f32
    %193 = vector.broadcast %cst_74 : f32 to vector<32x128xf32>
    %194 = arith.maximumf %193, %192 : vector<32x128xf32>
    %195 = vector.broadcast %cst_75 : f32 to vector<32x128xf32>
    %196 = arith.minimumf %195, %194 : vector<32x128xf32>
    %c0_76 = arith.constant 0 : index
    %c2_77 = arith.constant 2 : index
    %c0_78 = arith.constant 0 : index
    %c0_79 = arith.constant 0 : index
    %197 = vector.load %arg10[%c0_76, %c2_77, %c0_78, %c0_79] : memref<1x4x32x128xf32, #tpu.memory_space<vmem>>, vector<1x1x32x128xf32>
    %198 = vector.shape_cast %197 : vector<1x1x32x128xf32> to vector<32x128xf32>
    %199 = vector.shape_cast %196 : vector<32x128xf32> to vector<1x1x32x128xf32>
    tpu.vector_store %arg10[%c0_76, %c2_77, %c0_78, %c0_79], %199 {strides = array<i32>} : memref<1x4x32x128xf32, #tpu.memory_space<vmem>>, vector<1x1x32x128xf32>,
    %200 = vector.extract_strided_slice %66 {offsets = [0, 7], sizes = [32, 128], strides = [1, 1]} : vector<32x142xf32> to vector<32x128xf32>
    %cst_80 = arith.constant 2.500000e-01 : f32
    %201 = vector.broadcast %cst_80 : f32 to vector<32x128xf32>
    %202 = arith.mulf %201, %200 : vector<32x128xf32>
    %203 = vector.extract_strided_slice %66 {offsets = [0, 14], sizes = [32, 128], strides = [1, 1]} : vector<32x142xf32> to vector<32x128xf32>
    %cst_81 = arith.constant 7.500000e-01 : f32
    %204 = vector.broadcast %cst_81 : f32 to vector<32x128xf32>
    %205 = arith.mulf %204, %203 : vector<32x128xf32>
    %206 = arith.addf %202, %205 : vector<32x128xf32>
    %207 = vector.extract_strided_slice %96 {offsets = [0, 7], sizes = [32, 128], strides = [1, 1]} : vector<32x142xf32> to vector<32x128xf32>
    %cst_82 = arith.constant 7.500000e-01 : f32
    %208 = vector.broadcast %cst_82 : f32 to vector<32x128xf32>
    %209 = arith.mulf %208, %207 : vector<32x128xf32>
    %210 = arith.addf %206, %209 : vector<32x128xf32>
    %211 = vector.extract_strided_slice %96 {offsets = [0, 14], sizes = [32, 128], strides = [1, 1]} : vector<32x142xf32> to vector<32x128xf32>
    %cst_83 = arith.constant 2.500000e-01 : f32
    %212 = vector.broadcast %cst_83 : f32 to vector<32x128xf32>
    %213 = arith.mulf %212, %211 : vector<32x128xf32>
    %214 = arith.addf %210, %213 : vector<32x128xf32>
    %c3 = arith.constant 3 : index
    %c0_84 = arith.constant 0 : index
    %215 = vector.load %arg9[%c3, %c0_84] : memref<4x128xf32, #tpu.memory_space<vmem>>, vector<1x128xf32>
    %216 = vector.broadcast %215 : vector<1x128xf32> to vector<32x128xf32>
    %217 = arith.addf %214, %216 : vector<32x128xf32>
    %218 = vector.broadcast %97 : vector<32x1xf32> to vector<32x128xf32>
    %219 = arith.addf %217, %218 : vector<32x128xf32>
    %cst_85 = arith.constant 0.000000e+00 : f32
    %220 = vector.broadcast %cst_85 : f32 to vector<32x128xf32>
    %221 = arith.cmpf oge, %219, %220 : vector<32x128xf32>
    %cst_86 = arith.constant 2.000000e-01 : f32
    %222 = vector.broadcast %cst_86 : f32 to vector<32x128xf32>
    %223 = arith.mulf %222, %219 : vector<32x128xf32>
    %224 = arith.select %221, %219, %223 : vector<32x128xi1>, vector<32x128xf32>
    %cst_87 = arith.constant 1.41421354 : f32
    %225 = vector.broadcast %cst_87 : f32 to vector<32x128xf32>
    %226 = arith.mulf %224, %225 : vector<32x128xf32>
    %cst_88 = arith.constant -2.560000e+02 : f32
    %cst_89 = arith.constant 2.560000e+02 : f32
    %227 = vector.broadcast %cst_88 : f32 to vector<32x128xf32>
    %228 = arith.maximumf %227, %226 : vector<32x128xf32>
    %229 = vector.broadcast %cst_89 : f32 to vector<32x128xf32>
    %230 = arith.minimumf %229, %228 : vector<32x128xf32>
    %c0_90 = arith.constant 0 : index
    %c3_91 = arith.constant 3 : index
    %c0_92 = arith.constant 0 : index
    %c0_93 = arith.constant 0 : index
    %231 = vector.load %arg10[%c0_90, %c3_91, %c0_92, %c0_93] : memref<1x4x32x128xf32, #tpu.memory_space<vmem>>, vector<1x1x32x128xf32>
    %232 = vector.shape_cast %231 : vector<1x1x32x128xf32> to vector<32x128xf32>
    %233 = vector.shape_cast %230 : vector<32x128xf32> to vector<1x1x32x128xf32>
    tpu.vector_store %arg10[%c0_90, %c3_91, %c0_92, %c0_93], %233 {strides = array<i32>} : memref<1x4x32x128xf32, #tpu.memory_space<vmem>>, vector<1x1x32x128xf32>,
    return
  }
  func.func @transform_0(%arg0: i32) -> (i32, i32, i32) {
    %c0_i32 = arith.constant 0 : i32
    %c0_i32_0 = arith.constant 0 : i32
    %c0_i32_1 = arith.constant 0 : i32
    return %arg0, %c0_i32, %c0_i32_0 : i32, i32, i32
  }
  func.func @transform_1(%arg0: i32) -> (i32, i32) {
    %c0_i32 = arith.constant 0 : i32
    %c0_i32_0 = arith.constant 0 : i32
    %c0_i32_1 = arith.constant 0 : i32
    return %c0_i32, %c0_i32_0 : i32, i32
  }
  func.func @transform_2(%arg0: i32) -> (i32, i32) {
    %c0_i32 = arith.constant 0 : i32
    %c0_i32_0 = arith.constant 0 : i32
    %c0_i32_1 = arith.constant 0 : i32
    return %c0_i32, %c0_i32_0 : i32, i32
  }
  func.func @transform_3(%arg0: i32) -> (i32, i32) {
    %c0_i32 = arith.constant 0 : i32
    %c0_i32_0 = arith.constant 0 : i32
    %c0_i32_1 = arith.constant 0 : i32
    return %c0_i32, %c0_i32_0 : i32, i32
  }
  func.func @transform_4(%arg0: i32) -> (i32, i32) {
    %c0_i32 = arith.constant 0 : i32
    %c0_i32_0 = arith.constant 0 : i32
    %c0_i32_1 = arith.constant 0 : i32
    return %c0_i32, %c0_i32_0 : i32, i32
  }
  func.func @transform_5(%arg0: i32) -> (i32, i32, i32) {
    %c0_i32 = arith.constant 0 : i32
    %c0_i32_0 = arith.constant 0 : i32
    %c0_i32_1 = arith.constant 0 : i32
    return %arg0, %c0_i32, %c0_i32_0 : i32, i32, i32
  }
  func.func @transform_6(%arg0: i32) -> (i32, i32, i32) {
    %c0_i32 = arith.constant 0 : i32
    %c0_i32_0 = arith.constant 0 : i32
    %c0_i32_1 = arith.constant 0 : i32
    return %arg0, %c0_i32, %c0_i32_0 : i32, i32, i32
  }
  func.func @transform_7(%arg0: i32) -> (i32, i32) {
    %c0_i32 = arith.constant 0 : i32
    %c0_i32_0 = arith.constant 0 : i32
    %c0_i32_1 = arith.constant 0 : i32
    return %c0_i32, %c0_i32_0 : i32, i32
  }
  func.func @transform_8(%arg0: i32) -> (i32, i32) {
    %c0_i32 = arith.constant 0 : i32
    %c0_i32_0 = arith.constant 0 : i32
    %c0_i32_1 = arith.constant 0 : i32
    return %c0_i32, %c0_i32_0 : i32, i32
  }
  func.func @transform_9(%arg0: i32) -> (i32, i32, i32, i32) {
    %c0_i32 = arith.constant 0 : i32
    %c0_i32_0 = arith.constant 0 : i32
    %c0_i32_1 = arith.constant 0 : i32
    %c0_i32_2 = arith.constant 0 : i32
    return %arg0, %c0_i32, %c0_i32_0, %c0_i32_1 : i32, i32, i32, i32
  }
}

module attributes {stable_mosaic.version = 11 : i64} {
  func.func @kernel(%arg0: i32, %arg1: memref<1x32x150xf32, #tpu.memory_space<vmem>>, %arg2: memref<32x288xbf16, #tpu.memory_space<vmem>>, %arg3: memref<1x32x1xf32, #tpu.memory_space<vmem>>, %arg4: memref<1x32x1xf32, #tpu.memory_space<vmem>>, %arg5: memref<32x1xf32, #tpu.memory_space<vmem>>, %arg6: memref<1x128xf32, #tpu.memory_space<vmem>>, %arg7: memref<4x32xf32, #tpu.memory_space<vmem>>, %arg8: memref<1x1x32xf32, #tpu.memory_space<vmem>>, %arg9: memref<4x1xf32, #tpu.memory_space<vmem>>, %arg10: memref<1x32x128xf32, #tpu.memory_space<vmem>>, %arg11: memref<1x4x128xf32, #tpu.memory_space<vmem>>) attributes {dimension_semantics = [#tpu.dimension_semantics<parallel>], iteration_bounds = array<i64: 2>, scalar_prefetch = 0 : i64, scratch_operands = 0 : i64, tpu.core_type = #tpu.core_type<tc>, window_params = [{transform_indices = @transform_0, window_bounds = array<i64: 1, 32, 150>}, {pipeline_mode = #tpu.pipeline_mode<synchronous>, transform_indices = @transform_1, window_bounds = array<i64: 32, 288>}, {transform_indices = @transform_2, window_bounds = array<i64: 1, 32, 1>}, {transform_indices = @transform_3, window_bounds = array<i64: 1, 32, 1>}, {pipeline_mode = #tpu.pipeline_mode<synchronous>, transform_indices = @transform_4, window_bounds = array<i64: 32, 1>}, {pipeline_mode = #tpu.pipeline_mode<synchronous>, transform_indices = @transform_5, window_bounds = array<i64: 1, 128>}, {pipeline_mode = #tpu.pipeline_mode<synchronous>, transform_indices = @transform_6, window_bounds = array<i64: 4, 32>}, {transform_indices = @transform_7, window_bounds = array<i64: 1, 1, 32>}, {pipeline_mode = #tpu.pipeline_mode<synchronous>, transform_indices = @transform_8, window_bounds = array<i64: 4, 1>}, {transform_indices = @transform_9, window_bounds = array<i64: 1, 32, 128>}, {transform_indices = @transform_10, window_bounds = array<i64: 1, 4, 128>}]} {
    %c0 = arith.constant 0 : index
    %c0_0 = arith.constant 0 : index
    %c0_1 = arith.constant 0 : index
    %0 = vector.load %arg1[%c0, %c0_0, %c0_1] : memref<1x32x150xf32, #tpu.memory_space<vmem>>, vector<1x32x150xf32>
    %1 = vector.shape_cast %0 : vector<1x32x150xf32> to vector<32x150xf32>
    %c0_2 = arith.constant 0 : index
    %c0_3 = arith.constant 0 : index
    %c0_4 = arith.constant 0 : index
    %2 = vector.load %arg3[%c0_2, %c0_3, %c0_4] : memref<1x32x1xf32, #tpu.memory_space<vmem>>, vector<1x32x1xf32>
    %3 = vector.shape_cast %2 : vector<1x32x1xf32> to vector<32x1xf32>
    %c0_5 = arith.constant 0 : index
    %c0_6 = arith.constant 0 : index
    %c0_7 = arith.constant 0 : index
    %4 = vector.load %arg4[%c0_5, %c0_6, %c0_7] : memref<1x32x1xf32, #tpu.memory_space<vmem>>, vector<1x32x1xf32>
    %5 = vector.shape_cast %4 : vector<1x32x1xf32> to vector<32x1xf32>
    %6 = vector.broadcast %3 : vector<32x1xf32> to vector<32x150xf32>
    %7 = arith.mulf %1, %6 : vector<32x150xf32>
    %8 = arith.truncf %7 : vector<32x150xf32> to vector<32x150xbf16>
    %c0_8 = arith.constant 0 : index
    %c0_9 = arith.constant 0 : index
    %9 = vector.load %arg2[%c0_8, %c0_9] : memref<32x288xbf16, #tpu.memory_space<vmem>>, vector<32x288xbf16>
    %c0_10 = arith.constant 0 : index
    %c0_11 = arith.constant 0 : index
    %10 = vector.load %arg7[%c0_10, %c0_11] : memref<4x32xf32, #tpu.memory_space<vmem>>, vector<4x32xf32>
    %c0_12 = arith.constant 0 : index
    %c0_13 = arith.constant 0 : index
    %c0_14 = arith.constant 0 : index
    %11 = vector.load %arg8[%c0_12, %c0_13, %c0_14] : memref<1x1x32xf32, #tpu.memory_space<vmem>>, vector<1x1x32xf32>
    %12 = vector.shape_cast %11 : vector<1x1x32xf32> to vector<1x32xf32>
    %13 = vector.broadcast %12 : vector<1x32xf32> to vector<4x32xf32>
    %14 = arith.mulf %10, %13 : vector<4x32xf32>
    %15 = arith.truncf %14 : vector<4x32xf32> to vector<4x32xbf16>
    %c0_15 = arith.constant 0 : index
    %c0_16 = arith.constant 0 : index
    %16 = vector.load %arg5[%c0_15, %c0_16] : memref<32x1xf32, #tpu.memory_space<vmem>>, vector<32x1xf32>
    %c0_17 = arith.constant 0 : index
    %c0_18 = arith.constant 0 : index
    %17 = vector.load %arg9[%c0_17, %c0_18] : memref<4x1xf32, #tpu.memory_space<vmem>>, vector<4x1xf32>
    %18 = vector.extract_strided_slice %8 {offsets = [0, 0], sizes = [32, 128], strides = [1, 1]} : vector<32x150xbf16> to vector<32x128xbf16>
    %19 = vector.extract_strided_slice %8 {offsets = [0, 1], sizes = [32, 128], strides = [1, 1]} : vector<32x150xbf16> to vector<32x128xbf16>
    %20 = vector.extract_strided_slice %8 {offsets = [0, 2], sizes = [32, 128], strides = [1, 1]} : vector<32x150xbf16> to vector<32x128xbf16>
    %21 = vector.extract_strided_slice %8 {offsets = [0, 10], sizes = [32, 128], strides = [1, 1]} : vector<32x150xbf16> to vector<32x128xbf16>
    %22 = vector.extract_strided_slice %8 {offsets = [0, 11], sizes = [32, 128], strides = [1, 1]} : vector<32x150xbf16> to vector<32x128xbf16>
    %23 = vector.extract_strided_slice %8 {offsets = [0, 12], sizes = [32, 128], strides = [1, 1]} : vector<32x150xbf16> to vector<32x128xbf16>
    %24 = vector.extract_strided_slice %8 {offsets = [0, 20], sizes = [32, 128], strides = [1, 1]} : vector<32x150xbf16> to vector<32x128xbf16>
    %25 = vector.extract_strided_slice %8 {offsets = [0, 21], sizes = [32, 128], strides = [1, 1]} : vector<32x150xbf16> to vector<32x128xbf16>
    %26 = vector.extract_strided_slice %8 {offsets = [0, 22], sizes = [32, 128], strides = [1, 1]} : vector<32x150xbf16> to vector<32x128xbf16>
    %27 = tpu.concatenate %18, %19, %20, %21, %22, %23, %24, %25, %26 in 0 : vector<32x128xbf16>, vector<32x128xbf16>, vector<32x128xbf16>, vector<32x128xbf16>, vector<32x128xbf16>, vector<32x128xbf16>, vector<32x128xbf16>, vector<32x128xbf16>, vector<32x128xbf16> -> vector<288x128xbf16>
    %cst = arith.constant dense<0.000000e+00> : vector<32x128xf32>
    %28 = tpu.matmul %9, %27, %cst {dimension_numbers = #tpu.dot_dimension_numbers<[1], [0], [0], [1], [0, 0, 1, 1], [], []>} : vector<32x288xbf16>, vector<288x128xbf16>, vector<32x128xf32> -> vector<32x128xf32>
    %29 = vector.broadcast %5 : vector<32x1xf32> to vector<32x128xf32>
    %30 = arith.mulf %28, %29 : vector<32x128xf32>
    %c0_19 = arith.constant 0 : index
    %c0_20 = arith.constant 0 : index
    %31 = vector.load %arg6[%c0_19, %c0_20] : memref<1x128xf32, #tpu.memory_space<vmem>>, vector<1x128xf32>
    %32 = vector.broadcast %31 : vector<1x128xf32> to vector<32x128xf32>
    %33 = arith.addf %30, %32 : vector<32x128xf32>
    %34 = vector.broadcast %16 : vector<32x1xf32> to vector<32x128xf32>
    %35 = arith.addf %33, %34 : vector<32x128xf32>
    %cst_21 = arith.constant 0.000000e+00 : f32
    %36 = vector.broadcast %cst_21 : f32 to vector<32x128xf32>
    %37 = arith.cmpf oge, %35, %36 : vector<32x128xf32>
    %cst_22 = arith.constant 2.000000e-01 : f32
    %38 = vector.broadcast %cst_22 : f32 to vector<32x128xf32>
    %39 = arith.mulf %38, %35 : vector<32x128xf32>
    %40 = arith.select %37, %35, %39 : vector<32x128xi1>, vector<32x128xf32>
    %cst_23 = arith.constant 1.41421354 : f32
    %41 = vector.broadcast %cst_23 : f32 to vector<32x128xf32>
    %42 = arith.mulf %40, %41 : vector<32x128xf32>
    %cst_24 = arith.constant -2.560000e+02 : f32
    %cst_25 = arith.constant 2.560000e+02 : f32
    %43 = vector.broadcast %cst_24 : f32 to vector<32x128xf32>
    %44 = arith.maximumf %43, %42 : vector<32x128xf32>
    %45 = vector.broadcast %cst_25 : f32 to vector<32x128xf32>
    %46 = arith.minimumf %45, %44 : vector<32x128xf32>
    %c0_26 = arith.constant 0 : index
    %c0_27 = arith.constant 0 : index
    %c0_28 = arith.constant 0 : index
    %47 = vector.load %arg10[%c0_26, %c0_27, %c0_28] : memref<1x32x128xf32, #tpu.memory_space<vmem>>, vector<1x32x128xf32>
    %48 = vector.shape_cast %47 : vector<1x32x128xf32> to vector<32x128xf32>
    %49 = vector.shape_cast %46 : vector<32x128xf32> to vector<1x32x128xf32>
    tpu.vector_store %arg10[%c0_26, %c0_27, %c0_28], %49 {strides = array<i32>} : memref<1x32x128xf32, #tpu.memory_space<vmem>>, vector<1x32x128xf32>,
    %50 = arith.truncf %46 : vector<32x128xf32> to vector<32x128xbf16>
    %cst_29 = arith.constant dense<0.000000e+00> : vector<4x128xf32>
    %51 = tpu.matmul %15, %50, %cst_29 {dimension_numbers = #tpu.dot_dimension_numbers<[1], [0], [0], [1], [0, 0, 1, 1], [], []>} : vector<4x32xbf16>, vector<32x128xbf16>, vector<4x128xf32> -> vector<4x128xf32>
    %52 = vector.broadcast %17 : vector<4x1xf32> to vector<4x128xf32>
    %53 = arith.addf %51, %52 : vector<4x128xf32>
    %cst_30 = arith.constant -2.560000e+02 : f32
    %cst_31 = arith.constant 2.560000e+02 : f32
    %54 = vector.broadcast %cst_30 : f32 to vector<4x128xf32>
    %55 = arith.maximumf %54, %53 : vector<4x128xf32>
    %56 = vector.broadcast %cst_31 : f32 to vector<4x128xf32>
    %57 = arith.minimumf %56, %55 : vector<4x128xf32>
    %c0_32 = arith.constant 0 : index
    %c0_33 = arith.constant 0 : index
    %c0_34 = arith.constant 0 : index
    %58 = vector.load %arg11[%c0_32, %c0_33, %c0_34] : memref<1x4x128xf32, #tpu.memory_space<vmem>>, vector<1x4x128xf32>
    %59 = vector.shape_cast %58 : vector<1x4x128xf32> to vector<4x128xf32>
    %60 = vector.shape_cast %57 : vector<4x128xf32> to vector<1x4x128xf32>
    tpu.vector_store %arg11[%c0_32, %c0_33, %c0_34], %60 {strides = array<i32>} : memref<1x4x128xf32, #tpu.memory_space<vmem>>, vector<1x4x128xf32>,
    return
  }
  func.func @transform_0(%arg0: i32) -> (i32, i32, i32) {
    %c0_i32 = arith.constant 0 : i32
    %c0_i32_0 = arith.constant 0 : i32
    %c0_i32_1 = arith.constant 0 : i32
    return %arg0, %c0_i32, %c0_i32_0 : i32, i32, i32
  }
  func.func @transform_1(%arg0: i32) -> (i32, i32) {
    %c0_i32 = arith.constant 0 : i32
    %c0_i32_0 = arith.constant 0 : i32
    %c0_i32_1 = arith.constant 0 : i32
    return %c0_i32, %c0_i32_0 : i32, i32
  }
  func.func @transform_2(%arg0: i32) -> (i32, i32, i32) {
    %c0_i32 = arith.constant 0 : i32
    %c0_i32_0 = arith.constant 0 : i32
    %c0_i32_1 = arith.constant 0 : i32
    return %arg0, %c0_i32, %c0_i32_0 : i32, i32, i32
  }
  func.func @transform_3(%arg0: i32) -> (i32, i32, i32) {
    %c0_i32 = arith.constant 0 : i32
    %c0_i32_0 = arith.constant 0 : i32
    %c0_i32_1 = arith.constant 0 : i32
    return %arg0, %c0_i32, %c0_i32_0 : i32, i32, i32
  }
  func.func @transform_4(%arg0: i32) -> (i32, i32) {
    %c0_i32 = arith.constant 0 : i32
    %c0_i32_0 = arith.constant 0 : i32
    %c0_i32_1 = arith.constant 0 : i32
    return %c0_i32, %c0_i32_0 : i32, i32
  }
  func.func @transform_5(%arg0: i32) -> (i32, i32) {
    %c0_i32 = arith.constant 0 : i32
    %c0_i32_0 = arith.constant 0 : i32
    %c0_i32_1 = arith.constant 0 : i32
    return %c0_i32, %c0_i32_0 : i32, i32
  }
  func.func @transform_6(%arg0: i32) -> (i32, i32) {
    %c0_i32 = arith.constant 0 : i32
    %c0_i32_0 = arith.constant 0 : i32
    %c0_i32_1 = arith.constant 0 : i32
    return %c0_i32, %c0_i32_0 : i32, i32
  }
  func.func @transform_7(%arg0: i32) -> (i32, i32, i32) {
    %c0_i32 = arith.constant 0 : i32
    %c0_i32_0 = arith.constant 0 : i32
    %c0_i32_1 = arith.constant 0 : i32
    return %arg0, %c0_i32, %c0_i32_0 : i32, i32, i32
  }
  func.func @transform_8(%arg0: i32) -> (i32, i32) {
    %c0_i32 = arith.constant 0 : i32
    %c0_i32_0 = arith.constant 0 : i32
    %c0_i32_1 = arith.constant 0 : i32
    return %c0_i32, %c0_i32_0 : i32, i32
  }
  func.func @transform_9(%arg0: i32) -> (i32, i32, i32) {
    %c0_i32 = arith.constant 0 : i32
    %c0_i32_0 = arith.constant 0 : i32
    %c0_i32_1 = arith.constant 0 : i32
    return %arg0, %c0_i32, %c0_i32_0 : i32, i32, i32
  }
  func.func @transform_10(%arg0: i32) -> (i32, i32, i32) {
    %c0_i32 = arith.constant 0 : i32
    %c0_i32_0 = arith.constant 0 : i32
    %c0_i32_1 = arith.constant 0 : i32
    return %arg0, %c0_i32, %c0_i32_0 : i32, i32, i32
  }
}

module attributes {stable_mosaic.version = 11 : i64} {
  func.func @kernel(%arg0: i32, %arg1: memref<1x32x275xf32, #tpu.memory_space<vmem>>, %arg2: memref<16x128xbf16, #tpu.memory_space<vmem>>, %arg3: memref<16x64xbf16, #tpu.memory_space<vmem>>, %arg4: memref<16x64xbf16, #tpu.memory_space<vmem>>, %arg5: memref<16x32xbf16, #tpu.memory_space<vmem>>, %arg6: memref<1x32x1xf32, #tpu.memory_space<vmem>>, %arg7: memref<1x16x1xf32, #tpu.memory_space<vmem>>, %arg8: memref<16x1xf32, #tpu.memory_space<vmem>>, %arg9: memref<4x128xf32, #tpu.memory_space<vmem>>, %arg10: memref<1x4x16x128xf32, #tpu.memory_space<vmem>>) attributes {dimension_semantics = [#tpu.dimension_semantics<parallel>], iteration_bounds = array<i64: 2>, scalar_prefetch = 0 : i64, scratch_operands = 0 : i64, tpu.core_type = #tpu.core_type<tc>, window_params = [{transform_indices = @transform_0, window_bounds = array<i64: 1, 32, 275>}, {pipeline_mode = #tpu.pipeline_mode<synchronous>, transform_indices = @transform_1, window_bounds = array<i64: 16, 128>}, {pipeline_mode = #tpu.pipeline_mode<synchronous>, transform_indices = @transform_2, window_bounds = array<i64: 16, 64>}, {pipeline_mode = #tpu.pipeline_mode<synchronous>, transform_indices = @transform_3, window_bounds = array<i64: 16, 64>}, {pipeline_mode = #tpu.pipeline_mode<synchronous>, transform_indices = @transform_4, window_bounds = array<i64: 16, 32>}, {transform_indices = @transform_5, window_bounds = array<i64: 1, 32, 1>}, {transform_indices = @transform_6, window_bounds = array<i64: 1, 16, 1>}, {pipeline_mode = #tpu.pipeline_mode<synchronous>, transform_indices = @transform_7, window_bounds = array<i64: 16, 1>}, {pipeline_mode = #tpu.pipeline_mode<synchronous>, transform_indices = @transform_8, window_bounds = array<i64: 4, 128>}, {transform_indices = @transform_9, window_bounds = array<i64: 1, 4, 16, 128>}]} {
    %c0 = arith.constant 0 : index
    %c0_0 = arith.constant 0 : index
    %c0_1 = arith.constant 0 : index
    %0 = vector.load %arg1[%c0, %c0_0, %c0_1] : memref<1x32x275xf32, #tpu.memory_space<vmem>>, vector<1x32x275xf32>
    %1 = vector.shape_cast %0 : vector<1x32x275xf32> to vector<32x275xf32>
    %c0_2 = arith.constant 0 : index
    %c0_3 = arith.constant 0 : index
    %c0_4 = arith.constant 0 : index
    %2 = vector.load %arg6[%c0_2, %c0_3, %c0_4] : memref<1x32x1xf32, #tpu.memory_space<vmem>>, vector<1x32x1xf32>
    %3 = vector.shape_cast %2 : vector<1x32x1xf32> to vector<32x1xf32>
    %c0_5 = arith.constant 0 : index
    %c0_6 = arith.constant 0 : index
    %c0_7 = arith.constant 0 : index
    %4 = vector.load %arg7[%c0_5, %c0_6, %c0_7] : memref<1x16x1xf32, #tpu.memory_space<vmem>>, vector<1x16x1xf32>
    %5 = vector.shape_cast %4 : vector<1x16x1xf32> to vector<16x1xf32>
    %6 = vector.broadcast %3 : vector<32x1xf32> to vector<32x275xf32>
    %7 = arith.mulf %1, %6 : vector<32x275xf32>
    %8 = arith.truncf %7 : vector<32x275xf32> to vector<32x275xbf16>
    %9 = vector.extract_strided_slice %8 {offsets = [0, 0], sizes = [32, 256], strides = [1, 1]} : vector<32x275xbf16> to vector<32x256xbf16>
    %10 = vector.extract_strided_slice %8 {offsets = [0, 1], sizes = [32, 256], strides = [1, 1]} : vector<32x275xbf16> to vector<32x256xbf16>
    %11 = vector.extract_strided_slice %8 {offsets = [0, 11], sizes = [32, 256], strides = [1, 1]} : vector<32x275xbf16> to vector<32x256xbf16>
    %12 = vector.extract_strided_slice %8 {offsets = [0, 12], sizes = [32, 256], strides = [1, 1]} : vector<32x275xbf16> to vector<32x256xbf16>
    %13 = tpu.concatenate %9, %10, %11, %12 in 0 : vector<32x256xbf16>, vector<32x256xbf16>, vector<32x256xbf16>, vector<32x256xbf16> -> vector<128x256xbf16>
    %c0_8 = arith.constant 0 : index
    %c0_9 = arith.constant 0 : index
    %14 = vector.load %arg2[%c0_8, %c0_9] : memref<16x128xbf16, #tpu.memory_space<vmem>>, vector<16x128xbf16>
    %cst = arith.constant dense<0.000000e+00> : vector<16x256xf32>
    %15 = tpu.matmul %14, %13, %cst {dimension_numbers = #tpu.dot_dimension_numbers<[1], [0], [0], [1], [0, 0, 1, 1], [], []>} : vector<16x128xbf16>, vector<128x256xbf16>, vector<16x256xf32> -> vector<16x256xf32>
    %16 = vector.broadcast %5 : vector<16x1xf32> to vector<16x256xf32>
    %17 = arith.mulf %15, %16 : vector<16x256xf32>
    %18 = vector.extract_strided_slice %8 {offsets = [0, 1], sizes = [32, 256], strides = [1, 1]} : vector<32x275xbf16> to vector<32x256xbf16>
    %19 = vector.extract_strided_slice %8 {offsets = [0, 12], sizes = [32, 256], strides = [1, 1]} : vector<32x275xbf16> to vector<32x256xbf16>
    %20 = tpu.concatenate %18, %19 in 0 : vector<32x256xbf16>, vector<32x256xbf16> -> vector<64x256xbf16>
    %c0_10 = arith.constant 0 : index
    %c0_11 = arith.constant 0 : index
    %21 = vector.load %arg3[%c0_10, %c0_11] : memref<16x64xbf16, #tpu.memory_space<vmem>>, vector<16x64xbf16>
    %cst_12 = arith.constant dense<0.000000e+00> : vector<16x256xf32>
    %22 = tpu.matmul %21, %20, %cst_12 {dimension_numbers = #tpu.dot_dimension_numbers<[1], [0], [0], [1], [0, 0, 1, 1], [], []>} : vector<16x64xbf16>, vector<64x256xbf16>, vector<16x256xf32> -> vector<16x256xf32>
    %23 = vector.broadcast %5 : vector<16x1xf32> to vector<16x256xf32>
    %24 = arith.mulf %22, %23 : vector<16x256xf32>
    %25 = vector.extract_strided_slice %8 {offsets = [0, 11], sizes = [32, 256], strides = [1, 1]} : vector<32x275xbf16> to vector<32x256xbf16>
    %26 = vector.extract_strided_slice %8 {offsets = [0, 12], sizes = [32, 256], strides = [1, 1]} : vector<32x275xbf16> to vector<32x256xbf16>
    %27 = tpu.concatenate %25, %26 in 0 : vector<32x256xbf16>, vector<32x256xbf16> -> vector<64x256xbf16>
    %c0_13 = arith.constant 0 : index
    %c0_14 = arith.constant 0 : index
    %28 = vector.load %arg4[%c0_13, %c0_14] : memref<16x64xbf16, #tpu.memory_space<vmem>>, vector<16x64xbf16>
    %cst_15 = arith.constant dense<0.000000e+00> : vector<16x256xf32>
    %29 = tpu.matmul %28, %27, %cst_15 {dimension_numbers = #tpu.dot_dimension_numbers<[1], [0], [0], [1], [0, 0, 1, 1], [], []>} : vector<16x64xbf16>, vector<64x256xbf16>, vector<16x256xf32> -> vector<16x256xf32>
    %30 = vector.broadcast %5 : vector<16x1xf32> to vector<16x256xf32>
    %31 = arith.mulf %29, %30 : vector<16x256xf32>
    %32 = vector.extract_strided_slice %8 {offsets = [0, 12], sizes = [32, 256], strides = [1, 1]} : vector<32x275xbf16> to vector<32x256xbf16>
    %c0_16 = arith.constant 0 : index
    %c0_17 = arith.constant 0 : index
    %33 = vector.load %arg5[%c0_16, %c0_17] : memref<16x32xbf16, #tpu.memory_space<vmem>>, vector<16x32xbf16>
    %cst_18 = arith.constant dense<0.000000e+00> : vector<16x256xf32>
    %34 = tpu.matmul %33, %32, %cst_18 {dimension_numbers = #tpu.dot_dimension_numbers<[1], [0], [0], [1], [0, 0, 1, 1], [], []>} : vector<16x32xbf16>, vector<32x256xbf16>, vector<16x256xf32> -> vector<16x256xf32>
    %35 = vector.broadcast %5 : vector<16x1xf32> to vector<16x256xf32>
    %36 = arith.mulf %34, %35 : vector<16x256xf32>
    %37 = vector.extract_strided_slice %17 {offsets = [0, 1], sizes = [16, 150], strides = [1, 1]} : vector<16x256xf32> to vector<16x150xf32>
    %cst_19 = arith.constant 7.500000e-01 : f32
    %38 = vector.broadcast %cst_19 : f32 to vector<16x150xf32>
    %39 = arith.mulf %38, %37 : vector<16x150xf32>
    %40 = vector.extract_strided_slice %17 {offsets = [0, 2], sizes = [16, 150], strides = [1, 1]} : vector<16x256xf32> to vector<16x150xf32>
    %cst_20 = arith.constant 2.500000e-01 : f32
    %41 = vector.broadcast %cst_20 : f32 to vector<16x150xf32>
    %42 = arith.mulf %41, %40 : vector<16x150xf32>
    %43 = arith.addf %39, %42 : vector<16x150xf32>
    %44 = vector.extract_strided_slice %24 {offsets = [0, 0], sizes = [16, 150], strides = [1, 1]} : vector<16x256xf32> to vector<16x150xf32>
    %cst_21 = arith.constant 2.500000e-01 : f32
    %45 = vector.broadcast %cst_21 : f32 to vector<16x150xf32>
    %46 = arith.mulf %45, %44 : vector<16x150xf32>
    %47 = arith.addf %43, %46 : vector<16x150xf32>
    %48 = vector.extract_strided_slice %24 {offsets = [0, 1], sizes = [16, 150], strides = [1, 1]} : vector<16x256xf32> to vector<16x150xf32>
    %cst_22 = arith.constant 7.500000e-01 : f32
    %49 = vector.broadcast %cst_22 : f32 to vector<16x150xf32>
    %50 = arith.mulf %49, %48 : vector<16x150xf32>
    %51 = arith.addf %47, %50 : vector<16x150xf32>
    %52 = vector.extract_strided_slice %17 {offsets = [0, 1], sizes = [16, 150], strides = [1, 1]} : vector<16x256xf32> to vector<16x150xf32>
    %cst_23 = arith.constant 2.500000e-01 : f32
    %53 = vector.broadcast %cst_23 : f32 to vector<16x150xf32>
    %54 = arith.mulf %53, %52 : vector<16x150xf32>
    %55 = vector.extract_strided_slice %17 {offsets = [0, 2], sizes = [16, 150], strides = [1, 1]} : vector<16x256xf32> to vector<16x150xf32>
    %cst_24 = arith.constant 7.500000e-01 : f32
    %56 = vector.broadcast %cst_24 : f32 to vector<16x150xf32>
    %57 = arith.mulf %56, %55 : vector<16x150xf32>
    %58 = arith.addf %54, %57 : vector<16x150xf32>
    %59 = vector.extract_strided_slice %24 {offsets = [0, 1], sizes = [16, 150], strides = [1, 1]} : vector<16x256xf32> to vector<16x150xf32>
    %cst_25 = arith.constant 7.500000e-01 : f32
    %60 = vector.broadcast %cst_25 : f32 to vector<16x150xf32>
    %61 = arith.mulf %60, %59 : vector<16x150xf32>
    %62 = arith.addf %58, %61 : vector<16x150xf32>
    %63 = vector.extract_strided_slice %24 {offsets = [0, 2], sizes = [16, 150], strides = [1, 1]} : vector<16x256xf32> to vector<16x150xf32>
    %cst_26 = arith.constant 2.500000e-01 : f32
    %64 = vector.broadcast %cst_26 : f32 to vector<16x150xf32>
    %65 = arith.mulf %64, %63 : vector<16x150xf32>
    %66 = arith.addf %62, %65 : vector<16x150xf32>
    %67 = vector.extract_strided_slice %31 {offsets = [0, 1], sizes = [16, 150], strides = [1, 1]} : vector<16x256xf32> to vector<16x150xf32>
    %cst_27 = arith.constant 7.500000e-01 : f32
    %68 = vector.broadcast %cst_27 : f32 to vector<16x150xf32>
    %69 = arith.mulf %68, %67 : vector<16x150xf32>
    %70 = vector.extract_strided_slice %31 {offsets = [0, 2], sizes = [16, 150], strides = [1, 1]} : vector<16x256xf32> to vector<16x150xf32>
    %cst_28 = arith.constant 2.500000e-01 : f32
    %71 = vector.broadcast %cst_28 : f32 to vector<16x150xf32>
    %72 = arith.mulf %71, %70 : vector<16x150xf32>
    %73 = arith.addf %69, %72 : vector<16x150xf32>
    %74 = vector.extract_strided_slice %36 {offsets = [0, 0], sizes = [16, 150], strides = [1, 1]} : vector<16x256xf32> to vector<16x150xf32>
    %cst_29 = arith.constant 2.500000e-01 : f32
    %75 = vector.broadcast %cst_29 : f32 to vector<16x150xf32>
    %76 = arith.mulf %75, %74 : vector<16x150xf32>
    %77 = arith.addf %73, %76 : vector<16x150xf32>
    %78 = vector.extract_strided_slice %36 {offsets = [0, 1], sizes = [16, 150], strides = [1, 1]} : vector<16x256xf32> to vector<16x150xf32>
    %cst_30 = arith.constant 7.500000e-01 : f32
    %79 = vector.broadcast %cst_30 : f32 to vector<16x150xf32>
    %80 = arith.mulf %79, %78 : vector<16x150xf32>
    %81 = arith.addf %77, %80 : vector<16x150xf32>
    %82 = vector.extract_strided_slice %31 {offsets = [0, 1], sizes = [16, 150], strides = [1, 1]} : vector<16x256xf32> to vector<16x150xf32>
    %cst_31 = arith.constant 2.500000e-01 : f32
    %83 = vector.broadcast %cst_31 : f32 to vector<16x150xf32>
    %84 = arith.mulf %83, %82 : vector<16x150xf32>
    %85 = vector.extract_strided_slice %31 {offsets = [0, 2], sizes = [16, 150], strides = [1, 1]} : vector<16x256xf32> to vector<16x150xf32>
    %cst_32 = arith.constant 7.500000e-01 : f32
    %86 = vector.broadcast %cst_32 : f32 to vector<16x150xf32>
    %87 = arith.mulf %86, %85 : vector<16x150xf32>
    %88 = arith.addf %84, %87 : vector<16x150xf32>
    %89 = vector.extract_strided_slice %36 {offsets = [0, 1], sizes = [16, 150], strides = [1, 1]} : vector<16x256xf32> to vector<16x150xf32>
    %cst_33 = arith.constant 7.500000e-01 : f32
    %90 = vector.broadcast %cst_33 : f32 to vector<16x150xf32>
    %91 = arith.mulf %90, %89 : vector<16x150xf32>
    %92 = arith.addf %88, %91 : vector<16x150xf32>
    %93 = vector.extract_strided_slice %36 {offsets = [0, 2], sizes = [16, 150], strides = [1, 1]} : vector<16x256xf32> to vector<16x150xf32>
    %cst_34 = arith.constant 2.500000e-01 : f32
    %94 = vector.broadcast %cst_34 : f32 to vector<16x150xf32>
    %95 = arith.mulf %94, %93 : vector<16x150xf32>
    %96 = arith.addf %92, %95 : vector<16x150xf32>
    %c0_35 = arith.constant 0 : index
    %c0_36 = arith.constant 0 : index
    %97 = vector.load %arg8[%c0_35, %c0_36] : memref<16x1xf32, #tpu.memory_space<vmem>>, vector<16x1xf32>
    %98 = vector.extract_strided_slice %51 {offsets = [0, 11], sizes = [16, 128], strides = [1, 1]} : vector<16x150xf32> to vector<16x128xf32>
    %cst_37 = arith.constant 7.500000e-01 : f32
    %99 = vector.broadcast %cst_37 : f32 to vector<16x128xf32>
    %100 = arith.mulf %99, %98 : vector<16x128xf32>
    %101 = vector.extract_strided_slice %51 {offsets = [0, 22], sizes = [16, 128], strides = [1, 1]} : vector<16x150xf32> to vector<16x128xf32>
    %cst_38 = arith.constant 2.500000e-01 : f32
    %102 = vector.broadcast %cst_38 : f32 to vector<16x128xf32>
    %103 = arith.mulf %102, %101 : vector<16x128xf32>
    %104 = arith.addf %100, %103 : vector<16x128xf32>
    %105 = vector.extract_strided_slice %81 {offsets = [0, 0], sizes = [16, 128], strides = [1, 1]} : vector<16x150xf32> to vector<16x128xf32>
    %cst_39 = arith.constant 2.500000e-01 : f32
    %106 = vector.broadcast %cst_39 : f32 to vector<16x128xf32>
    %107 = arith.mulf %106, %105 : vector<16x128xf32>
    %108 = arith.addf %104, %107 : vector<16x128xf32>
    %109 = vector.extract_strided_slice %81 {offsets = [0, 11], sizes = [16, 128], strides = [1, 1]} : vector<16x150xf32> to vector<16x128xf32>
    %cst_40 = arith.constant 7.500000e-01 : f32
    %110 = vector.broadcast %cst_40 : f32 to vector<16x128xf32>
    %111 = arith.mulf %110, %109 : vector<16x128xf32>
    %112 = arith.addf %108, %111 : vector<16x128xf32>
    %c0_41 = arith.constant 0 : index
    %c0_42 = arith.constant 0 : index
    %113 = vector.load %arg9[%c0_41, %c0_42] : memref<4x128xf32, #tpu.memory_space<vmem>>, vector<1x128xf32>
    %114 = vector.broadcast %113 : vector<1x128xf32> to vector<16x128xf32>
    %115 = arith.addf %112, %114 : vector<16x128xf32>
    %116 = vector.broadcast %97 : vector<16x1xf32> to vector<16x128xf32>
    %117 = arith.addf %115, %116 : vector<16x128xf32>
    %cst_43 = arith.constant 0.000000e+00 : f32
    %118 = vector.broadcast %cst_43 : f32 to vector<16x128xf32>
    %119 = arith.cmpf oge, %117, %118 : vector<16x128xf32>
    %cst_44 = arith.constant 2.000000e-01 : f32
    %120 = vector.broadcast %cst_44 : f32 to vector<16x128xf32>
    %121 = arith.mulf %120, %117 : vector<16x128xf32>
    %122 = arith.select %119, %117, %121 : vector<16x128xi1>, vector<16x128xf32>
    %cst_45 = arith.constant 1.41421354 : f32
    %123 = vector.broadcast %cst_45 : f32 to vector<16x128xf32>
    %124 = arith.mulf %122, %123 : vector<16x128xf32>
    %cst_46 = arith.constant -2.560000e+02 : f32
    %cst_47 = arith.constant 2.560000e+02 : f32
    %125 = vector.broadcast %cst_46 : f32 to vector<16x128xf32>
    %126 = arith.maximumf %125, %124 : vector<16x128xf32>
    %127 = vector.broadcast %cst_47 : f32 to vector<16x128xf32>
    %128 = arith.minimumf %127, %126 : vector<16x128xf32>
    %c0_48 = arith.constant 0 : index
    %c0_49 = arith.constant 0 : index
    %c0_50 = arith.constant 0 : index
    %c0_51 = arith.constant 0 : index
    %129 = vector.load %arg10[%c0_48, %c0_49, %c0_50, %c0_51] : memref<1x4x16x128xf32, #tpu.memory_space<vmem>>, vector<1x1x16x128xf32>
    %130 = vector.shape_cast %129 : vector<1x1x16x128xf32> to vector<16x128xf32>
    %131 = vector.shape_cast %128 : vector<16x128xf32> to vector<1x1x16x128xf32>
    tpu.vector_store %arg10[%c0_48, %c0_49, %c0_50, %c0_51], %131 {strides = array<i32>} : memref<1x4x16x128xf32, #tpu.memory_space<vmem>>, vector<1x1x16x128xf32>,
    %132 = vector.extract_strided_slice %66 {offsets = [0, 11], sizes = [16, 128], strides = [1, 1]} : vector<16x150xf32> to vector<16x128xf32>
    %cst_52 = arith.constant 7.500000e-01 : f32
    %133 = vector.broadcast %cst_52 : f32 to vector<16x128xf32>
    %134 = arith.mulf %133, %132 : vector<16x128xf32>
    %135 = vector.extract_strided_slice %66 {offsets = [0, 22], sizes = [16, 128], strides = [1, 1]} : vector<16x150xf32> to vector<16x128xf32>
    %cst_53 = arith.constant 2.500000e-01 : f32
    %136 = vector.broadcast %cst_53 : f32 to vector<16x128xf32>
    %137 = arith.mulf %136, %135 : vector<16x128xf32>
    %138 = arith.addf %134, %137 : vector<16x128xf32>
    %139 = vector.extract_strided_slice %96 {offsets = [0, 0], sizes = [16, 128], strides = [1, 1]} : vector<16x150xf32> to vector<16x128xf32>
    %cst_54 = arith.constant 2.500000e-01 : f32
    %140 = vector.broadcast %cst_54 : f32 to vector<16x128xf32>
    %141 = arith.mulf %140, %139 : vector<16x128xf32>
    %142 = arith.addf %138, %141 : vector<16x128xf32>
    %143 = vector.extract_strided_slice %96 {offsets = [0, 11], sizes = [16, 128], strides = [1, 1]} : vector<16x150xf32> to vector<16x128xf32>
    %cst_55 = arith.constant 7.500000e-01 : f32
    %144 = vector.broadcast %cst_55 : f32 to vector<16x128xf32>
    %145 = arith.mulf %144, %143 : vector<16x128xf32>
    %146 = arith.addf %142, %145 : vector<16x128xf32>
    %c1 = arith.constant 1 : index
    %c0_56 = arith.constant 0 : index
    %147 = vector.load %arg9[%c1, %c0_56] : memref<4x128xf32, #tpu.memory_space<vmem>>, vector<1x128xf32>
    %148 = vector.broadcast %147 : vector<1x128xf32> to vector<16x128xf32>
    %149 = arith.addf %146, %148 : vector<16x128xf32>
    %150 = vector.broadcast %97 : vector<16x1xf32> to vector<16x128xf32>
    %151 = arith.addf %149, %150 : vector<16x128xf32>
    %cst_57 = arith.constant 0.000000e+00 : f32
    %152 = vector.broadcast %cst_57 : f32 to vector<16x128xf32>
    %153 = arith.cmpf oge, %151, %152 : vector<16x128xf32>
    %cst_58 = arith.constant 2.000000e-01 : f32
    %154 = vector.broadcast %cst_58 : f32 to vector<16x128xf32>
    %155 = arith.mulf %154, %151 : vector<16x128xf32>
    %156 = arith.select %153, %151, %155 : vector<16x128xi1>, vector<16x128xf32>
    %cst_59 = arith.constant 1.41421354 : f32
    %157 = vector.broadcast %cst_59 : f32 to vector<16x128xf32>
    %158 = arith.mulf %156, %157 : vector<16x128xf32>
    %cst_60 = arith.constant -2.560000e+02 : f32
    %cst_61 = arith.constant 2.560000e+02 : f32
    %159 = vector.broadcast %cst_60 : f32 to vector<16x128xf32>
    %160 = arith.maximumf %159, %158 : vector<16x128xf32>
    %161 = vector.broadcast %cst_61 : f32 to vector<16x128xf32>
    %162 = arith.minimumf %161, %160 : vector<16x128xf32>
    %c0_62 = arith.constant 0 : index
    %c1_63 = arith.constant 1 : index
    %c0_64 = arith.constant 0 : index
    %c0_65 = arith.constant 0 : index
    %163 = vector.load %arg10[%c0_62, %c1_63, %c0_64, %c0_65] : memref<1x4x16x128xf32, #tpu.memory_space<vmem>>, vector<1x1x16x128xf32>
    %164 = vector.shape_cast %163 : vector<1x1x16x128xf32> to vector<16x128xf32>
    %165 = vector.shape_cast %162 : vector<16x128xf32> to vector<1x1x16x128xf32>
    tpu.vector_store %arg10[%c0_62, %c1_63, %c0_64, %c0_65], %165 {strides = array<i32>} : memref<1x4x16x128xf32, #tpu.memory_space<vmem>>, vector<1x1x16x128xf32>,
    %166 = vector.extract_strided_slice %51 {offsets = [0, 11], sizes = [16, 128], strides = [1, 1]} : vector<16x150xf32> to vector<16x128xf32>
    %cst_66 = arith.constant 2.500000e-01 : f32
    %167 = vector.broadcast %cst_66 : f32 to vector<16x128xf32>
    %168 = arith.mulf %167, %166 : vector<16x128xf32>
    %169 = vector.extract_strided_slice %51 {offsets = [0, 22], sizes = [16, 128], strides = [1, 1]} : vector<16x150xf32> to vector<16x128xf32>
    %cst_67 = arith.constant 7.500000e-01 : f32
    %170 = vector.broadcast %cst_67 : f32 to vector<16x128xf32>
    %171 = arith.mulf %170, %169 : vector<16x128xf32>
    %172 = arith.addf %168, %171 : vector<16x128xf32>
    %173 = vector.extract_strided_slice %81 {offsets = [0, 11], sizes = [16, 128], strides = [1, 1]} : vector<16x150xf32> to vector<16x128xf32>
    %cst_68 = arith.constant 7.500000e-01 : f32
    %174 = vector.broadcast %cst_68 : f32 to vector<16x128xf32>
    %175 = arith.mulf %174, %173 : vector<16x128xf32>
    %176 = arith.addf %172, %175 : vector<16x128xf32>
    %177 = vector.extract_strided_slice %81 {offsets = [0, 22], sizes = [16, 128], strides = [1, 1]} : vector<16x150xf32> to vector<16x128xf32>
    %cst_69 = arith.constant 2.500000e-01 : f32
    %178 = vector.broadcast %cst_69 : f32 to vector<16x128xf32>
    %179 = arith.mulf %178, %177 : vector<16x128xf32>
    %180 = arith.addf %176, %179 : vector<16x128xf32>
    %c2 = arith.constant 2 : index
    %c0_70 = arith.constant 0 : index
    %181 = vector.load %arg9[%c2, %c0_70] : memref<4x128xf32, #tpu.memory_space<vmem>>, vector<1x128xf32>
    %182 = vector.broadcast %181 : vector<1x128xf32> to vector<16x128xf32>
    %183 = arith.addf %180, %182 : vector<16x128xf32>
    %184 = vector.broadcast %97 : vector<16x1xf32> to vector<16x128xf32>
    %185 = arith.addf %183, %184 : vector<16x128xf32>
    %cst_71 = arith.constant 0.000000e+00 : f32
    %186 = vector.broadcast %cst_71 : f32 to vector<16x128xf32>
    %187 = arith.cmpf oge, %185, %186 : vector<16x128xf32>
    %cst_72 = arith.constant 2.000000e-01 : f32
    %188 = vector.broadcast %cst_72 : f32 to vector<16x128xf32>
    %189 = arith.mulf %188, %185 : vector<16x128xf32>
    %190 = arith.select %187, %185, %189 : vector<16x128xi1>, vector<16x128xf32>
    %cst_73 = arith.constant 1.41421354 : f32
    %191 = vector.broadcast %cst_73 : f32 to vector<16x128xf32>
    %192 = arith.mulf %190, %191 : vector<16x128xf32>
    %cst_74 = arith.constant -2.560000e+02 : f32
    %cst_75 = arith.constant 2.560000e+02 : f32
    %193 = vector.broadcast %cst_74 : f32 to vector<16x128xf32>
    %194 = arith.maximumf %193, %192 : vector<16x128xf32>
    %195 = vector.broadcast %cst_75 : f32 to vector<16x128xf32>
    %196 = arith.minimumf %195, %194 : vector<16x128xf32>
    %c0_76 = arith.constant 0 : index
    %c2_77 = arith.constant 2 : index
    %c0_78 = arith.constant 0 : index
    %c0_79 = arith.constant 0 : index
    %197 = vector.load %arg10[%c0_76, %c2_77, %c0_78, %c0_79] : memref<1x4x16x128xf32, #tpu.memory_space<vmem>>, vector<1x1x16x128xf32>
    %198 = vector.shape_cast %197 : vector<1x1x16x128xf32> to vector<16x128xf32>
    %199 = vector.shape_cast %196 : vector<16x128xf32> to vector<1x1x16x128xf32>
    tpu.vector_store %arg10[%c0_76, %c2_77, %c0_78, %c0_79], %199 {strides = array<i32>} : memref<1x4x16x128xf32, #tpu.memory_space<vmem>>, vector<1x1x16x128xf32>,
    %200 = vector.extract_strided_slice %66 {offsets = [0, 11], sizes = [16, 128], strides = [1, 1]} : vector<16x150xf32> to vector<16x128xf32>
    %cst_80 = arith.constant 2.500000e-01 : f32
    %201 = vector.broadcast %cst_80 : f32 to vector<16x128xf32>
    %202 = arith.mulf %201, %200 : vector<16x128xf32>
    %203 = vector.extract_strided_slice %66 {offsets = [0, 22], sizes = [16, 128], strides = [1, 1]} : vector<16x150xf32> to vector<16x128xf32>
    %cst_81 = arith.constant 7.500000e-01 : f32
    %204 = vector.broadcast %cst_81 : f32 to vector<16x128xf32>
    %205 = arith.mulf %204, %203 : vector<16x128xf32>
    %206 = arith.addf %202, %205 : vector<16x128xf32>
    %207 = vector.extract_strided_slice %96 {offsets = [0, 11], sizes = [16, 128], strides = [1, 1]} : vector<16x150xf32> to vector<16x128xf32>
    %cst_82 = arith.constant 7.500000e-01 : f32
    %208 = vector.broadcast %cst_82 : f32 to vector<16x128xf32>
    %209 = arith.mulf %208, %207 : vector<16x128xf32>
    %210 = arith.addf %206, %209 : vector<16x128xf32>
    %211 = vector.extract_strided_slice %96 {offsets = [0, 22], sizes = [16, 128], strides = [1, 1]} : vector<16x150xf32> to vector<16x128xf32>
    %cst_83 = arith.constant 2.500000e-01 : f32
    %212 = vector.broadcast %cst_83 : f32 to vector<16x128xf32>
    %213 = arith.mulf %212, %211 : vector<16x128xf32>
    %214 = arith.addf %210, %213 : vector<16x128xf32>
    %c3 = arith.constant 3 : index
    %c0_84 = arith.constant 0 : index
    %215 = vector.load %arg9[%c3, %c0_84] : memref<4x128xf32, #tpu.memory_space<vmem>>, vector<1x128xf32>
    %216 = vector.broadcast %215 : vector<1x128xf32> to vector<16x128xf32>
    %217 = arith.addf %214, %216 : vector<16x128xf32>
    %218 = vector.broadcast %97 : vector<16x1xf32> to vector<16x128xf32>
    %219 = arith.addf %217, %218 : vector<16x128xf32>
    %cst_85 = arith.constant 0.000000e+00 : f32
    %220 = vector.broadcast %cst_85 : f32 to vector<16x128xf32>
    %221 = arith.cmpf oge, %219, %220 : vector<16x128xf32>
    %cst_86 = arith.constant 2.000000e-01 : f32
    %222 = vector.broadcast %cst_86 : f32 to vector<16x128xf32>
    %223 = arith.mulf %222, %219 : vector<16x128xf32>
    %224 = arith.select %221, %219, %223 : vector<16x128xi1>, vector<16x128xf32>
    %cst_87 = arith.constant 1.41421354 : f32
    %225 = vector.broadcast %cst_87 : f32 to vector<16x128xf32>
    %226 = arith.mulf %224, %225 : vector<16x128xf32>
    %cst_88 = arith.constant -2.560000e+02 : f32
    %cst_89 = arith.constant 2.560000e+02 : f32
    %227 = vector.broadcast %cst_88 : f32 to vector<16x128xf32>
    %228 = arith.maximumf %227, %226 : vector<16x128xf32>
    %229 = vector.broadcast %cst_89 : f32 to vector<16x128xf32>
    %230 = arith.minimumf %229, %228 : vector<16x128xf32>
    %c0_90 = arith.constant 0 : index
    %c3_91 = arith.constant 3 : index
    %c0_92 = arith.constant 0 : index
    %c0_93 = arith.constant 0 : index
    %231 = vector.load %arg10[%c0_90, %c3_91, %c0_92, %c0_93] : memref<1x4x16x128xf32, #tpu.memory_space<vmem>>, vector<1x1x16x128xf32>
    %232 = vector.shape_cast %231 : vector<1x1x16x128xf32> to vector<16x128xf32>
    %233 = vector.shape_cast %230 : vector<16x128xf32> to vector<1x1x16x128xf32>
    tpu.vector_store %arg10[%c0_90, %c3_91, %c0_92, %c0_93], %233 {strides = array<i32>} : memref<1x4x16x128xf32, #tpu.memory_space<vmem>>, vector<1x1x16x128xf32>,
    return
  }
  func.func @transform_0(%arg0: i32) -> (i32, i32, i32) {
    %c0_i32 = arith.constant 0 : i32
    %c0_i32_0 = arith.constant 0 : i32
    %c0_i32_1 = arith.constant 0 : i32
    return %arg0, %c0_i32, %c0_i32_0 : i32, i32, i32
  }
  func.func @transform_1(%arg0: i32) -> (i32, i32) {
    %c0_i32 = arith.constant 0 : i32
    %c0_i32_0 = arith.constant 0 : i32
    %c0_i32_1 = arith.constant 0 : i32
    return %c0_i32, %c0_i32_0 : i32, i32
  }
  func.func @transform_2(%arg0: i32) -> (i32, i32) {
    %c0_i32 = arith.constant 0 : i32
    %c0_i32_0 = arith.constant 0 : i32
    %c0_i32_1 = arith.constant 0 : i32
    return %c0_i32, %c0_i32_0 : i32, i32
  }
  func.func @transform_3(%arg0: i32) -> (i32, i32) {
    %c0_i32 = arith.constant 0 : i32
    %c0_i32_0 = arith.constant 0 : i32
    %c0_i32_1 = arith.constant 0 : i32
    return %c0_i32, %c0_i32_0 : i32, i32
  }
  func.func @transform_4(%arg0: i32) -> (i32, i32) {
    %c0_i32 = arith.constant 0 : i32
    %c0_i32_0 = arith.constant 0 : i32
    %c0_i32_1 = arith.constant 0 : i32
    return %c0_i32, %c0_i32_0 : i32, i32
  }
  func.func @transform_5(%arg0: i32) -> (i32, i32, i32) {
    %c0_i32 = arith.constant 0 : i32
    %c0_i32_0 = arith.constant 0 : i32
    %c0_i32_1 = arith.constant 0 : i32
    return %arg0, %c0_i32, %c0_i32_0 : i32, i32, i32
  }
  func.func @transform_6(%arg0: i32) -> (i32, i32, i32) {
    %c0_i32 = arith.constant 0 : i32
    %c0_i32_0 = arith.constant 0 : i32
    %c0_i32_1 = arith.constant 0 : i32
    return %arg0, %c0_i32, %c0_i32_0 : i32, i32, i32
  }
  func.func @transform_7(%arg0: i32) -> (i32, i32) {
    %c0_i32 = arith.constant 0 : i32
    %c0_i32_0 = arith.constant 0 : i32
    %c0_i32_1 = arith.constant 0 : i32
    return %c0_i32, %c0_i32_0 : i32, i32
  }
  func.func @transform_8(%arg0: i32) -> (i32, i32) {
    %c0_i32 = arith.constant 0 : i32
    %c0_i32_0 = arith.constant 0 : i32
    %c0_i32_1 = arith.constant 0 : i32
    return %c0_i32, %c0_i32_0 : i32, i32
  }
  func.func @transform_9(%arg0: i32) -> (i32, i32, i32, i32) {
    %c0_i32 = arith.constant 0 : i32
    %c0_i32_0 = arith.constant 0 : i32
    %c0_i32_1 = arith.constant 0 : i32
    %c0_i32_2 = arith.constant 0 : i32
    return %arg0, %c0_i32, %c0_i32_0, %c0_i32_1 : i32, i32, i32, i32
  }
}

module attributes {stable_mosaic.version = 11 : i64} {
  func.func @kernel(%arg0: i32, %arg1: memref<1x16x432xf32, #tpu.memory_space<vmem>>, %arg2: memref<16x144xbf16, #tpu.memory_space<vmem>>, %arg3: memref<1x16x1xf32, #tpu.memory_space<vmem>>, %arg4: memref<1x16x1xf32, #tpu.memory_space<vmem>>, %arg5: memref<16x1xf32, #tpu.memory_space<vmem>>, %arg6: memref<1x384xf32, #tpu.memory_space<vmem>>, %arg7: memref<4x16xf32, #tpu.memory_space<vmem>>, %arg8: memref<1x1x16xf32, #tpu.memory_space<vmem>>, %arg9: memref<4x1xf32, #tpu.memory_space<vmem>>, %arg10: memref<1x16x384xf32, #tpu.memory_space<vmem>>, %arg11: memref<1x4x384xf32, #tpu.memory_space<vmem>>) attributes {dimension_semantics = [#tpu.dimension_semantics<parallel>], iteration_bounds = array<i64: 2>, scalar_prefetch = 0 : i64, scratch_operands = 0 : i64, tpu.core_type = #tpu.core_type<tc>, window_params = [{transform_indices = @transform_0, window_bounds = array<i64: 1, 16, 432>}, {pipeline_mode = #tpu.pipeline_mode<synchronous>, transform_indices = @transform_1, window_bounds = array<i64: 16, 144>}, {transform_indices = @transform_2, window_bounds = array<i64: 1, 16, 1>}, {transform_indices = @transform_3, window_bounds = array<i64: 1, 16, 1>}, {pipeline_mode = #tpu.pipeline_mode<synchronous>, transform_indices = @transform_4, window_bounds = array<i64: 16, 1>}, {pipeline_mode = #tpu.pipeline_mode<synchronous>, transform_indices = @transform_5, window_bounds = array<i64: 1, 384>}, {pipeline_mode = #tpu.pipeline_mode<synchronous>, transform_indices = @transform_6, window_bounds = array<i64: 4, 16>}, {transform_indices = @transform_7, window_bounds = array<i64: 1, 1, 16>}, {pipeline_mode = #tpu.pipeline_mode<synchronous>, transform_indices = @transform_8, window_bounds = array<i64: 4, 1>}, {transform_indices = @transform_9, window_bounds = array<i64: 1, 16, 384>}, {transform_indices = @transform_10, window_bounds = array<i64: 1, 4, 384>}]} {
    %c0 = arith.constant 0 : index
    %c0_0 = arith.constant 0 : index
    %c0_1 = arith.constant 0 : index
    %0 = vector.load %arg1[%c0, %c0_0, %c0_1] : memref<1x16x432xf32, #tpu.memory_space<vmem>>, vector<1x16x432xf32>
    %1 = vector.shape_cast %0 : vector<1x16x432xf32> to vector<16x432xf32>
    %c0_2 = arith.constant 0 : index
    %c0_3 = arith.constant 0 : index
    %c0_4 = arith.constant 0 : index
    %2 = vector.load %arg3[%c0_2, %c0_3, %c0_4] : memref<1x16x1xf32, #tpu.memory_space<vmem>>, vector<1x16x1xf32>
    %3 = vector.shape_cast %2 : vector<1x16x1xf32> to vector<16x1xf32>
    %c0_5 = arith.constant 0 : index
    %c0_6 = arith.constant 0 : index
    %c0_7 = arith.constant 0 : index
    %4 = vector.load %arg4[%c0_5, %c0_6, %c0_7] : memref<1x16x1xf32, #tpu.memory_space<vmem>>, vector<1x16x1xf32>
    %5 = vector.shape_cast %4 : vector<1x16x1xf32> to vector<16x1xf32>
    %6 = vector.broadcast %3 : vector<16x1xf32> to vector<16x432xf32>
    %7 = arith.mulf %1, %6 : vector<16x432xf32>
    %8 = arith.truncf %7 : vector<16x432xf32> to vector<16x432xbf16>
    %c0_8 = arith.constant 0 : index
    %c0_9 = arith.constant 0 : index
    %9 = vector.load %arg2[%c0_8, %c0_9] : memref<16x144xbf16, #tpu.memory_space<vmem>>, vector<16x144xbf16>
    %c0_10 = arith.constant 0 : index
    %c0_11 = arith.constant 0 : index
    %10 = vector.load %arg7[%c0_10, %c0_11] : memref<4x16xf32, #tpu.memory_space<vmem>>, vector<4x16xf32>
    %c0_12 = arith.constant 0 : index
    %c0_13 = arith.constant 0 : index
    %c0_14 = arith.constant 0 : index
    %11 = vector.load %arg8[%c0_12, %c0_13, %c0_14] : memref<1x1x16xf32, #tpu.memory_space<vmem>>, vector<1x1x16xf32>
    %12 = vector.shape_cast %11 : vector<1x1x16xf32> to vector<1x16xf32>
    %13 = vector.broadcast %12 : vector<1x16xf32> to vector<4x16xf32>
    %14 = arith.mulf %10, %13 : vector<4x16xf32>
    %15 = arith.truncf %14 : vector<4x16xf32> to vector<4x16xbf16>
    %c0_15 = arith.constant 0 : index
    %c0_16 = arith.constant 0 : index
    %16 = vector.load %arg5[%c0_15, %c0_16] : memref<16x1xf32, #tpu.memory_space<vmem>>, vector<16x1xf32>
    %c0_17 = arith.constant 0 : index
    %c0_18 = arith.constant 0 : index
    %17 = vector.load %arg9[%c0_17, %c0_18] : memref<4x1xf32, #tpu.memory_space<vmem>>, vector<4x1xf32>
    %18 = vector.extract_strided_slice %8 {offsets = [0, 0], sizes = [16, 384], strides = [1, 1]} : vector<16x432xbf16> to vector<16x384xbf16>
    %19 = vector.extract_strided_slice %8 {offsets = [0, 1], sizes = [16, 384], strides = [1, 1]} : vector<16x432xbf16> to vector<16x384xbf16>
    %20 = vector.extract_strided_slice %8 {offsets = [0, 2], sizes = [16, 384], strides = [1, 1]} : vector<16x432xbf16> to vector<16x384xbf16>
    %21 = vector.extract_strided_slice %8 {offsets = [0, 18], sizes = [16, 384], strides = [1, 1]} : vector<16x432xbf16> to vector<16x384xbf16>
    %22 = vector.extract_strided_slice %8 {offsets = [0, 19], sizes = [16, 384], strides = [1, 1]} : vector<16x432xbf16> to vector<16x384xbf16>
    %23 = vector.extract_strided_slice %8 {offsets = [0, 20], sizes = [16, 384], strides = [1, 1]} : vector<16x432xbf16> to vector<16x384xbf16>
    %24 = vector.extract_strided_slice %8 {offsets = [0, 36], sizes = [16, 384], strides = [1, 1]} : vector<16x432xbf16> to vector<16x384xbf16>
    %25 = vector.extract_strided_slice %8 {offsets = [0, 37], sizes = [16, 384], strides = [1, 1]} : vector<16x432xbf16> to vector<16x384xbf16>
    %26 = vector.extract_strided_slice %8 {offsets = [0, 38], sizes = [16, 384], strides = [1, 1]} : vector<16x432xbf16> to vector<16x384xbf16>
    %27 = tpu.concatenate %18, %19, %20, %21, %22, %23, %24, %25, %26 in 0 : vector<16x384xbf16>, vector<16x384xbf16>, vector<16x384xbf16>, vector<16x384xbf16>, vector<16x384xbf16>, vector<16x384xbf16>, vector<16x384xbf16>, vector<16x384xbf16>, vector<16x384xbf16> -> vector<144x384xbf16>
    %cst = arith.constant dense<0.000000e+00> : vector<16x384xf32>
    %28 = tpu.matmul %9, %27, %cst {dimension_numbers = #tpu.dot_dimension_numbers<[1], [0], [0], [1], [0, 0, 1, 1], [], []>} : vector<16x144xbf16>, vector<144x384xbf16>, vector<16x384xf32> -> vector<16x384xf32>
    %29 = vector.broadcast %5 : vector<16x1xf32> to vector<16x384xf32>
    %30 = arith.mulf %28, %29 : vector<16x384xf32>
    %c0_19 = arith.constant 0 : index
    %c0_20 = arith.constant 0 : index
    %31 = vector.load %arg6[%c0_19, %c0_20] : memref<1x384xf32, #tpu.memory_space<vmem>>, vector<1x384xf32>
    %32 = vector.broadcast %31 : vector<1x384xf32> to vector<16x384xf32>
    %33 = arith.addf %30, %32 : vector<16x384xf32>
    %34 = vector.broadcast %16 : vector<16x1xf32> to vector<16x384xf32>
    %35 = arith.addf %33, %34 : vector<16x384xf32>
    %cst_21 = arith.constant 0.000000e+00 : f32
    %36 = vector.broadcast %cst_21 : f32 to vector<16x384xf32>
    %37 = arith.cmpf oge, %35, %36 : vector<16x384xf32>
    %cst_22 = arith.constant 2.000000e-01 : f32
    %38 = vector.broadcast %cst_22 : f32 to vector<16x384xf32>
    %39 = arith.mulf %38, %35 : vector<16x384xf32>
    %40 = arith.select %37, %35, %39 : vector<16x384xi1>, vector<16x384xf32>
    %cst_23 = arith.constant 1.41421354 : f32
    %41 = vector.broadcast %cst_23 : f32 to vector<16x384xf32>
    %42 = arith.mulf %40, %41 : vector<16x384xf32>
    %cst_24 = arith.constant -2.560000e+02 : f32
    %cst_25 = arith.constant 2.560000e+02 : f32
    %43 = vector.broadcast %cst_24 : f32 to vector<16x384xf32>
    %44 = arith.maximumf %43, %42 : vector<16x384xf32>
    %45 = vector.broadcast %cst_25 : f32 to vector<16x384xf32>
    %46 = arith.minimumf %45, %44 : vector<16x384xf32>
    %c0_26 = arith.constant 0 : index
    %c0_27 = arith.constant 0 : index
    %c0_28 = arith.constant 0 : index
    %47 = vector.load %arg10[%c0_26, %c0_27, %c0_28] : memref<1x16x384xf32, #tpu.memory_space<vmem>>, vector<1x16x384xf32>
    %48 = vector.shape_cast %47 : vector<1x16x384xf32> to vector<16x384xf32>
    %49 = vector.shape_cast %46 : vector<16x384xf32> to vector<1x16x384xf32>
    tpu.vector_store %arg10[%c0_26, %c0_27, %c0_28], %49 {strides = array<i32>} : memref<1x16x384xf32, #tpu.memory_space<vmem>>, vector<1x16x384xf32>,
    %50 = arith.truncf %46 : vector<16x384xf32> to vector<16x384xbf16>
    %cst_29 = arith.constant dense<0.000000e+00> : vector<4x384xf32>
    %51 = tpu.matmul %15, %50, %cst_29 {dimension_numbers = #tpu.dot_dimension_numbers<[1], [0], [0], [1], [0, 0, 1, 1], [], []>} : vector<4x16xbf16>, vector<16x384xbf16>, vector<4x384xf32> -> vector<4x384xf32>
    %52 = vector.broadcast %17 : vector<4x1xf32> to vector<4x384xf32>
    %53 = arith.addf %51, %52 : vector<4x384xf32>
    %cst_30 = arith.constant -2.560000e+02 : f32
    %cst_31 = arith.constant 2.560000e+02 : f32
    %54 = vector.broadcast %cst_30 : f32 to vector<4x384xf32>
    %55 = arith.maximumf %54, %53 : vector<4x384xf32>
    %56 = vector.broadcast %cst_31 : f32 to vector<4x384xf32>
    %57 = arith.minimumf %56, %55 : vector<4x384xf32>
    %c0_32 = arith.constant 0 : index
    %c0_33 = arith.constant 0 : index
    %c0_34 = arith.constant 0 : index
    %58 = vector.load %arg11[%c0_32, %c0_33, %c0_34] : memref<1x4x384xf32, #tpu.memory_space<vmem>>, vector<1x4x384xf32>
    %59 = vector.shape_cast %58 : vector<1x4x384xf32> to vector<4x384xf32>
    %60 = vector.shape_cast %57 : vector<4x384xf32> to vector<1x4x384xf32>
    tpu.vector_store %arg11[%c0_32, %c0_33, %c0_34], %60 {strides = array<i32>} : memref<1x4x384xf32, #tpu.memory_space<vmem>>, vector<1x4x384xf32>,
    return
  }
  func.func @transform_0(%arg0: i32) -> (i32, i32, i32) {
    %c0_i32 = arith.constant 0 : i32
    %c0_i32_0 = arith.constant 0 : i32
    %c0_i32_1 = arith.constant 0 : i32
    return %arg0, %c0_i32, %c0_i32_0 : i32, i32, i32
  }
  func.func @transform_1(%arg0: i32) -> (i32, i32) {
    %c0_i32 = arith.constant 0 : i32
    %c0_i32_0 = arith.constant 0 : i32
    %c0_i32_1 = arith.constant 0 : i32
    return %c0_i32, %c0_i32_0 : i32, i32
  }
  func.func @transform_2(%arg0: i32) -> (i32, i32, i32) {
    %c0_i32 = arith.constant 0 : i32
    %c0_i32_0 = arith.constant 0 : i32
    %c0_i32_1 = arith.constant 0 : i32
    return %arg0, %c0_i32, %c0_i32_0 : i32, i32, i32
  }
  func.func @transform_3(%arg0: i32) -> (i32, i32, i32) {
    %c0_i32 = arith.constant 0 : i32
    %c0_i32_0 = arith.constant 0 : i32
    %c0_i32_1 = arith.constant 0 : i32
    return %arg0, %c0_i32, %c0_i32_0 : i32, i32, i32
  }
  func.func @transform_4(%arg0: i32) -> (i32, i32) {
    %c0_i32 = arith.constant 0 : i32
    %c0_i32_0 = arith.constant 0 : i32
    %c0_i32_1 = arith.constant 0 : i32
    return %c0_i32, %c0_i32_0 : i32, i32
  }
  func.func @transform_5(%arg0: i32) -> (i32, i32) {
    %c0_i32 = arith.constant 0 : i32
    %c0_i32_0 = arith.constant 0 : i32
    %c0_i32_1 = arith.constant 0 : i32
    return %c0_i32, %c0_i32_0 : i32, i32
  }
  func.func @transform_6(%arg0: i32) -> (i32, i32) {
    %c0_i32 = arith.constant 0 : i32
    %c0_i32_0 = arith.constant 0 : i32
    %c0_i32_1 = arith.constant 0 : i32
    return %c0_i32, %c0_i32_0 : i32, i32
  }
  func.func @transform_7(%arg0: i32) -> (i32, i32, i32) {
    %c0_i32 = arith.constant 0 : i32
    %c0_i32_0 = arith.constant 0 : i32
    %c0_i32_1 = arith.constant 0 : i32
    return %arg0, %c0_i32, %c0_i32_0 : i32, i32, i32
  }
  func.func @transform_8(%arg0: i32) -> (i32, i32) {
    %c0_i32 = arith.constant 0 : i32
    %c0_i32_0 = arith.constant 0 : i32
    %c0_i32_1 = arith.constant 0 : i32
    return %c0_i32, %c0_i32_0 : i32, i32
  }
  func.func @transform_9(%arg0: i32) -> (i32, i32, i32) {
    %c0_i32 = arith.constant 0 : i32
    %c0_i32_0 = arith.constant 0 : i32
    %c0_i32_1 = arith.constant 0 : i32
    return %arg0, %c0_i32, %c0_i32_0 : i32, i32, i32
  }
  func.func @transform_10(%arg0: i32) -> (i32, i32, i32) {
    %c0_i32 = arith.constant 0 : i32
    %c0_i32_0 = arith.constant 0 : i32
    %c0_i32_1 = arith.constant 0 : i32
    return %arg0, %c0_i32, %c0_i32_0 : i32, i32, i32
  }
}

module attributes {stable_mosaic.version = 11 : i64} {
  func.func @kernel(%arg0: i32, %arg1: memref<1x4x144xf32, #tpu.memory_space<vmem>>, %arg2: memref<1x4x4x128xf32, #tpu.memory_space<vmem>>) attributes {dimension_semantics = [#tpu.dimension_semantics<parallel>], iteration_bounds = array<i64: 2>, scalar_prefetch = 0 : i64, scratch_operands = 0 : i64, tpu.core_type = #tpu.core_type<tc>, window_params = [{transform_indices = @transform_0, window_bounds = array<i64: 1, 4, 144>}, {transform_indices = @transform_1, window_bounds = array<i64: 1, 4, 4, 128>}]} {
    %c0 = arith.constant 0 : index
    %c0_0 = arith.constant 0 : index
    %c0_1 = arith.constant 0 : index
    %0 = vector.load %arg1[%c0, %c0_0, %c0_1] : memref<1x4x144xf32, #tpu.memory_space<vmem>>, vector<1x4x144xf32>
    %1 = vector.shape_cast %0 : vector<1x4x144xf32> to vector<4x144xf32>
    %2 = vector.extract_strided_slice %1 {offsets = [0, 0], sizes = [4, 128], strides = [1, 1]} : vector<4x144xf32> to vector<4x128xf32>
    %cst = arith.constant 6.250000e-02 : f32
    %3 = vector.broadcast %cst : f32 to vector<4x128xf32>
    %4 = arith.mulf %3, %2 : vector<4x128xf32>
    %5 = vector.extract_strided_slice %1 {offsets = [0, 1], sizes = [4, 128], strides = [1, 1]} : vector<4x144xf32> to vector<4x128xf32>
    %cst_2 = arith.constant 1.875000e-01 : f32
    %6 = vector.broadcast %cst_2 : f32 to vector<4x128xf32>
    %7 = arith.mulf %6, %5 : vector<4x128xf32>
    %8 = arith.addf %4, %7 : vector<4x128xf32>
    %9 = vector.extract_strided_slice %1 {offsets = [0, 6], sizes = [4, 128], strides = [1, 1]} : vector<4x144xf32> to vector<4x128xf32>
    %cst_3 = arith.constant 1.875000e-01 : f32
    %10 = vector.broadcast %cst_3 : f32 to vector<4x128xf32>
    %11 = arith.mulf %10, %9 : vector<4x128xf32>
    %12 = arith.addf %8, %11 : vector<4x128xf32>
    %13 = vector.extract_strided_slice %1 {offsets = [0, 7], sizes = [4, 128], strides = [1, 1]} : vector<4x144xf32> to vector<4x128xf32>
    %cst_4 = arith.constant 5.625000e-01 : f32
    %14 = vector.broadcast %cst_4 : f32 to vector<4x128xf32>
    %15 = arith.mulf %14, %13 : vector<4x128xf32>
    %16 = arith.addf %12, %15 : vector<4x128xf32>
    %c0_5 = arith.constant 0 : index
    %c0_6 = arith.constant 0 : index
    %c0_7 = arith.constant 0 : index
    %c0_8 = arith.constant 0 : index
    %17 = vector.load %arg2[%c0_5, %c0_6, %c0_7, %c0_8] : memref<1x4x4x128xf32, #tpu.memory_space<vmem>>, vector<1x1x4x128xf32>
    %18 = vector.shape_cast %17 : vector<1x1x4x128xf32> to vector<4x128xf32>
    %19 = vector.shape_cast %16 : vector<4x128xf32> to vector<1x1x4x128xf32>
    tpu.vector_store %arg2[%c0_5, %c0_6, %c0_7, %c0_8], %19 {strides = array<i32>} : memref<1x4x4x128xf32, #tpu.memory_space<vmem>>, vector<1x1x4x128xf32>,
    %20 = vector.extract_strided_slice %1 {offsets = [0, 1], sizes = [4, 128], strides = [1, 1]} : vector<4x144xf32> to vector<4x128xf32>
    %cst_9 = arith.constant 1.875000e-01 : f32
    %21 = vector.broadcast %cst_9 : f32 to vector<4x128xf32>
    %22 = arith.mulf %21, %20 : vector<4x128xf32>
    %23 = vector.extract_strided_slice %1 {offsets = [0, 2], sizes = [4, 128], strides = [1, 1]} : vector<4x144xf32> to vector<4x128xf32>
    %cst_10 = arith.constant 6.250000e-02 : f32
    %24 = vector.broadcast %cst_10 : f32 to vector<4x128xf32>
    %25 = arith.mulf %24, %23 : vector<4x128xf32>
    %26 = arith.addf %22, %25 : vector<4x128xf32>
    %27 = vector.extract_strided_slice %1 {offsets = [0, 7], sizes = [4, 128], strides = [1, 1]} : vector<4x144xf32> to vector<4x128xf32>
    %cst_11 = arith.constant 5.625000e-01 : f32
    %28 = vector.broadcast %cst_11 : f32 to vector<4x128xf32>
    %29 = arith.mulf %28, %27 : vector<4x128xf32>
    %30 = arith.addf %26, %29 : vector<4x128xf32>
    %31 = vector.extract_strided_slice %1 {offsets = [0, 8], sizes = [4, 128], strides = [1, 1]} : vector<4x144xf32> to vector<4x128xf32>
    %cst_12 = arith.constant 1.875000e-01 : f32
    %32 = vector.broadcast %cst_12 : f32 to vector<4x128xf32>
    %33 = arith.mulf %32, %31 : vector<4x128xf32>
    %34 = arith.addf %30, %33 : vector<4x128xf32>
    %c0_13 = arith.constant 0 : index
    %c1 = arith.constant 1 : index
    %c0_14 = arith.constant 0 : index
    %c0_15 = arith.constant 0 : index
    %35 = vector.load %arg2[%c0_13, %c1, %c0_14, %c0_15] : memref<1x4x4x128xf32, #tpu.memory_space<vmem>>, vector<1x1x4x128xf32>
    %36 = vector.shape_cast %35 : vector<1x1x4x128xf32> to vector<4x128xf32>
    %37 = vector.shape_cast %34 : vector<4x128xf32> to vector<1x1x4x128xf32>
    tpu.vector_store %arg2[%c0_13, %c1, %c0_14, %c0_15], %37 {strides = array<i32>} : memref<1x4x4x128xf32, #tpu.memory_space<vmem>>, vector<1x1x4x128xf32>,
    %38 = vector.extract_strided_slice %1 {offsets = [0, 6], sizes = [4, 128], strides = [1, 1]} : vector<4x144xf32> to vector<4x128xf32>
    %cst_16 = arith.constant 1.875000e-01 : f32
    %39 = vector.broadcast %cst_16 : f32 to vector<4x128xf32>
    %40 = arith.mulf %39, %38 : vector<4x128xf32>
    %41 = vector.extract_strided_slice %1 {offsets = [0, 7], sizes = [4, 128], strides = [1, 1]} : vector<4x144xf32> to vector<4x128xf32>
    %cst_17 = arith.constant 5.625000e-01 : f32
    %42 = vector.broadcast %cst_17 : f32 to vector<4x128xf32>
    %43 = arith.mulf %42, %41 : vector<4x128xf32>
    %44 = arith.addf %40, %43 : vector<4x128xf32>
    %45 = vector.extract_strided_slice %1 {offsets = [0, 12], sizes = [4, 128], strides = [1, 1]} : vector<4x144xf32> to vector<4x128xf32>
    %cst_18 = arith.constant 6.250000e-02 : f32
    %46 = vector.broadcast %cst_18 : f32 to vector<4x128xf32>
    %47 = arith.mulf %46, %45 : vector<4x128xf32>
    %48 = arith.addf %44, %47 : vector<4x128xf32>
    %49 = vector.extract_strided_slice %1 {offsets = [0, 13], sizes = [4, 128], strides = [1, 1]} : vector<4x144xf32> to vector<4x128xf32>
    %cst_19 = arith.constant 1.875000e-01 : f32
    %50 = vector.broadcast %cst_19 : f32 to vector<4x128xf32>
    %51 = arith.mulf %50, %49 : vector<4x128xf32>
    %52 = arith.addf %48, %51 : vector<4x128xf32>
    %c0_20 = arith.constant 0 : index
    %c2 = arith.constant 2 : index
    %c0_21 = arith.constant 0 : index
    %c0_22 = arith.constant 0 : index
    %53 = vector.load %arg2[%c0_20, %c2, %c0_21, %c0_22] : memref<1x4x4x128xf32, #tpu.memory_space<vmem>>, vector<1x1x4x128xf32>
    %54 = vector.shape_cast %53 : vector<1x1x4x128xf32> to vector<4x128xf32>
    %55 = vector.shape_cast %52 : vector<4x128xf32> to vector<1x1x4x128xf32>
    tpu.vector_store %arg2[%c0_20, %c2, %c0_21, %c0_22], %55 {strides = array<i32>} : memref<1x4x4x128xf32, #tpu.memory_space<vmem>>, vector<1x1x4x128xf32>,
    %56 = vector.extract_strided_slice %1 {offsets = [0, 7], sizes = [4, 128], strides = [1, 1]} : vector<4x144xf32> to vector<4x128xf32>
    %cst_23 = arith.constant 5.625000e-01 : f32
    %57 = vector.broadcast %cst_23 : f32 to vector<4x128xf32>
    %58 = arith.mulf %57, %56 : vector<4x128xf32>
    %59 = vector.extract_strided_slice %1 {offsets = [0, 8], sizes = [4, 128], strides = [1, 1]} : vector<4x144xf32> to vector<4x128xf32>
    %cst_24 = arith.constant 1.875000e-01 : f32
    %60 = vector.broadcast %cst_24 : f32 to vector<4x128xf32>
    %61 = arith.mulf %60, %59 : vector<4x128xf32>
    %62 = arith.addf %58, %61 : vector<4x128xf32>
    %63 = vector.extract_strided_slice %1 {offsets = [0, 13], sizes = [4, 128], strides = [1, 1]} : vector<4x144xf32> to vector<4x128xf32>
    %cst_25 = arith.constant 1.875000e-01 : f32
    %64 = vector.broadcast %cst_25 : f32 to vector<4x128xf32>
    %65 = arith.mulf %64, %63 : vector<4x128xf32>
    %66 = arith.addf %62, %65 : vector<4x128xf32>
    %67 = vector.extract_strided_slice %1 {offsets = [0, 14], sizes = [4, 128], strides = [1, 1]} : vector<4x144xf32> to vector<4x128xf32>
    %cst_26 = arith.constant 6.250000e-02 : f32
    %68 = vector.broadcast %cst_26 : f32 to vector<4x128xf32>
    %69 = arith.mulf %68, %67 : vector<4x128xf32>
    %70 = arith.addf %66, %69 : vector<4x128xf32>
    %c0_27 = arith.constant 0 : index
    %c3 = arith.constant 3 : index
    %c0_28 = arith.constant 0 : index
    %c0_29 = arith.constant 0 : index
    %71 = vector.load %arg2[%c0_27, %c3, %c0_28, %c0_29] : memref<1x4x4x128xf32, #tpu.memory_space<vmem>>, vector<1x1x4x128xf32>
    %72 = vector.shape_cast %71 : vector<1x1x4x128xf32> to vector<4x128xf32>
    %73 = vector.shape_cast %70 : vector<4x128xf32> to vector<1x1x4x128xf32>
    tpu.vector_store %arg2[%c0_27, %c3, %c0_28, %c0_29], %73 {strides = array<i32>} : memref<1x4x4x128xf32, #tpu.memory_space<vmem>>, vector<1x1x4x128xf32>,
    return
  }
  func.func @transform_0(%arg0: i32) -> (i32, i32, i32) {
    %c0_i32 = arith.constant 0 : i32
    %c0_i32_0 = arith.constant 0 : i32
    %c0_i32_1 = arith.constant 0 : i32
    return %arg0, %c0_i32, %c0_i32_0 : i32, i32, i32
  }
  func.func @transform_1(%arg0: i32) -> (i32, i32, i32, i32) {
    %c0_i32 = arith.constant 0 : i32
    %c0_i32_0 = arith.constant 0 : i32
    %c0_i32_1 = arith.constant 0 : i32
    %c0_i32_2 = arith.constant 0 : i32
    return %arg0, %c0_i32, %c0_i32_0, %c0_i32_1 : i32, i32, i32, i32
  }
}

module attributes {stable_mosaic.version = 11 : i64} {
  func.func @kernel(%arg0: i32, %arg1: memref<1x4x160xf32, #tpu.memory_space<vmem>>, %arg2: memref<1x4x4x128xf32, #tpu.memory_space<vmem>>) attributes {dimension_semantics = [#tpu.dimension_semantics<parallel>], iteration_bounds = array<i64: 2>, scalar_prefetch = 0 : i64, scratch_operands = 0 : i64, tpu.core_type = #tpu.core_type<tc>, window_params = [{transform_indices = @transform_0, window_bounds = array<i64: 1, 4, 160>}, {transform_indices = @transform_1, window_bounds = array<i64: 1, 4, 4, 128>}]} {
    %c0 = arith.constant 0 : index
    %c0_0 = arith.constant 0 : index
    %c0_1 = arith.constant 0 : index
    %0 = vector.load %arg1[%c0, %c0_0, %c0_1] : memref<1x4x160xf32, #tpu.memory_space<vmem>>, vector<1x4x160xf32>
    %1 = vector.shape_cast %0 : vector<1x4x160xf32> to vector<4x160xf32>
    %2 = vector.extract_strided_slice %1 {offsets = [0, 0], sizes = [4, 128], strides = [1, 1]} : vector<4x160xf32> to vector<4x128xf32>
    %cst = arith.constant 6.250000e-02 : f32
    %3 = vector.broadcast %cst : f32 to vector<4x128xf32>
    %4 = arith.mulf %3, %2 : vector<4x128xf32>
    %5 = vector.extract_strided_slice %1 {offsets = [0, 1], sizes = [4, 128], strides = [1, 1]} : vector<4x160xf32> to vector<4x128xf32>
    %cst_2 = arith.constant 1.875000e-01 : f32
    %6 = vector.broadcast %cst_2 : f32 to vector<4x128xf32>
    %7 = arith.mulf %6, %5 : vector<4x128xf32>
    %8 = arith.addf %4, %7 : vector<4x128xf32>
    %9 = vector.extract_strided_slice %1 {offsets = [0, 10], sizes = [4, 128], strides = [1, 1]} : vector<4x160xf32> to vector<4x128xf32>
    %cst_3 = arith.constant 1.875000e-01 : f32
    %10 = vector.broadcast %cst_3 : f32 to vector<4x128xf32>
    %11 = arith.mulf %10, %9 : vector<4x128xf32>
    %12 = arith.addf %8, %11 : vector<4x128xf32>
    %13 = vector.extract_strided_slice %1 {offsets = [0, 11], sizes = [4, 128], strides = [1, 1]} : vector<4x160xf32> to vector<4x128xf32>
    %cst_4 = arith.constant 5.625000e-01 : f32
    %14 = vector.broadcast %cst_4 : f32 to vector<4x128xf32>
    %15 = arith.mulf %14, %13 : vector<4x128xf32>
    %16 = arith.addf %12, %15 : vector<4x128xf32>
    %c0_5 = arith.constant 0 : index
    %c0_6 = arith.constant 0 : index
    %c0_7 = arith.constant 0 : index
    %c0_8 = arith.constant 0 : index
    %17 = vector.load %arg2[%c0_5, %c0_6, %c0_7, %c0_8] : memref<1x4x4x128xf32, #tpu.memory_space<vmem>>, vector<1x1x4x128xf32>
    %18 = vector.shape_cast %17 : vector<1x1x4x128xf32> to vector<4x128xf32>
    %19 = vector.shape_cast %16 : vector<4x128xf32> to vector<1x1x4x128xf32>
    tpu.vector_store %arg2[%c0_5, %c0_6, %c0_7, %c0_8], %19 {strides = array<i32>} : memref<1x4x4x128xf32, #tpu.memory_space<vmem>>, vector<1x1x4x128xf32>,
    %20 = vector.extract_strided_slice %1 {offsets = [0, 1], sizes = [4, 128], strides = [1, 1]} : vector<4x160xf32> to vector<4x128xf32>
    %cst_9 = arith.constant 1.875000e-01 : f32
    %21 = vector.broadcast %cst_9 : f32 to vector<4x128xf32>
    %22 = arith.mulf %21, %20 : vector<4x128xf32>
    %23 = vector.extract_strided_slice %1 {offsets = [0, 2], sizes = [4, 128], strides = [1, 1]} : vector<4x160xf32> to vector<4x128xf32>
    %cst_10 = arith.constant 6.250000e-02 : f32
    %24 = vector.broadcast %cst_10 : f32 to vector<4x128xf32>
    %25 = arith.mulf %24, %23 : vector<4x128xf32>
    %26 = arith.addf %22, %25 : vector<4x128xf32>
    %27 = vector.extract_strided_slice %1 {offsets = [0, 11], sizes = [4, 128], strides = [1, 1]} : vector<4x160xf32> to vector<4x128xf32>
    %cst_11 = arith.constant 5.625000e-01 : f32
    %28 = vector.broadcast %cst_11 : f32 to vector<4x128xf32>
    %29 = arith.mulf %28, %27 : vector<4x128xf32>
    %30 = arith.addf %26, %29 : vector<4x128xf32>
    %31 = vector.extract_strided_slice %1 {offsets = [0, 12], sizes = [4, 128], strides = [1, 1]} : vector<4x160xf32> to vector<4x128xf32>
    %cst_12 = arith.constant 1.875000e-01 : f32
    %32 = vector.broadcast %cst_12 : f32 to vector<4x128xf32>
    %33 = arith.mulf %32, %31 : vector<4x128xf32>
    %34 = arith.addf %30, %33 : vector<4x128xf32>
    %c0_13 = arith.constant 0 : index
    %c1 = arith.constant 1 : index
    %c0_14 = arith.constant 0 : index
    %c0_15 = arith.constant 0 : index
    %35 = vector.load %arg2[%c0_13, %c1, %c0_14, %c0_15] : memref<1x4x4x128xf32, #tpu.memory_space<vmem>>, vector<1x1x4x128xf32>
    %36 = vector.shape_cast %35 : vector<1x1x4x128xf32> to vector<4x128xf32>
    %37 = vector.shape_cast %34 : vector<4x128xf32> to vector<1x1x4x128xf32>
    tpu.vector_store %arg2[%c0_13, %c1, %c0_14, %c0_15], %37 {strides = array<i32>} : memref<1x4x4x128xf32, #tpu.memory_space<vmem>>, vector<1x1x4x128xf32>,
    %38 = vector.extract_strided_slice %1 {offsets = [0, 10], sizes = [4, 128], strides = [1, 1]} : vector<4x160xf32> to vector<4x128xf32>
    %cst_16 = arith.constant 1.875000e-01 : f32
    %39 = vector.broadcast %cst_16 : f32 to vector<4x128xf32>
    %40 = arith.mulf %39, %38 : vector<4x128xf32>
    %41 = vector.extract_strided_slice %1 {offsets = [0, 11], sizes = [4, 128], strides = [1, 1]} : vector<4x160xf32> to vector<4x128xf32>
    %cst_17 = arith.constant 5.625000e-01 : f32
    %42 = vector.broadcast %cst_17 : f32 to vector<4x128xf32>
    %43 = arith.mulf %42, %41 : vector<4x128xf32>
    %44 = arith.addf %40, %43 : vector<4x128xf32>
    %45 = vector.extract_strided_slice %1 {offsets = [0, 20], sizes = [4, 128], strides = [1, 1]} : vector<4x160xf32> to vector<4x128xf32>
    %cst_18 = arith.constant 6.250000e-02 : f32
    %46 = vector.broadcast %cst_18 : f32 to vector<4x128xf32>
    %47 = arith.mulf %46, %45 : vector<4x128xf32>
    %48 = arith.addf %44, %47 : vector<4x128xf32>
    %49 = vector.extract_strided_slice %1 {offsets = [0, 21], sizes = [4, 128], strides = [1, 1]} : vector<4x160xf32> to vector<4x128xf32>
    %cst_19 = arith.constant 1.875000e-01 : f32
    %50 = vector.broadcast %cst_19 : f32 to vector<4x128xf32>
    %51 = arith.mulf %50, %49 : vector<4x128xf32>
    %52 = arith.addf %48, %51 : vector<4x128xf32>
    %c0_20 = arith.constant 0 : index
    %c2 = arith.constant 2 : index
    %c0_21 = arith.constant 0 : index
    %c0_22 = arith.constant 0 : index
    %53 = vector.load %arg2[%c0_20, %c2, %c0_21, %c0_22] : memref<1x4x4x128xf32, #tpu.memory_space<vmem>>, vector<1x1x4x128xf32>
    %54 = vector.shape_cast %53 : vector<1x1x4x128xf32> to vector<4x128xf32>
    %55 = vector.shape_cast %52 : vector<4x128xf32> to vector<1x1x4x128xf32>
    tpu.vector_store %arg2[%c0_20, %c2, %c0_21, %c0_22], %55 {strides = array<i32>} : memref<1x4x4x128xf32, #tpu.memory_space<vmem>>, vector<1x1x4x128xf32>,
    %56 = vector.extract_strided_slice %1 {offsets = [0, 11], sizes = [4, 128], strides = [1, 1]} : vector<4x160xf32> to vector<4x128xf32>
    %cst_23 = arith.constant 5.625000e-01 : f32
    %57 = vector.broadcast %cst_23 : f32 to vector<4x128xf32>
    %58 = arith.mulf %57, %56 : vector<4x128xf32>
    %59 = vector.extract_strided_slice %1 {offsets = [0, 12], sizes = [4, 128], strides = [1, 1]} : vector<4x160xf32> to vector<4x128xf32>
    %cst_24 = arith.constant 1.875000e-01 : f32
    %60 = vector.broadcast %cst_24 : f32 to vector<4x128xf32>
    %61 = arith.mulf %60, %59 : vector<4x128xf32>
    %62 = arith.addf %58, %61 : vector<4x128xf32>
    %63 = vector.extract_strided_slice %1 {offsets = [0, 21], sizes = [4, 128], strides = [1, 1]} : vector<4x160xf32> to vector<4x128xf32>
    %cst_25 = arith.constant 1.875000e-01 : f32
    %64 = vector.broadcast %cst_25 : f32 to vector<4x128xf32>
    %65 = arith.mulf %64, %63 : vector<4x128xf32>
    %66 = arith.addf %62, %65 : vector<4x128xf32>
    %67 = vector.extract_strided_slice %1 {offsets = [0, 22], sizes = [4, 128], strides = [1, 1]} : vector<4x160xf32> to vector<4x128xf32>
    %cst_26 = arith.constant 6.250000e-02 : f32
    %68 = vector.broadcast %cst_26 : f32 to vector<4x128xf32>
    %69 = arith.mulf %68, %67 : vector<4x128xf32>
    %70 = arith.addf %66, %69 : vector<4x128xf32>
    %c0_27 = arith.constant 0 : index
    %c3 = arith.constant 3 : index
    %c0_28 = arith.constant 0 : index
    %c0_29 = arith.constant 0 : index
    %71 = vector.load %arg2[%c0_27, %c3, %c0_28, %c0_29] : memref<1x4x4x128xf32, #tpu.memory_space<vmem>>, vector<1x1x4x128xf32>
    %72 = vector.shape_cast %71 : vector<1x1x4x128xf32> to vector<4x128xf32>
    %73 = vector.shape_cast %70 : vector<4x128xf32> to vector<1x1x4x128xf32>
    tpu.vector_store %arg2[%c0_27, %c3, %c0_28, %c0_29], %73 {strides = array<i32>} : memref<1x4x4x128xf32, #tpu.memory_space<vmem>>, vector<1x1x4x128xf32>,
    return
  }
  func.func @transform_0(%arg0: i32) -> (i32, i32, i32) {
    %c0_i32 = arith.constant 0 : i32
    %c0_i32_0 = arith.constant 0 : i32
    %c0_i32_1 = arith.constant 0 : i32
    return %arg0, %c0_i32, %c0_i32_0 : i32, i32, i32
  }
  func.func @transform_1(%arg0: i32) -> (i32, i32, i32, i32) {
    %c0_i32 = arith.constant 0 : i32
    %c0_i32_0 = arith.constant 0 : i32
    %c0_i32_1 = arith.constant 0 : i32
    %c0_i32_2 = arith.constant 0 : i32
    return %arg0, %c0_i32, %c0_i32_0, %c0_i32_1 : i32, i32, i32, i32
  }
}

</mosaic_0001>

<bundles_post_ra>
// kernel: _lambda_.7
= control target key start
LH: loop header
LB: loop body
LE: loop exit
PB: predicated region body
PF: predicated region fallthrough
CT: control target
= control target key end

     0   :  { %s1189_s13 = smov 0   ;;  %s1296_s0 = inlined_call_operand.vmem [shape: f32[2,32,144], index: 0, kind: input, shape index: {}]   ;;  %s1297_s1 = inlined_call_operand.vmem [shape: bf16[32,288], index: 1, kind: input, shape index: {}]   ;;  %s1298_s2 = inlined_call_operand.vmem [shape: f32[2,32,1], index: 2, kind: input, shape index: {}]   ;;  %s1299_s3 = inlined_call_operand.vmem [shape: f32[2,32,1], index: 3, kind: input, shape index: {}]   ;;  %s1300_s4 = inlined_call_operand.vmem [shape: f32[32,1], index: 4, kind: input, shape index: {}]   ;;  %s1301_s5 = inlined_call_operand.vmem [shape: f32[1,128], index: 5, kind: input, shape index: {}]   ;;  %s1302_s6 = inlined_call_operand.vmem [shape: f32[4,32], index: 6, kind: input, shape index: {}]   ;;  %s1303_s7 = inlined_call_operand.vmem [shape: f32[2,1,32], index: 7, kind: input, shape index: {}]   ;;  %s1304_s8 = inlined_call_operand.vmem [shape: f32[4,1], index: 8, kind: input, shape index: {}]   ;;  %s1305_s9 = inlined_call_operand.vmem [shape: f32[2,32,128], index: 9, kind: output, shape index: {0}]   ;;  %s1306_s10 = inlined_call_operand.vmem [shape: f32[2,4,128], index: 10, kind: output, shape index: {1}]  }
   0x1 LB: > { %s999_s14 = sadd.s32 4294967295, %s1121_s13   ;;  %p1003_p0 = scmp.ge.s32.totalorder %s1121_s13, 1  ;;  %s1121_s13 = sphi %s1189_s13, %s21_s13  }
   0x2   : > { %p343_p1 = scmp.lt.s32.totalorder %s1121_s13, 3 }
   0x4   : > { %p344_p2 = pnand %p1003_p0, %p343_p1 }
   0x5   : > { %p398_p3 = scmp.lt.s32.totalorder (!%p344_p2), %s999_s14, 1  ;;  %v1123_v0 = vmov (!%p344_p2), 0   ;;  %s1124_s23 = smov (!%p344_p2), 121   ;;  %v1109_v29 = vld [vmem:[%s1297_s1 + $0x4] ss:$12 sps:$4 sm:$0xff] (!%p344_p2)   ;;  %vm635_vm0 = vcmask (!%p344_p2), 261120  }
   0x6   : > { %347 = sbr.rel (%p344_p2) target bundleno = 789 (0x315), region = 56  ;;  %1106 = vset.pattern.permute.xlu1 (!%p344_p2), %v1123_v0  ;;  %1105 = vset.pattern.permute.xlu0 (!%p344_p2), %v1123_v0  ;;  %s1125_s24 = smov (!%p344_p2), 120   ;;  %v1113_v30 = vld [vmem:[%s1297_s1 + $0x8] ss:$12 sps:$4 sm:$0xff] (!%p344_p2)   ;;  %v492_v36 = vld [vmem:[%s1300_s4] sm:$0xff] (!%p344_p2)  ;;  %v495_v37 = vld [vmem:[%s1300_s4 + $0x18] sm:$0xff] (!%p344_p2) }
   0x7   : > { %s1126_s25 = smov (!%p344_p2), 127   ;;  %s1127_s26 = smov (!%p344_p2), 116   ;;  %674 = vmatprep.mubr.bf16.mxu0 (!%p344_p2), %v1109_v29  ;;  %1074 = vmatprep.mubr.msk.bf16.mxu1 (!%p344_p2), %vm635_vm0, %v1113_v30  ;;  %v493_v35 = vld [vmem:[%s1300_s4 + $0x8] sm:$0xff] (!%p344_p2)  ;;  %v494_v38 = vld [vmem:[%s1300_s4 + $0x10] sm:$0xff] (!%p344_p2)  ;;  %v496_v39 = vld [vmem:[%s1304_s8] sm:$0xf] (!%p344_p2) }
   0x8   : > { %s1128_s27 = smov (!%p344_p2), 126   ;;  %s1129_s28 = smov (!%p344_p2), 115   ;;  %vm548_vm1 = vcmask (!%p344_p2), 990208   ;;  %vm561_vm2 = vcmask (!%p344_p2), 982016   ;;  %vm509_vm3 = vcmask (!%p344_p2), 1039360   ;;  %vm574_vm4 = vcmask (!%p344_p2), 949248  }
   0x9   : > { %s1130_s11 = smov (!%p344_p2), 122   ;;  %s1131_s17 = smov (!%p344_p2), 114   ;;  %vm522_vm5 = vcmask (!%p344_p2), 1031168   ;;  %vm587_vm6 = vcmask (!%p344_p2), 941056   ;;  %vm535_vm7 = vcmask (!%p344_p2), 998400   ;;  %vm600_vm8 = vcmask (!%p344_p2), 932864  }
   0xa   : > { %vm1133_vm9 = vmmov (!%p344_p2), 0  }
   0xd   : > { %s1308_s14 = smov (!%p398_p3, %s999_s14), 1 }
   0xe   : > { %s1200_s15 = sshll.u32 %s1308_s14, 5  ;;  %s1031_s19 = sshll.u32 %s1308_s14, 6 }
   0xf   : > { %s407_s18 = scalar_lea.vmem %s1298_s2, %s1200_s15  ;;  %s402_s22 = scalar_lea.vmem %s1296_s0, %s1031_s19 }
  0x10   : > { %v436_v1 = vld [vmem:[%s407_s18 + $0x10] sm:$0xff]  ;;  %v434_v2 = vld [vmem:[%s407_s18] sm:$0xff]  ;;  %v437_v3 = vld [vmem:[%s407_s18 + $0x18] sm:$0xff]  ;;  %s412_s20 = scalar_lea.vmem %s1299_s3, %s1200_s15  ;;  %s415_s29 = scalar_lea.vmem %s1303_s7, %s1308_s14 }
  0x11   : > { %454 = vperm.xlu1 %1106, %v436_v1   ;;  %444 = vperm.xlu0 %1105, %v434_v2   ;;  %v435_v4 = vld [vmem:[%s407_s18 + $0x8] sm:$0xff]  ;;  %v426_v7 = vld [vmem:[%s402_s22] sm:$0xff]  ;;  %v428_v9 = vld [vmem:[%s402_s22 + $0x10] sm:$0xff] }
  0x12   : > { %v427_v8 = vld [vmem:[%s402_s22 + $0x8] sm:$0xff]  ;;  %v429_v10 = vld [vmem:[%s402_s22 + $0x18] sm:$0xff]  ;;  %v430_v11 = vld [vmem:[%s402_s22 + $0x20] sm:$0xff] }
  0x13   : > { %v431_v12 = vld [vmem:[%s402_s22 + $0x28] sm:$0xff]  ;;  %v432_v14 = vld [vmem:[%s402_s22 + $0x30] sm:$0xff]  ;;  %v433_v15 = vld [vmem:[%s402_s22 + $0x38] sm:$0xff] }
  0x14   : > { %v439_v31 = vld [vmem:[%s412_s20 + $0x8] sm:$0xff]  ;;  %v438_v32 = vld [vmem:[%s412_s20] sm:$0xff]  ;;  %v441_v33 = vld [vmem:[%s412_s20 + $0x18] sm:$0xff] }
  0x15   : > { %459 = vperm.xlu1 %1106, %v437_v3   ;;  %449 = vperm.xlu0 %1105, %v435_v4   ;;  %v440_v34 = vld [vmem:[%s412_s20 + $0x10] sm:$0xff] }
  0x90   : > { %v455_v5 = vpop.permute.xlu1 %454  ;;  %v445_v6 = vpop.permute.xlu0 %444 }
  0x91   : > { %v462_v17 = vmul.f32 %v445_v6, %v426_v7  ;;  %v463_v18 = vmul.f32 %v445_v6, %v427_v8  ;;  %v466_v21 = vmul.f32 %v455_v5, %v430_v11  ;;  %v467_v22 = vmul.f32 %v455_v5, %v431_v12 }
  0x94   : > { %v460_v13 = vpop.permute.xlu1 %459  ;;  %v450_v16 = vpop.permute.xlu0 %449 }
  0x95   : > { %v464_v19 = vmul.f32 %v450_v16, %v428_v9  ;;  %v465_v20 = vmul.f32 %v450_v16, %v429_v10  ;;  %v468_v23 = vmul.f32 %v460_v13, %v432_v14  ;;  %v469_v24 = vmul.f32 %v460_v13, %v433_v15 }
  0x97   : > { %v1210_v25 = vpack.c.bf16 %v464_v19, %v462_v17  ;;  %v471_v26 = vpack.c.bf16 %v465_v20, %v463_v18  ;;  %v1213_v27 = vpack.c.bf16 %v468_v23, %v466_v21  ;;  %v473_v28 = vpack.c.bf16 %v469_v24, %v467_v22  ;;  %v1107_v18 = vld [vmem:[%s1297_s1] ss:$12 sps:$4 sm:$0xff]   ;;  %v1110_v19 = vld [vmem:[%s1297_s1 + $0x1c] ss:$12 sps:$4 sm:$0xff]  }
  0x99   : > { %542 = vrot.lane.b32.xlu1 %v471_v26, %s1124_s23  ;;  %540 = vrot.lane.b32.xlu0 %v1210_v25, %s1124_s23 }
  0x9d   : > { %546 = vrot.lane.b32.xlu1 %v473_v28, %s1124_s23  ;;  %544 = vrot.lane.b32.xlu0 %v1213_v27, %s1124_s23 }
  0xa1   : > { %555 = vrot.lane.b32.xlu1 %v471_v26, %s1125_s24  ;;  %553 = vrot.lane.b32.xlu0 %v1210_v25, %s1125_s24 }
  0xa5   : > { %503 = vrot.lane.b32.xlu1 %v471_v26, %s1126_s25  ;;  %501 = vrot.lane.b32.xlu0 %v1210_v25, %s1126_s25 }
  0xa9   : > { %559 = vrot.lane.b32.xlu1 %v473_v28, %s1125_s24  ;;  %557 = vrot.lane.b32.xlu0 %v1213_v27, %s1125_s24 }
  0xad   : > { %507 = vrot.lane.b32.xlu1 %v473_v28, %s1126_s25  ;;  %505 = vrot.lane.b32.xlu0 %v1213_v27, %s1126_s25 }
  0xb1   : > { %568 = vrot.lane.b32.xlu1 %v471_v26, %s1127_s26  ;;  %566 = vrot.lane.b32.xlu0 %v1210_v25, %s1127_s26 }
  0xb5   : > { %516 = vrot.lane.b32.xlu1 %v471_v26, %s1128_s27  ;;  %514 = vrot.lane.b32.xlu0 %v1210_v25, %s1128_s27 }
  0xb9   : > { %572 = vrot.lane.b32.xlu1 %v473_v28, %s1127_s26  ;;  %570 = vrot.lane.b32.xlu0 %v1213_v27, %s1127_s26  ;;  %s420_s26 = scalar_lea.vmem %s1305_s9, %s1200_s15  ;;  %s1012_s15 = sshll.u32 %s1308_s14, 2 }
  0xbd   : > { %520 = vrot.lane.b32.xlu1 %v473_v28, %s1128_s27  ;;  %518 = vrot.lane.b32.xlu0 %v1213_v27, %s1128_s27 }
  0xc1   : > { %581 = vrot.lane.b32.xlu1 %v471_v26, %s1129_s28  ;;  %579 = vrot.lane.b32.xlu0 %v1210_v25, %s1129_s28 }
  0xc5   : > { %529 = vrot.lane.b32.xlu1 %v471_v26, %s1130_s11  ;;  %527 = vrot.lane.b32.xlu0 %v1210_v25, %s1130_s11 }
  0xc9   : > { %585 = vrot.lane.b32.xlu1 %v473_v28, %s1129_s28  ;;  %583 = vrot.lane.b32.xlu0 %v1213_v27, %s1129_s28 }
  0xcd   : > { %533 = vrot.lane.b32.xlu1 %v473_v28, %s1130_s11  ;;  %531 = vrot.lane.b32.xlu0 %v1213_v27, %s1130_s11 }
  0xd1   : > { %594 = vrot.lane.b32.xlu1 %v471_v26, %s1131_s17  ;;  %592 = vrot.lane.b32.xlu0 %v1210_v25, %s1131_s17  ;;  %v1112_v26 = vld [vmem:[%s1297_s1 + $0x18] ss:$12 sps:$4 sm:$0xff]  }
  0xd5   : > { %598 = vrot.lane.b32.xlu1 %v473_v28, %s1131_s17  ;;  %596 = vrot.lane.b32.xlu0 %v1213_v27, %s1131_s17  ;;  %v1132_v28 = vmov 0.0   ;;  %s424_s17 = scalar_lea.vmem %s1306_s10, %s1012_s15 }
  0xd9   : > { %747 = vperm.xlu1 %1106, %v439_v31   ;;  %742 = vperm.xlu0 %1105, %v438_v32  }
  0xdd   : > { %757 = vperm.xlu1 %1106, %v441_v33   ;;  %752 = vperm.xlu0 %1105, %v440_v34  }
  0xe1   : > { %782 = vperm.xlu1 %1106, %v493_v35   ;;  %777 = vperm.xlu0 %1105, %v492_v36  }
  0xe5   : > { %792 = vperm.xlu1 %1106, %v495_v37   ;;  %787 = vperm.xlu0 %1105, %v494_v38  }
  0xe9   : > { %831 = vperm.xlu0 %1105, %v496_v39  }
 0x10b   : > { %v543_v40 = vpop.permute.xlu1 %542  ;;  %v541_v41 = vpop.permute.xlu0 %540 }
 0x10c   : > { %v549_v42 = vsel %vm548_vm1, %v541_v41, %v543_v40 }
 0x10d   : > { %1035 = vmatprep.subr.bf16.mxu0 %v549_v42 }
 0x10e   : > { %1036 = vmatpush3.bf16.msra.mxu0 %v1210_v25 }
 0x10f   : > { %v547_v43 = vpop.permute.xlu1 %546  ;;  %v545_v44 = vpop.permute.xlu0 %544 }
 0x110   : > { %v550_v45 = vsel %vm548_vm1, %v545_v44, %v547_v43 }
 0x111   : > { %1037 = vmatprep.subr.bf16.mxu0 %v550_v45 }
 0x112   : > { %1038 = vmatpush3.bf16.msra.mxu0 %v1213_v27  ;;  %v1114_v27 = vld [vmem:[%s1297_s1 + $0x20] ss:$12 sps:$4 sm:$0xff]  }
 0x113   : > { %v556_v46 = vpop.permute.xlu1 %555  ;;  %v554_v47 = vpop.permute.xlu0 %553 }
 0x114   : > { %v562_v48 = vsel %vm561_vm2, %v554_v47, %v556_v46 }
 0x115   : > { %1039 = vmatprep.subr.bf16.mxu0 %v562_v48 }
 0x117   : > { %v504_v49 = vpop.permute.xlu1 %503  ;;  %v502_v50 = vpop.permute.xlu0 %501 }
 0x118   : > { %v510_v51 = vsel %vm509_vm3, %v502_v50, %v504_v49  ;;  %v1022_v50 = vld [vmem:[%s1301_s5] ss:$0 sm:$0xff] }
 0x119   : > { %1040 = vmatpush3.bf16.msra.mxu0 %v510_v51 }
 0x11b   : > { %v560_v52 = vpop.permute.xlu1 %559  ;;  %v558_v53 = vpop.permute.xlu0 %557 }
 0x11c   : > { %v563_v54 = vsel %vm561_vm2, %v558_v53, %v560_v52 }
 0x11d   : > { %1041 = vmatprep.subr.bf16.mxu0 %v563_v54 }
 0x11f   : > { %v508_v55 = vpop.permute.xlu1 %507  ;;  %v506_v56 = vpop.permute.xlu0 %505 }
 0x120   : > { %v511_v57 = vsel %vm509_vm3, %v506_v56, %v508_v55 }
 0x121   : > { %1042 = vmatpush3.bf16.msra.mxu0 %v511_v57 }
 0x123   : > { %v569_v58 = vpop.permute.xlu1 %568  ;;  %v567_v59 = vpop.permute.xlu0 %566 }
 0x124   : > { %v575_v60 = vsel %vm574_vm4, %v567_v59, %v569_v58 }
 0x125   : > { %1043 = vmatprep.subr.bf16.mxu0 %v575_v60 }
 0x127   : > { %v517_v61 = vpop.permute.xlu1 %516  ;;  %v515_v62 = vpop.permute.xlu0 %514 }
 0x128   : > { %v523_v63 = vsel %vm522_vm5, %v515_v62, %v517_v61 }
 0x129   : > { %1044 = vmatpush3.bf16.msra.mxu0 %v523_v63 }
 0x12b   : > { %v573_v0 = vpop.permute.xlu1 %572  ;;  %v571_v1 = vpop.permute.xlu0 %570 }
 0x12c   : > { %v576_v2 = vsel %vm574_vm4, %v571_v1, %v573_v0 }
 0x12d   : > { %1045 = vmatprep.subr.bf16.mxu0 %v576_v2 }
 0x12f   : > { %v521_v3 = vpop.permute.xlu1 %520  ;;  %v519_v4 = vpop.permute.xlu0 %518 }
 0x130   : > { %v524_v5 = vsel %vm522_vm5, %v519_v4, %v521_v3 }
 0x131   : > { %1046 = vmatpush3.bf16.msra.mxu0 %v524_v5 }
 0x133   : > { %v582_v6 = vpop.permute.xlu1 %581  ;;  %v580_v7 = vpop.permute.xlu0 %579 }
 0x134   : > { %v588_v8 = vsel %vm587_vm6, %v580_v7, %v582_v6 }
 0x135   : > { %1047 = vmatprep.subr.bf16.mxu0 %v588_v8 }
 0x137   : > { %v530_v9 = vpop.permute.xlu1 %529  ;;  %v528_v10 = vpop.permute.xlu0 %527 }
 0x138   : > { %v536_v11 = vsel %vm535_vm7, %v528_v10, %v530_v9 }
 0x139   : > { %1048 = vmatpush3.bf16.msra.mxu0 %v536_v11 }
 0x13b   : > { %v586_v12 = vpop.permute.xlu1 %585  ;;  %v584_v13 = vpop.permute.xlu0 %583 }
 0x13c   : > { %v589_v14 = vsel %vm587_vm6, %v584_v13, %v586_v12 }
 0x13d   : > { %1049 = vmatprep.subr.bf16.mxu0 %v589_v14 }
 0x13f   : > { %v534_v15 = vpop.permute.xlu1 %533  ;;  %v532_v16 = vpop.permute.xlu0 %531 }
 0x140   : > { %v537_v17 = vsel %vm535_vm7, %v532_v16, %v534_v15 }
 0x141   : > { %1050 = vmatpush3.bf16.msra.mxu0 %v537_v17 }
 0x143   : > { %v595_v20 = vpop.permute.xlu1 %594  ;;  %v593_v21 = vpop.permute.xlu0 %592 }
 0x144   : > { %675 = vmatmul.mubr.bf16.vlgmr.msra.gmra.mrb[0].mxu0 %v1107_v18  ;;  %v601_v22 = vsel %vm600_vm8, %v593_v21, %v595_v20  ;;  %v482_v21 = vld [vmem:[%s1302_s6] sm:$0xf] }
 0x145   : > { %1070 = vmatprep.subr.bf16.mxu1 %v601_v22  ;;  %682 = vmatprep.mubr.bf16.mxu0 %v1110_v19 }
 0x146   : > { %1071 = vmatpush3.bf16.msra.mxu1 %v601_v22  ;;  %v1013_v22 = vld [vmem:[%s415_s29] ss:$0 sm:$0xff] }
 0x147   : > { %v599_v23 = vpop.permute.xlu1 %598  ;;  %v597_v24 = vpop.permute.xlu0 %596 }
 0x148   : > { %v602_v25 = vsel %vm600_vm8, %v597_v24, %v599_v23 }
 0x149   : > { %1072 = vmatprep.subr.bf16.mxu1 %v602_v25 }
 0x14a   : > { %1073 = vmatpush3.bf16.msra.mxu1 %v602_v25 }
 0x14b   : > { %1078 = vmatprep.subr.bf16.mxu1 %v1132_v28 }
 0x14c   : > { %683 = vmatmul.mubr.bf16.gmra.mrb[4].mxu0 %v1112_v26  ;;  %v490_v26 = vmul.f32 %v1013_v22, %v482_v21 }
 0x14d   : > { %1075 = vmatmul.mubr.msk.bf16.vlgmr.msra.gmra.mrb[0].mxu1 %vm635_vm0, %v1114_v27 }
 0x14e   : > { %1082 = vmatprep.mubr.msk.bf16.mxu1 %vm1133_vm9, %v1132_v28  ;;  %v491_v27 = vpack.c.bf16 %v490_v26, %v490_v26 }
 0x158   : > { %v743_v29 = vpop.permute.xlu0 %742  ;;  %v748_v31 = vpop.permute.xlu1 %747 }
 0x15c   : > { %v753_v33 = vpop.permute.xlu0 %752  ;;  %v758_v38 = vpop.permute.xlu1 %757 }
 0x160   : > { %v778_v39 = vpop.permute.xlu0 %777  ;;  %v783_v53 = vpop.permute.xlu1 %782 }
 0x164   : > { %v788_v62 = vpop.permute.xlu0 %787  ;;  %v793_v3 = vpop.permute.xlu1 %792 }
 0x217   : > { %v1051_v30 = vpop.f32.mrb[0].mxu0 }
 0x218   : > { %v1052_v32 = vpop.f32.mrb[1].mxu0 }
 0x219   : > { %v1053_v34 = vadd.f32 %v1052_v32, %v1051_v30  ;;  %v1054_v35 = vpop.f32.mrb[2].mxu0 }
 0x21a   : > { %v1055_v36 = vpop.f32.mrb[3].mxu0 }
 0x21b   : > { %v1056_v37 = vadd.f32 %v1055_v36, %v1054_v35 }
 0x21f   : > { %v1057_v40 = vpop.f32.mrb[4].mxu0 }
 0x220   : > { %v1058_v41 = vpop.f32.mrb[5].mxu0  ;;  %v1076_v42 = vpop.f32.mrb[0].mxu1 }
 0x221   : > { %v1059_v43 = vadd.f32 %v1058_v41, %v1057_v40  ;;  %v1060_v44 = vpop.f32.mrb[6].mxu0  ;;  %v725_v45 = vpop.f32.mrb[1].mxu1 }
 0x222   : > { %v726_v46 = vadd.f32 %v1053_v34, %v725_v45  ;;  %v1061_v47 = vpop.f32.mrb[7].mxu0  ;;  %v1077_v48 = vpop.f32.mrb[2].mxu1 }
 0x223   : > { %v734_v49 = vadd.f32 %v1076_v42, %v1059_v43  ;;  %v1062_v51 = vadd.f32 %v1061_v47, %v1060_v44  ;;  %v728_v52 = vpop.f32.mrb[3].mxu1 }
 0x224   : > { %v760_v54 = vmul.f32 %v743_v29, %v726_v46  ;;  %v729_v55 = vadd.f32 %v1056_v37, %v728_v52  ;;  %v832_v29 = vpop.permute.xlu0 %831 }
 0x225   : > { %v762_v56 = vmul.f32 %v753_v33, %v734_v49  ;;  %v737_v57 = vadd.f32 %v1077_v48, %v1062_v51 }
 0x226   : > { %v771_v58 = vadd.f32 %v1022_v50, %v760_v54  ;;  %v761_v59 = vmul.f32 %v748_v31, %v729_v55 }
 0x227   : > { %v773_v60 = vadd.f32 %v1022_v50, %v762_v56  ;;  %v763_v61 = vmul.f32 %v758_v38, %v737_v57 }
 0x228   : > { %v795_v63 = vadd.f32 %v778_v39, %v771_v58  ;;  %v772_v0 = vadd.f32 %v1022_v50, %v761_v59 }
 0x229   : > { %v797_v1 = vadd.f32 %v788_v62, %v773_v60  ;;  %v774_v2 = vadd.f32 %v1022_v50, %v763_v61 }
 0x22a   : > { %vm799_vm10 = vcmp.ge.f32.partialorder %v795_v63, 0.0  ;;  %v803_v4 = vmul.f32 0.2, %v795_v63  ;;  %v796_v5 = vadd.f32 %v783_v53, %v772_v0 }
 0x22b   : > { %vm801_vm11 = vcmp.ge.f32.partialorder %v797_v1, 0.0  ;;  %v805_v6 = vmul.f32 0.2, %v797_v1  ;;  %v798_v7 = vadd.f32 %v793_v3, %v774_v2 }
 0x22c   : > { %vm800_vm12 = vcmp.ge.f32.partialorder %v796_v5, 0.0  ;;  %v804_v8 = vmul.f32 0.2, %v796_v5  ;;  %v807_v9 = vsel %vm799_vm10, %v795_v63, %v803_v4 }
 0x22d   : > { %vm802_vm13 = vcmp.ge.f32.partialorder %v798_v7, 0.0  ;;  %v806_v10 = vmul.f32 0.2, %v798_v7  ;;  %v811_v11 = vmul.f32 1.4142135, %v807_v9  ;;  %v809_v12 = vsel %vm801_vm11, %v797_v1, %v805_v6 }
 0x22e   : > { %v808_v13 = vsel %vm800_vm12, %v796_v5, %v804_v8  ;;  %v813_v14 = vmul.f32 1.4142135, %v809_v12 }
 0x22f   : > { %v812_v15 = vmul.f32 1.4142135, %v808_v13  ;;  %v1023_v16 = vclamps-f32 %v811_v11, 256.0  ;;  %v810_v17 = vsel %vm802_vm13, %v798_v7, %v806_v10 }
 0x230   : > { %v814_v18 = vmul.f32 1.4142135, %v810_v17  ;;  %v1025_v19 = vclamps-f32 %v813_v14, 256.0 }
 0x231   : > { %v1024_v20 = vclamps-f32 %v812_v15, 256.0  ;;  %823 = vst [vmem:[%s420_s26] sm:$0xff] %v1023_v16 }
 0x232   : > { %v1026_v23 = vclamps-f32 %v814_v18, 256.0  ;;  %825 = vst [vmem:[%s420_s26 + $0x10] sm:$0xff] %v1025_v19 }
 0x233   : > { %824 = vst [vmem:[%s420_s26 + $0x8] sm:$0xff] %v1024_v20  ;;  %v827_v24 = vpack.c.bf16 %v1024_v20, %v1023_v16 }
 0x234   : > { %826 = vst [vmem:[%s420_s26 + $0x18] sm:$0xff] %v1026_v23  ;;  %v828_v25 = vpack.c.bf16 %v1026_v23, %v1025_v19 }
 0x235   : > { %1079 = vmatpush3.bf16.msra.mxu1 %v827_v24 }
 0x236   : > { %1080 = vmatprep.subr.bf16.mxu1 %v1132_v28 }
 0x239   : > { %1081 = vmatpush3.bf16.msra.mxu1 %v828_v25 }
 0x23c   : > { %1083 = vmatmul.mubr.msk.bf16.vlgmr.msra.gmra.mrb[4].mxu1 %vm635_vm0, %v491_v27 }
 0x30f   : > { %v871_v30 = vpop.f32.mrb[4].mxu1 }
 0x310   : > { %v872_v31 = vadd.f32 %v871_v30, %v832_v29  ;;  %v1084_v32 = vpop.f32.mrb[5].mxu1 }
 0x311   : > { %v874_v33 = vpop.f32.mrb[6].mxu1 }
 0x312   : > { %v1028_v34 = vclamps-f32 %v872_v31, 256.0  ;;  %v1085_v35 = vpop.f32.mrb[7].mxu1 }
 0x314   : > { %879 = vst [vmem:[%s424_s17] sm:$0xf] %v1028_v34 }
 0x315 PF: > { %s21_s13 = sadd.s32 1, %s1121_s13  }
 0x316   : > { %p18_p4 = scmp.ge.s32.totalorder %s21_s13, 4  }
 0x318   :  { %20 = sbr.rel (!%p18_p4) target bundleno = 1 (0x1), region = 107 }

// kernel: _lambda_.9
= control target key start
LH: loop header
LB: loop body
LE: loop exit
PB: predicated region body
PF: predicated region fallthrough
CT: control target
= control target key end

     0   :  { %s1189_s13 = smov 0   ;;  %s1296_s0 = inlined_call_operand.vmem [shape: f32[2,32,150], index: 0, kind: input, shape index: {}]   ;;  %s1297_s1 = inlined_call_operand.vmem [shape: bf16[32,288], index: 1, kind: input, shape index: {}]   ;;  %s1298_s2 = inlined_call_operand.vmem [shape: f32[2,32,1], index: 2, kind: input, shape index: {}]   ;;  %s1299_s3 = inlined_call_operand.vmem [shape: f32[2,32,1], index: 3, kind: input, shape index: {}]   ;;  %s1300_s4 = inlined_call_operand.vmem [shape: f32[32,1], index: 4, kind: input, shape index: {}]   ;;  %s1301_s5 = inlined_call_operand.vmem [shape: f32[1,128], index: 5, kind: input, shape index: {}]   ;;  %s1302_s6 = inlined_call_operand.vmem [shape: f32[4,32], index: 6, kind: input, shape index: {}]   ;;  %s1303_s7 = inlined_call_operand.vmem [shape: f32[2,1,32], index: 7, kind: input, shape index: {}]   ;;  %s1304_s8 = inlined_call_operand.vmem [shape: f32[4,1], index: 8, kind: input, shape index: {}]   ;;  %s1305_s9 = inlined_call_operand.vmem [shape: f32[2,32,128], index: 9, kind: output, shape index: {0}]   ;;  %s1306_s10 = inlined_call_operand.vmem [shape: f32[2,4,128], index: 10, kind: output, shape index: {1}]  }
   0x1 LB: > { %s999_s14 = sadd.s32 4294967295, %s1121_s13   ;;  %p1003_p0 = scmp.ge.s32.totalorder %s1121_s13, 1  ;;  %s1121_s13 = sphi %s1189_s13, %s21_s13  }
   0x2   : > { %p343_p1 = scmp.lt.s32.totalorder %s1121_s13, 3 }
   0x4   : > { %p344_p2 = pnand %p1003_p0, %p343_p1 }
   0x5   : > { %p398_p3 = scmp.lt.s32.totalorder (!%p344_p2), %s999_s14, 1  ;;  %v1123_v0 = vmov (!%p344_p2), 0   ;;  %s1124_s23 = smov (!%p344_p2), 117   ;;  %v1109_v29 = vld [vmem:[%s1297_s1 + $0x4] ss:$12 sps:$4 sm:$0xff] (!%p344_p2)   ;;  %vm635_vm0 = vcmask (!%p344_p2), 261120  }
   0x6   : > { %347 = sbr.rel (%p344_p2) target bundleno = 789 (0x315), region = 56  ;;  %1106 = vset.pattern.permute.xlu1 (!%p344_p2), %v1123_v0  ;;  %1105 = vset.pattern.permute.xlu0 (!%p344_p2), %v1123_v0  ;;  %s1125_s24 = smov (!%p344_p2), 116   ;;  %v1113_v30 = vld [vmem:[%s1297_s1 + $0x8] ss:$12 sps:$4 sm:$0xff] (!%p344_p2)   ;;  %v492_v36 = vld [vmem:[%s1300_s4] sm:$0xff] (!%p344_p2)  ;;  %v495_v37 = vld [vmem:[%s1300_s4 + $0x18] sm:$0xff] (!%p344_p2) }
   0x7   : > { %s1126_s25 = smov (!%p344_p2), 127   ;;  %s1127_s26 = smov (!%p344_p2), 108   ;;  %674 = vmatprep.mubr.bf16.mxu0 (!%p344_p2), %v1109_v29  ;;  %1074 = vmatprep.mubr.msk.bf16.mxu1 (!%p344_p2), %vm635_vm0, %v1113_v30  ;;  %v493_v35 = vld [vmem:[%s1300_s4 + $0x8] sm:$0xff] (!%p344_p2)  ;;  %v494_v38 = vld [vmem:[%s1300_s4 + $0x10] sm:$0xff] (!%p344_p2)  ;;  %v496_v39 = vld [vmem:[%s1304_s8] sm:$0xf] (!%p344_p2) }
   0x8   : > { %s1128_s27 = smov (!%p344_p2), 126   ;;  %s1129_s28 = smov (!%p344_p2), 107   ;;  %vm548_vm1 = vcmask (!%p344_p2), 957440   ;;  %vm561_vm2 = vcmask (!%p344_p2), 949248   ;;  %vm509_vm3 = vcmask (!%p344_p2), 1039360   ;;  %vm574_vm4 = vcmask (!%p344_p2), 883712  }
   0x9   : > { %s1130_s11 = smov (!%p344_p2), 118   ;;  %s1131_s17 = smov (!%p344_p2), 106   ;;  %vm522_vm5 = vcmask (!%p344_p2), 1031168   ;;  %vm587_vm6 = vcmask (!%p344_p2), 875520   ;;  %vm535_vm7 = vcmask (!%p344_p2), 965632   ;;  %vm600_vm8 = vcmask (!%p344_p2), 867328  }
   0xa   : > { %vm1133_vm9 = vmmov (!%p344_p2), 0  }
   0xd   : > { %s1308_s14 = smov (!%p398_p3, %s999_s14), 1 }
   0xe   : > { %s1200_s15 = sshll.u32 %s1308_s14, 5  ;;  %s1031_s19 = sshll.u32 %s1308_s14, 6 }
   0xf   : > { %s407_s18 = scalar_lea.vmem %s1298_s2, %s1200_s15  ;;  %s402_s22 = scalar_lea.vmem %s1296_s0, %s1031_s19 }
  0x10   : > { %v436_v1 = vld [vmem:[%s407_s18 + $0x10] sm:$0xff]  ;;  %v434_v2 = vld [vmem:[%s407_s18] sm:$0xff]  ;;  %v437_v3 = vld [vmem:[%s407_s18 + $0x18] sm:$0xff]  ;;  %s412_s20 = scalar_lea.vmem %s1299_s3, %s1200_s15  ;;  %s415_s29 = scalar_lea.vmem %s1303_s7, %s1308_s14 }
  0x11   : > { %454 = vperm.xlu1 %1106, %v436_v1   ;;  %444 = vperm.xlu0 %1105, %v434_v2   ;;  %v435_v4 = vld [vmem:[%s407_s18 + $0x8] sm:$0xff]  ;;  %v426_v7 = vld [vmem:[%s402_s22] sm:$0xff]  ;;  %v428_v9 = vld [vmem:[%s402_s22 + $0x10] sm:$0xff] }
  0x12   : > { %v427_v8 = vld [vmem:[%s402_s22 + $0x8] sm:$0xff]  ;;  %v429_v10 = vld [vmem:[%s402_s22 + $0x18] sm:$0xff]  ;;  %v430_v11 = vld [vmem:[%s402_s22 + $0x20] sm:$0xff] }
  0x13   : > { %v431_v12 = vld [vmem:[%s402_s22 + $0x28] sm:$0xff]  ;;  %v432_v14 = vld [vmem:[%s402_s22 + $0x30] sm:$0xff]  ;;  %v433_v15 = vld [vmem:[%s402_s22 + $0x38] sm:$0xff] }
  0x14   : > { %v439_v31 = vld [vmem:[%s412_s20 + $0x8] sm:$0xff]  ;;  %v438_v32 = vld [vmem:[%s412_s20] sm:$0xff]  ;;  %v441_v33 = vld [vmem:[%s412_s20 + $0x18] sm:$0xff] }
  0x15   : > { %459 = vperm.xlu1 %1106, %v437_v3   ;;  %449 = vperm.xlu0 %1105, %v435_v4   ;;  %v440_v34 = vld [vmem:[%s412_s20 + $0x10] sm:$0xff] }
  0x90   : > { %v455_v5 = vpop.permute.xlu1 %454  ;;  %v445_v6 = vpop.permute.xlu0 %444 }
  0x91   : > { %v462_v17 = vmul.f32 %v445_v6, %v426_v7  ;;  %v463_v18 = vmul.f32 %v445_v6, %v427_v8  ;;  %v466_v21 = vmul.f32 %v455_v5, %v430_v11  ;;  %v467_v22 = vmul.f32 %v455_v5, %v431_v12 }
  0x94   : > { %v460_v13 = vpop.permute.xlu1 %459  ;;  %v450_v16 = vpop.permute.xlu0 %449 }
  0x95   : > { %v464_v19 = vmul.f32 %v450_v16, %v428_v9  ;;  %v465_v20 = vmul.f32 %v450_v16, %v429_v10  ;;  %v468_v23 = vmul.f32 %v460_v13, %v432_v14  ;;  %v469_v24 = vmul.f32 %v460_v13, %v433_v15 }
  0x97   : > { %v1210_v25 = vpack.c.bf16 %v464_v19, %v462_v17  ;;  %v471_v26 = vpack.c.bf16 %v465_v20, %v463_v18  ;;  %v1213_v27 = vpack.c.bf16 %v468_v23, %v466_v21  ;;  %v473_v28 = vpack.c.bf16 %v469_v24, %v467_v22  ;;  %v1107_v18 = vld [vmem:[%s1297_s1] ss:$12 sps:$4 sm:$0xff]   ;;  %v1110_v19 = vld [vmem:[%s1297_s1 + $0x1c] ss:$12 sps:$4 sm:$0xff]  }
  0x99   : > { %542 = vrot.lane.b32.xlu1 %v471_v26, %s1124_s23  ;;  %540 = vrot.lane.b32.xlu0 %v1210_v25, %s1124_s23 }
  0x9d   : > { %546 = vrot.lane.b32.xlu1 %v473_v28, %s1124_s23  ;;  %544 = vrot.lane.b32.xlu0 %v1213_v27, %s1124_s23 }
  0xa1   : > { %555 = vrot.lane.b32.xlu1 %v471_v26, %s1125_s24  ;;  %553 = vrot.lane.b32.xlu0 %v1210_v25, %s1125_s24 }
  0xa5   : > { %503 = vrot.lane.b32.xlu1 %v471_v26, %s1126_s25  ;;  %501 = vrot.lane.b32.xlu0 %v1210_v25, %s1126_s25 }
  0xa9   : > { %559 = vrot.lane.b32.xlu1 %v473_v28, %s1125_s24  ;;  %557 = vrot.lane.b32.xlu0 %v1213_v27, %s1125_s24 }
  0xad   : > { %507 = vrot.lane.b32.xlu1 %v473_v28, %s1126_s25  ;;  %505 = vrot.lane.b32.xlu0 %v1213_v27, %s1126_s25 }
  0xb1   : > { %568 = vrot.lane.b32.xlu1 %v471_v26, %s1127_s26  ;;  %566 = vrot.lane.b32.xlu0 %v1210_v25, %s1127_s26 }
  0xb5   : > { %516 = vrot.lane.b32.xlu1 %v471_v26, %s1128_s27  ;;  %514 = vrot.lane.b32.xlu0 %v1210_v25, %s1128_s27 }
  0xb9   : > { %572 = vrot.lane.b32.xlu1 %v473_v28, %s1127_s26  ;;  %570 = vrot.lane.b32.xlu0 %v1213_v27, %s1127_s26  ;;  %s420_s26 = scalar_lea.vmem %s1305_s9, %s1200_s15  ;;  %s1012_s15 = sshll.u32 %s1308_s14, 2 }
  0xbd   : > { %520 = vrot.lane.b32.xlu1 %v473_v28, %s1128_s27  ;;  %518 = vrot.lane.b32.xlu0 %v1213_v27, %s1128_s27 }
  0xc1   : > { %581 = vrot.lane.b32.xlu1 %v471_v26, %s1129_s28  ;;  %579 = vrot.lane.b32.xlu0 %v1210_v25, %s1129_s28 }
  0xc5   : > { %529 = vrot.lane.b32.xlu1 %v471_v26, %s1130_s11  ;;  %527 = vrot.lane.b32.xlu0 %v1210_v25, %s1130_s11 }
  0xc9   : > { %585 = vrot.lane.b32.xlu1 %v473_v28, %s1129_s28  ;;  %583 = vrot.lane.b32.xlu0 %v1213_v27, %s1129_s28 }
  0xcd   : > { %533 = vrot.lane.b32.xlu1 %v473_v28, %s1130_s11  ;;  %531 = vrot.lane.b32.xlu0 %v1213_v27, %s1130_s11 }
  0xd1   : > { %594 = vrot.lane.b32.xlu1 %v471_v26, %s1131_s17  ;;  %592 = vrot.lane.b32.xlu0 %v1210_v25, %s1131_s17  ;;  %v1112_v26 = vld [vmem:[%s1297_s1 + $0x18] ss:$12 sps:$4 sm:$0xff]  }
  0xd5   : > { %598 = vrot.lane.b32.xlu1 %v473_v28, %s1131_s17  ;;  %596 = vrot.lane.b32.xlu0 %v1213_v27, %s1131_s17  ;;  %v1132_v28 = vmov 0.0   ;;  %s424_s17 = scalar_lea.vmem %s1306_s10, %s1012_s15 }
  0xd9   : > { %747 = vperm.xlu1 %1106, %v439_v31   ;;  %742 = vperm.xlu0 %1105, %v438_v32  }
  0xdd   : > { %757 = vperm.xlu1 %1106, %v441_v33   ;;  %752 = vperm.xlu0 %1105, %v440_v34  }
  0xe1   : > { %782 = vperm.xlu1 %1106, %v493_v35   ;;  %777 = vperm.xlu0 %1105, %v492_v36  }
  0xe5   : > { %792 = vperm.xlu1 %1106, %v495_v37   ;;  %787 = vperm.xlu0 %1105, %v494_v38  }
  0xe9   : > { %831 = vperm.xlu0 %1105, %v496_v39  }
 0x10b   : > { %v543_v40 = vpop.permute.xlu1 %542  ;;  %v541_v41 = vpop.permute.xlu0 %540 }
 0x10c   : > { %v549_v42 = vsel %vm548_vm1, %v541_v41, %v543_v40 }
 0x10d   : > { %1035 = vmatprep.subr.bf16.mxu0 %v549_v42 }
 0x10e   : > { %1036 = vmatpush3.bf16.msra.mxu0 %v1210_v25 }
 0x10f   : > { %v547_v43 = vpop.permute.xlu1 %546  ;;  %v545_v44 = vpop.permute.xlu0 %544 }
 0x110   : > { %v550_v45 = vsel %vm548_vm1, %v545_v44, %v547_v43 }
 0x111   : > { %1037 = vmatprep.subr.bf16.mxu0 %v550_v45 }
 0x112   : > { %1038 = vmatpush3.bf16.msra.mxu0 %v1213_v27  ;;  %v1114_v27 = vld [vmem:[%s1297_s1 + $0x20] ss:$12 sps:$4 sm:$0xff]  }
 0x113   : > { %v556_v46 = vpop.permute.xlu1 %555  ;;  %v554_v47 = vpop.permute.xlu0 %553 }
 0x114   : > { %v562_v48 = vsel %vm561_vm2, %v554_v47, %v556_v46 }
 0x115   : > { %1039 = vmatprep.subr.bf16.mxu0 %v562_v48 }
 0x117   : > { %v504_v49 = vpop.permute.xlu1 %503  ;;  %v502_v50 = vpop.permute.xlu0 %501 }
 0x118   : > { %v510_v51 = vsel %vm509_vm3, %v502_v50, %v504_v49  ;;  %v1022_v50 = vld [vmem:[%s1301_s5] ss:$0 sm:$0xff] }
 0x119   : > { %1040 = vmatpush3.bf16.msra.mxu0 %v510_v51 }
 0x11b   : > { %v560_v52 = vpop.permute.xlu1 %559  ;;  %v558_v53 = vpop.permute.xlu0 %557 }
 0x11c   : > { %v563_v54 = vsel %vm561_vm2, %v558_v53, %v560_v52 }
 0x11d   : > { %1041 = vmatprep.subr.bf16.mxu0 %v563_v54 }
 0x11f   : > { %v508_v55 = vpop.permute.xlu1 %507  ;;  %v506_v56 = vpop.permute.xlu0 %505 }
 0x120   : > { %v511_v57 = vsel %vm509_vm3, %v506_v56, %v508_v55 }
 0x121   : > { %1042 = vmatpush3.bf16.msra.mxu0 %v511_v57 }
 0x123   : > { %v569_v58 = vpop.permute.xlu1 %568  ;;  %v567_v59 = vpop.permute.xlu0 %566 }
 0x124   : > { %v575_v60 = vsel %vm574_vm4, %v567_v59, %v569_v58 }
 0x125   : > { %1043 = vmatprep.subr.bf16.mxu0 %v575_v60 }
 0x127   : > { %v517_v61 = vpop.permute.xlu1 %516  ;;  %v515_v62 = vpop.permute.xlu0 %514 }
 0x128   : > { %v523_v63 = vsel %vm522_vm5, %v515_v62, %v517_v61 }
 0x129   : > { %1044 = vmatpush3.bf16.msra.mxu0 %v523_v63 }
 0x12b   : > { %v573_v0 = vpop.permute.xlu1 %572  ;;  %v571_v1 = vpop.permute.xlu0 %570 }
 0x12c   : > { %v576_v2 = vsel %vm574_vm4, %v571_v1, %v573_v0 }
 0x12d   : > { %1045 = vmatprep.subr.bf16.mxu0 %v576_v2 }
 0x12f   : > { %v521_v3 = vpop.permute.xlu1 %520  ;;  %v519_v4 = vpop.permute.xlu0 %518 }
 0x130   : > { %v524_v5 = vsel %vm522_vm5, %v519_v4, %v521_v3 }
 0x131   : > { %1046 = vmatpush3.bf16.msra.mxu0 %v524_v5 }
 0x133   : > { %v582_v6 = vpop.permute.xlu1 %581  ;;  %v580_v7 = vpop.permute.xlu0 %579 }
 0x134   : > { %v588_v8 = vsel %vm587_vm6, %v580_v7, %v582_v6 }
 0x135   : > { %1047 = vmatprep.subr.bf16.mxu0 %v588_v8 }
 0x137   : > { %v530_v9 = vpop.permute.xlu1 %529  ;;  %v528_v10 = vpop.permute.xlu0 %527 }
 0x138   : > { %v536_v11 = vsel %vm535_vm7, %v528_v10, %v530_v9 }
 0x139   : > { %1048 = vmatpush3.bf16.msra.mxu0 %v536_v11 }
 0x13b   : > { %v586_v12 = vpop.permute.xlu1 %585  ;;  %v584_v13 = vpop.permute.xlu0 %583 }
 0x13c   : > { %v589_v14 = vsel %vm587_vm6, %v584_v13, %v586_v12 }
 0x13d   : > { %1049 = vmatprep.subr.bf16.mxu0 %v589_v14 }
 0x13f   : > { %v534_v15 = vpop.permute.xlu1 %533  ;;  %v532_v16 = vpop.permute.xlu0 %531 }
 0x140   : > { %v537_v17 = vsel %vm535_vm7, %v532_v16, %v534_v15 }
 0x141   : > { %1050 = vmatpush3.bf16.msra.mxu0 %v537_v17 }
 0x143   : > { %v595_v20 = vpop.permute.xlu1 %594  ;;  %v593_v21 = vpop.permute.xlu0 %592 }
 0x144   : > { %675 = vmatmul.mubr.bf16.vlgmr.msra.gmra.mrb[0].mxu0 %v1107_v18  ;;  %v601_v22 = vsel %vm600_vm8, %v593_v21, %v595_v20  ;;  %v482_v21 = vld [vmem:[%s1302_s6] sm:$0xf] }
 0x145   : > { %1070 = vmatprep.subr.bf16.mxu1 %v601_v22  ;;  %682 = vmatprep.mubr.bf16.mxu0 %v1110_v19 }
 0x146   : > { %1071 = vmatpush3.bf16.msra.mxu1 %v601_v22  ;;  %v1013_v22 = vld [vmem:[%s415_s29] ss:$0 sm:$0xff] }
 0x147   : > { %v599_v23 = vpop.permute.xlu1 %598  ;;  %v597_v24 = vpop.permute.xlu0 %596 }
 0x148   : > { %v602_v25 = vsel %vm600_vm8, %v597_v24, %v599_v23 }
 0x149   : > { %1072 = vmatprep.subr.bf16.mxu1 %v602_v25 }
 0x14a   : > { %1073 = vmatpush3.bf16.msra.mxu1 %v602_v25 }
 0x14b   : > { %1078 = vmatprep.subr.bf16.mxu1 %v1132_v28 }
 0x14c   : > { %683 = vmatmul.mubr.bf16.gmra.mrb[4].mxu0 %v1112_v26  ;;  %v490_v26 = vmul.f32 %v1013_v22, %v482_v21 }
 0x14d   : > { %1075 = vmatmul.mubr.msk.bf16.vlgmr.msra.gmra.mrb[0].mxu1 %vm635_vm0, %v1114_v27 }
 0x14e   : > { %1082 = vmatprep.mubr.msk.bf16.mxu1 %vm1133_vm9, %v1132_v28  ;;  %v491_v27 = vpack.c.bf16 %v490_v26, %v490_v26 }
 0x158   : > { %v743_v29 = vpop.permute.xlu0 %742  ;;  %v748_v31 = vpop.permute.xlu1 %747 }
 0x15c   : > { %v753_v33 = vpop.permute.xlu0 %752  ;;  %v758_v38 = vpop.permute.xlu1 %757 }
 0x160   : > { %v778_v39 = vpop.permute.xlu0 %777  ;;  %v783_v53 = vpop.permute.xlu1 %782 }
 0x164   : > { %v788_v62 = vpop.permute.xlu0 %787  ;;  %v793_v3 = vpop.permute.xlu1 %792 }
 0x217   : > { %v1051_v30 = vpop.f32.mrb[0].mxu0 }
 0x218   : > { %v1052_v32 = vpop.f32.mrb[1].mxu0 }
 0x219   : > { %v1053_v34 = vadd.f32 %v1052_v32, %v1051_v30  ;;  %v1054_v35 = vpop.f32.mrb[2].mxu0 }
 0x21a   : > { %v1055_v36 = vpop.f32.mrb[3].mxu0 }
 0x21b   : > { %v1056_v37 = vadd.f32 %v1055_v36, %v1054_v35 }
 0x21f   : > { %v1057_v40 = vpop.f32.mrb[4].mxu0 }
 0x220   : > { %v1058_v41 = vpop.f32.mrb[5].mxu0  ;;  %v1076_v42 = vpop.f32.mrb[0].mxu1 }
 0x221   : > { %v1059_v43 = vadd.f32 %v1058_v41, %v1057_v40  ;;  %v1060_v44 = vpop.f32.mrb[6].mxu0  ;;  %v725_v45 = vpop.f32.mrb[1].mxu1 }
 0x222   : > { %v726_v46 = vadd.f32 %v1053_v34, %v725_v45  ;;  %v1061_v47 = vpop.f32.mrb[7].mxu0  ;;  %v1077_v48 = vpop.f32.mrb[2].mxu1 }
 0x223   : > { %v734_v49 = vadd.f32 %v1076_v42, %v1059_v43  ;;  %v1062_v51 = vadd.f32 %v1061_v47, %v1060_v44  ;;  %v728_v52 = vpop.f32.mrb[3].mxu1 }
 0x224   : > { %v760_v54 = vmul.f32 %v743_v29, %v726_v46  ;;  %v729_v55 = vadd.f32 %v1056_v37, %v728_v52  ;;  %v832_v29 = vpop.permute.xlu0 %831 }
 0x225   : > { %v762_v56 = vmul.f32 %v753_v33, %v734_v49  ;;  %v737_v57 = vadd.f32 %v1077_v48, %v1062_v51 }
 0x226   : > { %v771_v58 = vadd.f32 %v1022_v50, %v760_v54  ;;  %v761_v59 = vmul.f32 %v748_v31, %v729_v55 }
 0x227   : > { %v773_v60 = vadd.f32 %v1022_v50, %v762_v56  ;;  %v763_v61 = vmul.f32 %v758_v38, %v737_v57 }
 0x228   : > { %v795_v63 = vadd.f32 %v778_v39, %v771_v58  ;;  %v772_v0 = vadd.f32 %v1022_v50, %v761_v59 }
 0x229   : > { %v797_v1 = vadd.f32 %v788_v62, %v773_v60  ;;  %v774_v2 = vadd.f32 %v1022_v50, %v763_v61 }
 0x22a   : > { %vm799_vm10 = vcmp.ge.f32.partialorder %v795_v63, 0.0  ;;  %v803_v4 = vmul.f32 0.2, %v795_v63  ;;  %v796_v5 = vadd.f32 %v783_v53, %v772_v0 }
 0x22b   : > { %vm801_vm11 = vcmp.ge.f32.partialorder %v797_v1, 0.0  ;;  %v805_v6 = vmul.f32 0.2, %v797_v1  ;;  %v798_v7 = vadd.f32 %v793_v3, %v774_v2 }
 0x22c   : > { %vm800_vm12 = vcmp.ge.f32.partialorder %v796_v5, 0.0  ;;  %v804_v8 = vmul.f32 0.2, %v796_v5  ;;  %v807_v9 = vsel %vm799_vm10, %v795_v63, %v803_v4 }
 0x22d   : > { %vm802_vm13 = vcmp.ge.f32.partialorder %v798_v7, 0.0  ;;  %v806_v10 = vmul.f32 0.2, %v798_v7  ;;  %v811_v11 = vmul.f32 1.4142135, %v807_v9  ;;  %v809_v12 = vsel %vm801_vm11, %v797_v1, %v805_v6 }
 0x22e   : > { %v808_v13 = vsel %vm800_vm12, %v796_v5, %v804_v8  ;;  %v813_v14 = vmul.f32 1.4142135, %v809_v12 }
 0x22f   : > { %v812_v15 = vmul.f32 1.4142135, %v808_v13  ;;  %v1023_v16 = vclamps-f32 %v811_v11, 256.0  ;;  %v810_v17 = vsel %vm802_vm13, %v798_v7, %v806_v10 }
 0x230   : > { %v814_v18 = vmul.f32 1.4142135, %v810_v17  ;;  %v1025_v19 = vclamps-f32 %v813_v14, 256.0 }
 0x231   : > { %v1024_v20 = vclamps-f32 %v812_v15, 256.0  ;;  %823 = vst [vmem:[%s420_s26] sm:$0xff] %v1023_v16 }
 0x232   : > { %v1026_v23 = vclamps-f32 %v814_v18, 256.0  ;;  %825 = vst [vmem:[%s420_s26 + $0x10] sm:$0xff] %v1025_v19 }
 0x233   : > { %824 = vst [vmem:[%s420_s26 + $0x8] sm:$0xff] %v1024_v20  ;;  %v827_v24 = vpack.c.bf16 %v1024_v20, %v1023_v16 }
 0x234   : > { %826 = vst [vmem:[%s420_s26 + $0x18] sm:$0xff] %v1026_v23  ;;  %v828_v25 = vpack.c.bf16 %v1026_v23, %v1025_v19 }
 0x235   : > { %1079 = vmatpush3.bf16.msra.mxu1 %v827_v24 }
 0x236   : > { %1080 = vmatprep.subr.bf16.mxu1 %v1132_v28 }
 0x239   : > { %1081 = vmatpush3.bf16.msra.mxu1 %v828_v25 }
 0x23c   : > { %1083 = vmatmul.mubr.msk.bf16.vlgmr.msra.gmra.mrb[4].mxu1 %vm635_vm0, %v491_v27 }
 0x30f   : > { %v871_v30 = vpop.f32.mrb[4].mxu1 }
 0x310   : > { %v872_v31 = vadd.f32 %v871_v30, %v832_v29  ;;  %v1084_v32 = vpop.f32.mrb[5].mxu1 }
 0x311   : > { %v874_v33 = vpop.f32.mrb[6].mxu1 }
 0x312   : > { %v1028_v34 = vclamps-f32 %v872_v31, 256.0  ;;  %v1085_v35 = vpop.f32.mrb[7].mxu1 }
 0x314   : > { %879 = vst [vmem:[%s424_s17] sm:$0xf] %v1028_v34 }
 0x315 PF: > { %s21_s13 = sadd.s32 1, %s1121_s13  }
 0x316   : > { %p18_p4 = scmp.ge.s32.totalorder %s21_s13, 4  }
 0x318   :  { %20 = sbr.rel (!%p18_p4) target bundleno = 1 (0x1), region = 107 }

// kernel: _lambda_.8
= control target key start
LH: loop header
LB: loop body
LE: loop exit
PB: predicated region body
PF: predicated region fallthrough
CT: control target
= control target key end

     0   :  { %s2468_s30 = smov 0   ;;  %s3840_s0 = inlined_call_operand.vmem [shape: f32[2,32,266], index: 0, kind: input, shape index: {}]   ;;  %s3841_s1 = inlined_call_operand.vmem [shape: bf16[32,128], index: 1, kind: input, shape index: {}]   ;;  %s3842_s2 = inlined_call_operand.vmem [shape: bf16[32,64], index: 2, kind: input, shape index: {}]   ;;  %s3843_s3 = inlined_call_operand.vmem [shape: bf16[32,64], index: 3, kind: input, shape index: {}]   ;;  %s3844_s4 = inlined_call_operand.vmem [shape: bf16[32,32], index: 4, kind: input, shape index: {}]   ;;  %s3845_s5 = inlined_call_operand.vmem [shape: f32[2,32,1], index: 5, kind: input, shape index: {}]   ;;  %s3846_s6 = inlined_call_operand.vmem [shape: f32[2,32,1], index: 6, kind: input, shape index: {}]   ;;  %s3847_s7 = inlined_call_operand.vmem [shape: f32[32,1], index: 7, kind: input, shape index: {}]   ;;  %s3848_s8 = inlined_call_operand.vmem [shape: f32[4,128], index: 8, kind: input, shape index: {}]   ;;  %s3849_s9 = inlined_call_operand.vmem [shape: f32[2,4,32,128], index: 9, kind: output, shape index: {}]  }
   0x1 LB: > { %s2294_s10 = sadd.s32 4294967295, %s2409_s30   ;;  %p2298_p0 = scmp.ge.s32.totalorder %s2409_s30, 1  ;;  %s2409_s30 = sphi %s2468_s30, %s19_s30  }
   0x2   : > { %p307_p1 = scmp.lt.s32.totalorder %s2409_s30, 3 }
   0x4   : > { %p308_p2 = pnand %p2298_p0, %p307_p1 }
   0x6   : > { %311 = sbr.rel (%p308_p2) target bundleno = 1246 (0x4de), region = 56 }
   0xd   : > { %p353_p3 = scmp.lt.s32.totalorder %s2294_s10, 1  ;;  %v2411_v0 = vmov 0   ;;  %s2412_s19 = smov 121   ;;  %vm471_vm0 = vcmask 990208   ;;  %vm450_vm1 = vcmask 1039360   ;;  %vm492_vm2 = vcmask 982016  }
   0xe   : > { %2393 = vset.pattern.permute.xlu0 %v2411_v0  ;;  %2394 = vset.pattern.permute.xlu1 %v2411_v0  ;;  %s2413_s20 = smov 127   ;;  %s2414_s21 = smov 120   ;;  %vm632_vm3 = vcmask 523264   ;;  %vm815_vm4 = vcmask 261120   ;;  %vm976_vm5 = vcmask 7168   ;;  %vm1414_vm6 = vcmask 56320  }
   0xf   : > { %s3961_s10 = smov (!%p353_p3, %s2294_s10), 1  ;;  %671 = vmatprep.mubr.bf16.mxu1 %v2411_v0  ;;  %549 = vmatprep.mubr.bf16.mxu0 %v2411_v0  ;;  %s2415_s29 = smov 8  }
  0x10   : > { %s2370_s11 = sshll.u32 %s3961_s10, 5  ;;  %s2377_s15 = smul.u32 96, %s3961_s10 }
  0x11   : > { %s362_s14 = scalar_lea.vmem %s3845_s5, %s2370_s11  ;;  %s367_s24 = scalar_lea.vmem %s3846_s6, %s2370_s11 }
  0x12   : > { %v386_v1 = vld [vmem:[%s362_s14] sm:$0xff]  ;;  %v388_v2 = vld [vmem:[%s362_s14 + $0x10] sm:$0xff]  ;;  %v387_v3 = vld [vmem:[%s362_s14 + $0x8] sm:$0xff]  ;;  %s357_s18 = scalar_lea.vmem %s3840_s0, %s2377_s15 }
  0x13   : > { %396 = vperm.xlu0 %2393, %v386_v1   ;;  %406 = vperm.xlu1 %2394, %v388_v2   ;;  %v389_v4 = vld [vmem:[%s362_s14 + $0x18] sm:$0xff]  ;;  %v374_v6 = vld [vmem:[%s357_s18] sm:$0xff]  ;;  %v375_v8 = vld [vmem:[%s357_s18 + $0x8] sm:$0xff] }
  0x14   : > { %v376_v9 = vld [vmem:[%s357_s18 + $0x10] sm:$0xff]  ;;  %v381_v10 = vld [vmem:[%s357_s18 + $0x38] sm:$0xff]  ;;  %v378_v12 = vld [vmem:[%s357_s18 + $0x20] sm:$0xff] }
  0x15   : > { %v377_v11 = vld [vmem:[%s357_s18 + $0x18] sm:$0xff]  ;;  %v379_v13 = vld [vmem:[%s357_s18 + $0x28] sm:$0xff]  ;;  %v380_v14 = vld [vmem:[%s357_s18 + $0x30] sm:$0xff] }
  0x16   : > { %v384_v15 = vld [vmem:[%s357_s18 + $0x50] sm:$0xff]  ;;  %v383_v21 = vld [vmem:[%s357_s18 + $0x48] sm:$0xff]  ;;  %v382_v32 = vld [vmem:[%s357_s18 + $0x40] sm:$0xff] }
  0x17   : > { %401 = vperm.xlu0 %2393, %v387_v3   ;;  %411 = vperm.xlu1 %2394, %v389_v4   ;;  %v385_v33 = vld [vmem:[%s357_s18 + $0x58] sm:$0xff]  ;;  %v390_v62 = vld [vmem:[%s367_s24] sm:$0xff]  ;;  %v391_v63 = vld [vmem:[%s367_s24 + $0x8] sm:$0xff]  ;;  %s2416_s18 = smov 1  }
  0x18   : > { %v392_v1 = vld [vmem:[%s367_s24 + $0x10] sm:$0xff]  ;;  %v393_v2 = vld [vmem:[%s367_s24 + $0x18] sm:$0xff]  ;;  %v2320_v3 = vld [vmem:[%s3848_s8] ss:$0 sm:$0xff] }
  0x19   : > { %v1317_v4 = vld [vmem:[%s3847_s7] sm:$0xff] }
  0x92   : > { %v397_v5 = vpop.permute.xlu0 %396  ;;  %v407_v7 = vpop.permute.xlu1 %406 }
  0x93   : > { %v414_v16 = vmul.f32 %v397_v5, %v374_v6  ;;  %v415_v17 = vmul.f32 %v397_v5, %v375_v8  ;;  %v421_v18 = vmul.f32 %v407_v7, %v381_v10  ;;  %v416_v22 = vmul.f32 %v397_v5, %v376_v9  ;;  %v1318_v5 = vld [vmem:[%s3847_s7 + $0x8] sm:$0xff]  ;;  %v1319_v6 = vld [vmem:[%s3847_s7 + $0x10] sm:$0xff] }
  0x94   : > { %v420_v26 = vmul.f32 %v407_v7, %v380_v14  ;;  %v422_v35 = vmul.f32 %v407_v7, %v382_v32  ;;  %v1320_v7 = vld [vmem:[%s3847_s7 + $0x18] sm:$0xff] }
  0x96   : > { %v402_v19 = vpop.permute.xlu0 %401  ;;  %v412_v20 = vpop.permute.xlu1 %411 }
  0x97   : > { %v417_v23 = vmul.f32 %v402_v19, %v377_v11  ;;  %v418_v24 = vmul.f32 %v402_v19, %v378_v12  ;;  %v419_v25 = vmul.f32 %v402_v19, %v379_v13  ;;  %v424_v27 = vmul.f32 %v412_v20, %v384_v15 }
  0x98   : > { %v423_v28 = vmul.f32 %v412_v20, %v383_v21  ;;  %v425_v36 = vmul.f32 %v412_v20, %v385_v33  ;;  %v2395_v21 = vld [vmem:[%s3842_s2] sm:$0xff]  }
  0x99   : > { %v428_v29 = vpack.c.bf16 %v419_v25, %v416_v22  ;;  %v427_v30 = vpack.c.bf16 %v418_v24, %v415_v17  ;;  %v426_v31 = vpack.c.bf16 %v417_v23, %v414_v16  ;;  %v2492_v34 = vpack.c.bf16 %v424_v27, %v421_v18 }
  0x9a   : > { %v2496_v37 = vpack.c.bf16 %v423_v28, %v420_v26  ;;  %v431_v38 = vpack.c.bf16 %v425_v36, %v422_v35  ;;  %v2396_v28 = vld [vmem:[%s3842_s2 + $0x8] sm:$0xff]  }
  0x9b   : > { %463 = vrot.lane.b32.xlu1 %v428_v29, %s2412_s19  ;;  %461 = vrot.lane.b32.xlu0 %v427_v30, %s2412_s19 }
  0x9c   : > { %517 = vmatprep.subr.bf16.mxu0 %v427_v30 }
  0x9d   : > { %518 = vmatpush1.bf16.msra.mxu0 %v426_v31 }
  0x9e   : > { %519 = vmatprep.subr.bf16.mxu0 %v2492_v34 }
  0x9f   : > { %467 = vrot.lane.b32.xlu1 %v2492_v34, %s2412_s19  ;;  %459 = vrot.lane.b32.xlu0 %v426_v31, %s2412_s19 }
  0xa1   : > { %520 = vmatpush1.bf16.msra.mxu0 %v2496_v37 }
  0xa3   : > { %465 = vrot.lane.b32.xlu1 %v2496_v37, %s2412_s19  ;;  %469 = vrot.lane.b32.xlu0 %v431_v38, %s2412_s19 }
  0xa7   : > { %442 = vrot.lane.b32.xlu1 %v428_v29, %s2413_s20  ;;  %440 = vrot.lane.b32.xlu0 %v427_v30, %s2413_s20 }
  0xab   : > { %446 = vrot.lane.b32.xlu1 %v2492_v34, %s2413_s20  ;;  %438 = vrot.lane.b32.xlu0 %v426_v31, %s2413_s20 }
  0xaf   : > { %444 = vrot.lane.b32.xlu1 %v2496_v37, %s2413_s20  ;;  %448 = vrot.lane.b32.xlu0 %v431_v38, %s2413_s20 }
  0xb3   : > { %484 = vrot.lane.b32.xlu1 %v428_v29, %s2414_s21  ;;  %482 = vrot.lane.b32.xlu0 %v427_v30, %s2414_s21 }
 0x10d   : > { %v464_v39 = vpop.permute.xlu1 %463  ;;  %v462_v40 = vpop.permute.xlu0 %461 }
 0x10e   : > { %616 = vrot.lane.b32.xlu1 %v464_v39, %s2413_s20  ;;  %v2519_v47 = vsel %vm471_vm0, %v462_v40, %v464_v39  ;;  %v2399_v39 = vld [vmem:[%s3841_s1 + $0x8] sm:$0xff]  }
 0x111   : > { %v468_v41 = vpop.permute.xlu1 %467  ;;  %v460_v42 = vpop.permute.xlu0 %459 }
 0x112   : > { %v2529_v52 = vsel %vm471_vm0, %v460_v42, %v462_v40  ;;  %v2400_v40 = vld [vmem:[%s3843_s3 + $0x8] sm:$0xff]   ;;  %v2402_v42 = vld [vmem:[%s3844_s4] sm:$0xff]  }
 0x115   : > { %v466_v43 = vpop.permute.xlu1 %465  ;;  %v470_v44 = vpop.permute.xlu0 %469 }
 0x116   : > { %622 = vrot.lane.b32.xlu0 %v470_v44, %s2413_s20  ;;  %v2526_v51 = vsel %vm471_vm0, %v468_v41, %v470_v44  ;;  %v2537_v56 = vsel %vm471_vm0, %v466_v43, %v468_v41  ;;  %v2401_v41 = vld [vmem:[%s3844_s4 + $0x8] sm:$0xff]  }
 0x119   : > { %v443_v45 = vpop.permute.xlu1 %442  ;;  %v441_v46 = vpop.permute.xlu0 %440 }
 0x11a   : > { %718 = vrot.lane.b32.xlu1 %v443_v45, %s2412_s19  ;;  %614 = vrot.lane.b32.xlu0 %v2519_v47, %s2413_s20  ;;  %v452_v48 = vsel %vm450_vm1, %v441_v46, %v443_v45 }
 0x11b   : > { %521 = vmatprep.subr.bf16.mxu0 %v452_v48  ;;  %639 = vmatprep.subr.bf16.mxu1 %v452_v48 }
 0x11d   : > { %v447_v49 = vpop.permute.xlu1 %446  ;;  %v439_v50 = vpop.permute.xlu0 %438 }
 0x11e   : > { %620 = vrot.lane.b32.xlu1 %v2526_v51, %s2413_s20  ;;  %612 = vrot.lane.b32.xlu0 %v2529_v52, %s2413_s20  ;;  %v451_v53 = vsel %vm450_vm1, %v439_v50, %v441_v46 }
 0x11f   : > { %522 = vmatpush1.bf16.msra.mxu0 %v451_v53  ;;  %640 = vmatpush1.bf16.msra.mxu1 %v451_v53 }
 0x121   : > { %v445_v54 = vpop.permute.xlu1 %444  ;;  %v449_v55 = vpop.permute.xlu0 %448 }
 0x122   : > { %618 = vrot.lane.b32.xlu1 %v2537_v56, %s2413_s20  ;;  %480 = vrot.lane.b32.xlu0 %v426_v31, %s2414_s21  ;;  %v454_v57 = vsel %vm450_vm1, %v447_v49, %v449_v55  ;;  %v453_v58 = vsel %vm450_vm1, %v445_v54, %v447_v49 }
 0x123   : > { %523 = vmatprep.subr.bf16.mxu0 %v454_v57  ;;  %641 = vmatprep.subr.bf16.mxu1 %v454_v57 }
 0x124   : > { %524 = vmatpush1.bf16.msra.mxu0 %v453_v58  ;;  %642 = vmatpush1.bf16.msra.mxu1 %v453_v58 }
 0x125   : > { %525 = vmatprep.subr.bf16.mxu0 %v2519_v47  ;;  %v485_v59 = vpop.permute.xlu1 %484  ;;  %v483_v60 = vpop.permute.xlu0 %482 }
 0x126   : > { %490 = vrot.lane.b32.xlu1 %v431_v38, %s2414_s21  ;;  %488 = vrot.lane.b32.xlu0 %v2492_v34, %s2414_s21  ;;  %v2554_v61 = vsel %vm492_vm2, %v483_v60, %v485_v59  ;;  %v2398_v38 = vld [vmem:[%s3843_s3] sm:$0xff]  }
 0x128   : > { %526 = vmatpush1.bf16.msra.mxu0 %v2529_v52 }
 0x129   : > { %527 = vmatprep.subr.bf16.mxu0 %v2526_v51 }
 0x12a   : > { %716 = vrot.lane.b32.xlu0 %v452_v48, %s2412_s19  ;;  %724 = vrot.lane.b32.xlu1 %v449_v55, %s2412_s19 }
 0x12c   : > { %528 = vmatpush1.bf16.msra.mxu0 %v2537_v56 }
 0x12d   : > { %529 = vmatprep.subr.bf16.mxu0 %v2554_v61 }
 0x12e   : > { %722 = vrot.lane.b32.xlu0 %v454_v57, %s2412_s19  ;;  %714 = vrot.lane.b32.xlu1 %v451_v53, %s2412_s19 }
 0x132   : > { %486 = vrot.lane.b32.xlu0 %v2496_v37, %s2414_s21  ;;  %720 = vrot.lane.b32.xlu1 %v453_v58, %s2412_s19  ;;  %v2397_v37 = vld [vmem:[%s3841_s1] sm:$0xff]  }
 0x136   : > { %572 = vperm.xlu0 %2393, %v390_v62   ;;  %577 = vperm.xlu1 %2394, %v391_v63  }
 0x13a   : > { %582 = vperm.xlu0 %2393, %v392_v1   ;;  %587 = vperm.xlu1 %2394, %v393_v2  }
 0x13e   : > { %1457 = vrot.lane.b32.xlu0 %v2320_v3, %s2415_s29  ;;  %1470 = vperm.xlu1 %2394, %v1317_v4  }
 0x142   : > { %1475 = vperm.xlu0 %2393, %v1318_v5   ;;  %1480 = vperm.xlu1 %2394, %v1319_v6  }
 0x146   : > { %1485 = vperm.xlu0 %2393, %v1320_v7  }
 0x180   : > { %v617_v8 = vpop.permute.xlu1 %616 }
 0x188   : > { %v623_v9 = vpop.permute.xlu0 %622 }
 0x18c   : > { %v719_v10 = vpop.permute.xlu1 %718  ;;  %v615_v11 = vpop.permute.xlu0 %614 }
 0x18d   : > { %v625_v12 = vsel %vm450_vm1, %v615_v11, %v617_v8 }
 0x18e   : > { %643 = vmatprep.subr.bf16.mxu1 %v625_v12 }
 0x190   : > { %v621_v13 = vpop.permute.xlu1 %620  ;;  %v613_v14 = vpop.permute.xlu0 %612 }
 0x191   : > { %v624_v15 = vsel %vm450_vm1, %v613_v14, %v615_v11  ;;  %v627_v16 = vsel %vm450_vm1, %v621_v13, %v623_v9 }
 0x192   : > { %644 = vmatpush1.bf16.msra.mxu1 %v624_v15 }
 0x193   : > { %645 = vmatprep.subr.bf16.mxu1 %v627_v16 }
 0x194   : > { %v619_v17 = vpop.permute.xlu1 %618  ;;  %v481_v18 = vpop.permute.xlu0 %480 }
 0x195   : > { %v493_v19 = vsel %vm492_vm2, %v481_v18, %v483_v60  ;;  %v626_v20 = vsel %vm450_vm1, %v619_v17, %v621_v13 }
 0x196   : > { %530 = vmatpush1.bf16.msra.mxu0 %v493_v19  ;;  %646 = vmatpush1.bf16.msra.mxu1 %v626_v20 }
 0x197   : > { %740 = vmatprep.subr.bf16.mxu1 %v2519_v47 }
 0x198   : > { %v491_v22 = vpop.permute.xlu1 %490  ;;  %v489_v23 = vpop.permute.xlu0 %488 }
 0x199   : > { %2310 = vmatmul.mubr.msk.bf16.vlgmr.msra.gmra.mrb[0].mxu1 %vm632_vm3, %v2395_v21  ;;  %v496_v24 = vsel %vm492_vm2, %v489_v23, %v491_v22 }
 0x19a   : > { %531 = vmatprep.subr.bf16.mxu0 %v496_v24  ;;  %741 = vmatpush1.bf16.msra.mxu1 %v2529_v52 }
 0x19b   : > { %742 = vmatprep.subr.bf16.mxu1 %v2526_v51  ;;  %681 = vmatprep.mubr.bf16.mxu1 %v2411_v0 }
 0x19c   : > { %v725_v25 = vpop.permute.xlu1 %724  ;;  %v717_v26 = vpop.permute.xlu0 %716 }
 0x19d   : > { %v727_v27 = vsel %vm471_vm0, %v717_v26, %v719_v10 }
 0x19e   : > { %743 = vmatpush1.bf16.msra.mxu1 %v2537_v56 }
 0x19f   : > { %744 = vmatprep.subr.bf16.mxu1 %v727_v27 }
 0x1a0   : > { %v715_v29 = vpop.permute.xlu1 %714  ;;  %v723_v30 = vpop.permute.xlu0 %722 }
 0x1a1   : > { %v726_v31 = vsel %vm471_vm0, %v715_v29, %v717_v26  ;;  %2311 = vmatmul.mubr.msk.bf16.gmra.mrb[4].mxu1 %vm632_vm3, %v2396_v28  ;;  %v729_v32 = vsel %vm471_vm0, %v723_v30, %v725_v25 }
 0x1a2   : > { %745 = vmatpush1.bf16.msra.mxu1 %v726_v31  ;;  %772 = vmatprep.mubr.bf16.mxu1 %v2411_v0 }
 0x1a3   : > { %746 = vmatprep.subr.bf16.mxu1 %v729_v32 }
 0x1a4   : > { %v721_v33 = vpop.permute.xlu1 %720  ;;  %v487_v34 = vpop.permute.xlu0 %486 }
 0x1a5   : > { %v728_v35 = vsel %vm471_vm0, %v721_v33, %v723_v30  ;;  %v495_v36 = vsel %vm492_vm2, %v487_v34, %v489_v23 }
 0x1a6   : > { %532 = vmatpush1.bf16.msra.mxu0 %v495_v36  ;;  %747 = vmatpush1.bf16.msra.mxu1 %v728_v35 }
 0x1a7   : > { %822 = vmatprep.subr.bf16.mxu0 %v2554_v61  ;;  %2373 = vmatprep.subr.bf16.mxu1 %v2554_v61 }
 0x1a9   : > { %550 = vmatmul.mubr.bf16.vlgmr.msra.gmra.mrb[0].mxu0 %v2397_v37  ;;  %2314 = vmatmul.mubr.msk.bf16.vlgmr.msra.gmra.mrb[8].mxu1 %vm632_vm3, %v2398_v38 }
 0x1aa   : > { %823 = vmatpush1.bf16.msra.mxu0 %v493_v19  ;;  %2375 = vmatpush1.bf16.msra.mxu1 %v493_v19 }
 0x1ab   : > { %824 = vmatprep.subr.bf16.mxu0 %v496_v24  ;;  %2374 = vmatprep.subr.bf16.mxu1 %v496_v24 }
 0x1ac   : > { %559 = vmatprep.mubr.bf16.mxu0 %v2411_v0  ;;  %782 = vmatprep.mubr.bf16.mxu1 %v2411_v0 }
 0x1ae   : > { %825 = vmatpush1.bf16.msra.mxu0 %v495_v36  ;;  %2376 = vmatpush1.bf16.msra.mxu1 %v495_v36 }
 0x1b1   : > { %560 = vmatmul.mubr.bf16.gmra.mrb[4].mxu0 %v2399_v39  ;;  %2315 = vmatmul.mubr.msk.bf16.gmra.mrb[12].mxu1 %vm632_vm3, %v2400_v40 }
 0x1b2   : > { %854 = vmatprep.mubr.bf16.mxu0 %v2411_v0  ;;  %864 = vmatprep.mubr.bf16.mxu1 %v2411_v0 }
 0x1b5   : > { %v2650_v50 = vpop.permute.xlu0 %572  ;;  %v2668_v63 = vpop.permute.xlu1 %577 }
 0x1b9   : > { %2319 = vmatmul.mubr.msk.bf16.vlgmr.msra.gmra.mrb[16].mxu1 %vm815_vm4, %v2401_v41  ;;  %2318 = vmatmul.mubr.msk.bf16.vlgmr.msra.gmra.mrb[8].mxu0 %vm815_vm4, %v2402_v42  ;;  %v2696_v15 = vpop.permute.xlu0 %582  ;;  %v2724_v30 = vpop.permute.xlu1 %587 }
 0x26c   : > { %v2634_v43 = vpop.f32.mrb[0].mxu1 }
 0x26d   : > { %v2636_v44 = vpop.f32.mrb[1].mxu1 }
 0x26e   : > { %v2638_v45 = vpop.f32.mrb[2].mxu1 }
 0x26f   : > { %v2640_v46 = vpop.f32.mrb[3].mxu1 }
 0x274   : > { %v2642_v0 = vpop.f32.mrb[4].mxu1 }
 0x275   : > { %v2644_v47 = vpop.f32.mrb[5].mxu1 }
 0x276   : > { %v2646_v48 = vpop.f32.mrb[6].mxu1 }
 0x277   : > { %v2648_v49 = vpop.f32.mrb[7].mxu1 }
 0x27c   : > { %v551_v51 = vpop.f32.mrb[0].mxu0  ;;  %v2652_v52 = vpop.f32.mrb[8].mxu1 }
 0x27d   : > { %v590_v53 = vmul.f32 %v2650_v50, %v551_v51  ;;  %v553_v54 = vpop.f32.mrb[1].mxu0  ;;  %v2655_v55 = vpop.f32.mrb[9].mxu1 }
 0x27e   : > { %v591_v56 = vmul.f32 %v2650_v50, %v553_v54  ;;  %v555_v57 = vpop.f32.mrb[2].mxu0  ;;  %v2658_v58 = vpop.f32.mrb[10].mxu1 }
 0x27f   : > { %v2660_v59 = vmul.f32 0.25, %v590_v53  ;;  %v557_v60 = vpop.f32.mrb[3].mxu0  ;;  %v2662_v61 = vpop.f32.mrb[11].mxu1  ;;  %v2672_v1 = vmul.f32 0.75, %v590_v53  ;;  %v592_v2 = vmul.f32 %v2668_v63, %v555_v57  ;;  %v2778_v57 = vmul.f32 %v2634_v43, %v2650_v50 }
 0x280   : > { %v2664_v62 = vmul.f32 0.25, %v591_v56  ;;  %v2675_v3 = vmul.f32 0.75, %v591_v56  ;;  %v593_v4 = vmul.f32 %v2668_v63, %v557_v60  ;;  %v2782_v60 = vmul.f32 %v2636_v44, %v2650_v50 }
 0x281   : > { %907 = vrot.lane.b32.xlu0 %v2660_v59, %s2413_s20  ;;  %v2688_v11 = vmul.f32 0.25, %v592_v2  ;;  %v2700_v16 = vmul.f32 0.75, %v592_v2  ;;  %v944_v2 = vmul.f32 0.25, %v2778_v57  ;;  %v2792_v43 = vmul.f32 %v2638_v45, %v2668_v63 }
 0x282   : > { %909 = vrot.lane.b32.xlu1 %v2664_v62, %s2413_s20  ;;  %v2692_v14 = vmul.f32 0.25, %v593_v4  ;;  %v2703_v18 = vmul.f32 0.75, %v593_v4  ;;  %v945_v4 = vmul.f32 0.25, %v2782_v60  ;;  %v2796_v44 = vmul.f32 %v2640_v46, %v2668_v63 }
 0x283   : > { %v2806_v45 = vmul.f32 %v2642_v0, %v2696_v15  ;;  %v2810_v46 = vmul.f32 %v2644_v47, %v2696_v15  ;;  %v2820_v0 = vmul.f32 %v2646_v48, %v2724_v30  ;;  %v2824_v47 = vmul.f32 %v2648_v49, %v2724_v30 }
 0x284   : > { %v561_v5 = vpop.f32.mrb[4].mxu0  ;;  %v2678_v6 = vpop.f32.mrb[12].mxu1  ;;  %v793_v48 = vmul.f32 %v2652_v52, %v2650_v50  ;;  %v795_v52 = vmul.f32 %v2658_v58, %v2668_v63 }
 0x285   : > { %v2680_v7 = vpop.f32.mrb[13].mxu1  ;;  %1021 = vrot.lane.b32.xlu0 %v2672_v1, %s2413_s20  ;;  %v563_v8 = vpop.f32.mrb[5].mxu0  ;;  %v594_v17 = vmul.f32 %v2696_v15, %v561_v5  ;;  %v946_v5 = vmul.f32 0.25, %v2792_v43 }
 0x286   : > { %v2684_v9 = vpop.f32.mrb[14].mxu1  ;;  %1023 = vrot.lane.b32.xlu1 %v2675_v3, %s2413_s20  ;;  %v565_v10 = vpop.f32.mrb[6].mxu0  ;;  %v595_v19 = vmul.f32 %v2696_v15, %v563_v8  ;;  %v947_v8 = vmul.f32 0.25, %v2796_v44  ;;  %v2838_v49 = vmul.f32 0.25, %v793_v48  ;;  %v2866_v58 = vmul.f32 0.75, %v795_v52 }
 0x287   : > { %v567_v12 = vpop.f32.mrb[7].mxu0  ;;  %v2690_v13 = vpop.f32.mrb[15].mxu1  ;;  %v2716_v26 = vmul.f32 0.25, %v594_v17  ;;  %v2728_v31 = vmul.f32 0.75, %v594_v17  ;;  %v596_v32 = vmul.f32 %v2724_v30, %v565_v10  ;;  %v948_v10 = vmul.f32 0.25, %v2806_v45 }
 0x288   : > { %v2720_v29 = vmul.f32 0.25, %v595_v19  ;;  %v2731_v33 = vmul.f32 0.75, %v595_v19  ;;  %v597_v34 = vmul.f32 %v2724_v30, %v567_v12  ;;  %v949_v12 = vmul.f32 0.25, %v2810_v46  ;;  %3882 = vst [vmem:[#allocation6_spill] sm:$0xff] %v2866_v58 }
 0x289   : > { %911 = vrot.lane.b32.xlu0 %v2688_v11, %s2413_s20  ;;  %v2738_v35 = vmul.f32 0.25, %v596_v32  ;;  %v2746_v37 = vmul.f32 0.75, %v596_v32  ;;  %v950_v17 = vmul.f32 0.25, %v2820_v0  ;;  %v951_v19 = vmul.f32 0.25, %v2824_v47 }
 0x28a   : > { %913 = vrot.lane.b32.xlu1 %v2692_v14, %s2413_s20  ;;  %v2740_v36 = vmul.f32 0.25, %v597_v34  ;;  %v2751_v39 = vmul.f32 0.75, %v597_v34  ;;  %v798_v34 = vmul.f32 %v2680_v7, %v2696_v15  ;;  %v799_v7 = vmul.f32 %v2684_v9, %v2724_v30  ;;  %v2908_v9 = vpop.permute.xlu1 %1470 }
 0x28b   : > { %3892 = vst [vmem:[#allocation16_spill] sm:$0xff] %v2908_v9 }
 0x28c   : > { %v856_v20 = vpop.f32.mrb[8].mxu0  ;;  %v2706_v21 = vpop.f32.mrb[16].mxu1 }
 0x28d   : > { %v2708_v22 = vpop.f32.mrb[17].mxu1  ;;  %1025 = vrot.lane.b32.xlu0 %v2700_v16, %s2413_s20  ;;  %v858_v23 = vpop.f32.mrb[9].mxu0  ;;  %v2749_v38 = vmul.f32 %v856_v20, %v2650_v50  ;;  %v794_v20 = vmul.f32 %v2655_v55, %v2650_v50  ;;  %v796_v55 = vmul.f32 %v2662_v61, %v2668_v63  ;;  %v797_v61 = vmul.f32 %v2678_v6, %v2696_v15 }
 0x28e   : > { %v2712_v24 = vpop.f32.mrb[18].mxu1  ;;  %1027 = vrot.lane.b32.xlu1 %v2703_v18, %s2413_s20  ;;  %v860_v25 = vpop.f32.mrb[10].mxu0  ;;  %v2754_v40 = vmul.f32 %v858_v23, %v2650_v50 }
 0x28f   : > { %v862_v27 = vpop.f32.mrb[11].mxu0  ;;  %v2718_v28 = vpop.f32.mrb[19].mxu1  ;;  %v1161_v41 = vmul.f32 0.25, %v2749_v38  ;;  %v2765_v51 = vmul.f32 %v860_v25, %v2668_v63  ;;  %v2840_v23 = vmul.f32 0.25, %v794_v20  ;;  %v2846_v25 = vmul.f32 0.75, %v793_v48 }
 0x290   : > { %v1162_v42 = vmul.f32 0.25, %v2754_v40  ;;  %v2768_v53 = vmul.f32 %v862_v27, %v2668_v63  ;;  %v2850_v50 = vmul.f32 0.75, %v794_v20  ;;  %v2858_v27 = vmul.f32 0.25, %v795_v52  ;;  %v2886_v6 = vpop.permute.xlu0 %1457  ;;  %v2931_v20 = vpop.permute.xlu1 %1480 }
 0x291   : > { %915 = vrot.lane.b32.xlu0 %v2716_v26, %s2413_s20  ;;  %3878 = vst [vmem:[#allocation2_spill] sm:$0xff] %v2765_v51  ;;  %v1163_v54 = vmul.f32 0.25, %v2765_v51  ;;  %v2860_v32 = vmul.f32 0.25, %v796_v55  ;;  %v2870_v63 = vmul.f32 0.75, %v796_v55  ;;  %3886 = vst [vmem:[#allocation10_spill] sm:$0xff] %v2886_v6  ;;  %v2942_v52 = vmul.f32 %v2718_v28, %v2724_v30 }
 0x292   : > { %917 = vrot.lane.b32.xlu1 %v2720_v29, %s2413_s20  ;;  %3879 = vst [vmem:[#allocation3_spill] sm:$0xff] %v2768_v53  ;;  %v1164_v56 = vmul.f32 0.25, %v2768_v53  ;;  %3880 = vst [vmem:[#allocation4_spill] sm:$0xff] %v2858_v27 }
 0x293   : > { %3881 = vst [vmem:[#allocation5_spill] sm:$0xff] %v2860_v32  ;;  %3883 = vst [vmem:[#allocation7_spill] sm:$0xff] %v2870_v63 }
 0x294   : > { %3898 = vst [vmem:[#allocation22_spill] sm:$0xff] %v2931_v20  ;;  %3900 = vst [vmem:[#allocation24_spill] sm:$0xff] %v2942_v52 }
 0x295   : > { %1029 = vrot.lane.b32.xlu0 %v2728_v31, %s2413_s20 }
 0x296   : > { %1031 = vrot.lane.b32.xlu1 %v2731_v33, %s2413_s20 }
 0x299   : > { %919 = vrot.lane.b32.xlu0 %v2738_v35, %s2413_s20 }
 0x29a   : > { %921 = vrot.lane.b32.xlu1 %v2740_v36, %s2413_s20 }
 0x29d   : > { %1033 = vrot.lane.b32.xlu0 %v2746_v37, %s2413_s20 }
 0x29e   : > { %1035 = vrot.lane.b32.xlu1 %v2751_v39, %s2413_s20 }
 0x2a1   : > { %1177 = vrot.lane.b32.xlu0 %v1161_v41, %s2416_s18 }
 0x2a2   : > { %1179 = vrot.lane.b32.xlu1 %v1162_v42, %s2416_s18 }
 0x2a5   : > { %1281 = vrot.lane.b32.xlu0 %v1161_v41, %s2413_s20  ;;  %v2878_v41 = vmul.f32 0.25, %v797_v61 }
 0x2a6   : > { %1283 = vrot.lane.b32.xlu1 %v1162_v42, %s2413_s20  ;;  %v2880_v42 = vmul.f32 0.25, %v798_v34 }
 0x2a7   : > { %3884 = vst [vmem:[#allocation8_spill] sm:$0xff] %v2878_v41 }
 0x2a8   : > { %3885 = vst [vmem:[#allocation9_spill] sm:$0xff] %v2880_v42 }
 0x2a9   : > { %1181 = vrot.lane.b32.xlu0 %v1163_v54, %s2416_s18 }
 0x2aa   : > { %1183 = vrot.lane.b32.xlu1 %v1164_v56, %s2416_s18 }
 0x2ad   : > { %1285 = vrot.lane.b32.xlu0 %v1163_v54, %s2413_s20  ;;  %v2888_v54 = vmul.f32 0.75, %v797_v61 }
 0x2ae   : > { %1287 = vrot.lane.b32.xlu1 %v1164_v56, %s2413_s20  ;;  %v2892_v56 = vmul.f32 0.75, %v798_v34 }
 0x2af   : > { %3887 = vst [vmem:[#allocation11_spill] sm:$0xff] %v2888_v54 }
 0x2b0   : > { %3888 = vst [vmem:[#allocation12_spill] sm:$0xff] %v2892_v56 }
 0x2b1   : > { %960 = vrot.lane.b32.xlu0 %v944_v2, %s2416_s18 }
 0x2b2   : > { %962 = vrot.lane.b32.xlu1 %v945_v4, %s2416_s18 }
 0x2b5   : > { %1065 = vrot.lane.b32.xlu0 %v944_v2, %s2413_s20  ;;  %v800_v2 = vmul.f32 %v2690_v13, %v2724_v30  ;;  %v2912_v13 = vmul.f32 0.75, %v799_v7 }
 0x2b6   : > { %1067 = vrot.lane.b32.xlu1 %v945_v4, %s2413_s20  ;;  %v2900_v4 = vmul.f32 0.25, %v799_v7  ;;  %v1168_v7 = vmul.f32 0.25, %v2942_v52 }
 0x2b7   : > { %3893 = vst [vmem:[#allocation17_spill] sm:$0xff] %v2912_v13 }
 0x2b8   : > { %3889 = vst [vmem:[#allocation13_spill] sm:$0xff] %v2900_v4 }
 0x2b9   : > { %964 = vrot.lane.b32.xlu0 %v946_v5, %s2416_s18 }
 0x2ba   : > { %966 = vrot.lane.b32.xlu1 %v947_v8, %s2416_s18 }
 0x2bd   : > { %1069 = vrot.lane.b32.xlu0 %v946_v5, %s2413_s20  ;;  %v2902_v5 = vmul.f32 0.25, %v800_v2 }
 0x2be   : > { %1071 = vrot.lane.b32.xlu1 %v947_v8, %s2413_s20  ;;  %v2904_v8 = vpop.permute.xlu0 %1475 }
 0x2bf   : > { %3890 = vst [vmem:[#allocation14_spill] sm:$0xff] %v2902_v5  ;;  %3891 = vst [vmem:[#allocation15_spill] sm:$0xff] %v2904_v8 }
 0x2c1   : > { %968 = vrot.lane.b32.xlu0 %v948_v10, %s2416_s18 }
 0x2c2   : > { %970 = vrot.lane.b32.xlu1 %v949_v12, %s2416_s18 }
 0x2c5   : > { %1073 = vrot.lane.b32.xlu0 %v948_v10, %s2413_s20  ;;  %v2916_v10 = vmul.f32 %v2706_v21, %v2696_v15 }
 0x2c6   : > { %1075 = vrot.lane.b32.xlu1 %v949_v12, %s2413_s20  ;;  %v2918_v12 = vmul.f32 0.75, %v800_v2 }
 0x2c7   : > { %3894 = vst [vmem:[#allocation18_spill] sm:$0xff] %v2916_v10  ;;  %v1165_v48 = vmul.f32 0.25, %v2916_v10 }
 0x2c8   : > { %3895 = vst [vmem:[#allocation19_spill] sm:$0xff] %v2918_v12 }
 0x2c9   : > { %972 = vrot.lane.b32.xlu0 %v950_v17, %s2416_s18 }
 0x2ca   : > { %974 = vrot.lane.b32.xlu1 %v951_v19, %s2416_s18 }
 0x2cd   : > { %1077 = vrot.lane.b32.xlu0 %v950_v17, %s2413_s20  ;;  %v2922_v17 = vmul.f32 %v2708_v22, %v2696_v15  ;;  %v2938_v15 = vmul.f32 %v2712_v24, %v2724_v30 }
 0x2ce   : > { %1079 = vrot.lane.b32.xlu1 %v951_v19, %s2413_s20  ;;  %v2928_v19 = vpop.permute.xlu0 %1485 }
 0x2cf   : > { %3896 = vst [vmem:[#allocation20_spill] sm:$0xff] %v2922_v17  ;;  %3897 = vst [vmem:[#allocation21_spill] sm:$0xff] %v2928_v19  ;;  %v1166_v21 = vmul.f32 0.25, %v2922_v17  ;;  %v1167_v61 = vmul.f32 0.25, %v2938_v15 }
 0x2d0   : > { %3899 = vst [vmem:[#allocation23_spill] sm:$0xff] %v2938_v15 }
 0x2d1   : > { %1125 = vrot.lane.b32.xlu0 %v2838_v49, %s2413_s20 }
 0x2d2   : > { %1127 = vrot.lane.b32.xlu1 %v2840_v23, %s2413_s20 }
 0x2d5   : > { %1237 = vrot.lane.b32.xlu0 %v2846_v25, %s2413_s20 }
 0x2d6   : > { %1239 = vrot.lane.b32.xlu1 %v2850_v50, %s2413_s20 }
 0x2d9   : > { %1129 = vrot.lane.b32.xlu0 %v2858_v27, %s2413_s20  ;;  %v998_v27 = vmul.f32 0.75, %v2782_v60 }
 0x2da   : > { %1131 = vrot.lane.b32.xlu1 %v2860_v32, %s2413_s20 }
 0x2dd   : > { %1241 = vrot.lane.b32.xlu0 %v2866_v58, %s2413_s20 }
 0x2de   : > { %1243 = vrot.lane.b32.xlu1 %v2870_v63, %s2413_s20 }
 0x2e1   : > { %1133 = vrot.lane.b32.xlu0 %v2878_v41, %s2413_s20 }
 0x2e2   : > { %1135 = vrot.lane.b32.xlu1 %v2880_v42, %s2413_s20 }
 0x2e5   : > { %1245 = vrot.lane.b32.xlu0 %v2888_v54, %s2413_s20 }
 0x2e6   : > { %1247 = vrot.lane.b32.xlu1 %v2892_v56, %s2413_s20 }
 0x2e9   : > { %1137 = vrot.lane.b32.xlu0 %v2900_v4, %s2413_s20 }
 0x2ea   : > { %1139 = vrot.lane.b32.xlu1 %v2902_v5, %s2413_s20 }
 0x2ed   : > { %1249 = vrot.lane.b32.xlu0 %v2912_v13, %s2413_s20 }
 0x2ee   : > { %1251 = vrot.lane.b32.xlu1 %v2918_v12, %s2413_s20 }
 0x2f1   : > { %1185 = vrot.lane.b32.xlu0 %v1165_v48, %s2416_s18 }
 0x2f2   : > { %1187 = vrot.lane.b32.xlu1 %v1166_v21, %s2416_s18 }
 0x2f3   : > { %v908_v22 = vpop.permute.xlu0 %907 }
 0x2f4   : > { %v910_v55 = vpop.permute.xlu1 %909 }
 0x2f5   : > { %1289 = vrot.lane.b32.xlu0 %v1165_v48, %s2413_s20  ;;  %v924_v17 = vsel %vm450_vm1, %v908_v22, %v910_v55 }
 0x2f6   : > { %1291 = vrot.lane.b32.xlu1 %v1166_v21, %s2413_s20 }
 0x2f7   : > { %v1022_v34 = vpop.permute.xlu0 %1021 }
 0x2f8   : > { %v1024_v2 = vpop.permute.xlu1 %1023 }
 0x2f9   : > { %1189 = vrot.lane.b32.xlu0 %v1167_v61, %s2416_s18  ;;  %v1037_v10 = vsel %vm450_vm1, %v1022_v34, %v1024_v2  ;;  %v1050_v41 = vadd.f32 %v1024_v2, %v2664_v62 }
 0x2fa   : > { %1191 = vrot.lane.b32.xlu1 %v1168_v7, %s2416_s18  ;;  %v1049_v58 = vadd.f32 %v1037_v10, %v2660_v59 }
 0x2fb   : > { %v912_v24 = vpop.permute.xlu0 %911 }
 0x2fc   : > { %v2950_v19 = vpop.permute.xlu1 %913 }
 0x2fd   : > { %1293 = vrot.lane.b32.xlu0 %v1167_v61, %s2413_s20 }
 0x2fe   : > { %1295 = vrot.lane.b32.xlu1 %v1168_v7, %s2413_s20  ;;  %s2417_s20 = smov 7  }
 0x2ff   : > { %v1026_v28 = vpop.permute.xlu0 %1025 }
 0x300   : > { %v1028_v30 = vpop.permute.xlu1 %1027 }
 0x303   : > { %v2954_v48 = vpop.permute.xlu0 %915 }
 0x304   : > { %v2956_v21 = vpop.permute.xlu1 %917 }
 0x307   : > { %v2958_v20 = vpop.permute.xlu0 %1029 }
 0x308   : > { %v2960_v8 = vpop.permute.xlu1 %1031 }
 0x30b   : > { %v2962_v9 = vpop.permute.xlu0 %919 }
 0x30c   : > { %v2964_v6 = vpop.permute.xlu1 %921 }
 0x30f   : > { %v2966_v12 = vpop.permute.xlu0 %1033 }
 0x310   : > { %v2968_v13 = vpop.permute.xlu1 %1035 }
 0x313   : > { %v2970_v61 = vpop.permute.xlu0 %1177 }
 0x314   : > { %v2972_v7 = vpop.permute.xlu1 %1179 }
 0x317   : > { %v2974_v15 = vpop.permute.xlu0 %1281 }
 0x318   : > { %3901 = vst [vmem:[#allocation25_spill] sm:$0xff] %v2974_v15  ;;  %v2976_v4 = vpop.permute.xlu1 %1283 }
 0x31b   : > { %v2978_v52 = vpop.permute.xlu0 %1181 }
 0x31c   : > { %3902 = vst [vmem:[#allocation26_spill] sm:$0xff] %v2978_v52  ;;  %v2980_v56 = vpop.permute.xlu1 %1183  ;;  %v997_v52 = vmul.f32 0.75, %v2778_v57  ;;  %v1052_v57 = vadd.f32 %v1028_v30, %v2692_v14 }
 0x31d   : > { %3903 = vst [vmem:[#allocation27_spill] sm:$0xff] %v2980_v56  ;;  %v936_v56 = vadd.f32 %v924_v17, %v2672_v1  ;;  %v999_v17 = vmul.f32 0.75, %v2792_v43 }
 0x31f   : > { %v2982_v5 = vpop.permute.xlu0 %1285 }
 0x320   : > { %3904 = vst [vmem:[#allocation28_spill] sm:$0xff] %v2982_v5  ;;  %v2984_v54 = vpop.permute.xlu1 %1287  ;;  %v1058_v5 = vadd.f32 %v1050_v41, %v998_v27 }
 0x321   : > { %3905 = vst [vmem:[#allocation29_spill] sm:$0xff] %v2984_v54  ;;  %v1057_v54 = vadd.f32 %v1049_v58, %v997_v52  ;;  %v937_v58 = vadd.f32 %v910_v55, %v2675_v3  ;;  %v925_v3 = vsel %vm450_vm1, %v912_v24, %v2950_v19 }
 0x323   : > { %v961_v42 = vpop.permute.xlu0 %960 }
 0x324   : > { %v963_v51 = vpop.permute.xlu1 %962  ;;  %v989_v63 = vadd.f32 %v961_v42, %v936_v56 }
 0x325   : > { %v977_v1 = vsel %vm976_vm5, %v961_v42, %v963_v51 }
 0x326   : > { %v1005_v59 = vadd.f32 %v997_v52, %v989_v63 }
 0x327   : > { %v1066_v53 = vpop.permute.xlu0 %1065 }
 0x328   : > { %v1068_v32 = vpop.permute.xlu1 %1067  ;;  %v3009_v14 = vmul.f32 0.75, %v1005_v59 }
 0x329   : > { %v1081_v34 = vsel %vm450_vm1, %v1066_v53, %v1068_v32  ;;  %v1094_v22 = vadd.f32 %v1068_v32, %v1058_v5  ;;  %v1000_v53 = vmul.f32 0.75, %v2796_v44  ;;  %v1038_v32 = vsel %vm450_vm1, %v1026_v28, %v1028_v30 }
 0x32a   : > { %v1093_v15 = vadd.f32 %v1081_v34, %v1057_v54  ;;  %v990_v54 = vadd.f32 %v977_v1, %v937_v58  ;;  %v1051_v42 = vadd.f32 %v1038_v32, %v2688_v11  ;;  %v3018_v5 = vmul.f32 0.25, %v1005_v59 }
 0x32b   : > { %v2994_v62 = vmul.f32 0.25, %v1094_v22  ;;  %v965_v2 = vpop.permute.xlu0 %964  ;;  %v3007_v63 = vmul.f32 0.75, %v1094_v22  ;;  %v1060_v51 = vadd.f32 %v1052_v57, %v1000_v53  ;;  %v938_v34 = vadd.f32 %v925_v3, %v2700_v16 }
 0x32c   : > { %v2996_v10 = vmul.f32 0.25, %v1093_v15  ;;  %v967_v60 = vpop.permute.xlu1 %966  ;;  %v1006_v52 = vadd.f32 %v998_v27, %v990_v54  ;;  %v3021_v55 = vmul.f32 0.75, %v1093_v15  ;;  %v1059_v11 = vadd.f32 %v1051_v42, %v999_v17 }
 0x32d   : > { %1607 = vrot.lane.b32.xlu0 %v2994_v62, %s2412_s19  ;;  %v991_v24 = vadd.f32 %v965_v2, %v938_v34  ;;  %v978_v58 = vsel %vm976_vm5, %v965_v2, %v967_v60  ;;  %v1039_v54 = vsel %vm450_vm1, %v2958_v20, %v2960_v8  ;;  %v1002_v20 = vmul.f32 0.75, %v2810_v46 }
 0x32e   : > { %1605 = vrot.lane.b32.xlu1 %v2996_v10, %s2412_s19  ;;  %v3031_v43 = vmul.f32 0.25, %v1006_v52  ;;  %v926_v42 = vsel %vm450_vm1, %v2954_v48, %v2956_v21  ;;  %v1001_v34 = vmul.f32 0.75, %v2806_v45 }
 0x32f   : > { %v1070_v41 = vpop.permute.xlu0 %1069  ;;  %v1007_v57 = vadd.f32 %v999_v17, %v991_v24 }
 0x330   : > { %v1072_v56 = vpop.permute.xlu1 %1071 }
 0x331   : > { %2027 = vrot.lane.b32.xlu0 %v3007_v63, %s2412_s19  ;;  %v1096_v44 = vadd.f32 %v1072_v56, %v1060_v51  ;;  %v1082_v22 = vsel %vm450_vm1, %v1070_v41, %v1072_v56  ;;  %v939_v41 = vadd.f32 %v2950_v19, %v2703_v18  ;;  %v3051_v51 = vmul.f32 0.25, %v1007_v57 }
 0x332   : > { %1827 = vrot.lane.b32.xlu1 %v3009_v14, %s2412_s19  ;;  %v1095_v27 = vadd.f32 %v1082_v22, %v1059_v11  ;;  %v3057_v60 = vmul.f32 0.75, %v1007_v57  ;;  %v1054_v18 = vadd.f32 %v2960_v8, %v2720_v29  ;;  %v1053_v19 = vadd.f32 %v1039_v54, %v2716_v26 }
 0x333   : > { %v969_v28 = vpop.permute.xlu0 %968  ;;  %v3029_v59 = vmul.f32 0.25, %v1096_v44  ;;  %v3037_v1 = vmul.f32 0.75, %v1096_v44  ;;  %v992_v56 = vadd.f32 %v978_v58, %v939_v41  ;;  %v3070_v44 = vmul.f32 0.75, %v1006_v52 }
 0x334   : > { %v971_v30 = vpop.permute.xlu1 %970  ;;  %v3040_v32 = vmul.f32 0.25, %v1095_v27  ;;  %v3073_v29 = vmul.f32 0.75, %v1095_v27  ;;  %v1062_v8 = vadd.f32 %v1054_v18, %v1002_v20  ;;  %v940_v26 = vadd.f32 %v926_v42, %v2728_v31 }
 0x335   : > { %1345 = vrot.lane.b32.xlu0 %v3018_v5, %s2412_s19  ;;  %v1008_v17 = vadd.f32 %v1000_v53, %v992_v56  ;;  %v1061_v46 = vadd.f32 %v1053_v19, %v1001_v34  ;;  %v979_v54 = vsel %vm976_vm5, %v969_v28, %v971_v30  ;;  %v941_v56 = vadd.f32 %v2956_v21, %v2731_v33 }
 0x336   : > { %2025 = vrot.lane.b32.xlu1 %v3021_v55, %s2412_s19  ;;  %v993_v52 = vadd.f32 %v969_v28, %v940_v26  ;;  %v1004_v18 = vmul.f32 0.75, %v2824_v47  ;;  %v1040_v19 = vsel %vm450_vm1, %v2966_v12, %v2968_v13  ;;  %v927_v33 = vsel %vm450_vm1, %v2962_v9, %v2964_v6 }
 0x337   : > { %v1074_v15 = vpop.permute.xlu0 %1073  ;;  %v3081_v48 = vmul.f32 0.75, %v1008_v17  ;;  %v3083_v45 = vmul.f32 0.25, %v1008_v17  ;;  %v1055_v21 = vadd.f32 %v1040_v19, %v2738_v35  ;;  %v942_v26 = vadd.f32 %v927_v33, %v2746_v37 }
 0x338   : > { %v1076_v16 = vpop.permute.xlu1 %1075 }
 0x339   : > { %1611 = vrot.lane.b32.xlu0 %v3029_v59, %s2412_s19  ;;  %v1083_v22 = vsel %vm450_vm1, %v1074_v15, %v1076_v16  ;;  %v1098_v53 = vadd.f32 %v1076_v16, %v1062_v8  ;;  %v1009_v15 = vadd.f32 %v1001_v34, %v993_v52  ;;  %v1056_v16 = vadd.f32 %v2968_v13, %v2740_v36 }
 0x33a   : > { %1347 = vrot.lane.b32.xlu1 %v3031_v43, %s2412_s19  ;;  %v1097_v27 = vadd.f32 %v1083_v22, %v1061_v46  ;;  %v994_v36 = vadd.f32 %v979_v54, %v941_v56  ;;  %v1003_v34 = vmul.f32 0.75, %v2820_v0 }
 0x33b   : > { %v3053_v3 = vpop.permute.xlu0 %972  ;;  %v3089_v31 = vmul.f32 0.25, %v1098_v53  ;;  %v3110_v42 = vmul.f32 0.75, %v1098_v53  ;;  %v3112_v17 = vmul.f32 0.75, %v1009_v15  ;;  %v1064_v28 = vadd.f32 %v1056_v16, %v1004_v18 }
 0x33c   : > { %v3055_v2 = vpop.permute.xlu1 %974  ;;  %v3091_v57 = vmul.f32 0.25, %v1097_v27  ;;  %v3122_v12 = vmul.f32 0.25, %v1009_v15  ;;  %v1010_v8 = vadd.f32 %v1002_v20, %v994_v36  ;;  %v3125_v22 = vmul.f32 0.75, %v1097_v27 }
 0x33d   : > { %2031 = vrot.lane.b32.xlu0 %v3037_v1, %s2412_s19  ;;  %v1063_v35 = vadd.f32 %v1055_v21, %v1003_v34  ;;  %v995_v9 = vadd.f32 %v3053_v3, %v942_v26  ;;  %v943_v16 = vadd.f32 %v2964_v6, %v2751_v39  ;;  %v1214_v39 = vmul.f32 0.75, %v2754_v40 }
 0x33e   : > { %1609 = vrot.lane.b32.xlu1 %v3040_v32, %s2412_s19  ;;  %v3136_v52 = vmul.f32 0.25, %v1010_v8  ;;  %v3175_v33 = vmul.f32 0.75, %v1010_v8 }
 0x33f   : > { %v1078_v11 = vpop.permute.xlu0 %1077  ;;  %v1011_v37 = vadd.f32 %v1003_v34, %v995_v9  ;;  %v3909_v9 = vld [vmem:[#allocation25_spill] sm:$0xff] }
 0x340   : > { %v1080_v24 = vpop.permute.xlu1 %1079 }
 0x341   : > { %1349 = vrot.lane.b32.xlu0 %v3051_v51, %s2412_s19  ;;  %v1100_v13 = vadd.f32 %v1080_v24, %v1064_v28  ;;  %v1084_v46 = vsel %vm450_vm1, %v1078_v11, %v1080_v24  ;;  %v980_v24 = vsel %vm976_vm5, %v3053_v3, %v3055_v2  ;;  %v3160_v28 = vmul.f32 0.25, %v1011_v37 }
 0x342   : > { %1831 = vrot.lane.b32.xlu1 %v3057_v60, %s2412_s19  ;;  %v1099_v0 = vadd.f32 %v1084_v46, %v1063_v35  ;;  %v996_v19 = vadd.f32 %v980_v24, %v943_v16  ;;  %v3164_v2 = vmul.f32 0.75, %v1011_v37 }
 0x343   : > { %v3093_v58 = vpop.permute.xlu0 %1125  ;;  %v3134_v53 = vmul.f32 0.25, %v1100_v13  ;;  %v3146_v11 = vmul.f32 0.75, %v1100_v13 }
 0x344   : > { %v3095_v41 = vpop.permute.xlu1 %1127  ;;  %v3151_v15 = vmul.f32 0.25, %v1099_v0  ;;  %3907 = vst [vmem:[#allocation31_spill] sm:$0xff] %v3164_v2  ;;  %v1012_v21 = vadd.f32 %v1004_v18, %v996_v19  ;;  %v3177_v13 = vmul.f32 0.75, %v1099_v0  ;;  %v1297_v0 = vsel %vm450_vm1, %v3909_v9, %v2976_v4  ;;  %v3910_v19 = vld [vmem:[#allocation5_spill] sm:$0xff]  ;;  %v3915_v9 = vld [vmem:[#allocation4_spill] sm:$0xff] }
 0x345   : > { %1829 = vrot.lane.b32.xlu0 %v3070_v44, %s2412_s19  ;;  %3906 = vst [vmem:[#allocation30_spill] sm:$0xff] %v3146_v11  ;;  %v1154_v3 = vadd.f32 %v3095_v41, %v2850_v50  ;;  %v1141_v26 = vsel %vm450_vm1, %v3093_v58, %v3095_v41 }
 0x346   : > { %2029 = vrot.lane.b32.xlu1 %v3073_v29, %s2412_s19  ;;  %v3192_v18 = vmul.f32 0.75, %v1012_v21  ;;  %v3197_v8 = vmul.f32 0.25, %v1012_v21  ;;  %v1153_v46 = vadd.f32 %v1141_v26, %v2846_v25  ;;  %v3912_v21 = vld [vmem:[#allocation3_spill] sm:$0xff]  ;;  %v3914_v26 = vld [vmem:[#allocation26_spill] sm:$0xff] }
 0x347   : > { %v1238_v47 = vpop.permute.xlu0 %1237 }
 0x348   : > { %v1240_v30 = vpop.permute.xlu1 %1239  ;;  %3908 = vst [vmem:[#allocation32_spill] sm:$0xff] %v3192_v18  ;;  %v1205_v24 = vadd.f32 %v2970_v61, %v1153_v46 }
 0x349   : > { %1833 = vrot.lane.b32.xlu0 %v3081_v48, %s2412_s19  ;;  %v1266_v36 = vadd.f32 %v1240_v30, %v2840_v23  ;;  %v1253_v6 = vsel %vm450_vm1, %v1238_v47, %v1240_v30  ;;  %v1193_v23 = vsel %vm976_vm5, %v2970_v61, %v2972_v7  ;;  %v1213_v7 = vmul.f32 0.75, %v2749_v38 }
 0x34a   : > { %1351 = vrot.lane.b32.xlu1 %v3083_v45, %s2412_s19  ;;  %v1206_v34 = vadd.f32 %v1193_v23, %v1154_v3  ;;  %v1265_v40 = vadd.f32 %v1253_v6, %v2838_v49 }
 0x34b   : > { %v3138_v20 = vpop.permute.xlu0 %1129  ;;  %v1274_v50 = vadd.f32 %v1266_v36, %v1214_v39  ;;  %v3217_v3 = vadd.f32 %v1213_v7, %v1205_v24 }
 0x34c   : > { %v3140_v27 = vpop.permute.xlu1 %1131  ;;  %v3200_v35 = vadd.f32 %v1214_v39, %v1206_v34  ;;  %v1273_v58 = vadd.f32 %v1265_v40, %v1213_v7  ;;  %v3911_v39 = vld [vmem:[#allocation7_spill] sm:$0xff] }
 0x34d   : > { %1615 = vrot.lane.b32.xlu0 %v3089_v31, %s2412_s19  ;;  %v3195_v49 = vadd.f32 %v2976_v4, %v1274_v50  ;;  %v1156_v4 = vadd.f32 %v3140_v27, %v3911_v39  ;;  %v1216_v50 = vmul.f32 0.75, %v3912_v21  ;;  %v3913_v40 = vld [vmem:[#allocation27_spill] sm:$0xff]  ;;  %v1382_v24 = vmul.f32 0.25, %v3217_v3  ;;  %v3917_v21 = vld [vmem:[#allocation29_spill] sm:$0xff] }
 0x34e   : > { %1613 = vrot.lane.b32.xlu1 %v3091_v57, %s2412_s19  ;;  %v3211_v25 = vadd.f32 %v1297_v0, %v1273_v58  ;;  %v1383_v16 = vmul.f32 0.25, %v3200_v35  ;;  %v1194_v7 = vsel %vm976_vm5, %v3914_v26, %v3913_v40 }
 0x34f   : > { %v1242_v54 = vpop.permute.xlu0 %1241  ;;  %v1642_v37 = vmul.f32 0.25, %v3195_v49  ;;  %v1208_v58 = vadd.f32 %v1194_v7, %v1156_v4 }
 0x350   : > { %v1244_v56 = vpop.permute.xlu1 %1243  ;;  %v1641_v61 = vmul.f32 0.25, %v3211_v25 }
 0x351   : > { %2035 = vrot.lane.b32.xlu0 %v3110_v42, %s2412_s19  ;;  %v1268_v36 = vadd.f32 %v1244_v56, %v3910_v19  ;;  %v1254_v34 = vsel %vm450_vm1, %v1242_v54, %v1244_v56  ;;  %v1142_v19 = vsel %vm450_vm1, %v3138_v20, %v3140_v27  ;;  %v3916_v54 = vld [vmem:[#allocation2_spill] sm:$0xff]  ;;  %v3919_v20 = vld [vmem:[#allocation28_spill] sm:$0xff] }
 0x352   : > { %1835 = vrot.lane.b32.xlu1 %v3112_v17, %s2412_s19  ;;  %v1267_v0 = vadd.f32 %v1254_v34, %v3915_v9  ;;  %v1215_v56 = vmul.f32 0.75, %v3916_v54  ;;  %v3245_v34 = vadd.f32 %v1216_v50, %v1208_v58  ;;  %v1298_v27 = vsel %vm450_vm1, %v3919_v20, %v3917_v21 }
 0x353   : > { %v3180_v47 = vpop.permute.xlu0 %1133  ;;  %v1276_v46 = vadd.f32 %v1268_v36, %v1216_v50  ;;  %v3918_v36 = vld [vmem:[#allocation6_spill] sm:$0xff] }
 0x354   : > { %v3182_v30 = vpop.permute.xlu1 %1135  ;;  %v1155_v4 = vadd.f32 %v1142_v19, %v3918_v36  ;;  %v1275_v7 = vadd.f32 %v1267_v0, %v1215_v56  ;;  %v1385_v50 = vmul.f32 0.25, %v3245_v34 }
 0x355   : > { %1353 = vrot.lane.b32.xlu0 %v3122_v12, %s2412_s19  ;;  %v3242_v40 = vadd.f32 %v3917_v21, %v1276_v46 }
 0x356   : > { %2033 = vrot.lane.b32.xlu1 %v3125_v22, %s2412_s19  ;;  %v1207_v9 = vadd.f32 %v3914_v26, %v1155_v4  ;;  %v3254_v54 = vadd.f32 %v1298_v27, %v1275_v7  ;;  %v3921_v26 = vld [vmem:[#allocation8_spill] sm:$0xff] }
 0x357   : > { %v1246_v41 = vpop.permute.xlu0 %1245  ;;  %v3922_v7 = vld [vmem:[#allocation20_spill] sm:$0xff] }
 0x358   : > { %v1248_v38 = vpop.permute.xlu1 %1247  ;;  %v3260_v58 = vadd.f32 %v1215_v56, %v1207_v9  ;;  %v1643_v0 = vmul.f32 0.25, %v3254_v54  ;;  %v1218_v20 = vmul.f32 0.75, %v3922_v7  ;;  %v3923_v56 = vld [vmem:[#allocation18_spill] sm:$0xff] }
 0x359   : > { %1619 = vrot.lane.b32.xlu0 %v3134_v53, %s2412_s19  ;;  %v1217_v27 = vmul.f32 0.75, %v3923_v56 }
 0x35a   : > { %1355 = vrot.lane.b32.xlu1 %v3136_v52, %s2412_s19  ;;  %v1384_v9 = vmul.f32 0.25, %v3260_v58 }
 0x35b   : > { %v3221_v6 = vpop.permute.xlu0 %1137 }
 0x35c   : > { %v3223_v23 = vpop.permute.xlu1 %1139 }
 0x35d   : > { %2039 = vrot.lane.b32.xlu0 %v3146_v11, %s2412_s19 }
 0x35e   : > { %1617 = vrot.lane.b32.xlu1 %v3151_v15, %s2412_s19 }
 0x360   : > { %v1252_v39 = vpop.permute.xlu1 %1251 }
 0x361   : > { %1357 = vrot.lane.b32.xlu0 %v3160_v28, %s2412_s19 }
 0x362   : > { %1839 = vrot.lane.b32.xlu1 %v3164_v2, %s2412_s19 }
 0x365   : > { %1837 = vrot.lane.b32.xlu0 %v3175_v33, %s2412_s19 }
 0x366   : > { %2037 = vrot.lane.b32.xlu1 %v3177_v13, %s2412_s19 }
 0x369   : > { %1841 = vrot.lane.b32.xlu0 %v3192_v18, %s2412_s19  ;;  %v1188_v18 = vpop.permute.xlu1 %1187 }
 0x36a   : > { %1359 = vrot.lane.b32.xlu1 %v3197_v8, %s2412_s19 }
 0x36d   : > { %1659 = vrot.lane.b32.xlu0 %v1642_v37, %s2417_s20  ;;  %v1292_v4 = vpop.permute.xlu1 %1291 }
 0x36e   : > { %1400 = vrot.lane.b32.xlu1 %v1383_v16, %s2417_s20 }
 0x371   : > { %1873 = vrot.lane.b32.xlu0 %v1383_v16, %s2412_s19  ;;  %v1250_v16 = vpop.permute.xlu0 %1249 }
 0x372   : > { %1657 = vrot.lane.b32.xlu1 %v1641_v61, %s2417_s20 }
 0x375   : > { %2071 = vrot.lane.b32.xlu0 %v1642_v37, %s2412_s19  ;;  %v1644_v37 = vmul.f32 0.25, %v3242_v40  ;;  %v1186_v46 = vpop.permute.xlu0 %1185 }
 0x376   : > { %1871 = vrot.lane.b32.xlu1 %v1382_v24, %s2412_s19 }
 0x379   : > { %1398 = vrot.lane.b32.xlu0 %v1382_v24, %s2417_s20  ;;  %v3920_v24 = vld [vmem:[#allocation9_spill] sm:$0xff]  ;;  %v1290_v36 = vpop.permute.xlu0 %1289 }
 0x37a   : > { %2069 = vrot.lane.b32.xlu1 %v1641_v61, %s2412_s19  ;;  %v1255_v61 = vsel %vm450_vm1, %v1246_v41, %v1248_v38  ;;  %v1270_v19 = vadd.f32 %v1248_v38, %v3920_v24  ;;  %v1143_v41 = vsel %vm450_vm1, %v3180_v47, %v3182_v30  ;;  %v1299_v38 = vsel %vm450_vm1, %v1290_v36, %v1292_v4  ;;  %v1192_v47 = vpop.permute.xlu1 %1191 }
 0x37b   : > { %v1269_v21 = vadd.f32 %v1255_v61, %v3921_v26 }
 0x37c   : > { %v1278_v2 = vadd.f32 %v1270_v19, %v1218_v20 }
 0x37d   : > { %1663 = vrot.lane.b32.xlu0 %v1644_v37, %s2417_s20  ;;  %v1277_v24 = vadd.f32 %v1269_v21, %v1217_v27  ;;  %v3925_v21 = vld [vmem:[#allocation14_spill] sm:$0xff] }
 0x37e   : > { %1404 = vrot.lane.b32.xlu1 %v1385_v50, %s2417_s20  ;;  %v3277_v26 = vadd.f32 %v1292_v4, %v1278_v2  ;;  %v1272_v56 = vadd.f32 %v1252_v39, %v3925_v21  ;;  %v1195_v2 = vsel %vm976_vm5, %v1186_v46, %v1188_v18  ;;  %v3926_v4 = vld [vmem:[#allocation12_spill] sm:$0xff]  ;;  %v1144_v18 = vsel %vm450_vm1, %v3221_v6, %v3223_v23 }
 0x37f   : > { %v3279_v11 = vadd.f32 %v1299_v38, %v1277_v24  ;;  %v1158_v38 = vadd.f32 %v3182_v30, %v3926_v4 }
 0x380   : > { %v1646_v19 = vmul.f32 0.25, %v3277_v26 }
 0x381   : > { %1877 = vrot.lane.b32.xlu0 %v1385_v50, %s2412_s19  ;;  %v3924_v50 = vld [vmem:[#allocation11_spill] sm:$0xff] }
 0x382   : > { %1661 = vrot.lane.b32.xlu1 %v1643_v0, %s2417_s20  ;;  %v1157_v61 = vadd.f32 %v1143_v41, %v3924_v50  ;;  %v1190_v41 = vpop.permute.xlu0 %1189  ;;  %v1256_v50 = vsel %vm450_vm1, %v1250_v16, %v1252_v39 }
 0x384   : > { %v1209_v7 = vadd.f32 %v1186_v46, %v1157_v61  ;;  %v1296_v61 = vpop.permute.xlu1 %1295  ;;  %v3928_v46 = vld [vmem:[#allocation13_spill] sm:$0xff] }
 0x385   : > { %2075 = vrot.lane.b32.xlu0 %v1644_v37, %s2412_s19  ;;  %v1645_v37 = vmul.f32 0.25, %v3279_v11  ;;  %v1271_v21 = vadd.f32 %v1256_v50, %v3928_v46 }
 0x386   : > { %1875 = vrot.lane.b32.xlu1 %v1384_v9, %s2412_s19  ;;  %v3284_v36 = vadd.f32 %v1217_v27, %v1209_v7  ;;  %v1210_v27 = vadd.f32 %v1195_v2, %v1158_v38  ;;  %v1294_v30 = vpop.permute.xlu0 %1293  ;;  %v3930_v2 = vld [vmem:[#allocation17_spill] sm:$0xff] }
 0x387   : > { %v1159_v38 = vadd.f32 %v1144_v18, %v3930_v2  ;;  %v3336_v2 = vmul.f32 0.75, %v3195_v49  ;;  %v2342_v49 = vld [vmem:[%s3848_s8 + $0x2] ss:$0 sm:$0xff] }
 0x388   : > { %v1386_v24 = vmul.f32 0.25, %v3284_v36  ;;  %v3305_v39 = vadd.f32 %v1218_v20, %v1210_v27  ;;  %v1196_v27 = vsel %vm976_vm5, %v1190_v41, %v1192_v47 }
 0x389   : > { %1402 = vrot.lane.b32.xlu0 %v1384_v9, %s2417_s20  ;;  %v3927_v9 = vld [vmem:[#allocation24_spill] sm:$0xff]  ;;  %v1211_v6 = vadd.f32 %v1190_v41, %v1159_v38 }
 0x38a   : > { %2073 = vrot.lane.b32.xlu1 %v1643_v0, %s2412_s19  ;;  %v1220_v0 = vmul.f32 0.75, %v3927_v9  ;;  %v3929_v9 = vld [vmem:[#allocation23_spill] sm:$0xff]  ;;  %v1387_v46 = vmul.f32 0.25, %v3305_v39 }
 0x38b   : > { %v1219_v16 = vmul.f32 0.75, %v3929_v9 }
 0x38c   : > { %v1280_v7 = vadd.f32 %v1272_v56, %v1220_v0  ;;  %v1300_v56 = vsel %vm450_vm1, %v1294_v30, %v1296_v61 }
 0x38d   : > { %1667 = vrot.lane.b32.xlu0 %v1646_v19, %s2417_s20  ;;  %v3317_v20 = vadd.f32 %v1219_v16, %v1211_v6 }
 0x38e   : > { %1665 = vrot.lane.b32.xlu1 %v1645_v37, %s2417_s20  ;;  %v3302_v4 = vadd.f32 %v1296_v61, %v1280_v7 }
 0x38f   : > { %v1388_v30 = vmul.f32 0.25, %v3317_v20 }
 0x390   : > { %v1648_v50 = vmul.f32 0.25, %v3302_v4 }
 0x391   : > { %2079 = vrot.lane.b32.xlu0 %v1646_v19, %s2412_s19  ;;  %v1279_v19 = vadd.f32 %v1271_v21, %v1219_v16 }
 0x392   : > { %1879 = vrot.lane.b32.xlu1 %v1386_v24, %s2412_s19 }
 0x393   : > { %v3313_v7 = vadd.f32 %v1300_v56, %v1279_v19 }
 0x395   : > { %1406 = vrot.lane.b32.xlu0 %v1386_v24, %s2417_s20  ;;  %v1647_v61 = vmul.f32 0.25, %v3313_v7  ;;  %v3931_v24 = vld [vmem:[#allocation19_spill] sm:$0xff] }
 0x396   : > { %2077 = vrot.lane.b32.xlu1 %v1645_v37, %s2412_s19  ;;  %v1160_v37 = vadd.f32 %v3223_v23, %v3931_v24 }
 0x398   : > { %v1212_v18 = vadd.f32 %v1196_v27, %v1160_v37  ;;  %v2329_v27 = vld [vmem:[%s3848_s8 + $0x1] ss:$0 sm:$0xff]  ;;  %v2355_v37 = vld [vmem:[%s3848_s8 + $0x3] ss:$0 sm:$0xff] }
 0x399   : > { %1671 = vrot.lane.b32.xlu0 %v1648_v50, %s2417_s20 }
 0x39a   : > { %1408 = vrot.lane.b32.xlu1 %v1387_v46, %s2417_s20  ;;  %v3332_v47 = vadd.f32 %v1220_v0, %v1212_v18 }
 0x39c   : > { %v1389_v56 = vmul.f32 0.25, %v3332_v47 }
 0x39d   : > { %2083 = vrot.lane.b32.xlu0 %v1648_v50, %s2412_s19  ;;  %v3352_v50 = vmul.f32 0.75, %v3211_v25 }
 0x39e   : > { %1669 = vrot.lane.b32.xlu1 %v1647_v61, %s2417_s20 }
 0x39f   : > { %v3325_v21 = vpop.permute.xlu0 %1607 }
 0x3a0   : > { %v3328_v9 = vpop.permute.xlu1 %1605 }
 0x3a1   : > { %1410 = vrot.lane.b32.xlu0 %v1388_v30, %s2417_s20 }
 0x3a2   : > { %1883 = vrot.lane.b32.xlu1 %v1388_v30, %s2412_s19 }
 0x3a3   : > { %v2028_v41 = vpop.permute.xlu0 %2027 }
 0x3a4   : > { %v2054_v23 = vadd.f32 %v2028_v41, %v2994_v62  ;;  %v1828_v16 = vpop.permute.xlu1 %1827 }
 0x3a5   : > { %1881 = vrot.lane.b32.xlu0 %v1387_v46, %s2412_s19 }
 0x3a6   : > { %2081 = vrot.lane.b32.xlu1 %v1647_v61, %s2412_s19  ;;  %v3341_v38 = vadd.f32 %v2054_v23, %v3336_v2 }
 0x3a7   : > { %v1346_v19 = vpop.permute.xlu0 %1345 }
 0x3a8   : > { %3932 = vst [vmem:[#allocation25_spill] sm:$0xff] %v3341_v38  ;;  %v2026_v6 = vpop.permute.xlu1 %2025 }
 0x3a9   : > { %v2041_v0 = vsel %vm471_vm0, %v2026_v6, %v2028_v41  ;;  %1885 = vrot.lane.b32.xlu0 %v1389_v56, %s2412_s19  ;;  %v3375_v41 = vmul.f32 0.75, %v3242_v40  ;;  %v3388_v40 = vmul.f32 0.75, %v3200_v35 }
 0x3aa   : > { %v2053_v62 = vadd.f32 %v2041_v0, %v2996_v10  ;;  %1412 = vrot.lane.b32.xlu1 %v1389_v56, %s2417_s20 }
 0x3ab   : > { %v3354_v46 = vpop.permute.xlu0 %1611 }
 0x3ac   : > { %v3359_v61 = vpop.permute.xlu1 %1347  ;;  %v3362_v24 = vadd.f32 %v2053_v62, %v3352_v50 }
 0x3ad   : > { %v3366_v10 = vsel %vm471_vm0, %v1346_v19, %v3359_v61  ;;  %1913 = vrot.lane.b32.xlu0 %v2342_v49, %s2415_s29 }
 0x3ae   : > { %3933 = vst [vmem:[#allocation5_spill] sm:$0xff] %v3362_v24  ;;  %1715 = vrot.lane.b32.xlu1 %v2329_v27, %s2415_s29 }
 0x3af   : > { %v2032_v25 = vpop.permute.xlu0 %2031 }
 0x3b0   : > { %v2056_v18 = vadd.f32 %v2032_v25, %v3029_v59  ;;  %v1610_v30 = vpop.permute.xlu1 %1609 }
 0x3b1   : > { %v3379_v23 = vsel %vm471_vm0, %v1610_v30, %v3354_v46 }
 0x3b2   : > { %2111 = vrot.lane.b32.xlu1 %v2355_v37, %s2415_s29  ;;  %v3383_v56 = vadd.f32 %v2056_v18, %v3375_v41  ;;  %v3393_v37 = vmul.f32 0.75, %v3217_v3  ;;  %v3410_v3 = vmul.f32 0.75, %v3245_v34  ;;  %s2372_s29 = sshll.u32 %s3961_s10, 7 }
 0x3b3   : > { %v1350_v19 = vpop.permute.xlu0 %1349  ;;  %s3803_s11 = scalar_lea.vmem %s3849_s9, %s2372_s29 }
 0x3b4   : > { %3934 = vst [vmem:[#allocation7_spill] sm:$0xff] %v3383_v56  ;;  %v1832_v6 = vpop.permute.xlu1 %1831 }
 0x3b7   : > { %v1830_v0 = vpop.permute.xlu0 %1829 }
 0x3b8   : > { %v1843_v62 = vsel %vm471_vm0, %v1828_v16, %v1830_v0  ;;  %v1856_v59 = vadd.f32 %v1830_v0, %v3031_v43  ;;  %v2030_v49 = vpop.permute.xlu1 %2029  ;;  %v3400_v16 = vmul.f32 0.75, %v3254_v54 }
 0x3b9   : > { %v1855_v27 = vadd.f32 %v1843_v62, %v3018_v5  ;;  %v2042_v30 = vsel %vm471_vm0, %v2030_v49, %v2032_v25 }
 0x3ba   : > { %v2055_v18 = vadd.f32 %v2042_v30, %v3040_v32  ;;  %v3397_v56 = vadd.f32 %v1856_v59, %v3388_v40  ;;  %v3421_v59 = vmul.f32 0.75, %v3260_v58 }
 0x3bb   : > { %v1834_v43 = vpop.permute.xlu0 %1833  ;;  %v3403_v0 = vadd.f32 %v1855_v27, %v3393_v37 }
 0x3bc   : > { %v1844_v35 = vsel %vm471_vm0, %v1832_v6, %v1834_v43  ;;  %v1858_v5 = vadd.f32 %v1834_v43, %v3083_v45  ;;  %v3407_v25 = vpop.permute.xlu1 %1351  ;;  %v3413_v32 = vadd.f32 %v2055_v18, %v3400_v16 }
 0x3bd   : > { %3935 = vst [vmem:[#allocation3_spill] sm:$0xff] %v3403_v0  ;;  %v1857_v62 = vadd.f32 %v1844_v35, %v3051_v51  ;;  %v3418_v54 = vsel %vm471_vm0, %v1350_v19, %v3407_v25  ;;  %v3436_v19 = vmul.f32 0.75, %v3277_v26  ;;  %v3481_v0 = vmul.f32 0.75, %v3313_v7 }
 0x3be   : > { %3936 = vst [vmem:[#allocation27_spill] sm:$0xff] %v3413_v32  ;;  %v3424_v6 = vadd.f32 %v1858_v5, %v3410_v3  ;;  %v3445_v32 = vmul.f32 0.75, %v3279_v11 }
 0x3bf   : > { %v3426_v45 = vpop.permute.xlu0 %1615  ;;  %v3429_v34 = vadd.f32 %v1857_v62, %v3421_v59 }
 0x3c0   : > { %3937 = vst [vmem:[#allocation26_spill] sm:$0xff] %v3424_v6  ;;  %v1614_v49 = vpop.permute.xlu1 %1613 }
 0x3c1   : > { %3938 = vst [vmem:[#allocation4_spill] sm:$0xff] %v3429_v34  ;;  %v3433_v27 = vsel %vm471_vm0, %v1614_v49, %v3426_v45 }
 0x3c3   : > { %v2036_v51 = vpop.permute.xlu0 %2035 }
 0x3c4   : > { %v2058_v58 = vadd.f32 %v2036_v51, %v3089_v31  ;;  %v1836_v30 = vpop.permute.xlu1 %1835 }
 0x3c6   : > { %v3440_v18 = vadd.f32 %v2058_v58, %v3436_v19 }
 0x3c7   : > { %v1354_v43 = vpop.permute.xlu0 %1353 }
 0x3c8   : > { %3939 = vst [vmem:[#allocation2_spill] sm:$0xff] %v3440_v18  ;;  %v2034_v35 = vpop.permute.xlu1 %2033  ;;  %v3459_v18 = vmul.f32 0.75, %v3302_v4  ;;  %v3472_v4 = vmul.f32 0.75, %v3305_v39 }
 0x3c9   : > { %v2043_v5 = vsel %vm471_vm0, %v2034_v35, %v2036_v51 }
 0x3ca   : > { %v2057_v62 = vadd.f32 %v2043_v5, %v3091_v57 }
 0x3cb   : > { %v3447_v49 = vpop.permute.xlu0 %1619 }
 0x3cc   : > { %v3449_v34 = vpop.permute.xlu1 %1355  ;;  %v3452_v26 = vadd.f32 %v2057_v62, %v3445_v32 }
 0x3cd   : > { %v3456_v31 = vsel %vm471_vm0, %v1354_v43, %v3449_v34 }
 0x3ce   : > { %3940 = vst [vmem:[#allocation29_spill] sm:$0xff] %v3452_v26 }
 0x3cf   : > { %v2040_v58 = vpop.permute.xlu0 %2039 }
 0x3d0   : > { %v2060_v57 = vadd.f32 %v2040_v58, %v3134_v53  ;;  %v1618_v51 = vpop.permute.xlu1 %1617 }
 0x3d1   : > { %v3464_v11 = vsel %vm471_vm0, %v1618_v51, %v3447_v49  ;;  %v3477_v51 = vmul.f32 0.75, %v3284_v36 }
 0x3d2   : > { %v3467_v35 = vadd.f32 %v2060_v57, %v3459_v18 }
 0x3d3   : > { %v1358_v5 = vpop.permute.xlu0 %1357 }
 0x3d4   : > { %v1840_v62 = vpop.permute.xlu1 %1839 }
 0x3d7   : > { %v1838_v26 = vpop.permute.xlu0 %1837 }
 0x3d8   : > { %v1845_v43 = vsel %vm471_vm0, %v1836_v30, %v1838_v26  ;;  %v1860_v24 = vadd.f32 %v1838_v26, %v3136_v52  ;;  %v2038_v38 = vpop.permute.xlu1 %2037 }
 0x3d9   : > { %v1859_v53 = vadd.f32 %v1845_v43, %v3122_v12  ;;  %v2044_v6 = vsel %vm471_vm0, %v2038_v38, %v2040_v58 }
 0x3da   : > { %v2059_v57 = vadd.f32 %v2044_v6, %v3151_v15  ;;  %v3484_v30 = vadd.f32 %v1860_v24, %v3472_v4  ;;  %v3497_v15 = vmul.f32 0.75, %v3332_v47  ;;  %v3505_v6 = vmul.f32 0.75, %v3317_v20 }
 0x3db   : > { %v1842_v52 = vpop.permute.xlu0 %1841  ;;  %v3487_v26 = vadd.f32 %v1859_v53, %v3477_v51  ;;  %v1621_v47 = vsel %vm471_vm0, %v3328_v9, %v3325_v21  ;;  %v1634_v20 = vadd.f32 %v3325_v21, %v3007_v63  ;;  %v1375_v63 = vadd.f32 %v3359_v61, %v3070_v44 }
 0x3dc   : > { %v1846_v39 = vsel %vm471_vm0, %v1840_v62, %v1842_v52  ;;  %v1862_v12 = vadd.f32 %v1842_v52, %v3197_v8  ;;  %v3491_v38 = vpop.permute.xlu1 %1359  ;;  %v3494_v36 = vadd.f32 %v2059_v57, %v3481_v0  ;;  %v1636_v44 = vadd.f32 %v3354_v46, %v3037_v1 }
 0x3dd   : > { %v1861_v7 = vadd.f32 %v1846_v39, %v3160_v28  ;;  %v3502_v24 = vsel %vm471_vm0, %v1358_v5, %v3491_v38  ;;  %v1633_v28 = vadd.f32 %v1621_v47, %v3021_v55  ;;  %v1374_v55 = vadd.f32 %v3366_v10, %v3009_v14 }
 0x3de   : > { %v3508_v58 = vadd.f32 %v1862_v12, %v3497_v15  ;;  %v1377_v1 = vadd.f32 %v3407_v25, %v3081_v48  ;;  %v1638_v48 = vadd.f32 %v3426_v45, %v3110_v42 }
 0x3df   : > { %v1660_v8 = vpop.permute.xlu0 %1659  ;;  %v3511_v62 = vadd.f32 %v1861_v7, %v3505_v6 }
 0x3e0   : > { %3941 = vst [vmem:[#allocation6_spill] sm:$0xff] %v3508_v58  ;;  %v1401_v43 = vpop.permute.xlu1 %1400 }
 0x3e3   : > { %v3517_v5 = vpop.permute.xlu0 %1873 }
 0x3e4   : > { %v1658_v53 = vpop.permute.xlu1 %1657 }
 0x3e5   : > { %v1673_v57 = vsel %vm1414_vm6, %v1658_v53, %v1660_v8  ;;  %v1685_v52 = vadd.f32 %v1658_v53, %v1633_v28 }
 0x3e6   : > { %v1686_v39 = vadd.f32 %v1673_v57, %v1634_v20 }
 0x3e7   : > { %v3523_v12 = vadd.f32 %v3352_v50, %v1685_v52  ;;  %v3525_v7 = vpop.permute.xlu0 %2071  ;;  %v1635_v52 = vadd.f32 %v3379_v23, %v3073_v29  ;;  %v1376_v29 = vadd.f32 %v3418_v54, %v3057_v60 }
 0x3e8   : > { %v3528_v9 = vadd.f32 %v3336_v2, %v1686_v39  ;;  %v3530_v58 = vpop.permute.xlu1 %1871 }
 0x3eb   : > { %v1399_v21 = vpop.permute.xlu0 %1398 }
 0x3ec   : > { %v1415_v8 = vsel %vm1414_vm6, %v1399_v21, %v1401_v43  ;;  %v1427_v47 = vadd.f32 %v1399_v21, %v1374_v55  ;;  %v3537_v28 = vpop.permute.xlu1 %2069 }
 0x3ed   : > { %v1428_v50 = vadd.f32 %v1415_v8, %v1375_v63 }
 0x3ee   : > { %v1443_v20 = vadd.f32 %v3393_v37, %v1427_v47 }
 0x3ef   : > { %v1444_v2 = vadd.f32 %v3388_v40, %v1428_v50  ;;  %v1664_v53 = vpop.permute.xlu0 %1663 }
 0x3f0   : > { %v1405_v57 = vpop.permute.xlu1 %1404 }
 0x3f3   : > { %v3543_v14 = vpop.permute.xlu0 %1877 }
 0x3f4   : > { %v1662_v61 = vpop.permute.xlu1 %1661 }
 0x3f5   : > { %v1674_v10 = vsel %vm1414_vm6, %v1662_v61, %v1664_v53  ;;  %v1687_v43 = vadd.f32 %v1662_v61, %v1635_v52 }
 0x3f6   : > { %v1688_v39 = vadd.f32 %v1674_v10, %v1636_v44 }
 0x3f7   : > { %v3549_v55 = vadd.f32 %v3400_v16, %v1687_v43  ;;  %v3551_v37 = vpop.permute.xlu0 %2075 }
 0x3f8   : > { %v3554_v40 = vadd.f32 %v3375_v41, %v1688_v39  ;;  %v3556_v63 = vpop.permute.xlu1 %1875  ;;  %v1637_v41 = vadd.f32 %v3433_v27, %v3125_v22 }
 0x3fb   : > { %v1403_v46 = vpop.permute.xlu0 %1402 }
 0x3fc   : > { %v1416_v23 = vsel %vm1414_vm6, %v1403_v46, %v1405_v57  ;;  %v1429_v21 = vadd.f32 %v1403_v46, %v1376_v29  ;;  %v3563_v8 = vpop.permute.xlu1 %2073  ;;  %v1639_v29 = vadd.f32 %v3464_v11, %v3177_v13 }
 0x3fd   : > { %v1430_v16 = vadd.f32 %v1416_v23, %v1377_v1 }
 0x3fe   : > { %v3566_v47 = vadd.f32 %v3421_v59, %v1429_v21  ;;  %v3943_v21 = vld [vmem:[#allocation31_spill] sm:$0xff] }
 0x3ff   : > { %v3571_v50 = vadd.f32 %v3410_v3, %v1430_v16  ;;  %v1668_v60 = vpop.permute.xlu0 %1667  ;;  %v1378_v3 = vadd.f32 %v3456_v31, %v3112_v17  ;;  %v3942_v17 = vld [vmem:[#allocation30_spill] sm:$0xff]  ;;  %v1380_v16 = vadd.f32 %v3502_v24, %v3943_v21 }
 0x400   : > { %v1666_v25 = vpop.permute.xlu1 %1665  ;;  %v1640_v31 = vadd.f32 %v3447_v49, %v3942_v17 }
 0x401   : > { %v1675_v54 = vsel %vm1414_vm6, %v1666_v25, %v1668_v60  ;;  %v1689_v53 = vadd.f32 %v1666_v25, %v1637_v41 }
 0x402   : > { %v1690_v57 = vadd.f32 %v1675_v54, %v1638_v48  ;;  %v3944_v48 = vld [vmem:[#allocation10_spill] sm:$0xff] }
 0x403   : > { %v3577_v52 = vadd.f32 %v3445_v32, %v1689_v53  ;;  %v3579_v59 = vpop.permute.xlu0 %2079  ;;  %v1379_v32 = vadd.f32 %v3449_v34, %v3175_v33  ;;  %v1460_v25 = vadd.f32 %v3944_v48, %v1443_v20  ;;  %v1461_v54 = vadd.f32 %v3944_v48, %v1444_v2  ;;  %v3945_v20 = vld [vmem:[#allocation16_spill] sm:$0xff] }
 0x404   : > { %v3582_v44 = vadd.f32 %v3436_v19, %v1690_v57  ;;  %v1880_v22 = vpop.permute.xlu1 %1879 }
 0x405   : > { %v1488_v2 = vadd.f32 %v3945_v20, %v1460_v25 }
 0x407   : > { %v1407_v27 = vpop.permute.xlu0 %1406  ;;  %v1504_v17 = vmul.f32 0.2, %v1488_v2  ;;  %vm1496_vm8 = vcmp.ge.f32.partialorder %v1488_v2, 0.0 }
 0x408   : > { %v1431_v61 = vadd.f32 %v1407_v27, %v1378_v3  ;;  %v3586_v42 = vpop.permute.xlu1 %2077 }
 0x40a   : > { %v3589_v45 = vadd.f32 %v3477_v51, %v1431_v61 }
 0x40b   : > { %v1672_v10 = vpop.permute.xlu0 %1671 }
 0x40c   : > { %v1409_v43 = vpop.permute.xlu1 %1408 }
 0x40d   : > { %v1417_v39 = vsel %vm1414_vm6, %v1407_v27, %v1409_v43  ;;  %v1489_v27 = vadd.f32 %v3945_v20, %v1461_v54  ;;  %v3947_v43 = vld [vmem:[#allocation3_spill] sm:$0xff] }
 0x40e   : > { %v1432_v19 = vadd.f32 %v1417_v39, %v1379_v32  ;;  %v1900_v32 = vadd.f32 %v3517_v5, %v3397_v56  ;;  %v3951_v54 = vld [vmem:[#allocation15_spill] sm:$0xff] }
 0x40f   : > { %v2084_v1 = vpop.permute.xlu0 %2083  ;;  %vm1497_vm7 = vcmp.ge.f32.partialorder %v1489_v27, 0.0 }
 0x410   : > { %v3599_v46 = vadd.f32 %v3472_v4, %v1432_v19  ;;  %v3602_v51 = vadd.f32 %v2084_v1, %v3467_v35  ;;  %v1670_v23 = vpop.permute.xlu1 %1669  ;;  %v3948_v19 = vld [vmem:[#allocation26_spill] sm:$0xff] }
 0x411   : > { %v1676_v33 = vsel %vm1414_vm6, %v1670_v23, %v1672_v10  ;;  %v1691_v34 = vadd.f32 %v1670_v23, %v1639_v29  ;;  %v1902_v29 = vadd.f32 %v3543_v14, %v3948_v19 }
 0x412   : > { %v1692_v41 = vadd.f32 %v1676_v33, %v1640_v31 }
 0x413   : > { %v3608_v13 = vadd.f32 %v3481_v0, %v1691_v34  ;;  %v1411_v11 = vpop.permute.xlu0 %1410  ;;  %v3949_v34 = vld [vmem:[#allocation25_spill] sm:$0xff] }
 0x414   : > { %v3611_v49 = vadd.f32 %v3459_v18, %v1692_v41  ;;  %v1433_v4 = vadd.f32 %v1411_v11, %v1380_v16  ;;  %v3613_v60 = vpop.permute.xlu1 %1883  ;;  %v2098_v21 = vadd.f32 %v3525_v7, %v3949_v34  ;;  %v1888_v16 = vsel %vm471_vm0, %v3556_v63, %v3543_v14  ;;  %v3953_v63 = vld [vmem:[#allocation4_spill] sm:$0xff] }
 0x415   : > { %v1512_v14 = vsel %vm1496_vm8, %v1488_v2, %v1504_v17 }
 0x416   : > { %v3616_v35 = vadd.f32 %v3505_v6, %v1433_v4  ;;  %v1887_v6 = vsel %vm471_vm0, %v3530_v58, %v3517_v5  ;;  %v2085_v58 = vsel %vm471_vm0, %v3537_v28, %v3525_v7 }
 0x417   : > { %v3620_v53 = vpop.permute.xlu0 %1881  ;;  %v1899_v39 = vadd.f32 %v1887_v6, %v3947_v43 }
 0x418   : > { %v1889_v0 = vsel %vm471_vm0, %v1880_v22, %v3620_v53  ;;  %v2082_v24 = vpop.permute.xlu1 %2081  ;;  %v3946_v22 = vld [vmem:[#allocation32_spill] sm:$0xff] }
 0x419   : > { %v3625_v57 = vadd.f32 %v1889_v0, %v3487_v26  ;;  %v2088_v18 = vsel %vm471_vm0, %v2082_v24, %v2084_v1  ;;  %v1381_v10 = vadd.f32 %v3491_v38, %v3946_v22  ;;  %v1505_v38 = vmul.f32 0.2, %v1489_v27  ;;  %v3952_v24 = vld [vmem:[#allocation7_spill] sm:$0xff] }
 0x41a   : > { %v3629_v3 = vadd.f32 %v2088_v18, %v3494_v36  ;;  %v2100_v18 = vadd.f32 %v3551_v37, %v3952_v24  ;;  %v1901_v22 = vadd.f32 %v1888_v16, %v3953_v63 }
 0x41b   : > { %v3636_v61 = vpop.permute.xlu0 %1885  ;;  %v1513_v6 = vsel %vm1497_vm7, %v1489_v27, %v1505_v38 }
 0x41c   : > { %v1413_v26 = vpop.permute.xlu1 %1412 }
 0x41d   : > { %v1418_v36 = vsel %vm1414_vm6, %v1411_v11, %v1413_v26  ;;  %v2086_v26 = vsel %vm471_vm0, %v3563_v8, %v3551_v37 }
 0x41e   : > { %v1434_v1 = vadd.f32 %v1418_v36, %v1381_v10 }
 0x41f   : > { %v3649_v31 = vpop.permute.xlu0 %1913 }
 0x420   : > { %v3652_v56 = vadd.f32 %v3497_v15, %v1434_v1  ;;  %v3654_v5 = vpop.permute.xlu1 %1715  ;;  %v1917_v23 = vadd.f32 %v3649_v31, %v1900_v32  ;;  %v1916_v33 = vadd.f32 %v3649_v31, %v1899_v39  ;;  %v1919_v28 = vadd.f32 %v3649_v31, %v1902_v29  ;;  %v3950_v15 = vld [vmem:[#allocation5_spill] sm:$0xff] }
 0x421   : > { %v1718_v41 = vadd.f32 %v3654_v5, %v3523_v12  ;;  %v2097_v11 = vadd.f32 %v2085_v58, %v3950_v15  ;;  %v1918_v2 = vadd.f32 %v3649_v31, %v1901_v22 }
 0x422   : > { %v1925_v4 = vadd.f32 %v1917_v23, %v3945_v20  ;;  %v1924_v25 = vadd.f32 %v1916_v33, %v3945_v20  ;;  %v1927_v0 = vadd.f32 %v1919_v28, %v3951_v54 }
 0x423   : > { %v1726_v7 = vadd.f32 %v1718_v41, %v3945_v20 }
 0x424   : > { %v3676_v12 = vpop.permute.xlu1 %2111  ;;  %vm1933_vm9 = vcmp.ge.f32.partialorder %v1925_v4, 0.0  ;;  %v1941_v10 = vmul.f32 0.2, %v1925_v4  ;;  %vm1932_vm10 = vcmp.ge.f32.partialorder %v1924_v25, 0.0  ;;  %v1940_v32 = vmul.f32 0.2, %v1924_v25 }
 0x425   : > { %v2115_v36 = vadd.f32 %v3676_v12, %v2098_v21  ;;  %v2114_v43 = vadd.f32 %v3676_v12, %v2097_v11  ;;  %v1943_v27 = vmul.f32 0.2, %v1927_v0  ;;  %v1742_v58 = vmul.f32 0.2, %v1726_v7 }
 0x426   : > { %v1949_v39 = vsel %vm1933_vm9, %v1925_v4, %v1941_v10  ;;  %v1948_v29 = vsel %vm1932_vm10, %v1924_v25, %v1940_v32  ;;  %vm1935_vm11 = vcmp.ge.f32.partialorder %v1927_v0, 0.0  ;;  %vm1734_vm12 = vcmp.ge.f32.partialorder %v1726_v7, 0.0 }
 0x427   : > { %v1957_v19 = vmul.f32 1.4142135, %v1949_v39  ;;  %v2123_v1 = vadd.f32 %v2115_v36, %v3945_v20  ;;  %v2122_v17 = vadd.f32 %v2114_v43, %v3945_v20  ;;  %v1956_v38 = vmul.f32 1.4142135, %v1948_v29 }
 0x428   : > { %v2117_v37 = vadd.f32 %v3676_v12, %v2100_v18  ;;  %v1719_v21 = vadd.f32 %v3654_v5, %v3528_v9  ;;  %v1951_v41 = vsel %vm1935_vm11, %v1927_v0, %v1943_v27  ;;  %v1750_v15 = vsel %vm1734_vm12, %v1726_v7, %v1742_v58  ;;  %v3954_v18 = vld [vmem:[#allocation27_spill] sm:$0xff] }
 0x429   : > { %v2344_v8 = vclamps-f32 %v1957_v19, 256.0  ;;  %vm2131_vm13 = vcmp.ge.f32.partialorder %v2123_v1, 0.0  ;;  %v2139_v23 = vmul.f32 0.2, %v2123_v1  ;;  %vm2130_vm14 = vcmp.ge.f32.partialorder %v2122_v17, 0.0 }
 0x42a   : > { %v2343_v33 = vclamps-f32 %v1956_v38, 256.0  ;;  %v2138_v28 = vmul.f32 0.2, %v2122_v17  ;;  %v2125_v34 = vadd.f32 %v2117_v37, %v3951_v54  ;;  %v1926_v11 = vadd.f32 %v1918_v2, %v3951_v54 }
 0x42b   : > { %1990 = vrot.lane.b32.xlu1 %v2344_v8, %s2414_s21  ;;  %v2147_v16 = vsel %vm2131_vm13, %v2123_v1, %v2139_v23  ;;  %v1462_v4 = vadd.f32 %v3944_v48, %v3566_v47  ;;  %v2099_v63 = vadd.f32 %v2086_v26, %v3954_v18  ;;  %v1720_v9 = vadd.f32 %v3654_v5, %v3549_v55 }
 0x42c   : > { %1988 = vrot.lane.b32.xlu0 %v2343_v33, %s2414_s21  ;;  %v2155_v25 = vmul.f32 1.4142135, %v2147_v16  ;;  %v2146_v24 = vsel %vm2130_vm14, %v2122_v17, %v2138_v28  ;;  %vm2133_vm15 = vcmp.ge.f32.partialorder %v2125_v34, 0.0  ;;  %v2141_v10 = vmul.f32 0.2, %v2125_v34  ;;  %v3955_v33 = vld [vmem:[#allocation2_spill] sm:$0xff] }
 0x42d   : > { %v2154_v22 = vmul.f32 1.4142135, %v2146_v24  ;;  %v1959_v0 = vmul.f32 1.4142135, %v1951_v41  ;;  %v1758_v7 = vmul.f32 1.4142135, %v1750_v15  ;;  %v1727_v36 = vadd.f32 %v1719_v21, %v3945_v20 }
 0x42e   : > { %v2357_v32 = vclamps-f32 %v2155_v25, 256.0  ;;  %v2149_v39 = vsel %vm2133_vm15, %v2125_v34, %v2141_v10  ;;  %v1942_v47 = vmul.f32 0.2, %v1926_v11  ;;  %v2116_v27 = vadd.f32 %v3676_v12, %v2099_v63  ;;  %v3956_v34 = vld [vmem:[#allocation29_spill] sm:$0xff] }
 0x42f   : > { %v2356_v43 = vclamps-f32 %v2154_v22, 256.0  ;;  %v1463_v58 = vadd.f32 %v3944_v48, %v3571_v50  ;;  %v1490_v26 = vadd.f32 %v3951_v54, %v1462_v4  ;;  %v1521_v2 = vmul.f32 1.4142135, %v1513_v6 }
 0x430   : > { %2188 = vrot.lane.b32.xlu1 %v2357_v32, %s2414_s21  ;;  %vm1934_vm1 = vcmp.ge.f32.partialorder %v1926_v11, 0.0  ;;  %v2087_v55 = vsel %vm471_vm0, %v3586_v42, %v3579_v59  ;;  %v1520_v20 = vmul.f32 1.4142135, %v1512_v14  ;;  %v2124_v19 = vadd.f32 %v2116_v27, %v3951_v54 }
 0x431   : > { %2186 = vrot.lane.b32.xlu0 %v2356_v43, %s2414_s21  ;;  %v2346_v29 = vclamps-f32 %v1959_v0, 256.0  ;;  %v2157_v1 = vmul.f32 1.4142135, %v2149_v39  ;;  %v1743_v17 = vmul.f32 0.2, %v1727_v36  ;;  %v1728_v50 = vadd.f32 %v1720_v9, %v3951_v54 }
 0x432   : > { %v2330_v38 = vclamps-f32 %v1758_v7, 256.0  ;;  %v1950_v37 = vsel %vm1934_vm1, %v1926_v11, %v1942_v47  ;;  %vm1735_vm3 = vcmp.ge.f32.partialorder %v1727_v36, 0.0  ;;  %v1721_v6 = vadd.f32 %v3654_v5, %v3554_v40 }
 0x433   : > { %v1491_v8 = vadd.f32 %v3951_v54, %v1463_v58  ;;  %v1506_v23 = vmul.f32 0.2, %v1490_v26  ;;  %v2322_v42 = vclamps-f32 %v1521_v2, 256.0  ;;  %v2140_v14 = vmul.f32 0.2, %v2124_v19 }
 0x434   : > { %1994 = vrot.lane.b32.xlu1 %v2346_v29, %s2414_s21  ;;  %v2102_v28 = vadd.f32 %v3579_v59, %v3955_v33  ;;  %v2101_v21 = vadd.f32 %v2087_v55, %v3956_v34  ;;  %vm2132_vm4 = vcmp.ge.f32.partialorder %v2124_v19, 0.0  ;;  %vm1498_vm5 = vcmp.ge.f32.partialorder %v1490_v26, 0.0 }
 0x435   : > { %1790 = vrot.lane.b32.xlu0 %v2330_v38, %s2414_s21  ;;  %v2359_v16 = vclamps-f32 %v2157_v1, 256.0  ;;  %v1958_v41 = vmul.f32 1.4142135, %v1950_v37  ;;  %v1751_v15 = vsel %vm1735_vm3, %v1727_v36, %v1743_v17  ;;  %v1744_v40 = vmul.f32 0.2, %v1728_v50  ;;  %v3957_v36 = vld [vmem:[#allocation22_spill] sm:$0xff] }
 0x436   : > { %vm1736_vm6 = vcmp.ge.f32.partialorder %v1728_v50, 0.0  ;;  %v1729_v11 = vadd.f32 %v1721_v6, %v3951_v54  ;;  %v2119_v4 = vadd.f32 %v3676_v12, %v2102_v28  ;;  %v2118_v25 = vadd.f32 %v3676_v12, %v2101_v21 }
 0x437   : > { %v2321_v59 = vclamps-f32 %v1520_v20, 256.0  ;;  %v2148_v24 = vsel %vm2132_vm4, %v2124_v19, %v2140_v14  ;;  %v1464_v18 = vadd.f32 %v3944_v48, %v3589_v45  ;;  %v1759_v63 = vmul.f32 1.4142135, %v1751_v15 }
 0x438   : > { %2192 = vrot.lane.b32.xlu1 %v2359_v16, %s2414_s21  ;;  %vm1499_vm7 = vcmp.ge.f32.partialorder %v1491_v8, 0.0  ;;  %v1507_v22 = vmul.f32 0.2, %v1491_v8  ;;  %v2345_v10 = vclamps-f32 %v1958_v41, 256.0  ;;  %v1514_v9 = vsel %vm1498_vm5, %v1490_v26, %v1506_v23 }
 0x439   : > { %1554 = vrot.lane.b32.xlu0 %v2322_v42, %s2414_s21  ;;  %v1752_v54 = vsel %vm1736_vm6, %v1728_v50, %v1744_v40  ;;  %v1722_v32 = vadd.f32 %v3654_v5, %v3577_v52  ;;  %v2156_v0 = vmul.f32 1.4142135, %v2148_v24  ;;  %v1745_v7 = vmul.f32 0.2, %v1729_v11 }
 0x43a   : > { %v2127_v43 = vadd.f32 %v2119_v4, %v3957_v36  ;;  %v2126_v39 = vadd.f32 %v2118_v25, %v3957_v36  ;;  %v1904_v45 = vadd.f32 %v3620_v53, %v3484_v30  ;;  %vm1737_vm8 = vcmp.ge.f32.partialorder %v1729_v11, 0.0 }
 0x43b   : > { %v1492_v47 = vadd.f32 %v3957_v36, %v1464_v18  ;;  %v2331_v27 = vclamps-f32 %v1759_v63, 256.0  ;;  %v1522_v58 = vmul.f32 1.4142135, %v1514_v9  ;;  %v1515_v52 = vsel %vm1499_vm7, %v1491_v8, %v1507_v22  ;;  %v3959_v18 = vld [vmem:[#allocation6_spill] sm:$0xff] }
 0x43c   : > { %1552 = vrot.lane.b32.xlu1 %v2321_v59, %s2414_s21  ;;  %v1760_v26 = vmul.f32 1.4142135, %v1752_v54  ;;  %v1730_v2 = vadd.f32 %v1722_v32, %v3957_v36  ;;  %v1921_v55 = vadd.f32 %v3649_v31, %v1904_v45  ;;  %v1920_v20 = vadd.f32 %v3649_v31, %v3625_v57 }
 0x43d   : > { %1992 = vrot.lane.b32.xlu0 %v2345_v10, %s2414_s21  ;;  %v2358_v30 = vclamps-f32 %v2156_v0, 256.0  ;;  %v1753_v53 = vsel %vm1737_vm8, %v1729_v11, %v1745_v7  ;;  %v2143_v19 = vmul.f32 0.2, %v2127_v43  ;;  %v2142_v29 = vmul.f32 0.2, %v2126_v39 }
 0x43e   : > { %vm2135_vm9 = vcmp.ge.f32.partialorder %v2127_v43, 0.0  ;;  %vm2134_vm10 = vcmp.ge.f32.partialorder %v2126_v39, 0.0  ;;  %v1508_v1 = vmul.f32 0.2, %v1492_v47  ;;  %v2323_v17 = vclamps-f32 %v1522_v58, 256.0 }
 0x43f   : > { %v1523_v50 = vmul.f32 1.4142135, %v1515_v52  ;;  %vm1500_vm11 = vcmp.ge.f32.partialorder %v1492_v47, 0.0  ;;  %v2332_v38 = vclamps-f32 %v1760_v26, 256.0  ;;  %v1761_v37 = vmul.f32 1.4142135, %v1753_v53 }
 0x440   : > { %1792 = vrot.lane.b32.xlu1 %v2331_v27, %s2414_s21  ;;  %v1746_v6 = vmul.f32 0.2, %v1730_v2  ;;  %v1929_v8 = vadd.f32 %v1921_v55, %v3957_v36  ;;  %v2151_v57 = vsel %vm2135_vm9, %v2127_v43, %v2143_v19  ;;  %v2150_v23 = vsel %vm2134_vm10, %v2126_v39, %v2142_v29 }
 0x441   : > { %2190 = vrot.lane.b32.xlu0 %v2358_v30, %s2414_s21  ;;  %v1928_v42 = vadd.f32 %v1920_v20, %v3957_v36  ;;  %v1723_v14 = vadd.f32 %v3654_v5, %v3582_v44  ;;  %vm1738_vm12 = vcmp.ge.f32.partialorder %v1730_v2, 0.0  ;;  %v1724_v33 = vadd.f32 %v3654_v5, %v3608_v13 }
 0x442   : > { %v1465_v28 = vadd.f32 %v3944_v48, %v3599_v46  ;;  %v1466_v34 = vadd.f32 %v3944_v48, %v3616_v35  ;;  %v1890_v21 = vsel %vm471_vm0, %v3613_v60, %v3636_v61  ;;  %v2324_v16 = vclamps-f32 %v1523_v50, 256.0  ;;  %v3958_v60 = vld [vmem:[#allocation21_spill] sm:$0xff] }
 0x443   : > { %v2333_v44 = vclamps-f32 %v1761_v37, 256.0  ;;  %v2159_v41 = vmul.f32 1.4142135, %v2151_v57  ;;  %v2158_v15 = vmul.f32 1.4142135, %v2150_v23  ;;  %v1516_v40 = vsel %vm1500_vm11, %v1492_v47, %v1508_v1 }
 0x444   : > { %1556 = vrot.lane.b32.xlu1 %v2323_v17, %s2414_s21  ;;  %v1754_v11 = vsel %vm1738_vm12, %v1730_v2, %v1746_v6  ;;  %v1945_v13 = vmul.f32 0.2, %v1929_v8  ;;  %v1944_v4 = vmul.f32 0.2, %v1928_v42  ;;  %v1731_v46 = vadd.f32 %v1723_v14, %v3957_v36 }
 0x445   : > { %1794 = vrot.lane.b32.xlu0 %v2332_v38, %s2414_s21  ;;  %v1905_v25 = vadd.f32 %v1890_v21, %v3511_v62  ;;  %vm1937_vm13 = vcmp.ge.f32.partialorder %v1929_v8, 0.0  ;;  %vm1936_vm14 = vcmp.ge.f32.partialorder %v1928_v42, 0.0  ;;  %v1732_v35 = vadd.f32 %v1724_v33, %v3958_v60 }
 0x446   : > { %v1493_v59 = vadd.f32 %v3957_v36, %v1465_v28  ;;  %v1494_v24 = vadd.f32 %v3958_v60, %v1466_v34  ;;  %v1906_v63 = vadd.f32 %v3636_v61, %v3959_v18  ;;  %v1524_v22 = vmul.f32 1.4142135, %v1516_v40 }
 0x447   : > { %v2361_v10 = vclamps-f32 %v2159_v41, 256.0  ;;  %v2360_v9 = vclamps-f32 %v2158_v15, 256.0  ;;  %v1762_v54 = vmul.f32 1.4142135, %v1754_v11  ;;  %v1953_v62 = vsel %vm1937_vm13, %v1929_v8, %v1945_v13 }
 0x448   : > { %1796 = vrot.lane.b32.xlu1 %v2333_v44, %s2414_s21  ;;  %v1952_v32 = vsel %vm1936_vm14, %v1928_v42, %v1944_v4  ;;  %v1747_v0 = vmul.f32 0.2, %v1731_v46  ;;  %v1923_v7 = vadd.f32 %v3649_v31, %v1906_v63  ;;  %vm1739_vm0 = vcmp.ge.f32.partialorder %v1731_v46, 0.0 }
 0x449   : > { %1558 = vrot.lane.b32.xlu0 %v2324_v16, %s2414_s21  ;;  %v1748_v36 = vmul.f32 0.2, %v1732_v35  ;;  %v1922_v43 = vadd.f32 %v3649_v31, %v1905_v25  ;;  %v1510_v39 = vmul.f32 0.2, %v1494_v24  ;;  %v2325_v61 = vclamps-f32 %v1524_v22, 256.0 }
 0x44a   : > { %vm1740_vm15 = vcmp.ge.f32.partialorder %v1732_v35, 0.0  ;;  %v1509_v45 = vmul.f32 0.2, %v1493_v59  ;;  %v1961_v47 = vmul.f32 1.4142135, %v1953_v62  ;;  %vm1502_vm1 = vcmp.ge.f32.partialorder %v1494_v24, 0.0 }
 0x44b   : > { %v1960_v27 = vmul.f32 1.4142135, %v1952_v32  ;;  %vm1501_vm3 = vcmp.ge.f32.partialorder %v1493_v59, 0.0  ;;  %v2334_v58 = vclamps-f32 %v1762_v54, 256.0  ;;  %v1755_v52 = vsel %vm1739_vm0, %v1731_v46, %v1747_v0 }
 0x44c   : > { %2196 = vrot.lane.b32.xlu1 %v2361_v10, %s2414_s21  ;;  %v1931_v26 = vadd.f32 %v1923_v7, %v3958_v60  ;;  %v1725_v2 = vadd.f32 %v3654_v5, %v3611_v49  ;;  %v1467_v31 = vadd.f32 %v3944_v48, %v3652_v56  ;;  %v1756_v55 = vsel %vm1740_vm15, %v1732_v35, %v1748_v36 }
 0x44d   : > { %2194 = vrot.lane.b32.xlu0 %v2360_v9, %s2414_s21  ;;  %v1930_v20 = vadd.f32 %v1922_v43, %v3958_v60  ;;  %v1517_v30 = vsel %vm1501_vm3, %v1493_v59, %v1509_v45  ;;  %v2348_v53 = vclamps-f32 %v1961_v47, 256.0  ;;  %v2347_v19 = vclamps-f32 %v1960_v27, 256.0 }
 0x44e   : > { %v1763_v29 = vmul.f32 1.4142135, %v1755_v52  ;;  %v1518_v1 = vsel %vm1502_vm1, %v1494_v24, %v1510_v39  ;;  %v1764_v17 = vmul.f32 1.4142135, %v1756_v55  ;;  %v1947_v50 = vmul.f32 0.2, %v1931_v26 }
 0x44f   : > { %v1733_v38 = vadd.f32 %v1725_v2, %v3958_v60  ;;  %v2121_v49 = vadd.f32 %v3676_v12, %v3602_v51  ;;  %v1495_v48 = vadd.f32 %v3958_v60, %v1467_v31  ;;  %vm1939_vm4 = vcmp.ge.f32.partialorder %v1931_v26, 0.0 }
 0x450   : > { %1560 = vrot.lane.b32.xlu1 %v2325_v61, %s2414_s21  ;;  %v1946_v56 = vmul.f32 0.2, %v1930_v20  ;;  %v2120_v5 = vadd.f32 %v3676_v12, %v3629_v3  ;;  %vm1938_vm5 = vcmp.ge.f32.partialorder %v1930_v20, 0.0  ;;  %v2335_v37 = vclamps-f32 %v1763_v29, 256.0 }
 0x451   : > { %1798 = vrot.lane.b32.xlu0 %v2334_v58, %s2414_s21  ;;  %v1526_v6 = vmul.f32 1.4142135, %v1518_v1  ;;  %v1525_v8 = vmul.f32 1.4142135, %v1517_v30  ;;  %v2336_v57 = vclamps-f32 %v1764_v17, 256.0  ;;  %v1955_v23 = vsel %vm1939_vm4, %v1931_v26, %v1947_v50 }
 0x452   : > { %v1749_v42 = vmul.f32 0.2, %v1733_v38  ;;  %v2129_v51 = vadd.f32 %v2121_v49, %v3958_v60  ;;  %v1954_v14 = vsel %vm1938_vm5, %v1930_v20, %v1946_v56  ;;  %vm1741_vm6 = vcmp.ge.f32.partialorder %v1733_v38, 0.0 }
 0x453   : > { %v1511_v33 = vmul.f32 0.2, %v1495_v48  ;;  %v2128_v28 = vadd.f32 %v2120_v5, %v3958_v60  ;;  %vm1503_vm7 = vcmp.ge.f32.partialorder %v1495_v48, 0.0  ;;  %v2327_v3 = vclamps-f32 %v1526_v6, 256.0 }
 0x454   : > { %1998 = vrot.lane.b32.xlu1 %v2348_v53, %s2414_s21  ;;  %v1963_v12 = vmul.f32 1.4142135, %v1955_v23  ;;  %v2326_v34 = vclamps-f32 %v1525_v8, 256.0  ;;  %v1962_v21 = vmul.f32 1.4142135, %v1954_v14  ;;  %v1757_v16 = vsel %vm1741_vm6, %v1733_v38, %v1749_v42 }
 0x455   : > { %1996 = vrot.lane.b32.xlu0 %v2347_v19, %s2414_s21  ;;  %v2145_v44 = vmul.f32 0.2, %v2129_v51  ;;  %v1519_v41 = vsel %vm1503_vm7, %v1495_v48, %v1511_v33  ;;  %vm2137_vm8 = vcmp.ge.f32.partialorder %v2129_v51, 0.0  ;;  %v2144_v15 = vmul.f32 0.2, %v2128_v28 }
 0x456   : > { %vm2136_vm9 = vcmp.ge.f32.partialorder %v2128_v28, 0.0  ;;  %v2350_v40 = vclamps-f32 %v1963_v12, 256.0  ;;  %v1765_v11 = vmul.f32 1.4142135, %v1757_v16  ;;  %v2349_v13 = vclamps-f32 %v1962_v21, 256.0 }
 0x457   : > { %v1527_v4 = vmul.f32 1.4142135, %v1519_v41  ;;  %v2153_v46 = vsel %vm2137_vm8, %v2129_v51, %v2145_v44  ;;  %v2152_v25 = vsel %vm2136_vm9, %v2128_v28, %v2144_v15 }
 0x458   : > { %1800 = vrot.lane.b32.xlu1 %v2335_v37, %s2414_s21  ;;  %v2337_v60 = vclamps-f32 %v1765_v11, 256.0  ;;  %v2161_v35 = vmul.f32 1.4142135, %v2153_v46  ;;  %v2160_v24 = vmul.f32 1.4142135, %v2152_v25 }
 0x459   : > { %1802 = vrot.lane.b32.xlu0 %v2336_v57, %s2414_s21  ;;  %v2328_v59 = vclamps-f32 %v1527_v4, 256.0 }
 0x45a   : > { %v2363_v18 = vclamps-f32 %v2161_v35, 256.0  ;;  %v2362_v63 = vclamps-f32 %v2160_v24, 256.0 }
 0x45c   : > { %1564 = vrot.lane.b32.xlu1 %v2327_v3, %s2414_s21 }
 0x45d   : > { %1562 = vrot.lane.b32.xlu0 %v2326_v34, %s2414_s21 }
 0x460   : > { %2002 = vrot.lane.b32.xlu1 %v2350_v40, %s2414_s21 }
 0x461   : > { %2000 = vrot.lane.b32.xlu0 %v2349_v13, %s2414_s21 }
 0x464   : > { %1804 = vrot.lane.b32.xlu1 %v2337_v60, %s2414_s21 }
 0x465   : > { %1566 = vrot.lane.b32.xlu0 %v2328_v59, %s2414_s21 }
 0x468   : > { %2200 = vrot.lane.b32.xlu1 %v2363_v18, %s2414_s21 }
 0x469   : > { %2198 = vrot.lane.b32.xlu0 %v2362_v63, %s2414_s21 }
 0x49d   : > { %v1991_v22 = vpop.permute.xlu1 %1990 }
 0x49e   : > { %v1989_v10 = vpop.permute.xlu0 %1988 }
 0x49f   : > { %v2004_v9 = vsel %vm492_vm2, %v1989_v10, %v1991_v22 }
 0x4a0   : > { %2351 = vst [vmem:[%s3803_s11 + $0x40] sm:$0xff] %v2004_v9 }
 0x4a2   : > { %v2189_v54 = vpop.permute.xlu1 %2188 }
 0x4a3   : > { %v2187_v62 = vpop.permute.xlu0 %2186 }
 0x4a4   : > { %v2202_v32 = vsel %vm492_vm2, %v2187_v62, %v2189_v54 }
 0x4a5   : > { %2364 = vst [vmem:[%s3803_s11 + $0x60] sm:$0xff] %v2202_v32 }
 0x4a6   : > { %v1995_v0 = vpop.permute.xlu1 %1994 }
 0x4a7   : > { %v1791_v7 = vpop.permute.xlu0 %1790 }
 0x4aa   : > { %v2193_v36 = vpop.permute.xlu1 %2192 }
 0x4ab   : > { %v1555_v43 = vpop.permute.xlu0 %1554 }
 0x4ae   : > { %v1553_v39 = vpop.permute.xlu1 %1552 }
 0x4af   : > { %v1569_v61 = vsel %vm492_vm2, %v1553_v39, %v1555_v43  ;;  %v1993_v45 = vpop.permute.xlu0 %1992 }
 0x4b0   : > { %1577 = vst [vmem:[%s3803_s11] sm:$0xff] %v1569_v61  ;;  %v2005_v47 = vsel %vm492_vm2, %v1993_v45, %v1995_v0 }
 0x4b1   : > { %2352 = vst [vmem:[%s3803_s11 + $0x48] sm:$0xff] %v2005_v47 }
 0x4b2   : > { %v1793_v27 = vpop.permute.xlu1 %1792 }
 0x4b3   : > { %v1806_v58 = vsel %vm492_vm2, %v1791_v7, %v1793_v27  ;;  %v2191_v52 = vpop.permute.xlu0 %2190 }
 0x4b4   : > { %2338 = vst [vmem:[%s3803_s11 + $0x20] sm:$0xff] %v1806_v58  ;;  %v2203_v26 = vsel %vm492_vm2, %v2191_v52, %v2193_v36 }
 0x4b5   : > { %2365 = vst [vmem:[%s3803_s11 + $0x68] sm:$0xff] %v2203_v26 }
 0x4b6   : > { %v1557_v2 = vpop.permute.xlu1 %1556 }
 0x4b7   : > { %v1795_v31 = vpop.permute.xlu0 %1794 }
 0x4ba   : > { %v1797_v55 = vpop.permute.xlu1 %1796 }
 0x4bb   : > { %v1807_v20 = vsel %vm492_vm2, %v1795_v31, %v1797_v55  ;;  %v1559_v30 = vpop.permute.xlu0 %1558 }
 0x4bc   : > { %2339 = vst [vmem:[%s3803_s11 + $0x28] sm:$0xff] %v1807_v20  ;;  %v1570_v53 = vsel %vm492_vm2, %v1557_v2, %v1559_v30 }
 0x4bd   : > { %1578 = vst [vmem:[%s3803_s11 + $0x8] sm:$0xff] %v1570_v53 }
 0x4be   : > { %v2197_v19 = vpop.permute.xlu1 %2196 }
 0x4bf   : > { %v2195_v29 = vpop.permute.xlu0 %2194 }
 0x4c0   : > { %v2204_v1 = vsel %vm492_vm2, %v2195_v29, %v2197_v19 }
 0x4c1   : > { %2366 = vst [vmem:[%s3803_s11 + $0x70] sm:$0xff] %v2204_v1 }
 0x4c2   : > { %v1561_v17 = vpop.permute.xlu1 %1560 }
 0x4c3   : > { %v1799_v50 = vpop.permute.xlu0 %1798 }
 0x4c6   : > { %v1999_v38 = vpop.permute.xlu1 %1998 }
 0x4c7   : > { %v1997_v49 = vpop.permute.xlu0 %1996 }
 0x4c8   : > { %v2006_v48 = vsel %vm492_vm2, %v1997_v49, %v1999_v38 }
 0x4c9   : > { %2353 = vst [vmem:[%s3803_s11 + $0x50] sm:$0xff] %v2006_v48 }
 0x4ca   : > { %v1801_v56 = vpop.permute.xlu1 %1800 }
 0x4cb   : > { %v1808_v5 = vsel %vm492_vm2, %v1799_v50, %v1801_v56  ;;  %v1803_v37 = vpop.permute.xlu0 %1802 }
 0x4cc   : > { %2340 = vst [vmem:[%s3803_s11 + $0x30] sm:$0xff] %v1808_v5 }
 0x4ce   : > { %v1565_v6 = vpop.permute.xlu1 %1564 }
 0x4cf   : > { %v1563_v8 = vpop.permute.xlu0 %1562 }
 0x4d0   : > { %v1571_v57 = vsel %vm492_vm2, %v1561_v17, %v1563_v8 }
 0x4d1   : > { %1579 = vst [vmem:[%s3803_s11 + $0x10] sm:$0xff] %v1571_v57 }
 0x4d2   : > { %v2003_v23 = vpop.permute.xlu1 %2002 }
 0x4d3   : > { %v2001_v42 = vpop.permute.xlu0 %2000 }
 0x4d4   : > { %v2007_v51 = vsel %vm492_vm2, %v2001_v42, %v2003_v23 }
 0x4d5   : > { %2354 = vst [vmem:[%s3803_s11 + $0x58] sm:$0xff] %v2007_v51 }
 0x4d6   : > { %v1805_v14 = vpop.permute.xlu1 %1804 }
 0x4d7   : > { %v1809_v33 = vsel %vm492_vm2, %v1803_v37, %v1805_v14  ;;  %v1567_v28 = vpop.permute.xlu0 %1566 }
 0x4d8   : > { %2341 = vst [vmem:[%s3803_s11 + $0x38] sm:$0xff] %v1809_v33  ;;  %v1572_v3 = vsel %vm492_vm2, %v1565_v6, %v1567_v28 }
 0x4d9   : > { %1580 = vst [vmem:[%s3803_s11 + $0x18] sm:$0xff] %v1572_v3 }
 0x4da   : > { %v2201_v12 = vpop.permute.xlu1 %2200 }
 0x4db   : > { %v2199_v34 = vpop.permute.xlu0 %2198 }
 0x4dc   : > { %v2205_v21 = vsel %vm492_vm2, %v2199_v34, %v2201_v12 }
 0x4dd   : > { %2367 = vst [vmem:[%s3803_s11 + $0x78] sm:$0xff] %v2205_v21 }
 0x4de PF: > { %s19_s30 = sadd.s32 1, %s2409_s30  }
 0x4df   : > { %p16_p4 = scmp.ge.s32.totalorder %s19_s30, 4  }
 0x4e1   :  { %18 = sbr.rel (!%p16_p4) target bundleno = 1 (0x1), region = 95 }

// kernel: _lambda_.11
= control target key start
LH: loop header
LB: loop body
LE: loop exit
PB: predicated region body
PF: predicated region fallthrough
CT: control target
= control target key end

     0   :  { %s1681_s30 = smov 0   ;;  %s2285_s0 = inlined_call_operand.vmem [shape: f32[2,32,275], index: 0, kind: input, shape index: {}]   ;;  %s2286_s1 = inlined_call_operand.vmem [shape: bf16[16,128], index: 1, kind: input, shape index: {}]   ;;  %s2287_s2 = inlined_call_operand.vmem [shape: bf16[16,64], index: 2, kind: input, shape index: {}]   ;;  %s2288_s3 = inlined_call_operand.vmem [shape: bf16[16,64], index: 3, kind: input, shape index: {}]   ;;  %s2289_s4 = inlined_call_operand.vmem [shape: bf16[16,32], index: 4, kind: input, shape index: {}]   ;;  %s2290_s5 = inlined_call_operand.vmem [shape: f32[2,32,1], index: 5, kind: input, shape index: {}]   ;;  %s2291_s6 = inlined_call_operand.vmem [shape: f32[2,16,1], index: 6, kind: input, shape index: {}]   ;;  %s2292_s7 = inlined_call_operand.vmem [shape: f32[16,1], index: 7, kind: input, shape index: {}]   ;;  %s2293_s8 = inlined_call_operand.vmem [shape: f32[4,128], index: 8, kind: input, shape index: {}]   ;;  %s2294_s9 = inlined_call_operand.vmem [shape: f32[2,4,16,128], index: 9, kind: output, shape index: {}]  }
   0x1 LB: > { %s1544_s10 = sadd.s32 4294967295, %s1622_s30   ;;  %p1548_p0 = scmp.ge.s32.totalorder %s1622_s30, 1  ;;  %s1622_s30 = sphi %s1681_s30, %s19_s30  }
   0x2   : > { %p307_p1 = scmp.lt.s32.totalorder %s1622_s30, 3 }
   0x4   : > { %p308_p2 = pnand %p1548_p0, %p307_p1 }
   0x5   : > { %p353_p3 = scmp.lt.s32.totalorder (!%p308_p2), %s1544_s10, 1  ;;  %v1624_v0 = vmov (!%p308_p2), 0   ;;  %s1625_s19 = smov (!%p308_p2), 117   ;;  %vm469_vm0 = vcmask (!%p308_p2), 957440   ;;  %vm448_vm1 = vcmask (!%p308_p2), 1039360   ;;  %vm490_vm2 = vcmask (!%p308_p2), 949248  }
   0x6   : > { %311 = sbr.rel (%p308_p2) target bundleno = 1117 (0x45d), region = 56  ;;  %1610 = vset.pattern.permute.xlu0 (!%p308_p2), %v1624_v0  ;;  %1611 = vset.pattern.permute.xlu1 (!%p308_p2), %v1624_v0  ;;  %s1626_s20 = smov (!%p308_p2), 127   ;;  %v996_v63 = vld [vmem:[%s2292_s7 + $0x8] sm:$0xff] (!%p308_p2)  ;;  %vm591_vm3 = vcmask (!%p308_p2), 523264   ;;  %vm726_vm4 = vcmask (!%p308_p2), 261120   ;;  %vm824_vm5 = vcmask (!%p308_p2), 7168  }
   0x7   : > { %627 = vmatprep.mubr.bf16.mxu1 (!%p308_p2), %v1624_v0  ;;  %539 = vmatprep.mubr.bf16.mxu0 (!%p308_p2), %v1624_v0  ;;  %s1627_s21 = smov (!%p308_p2), 116   ;;  %s1629_s27 = smov (!%p308_p2), 12   ;;  %vm1044_vm6 = vcmask (!%p308_p2), 89088  }
   0xd   : > { %s2296_s10 = smov (!%p353_p3, %s1544_s10), 1 }
   0xe   : > { %s1591_s11 = sshll.u32 %s2296_s10, 5  ;;  %s1594_s15 = smul.u32 96, %s2296_s10 }
   0xf   : > { %s362_s14 = scalar_lea.vmem %s2290_s5, %s1591_s11  ;;  %s1592_s22 = sshll.u32 %s2296_s10, 4 }
  0x10   : > { %v386_v1 = vld [vmem:[%s362_s14] sm:$0xff]  ;;  %v388_v2 = vld [vmem:[%s362_s14 + $0x10] sm:$0xff]  ;;  %v387_v3 = vld [vmem:[%s362_s14 + $0x8] sm:$0xff]  ;;  %s357_s18 = scalar_lea.vmem %s2285_s0, %s1594_s15  ;;  %s367_s25 = scalar_lea.vmem %s2291_s6, %s1592_s22 }
  0x11   : > { %394 = vperm.xlu0 %1610, %v386_v1   ;;  %404 = vperm.xlu1 %1611, %v388_v2   ;;  %v389_v4 = vld [vmem:[%s362_s14 + $0x18] sm:$0xff]  ;;  %v374_v6 = vld [vmem:[%s357_s18] sm:$0xff]  ;;  %v375_v8 = vld [vmem:[%s357_s18 + $0x8] sm:$0xff]  ;;  %s1628_s22 = smov 1  }
  0x12   : > { %v376_v9 = vld [vmem:[%s357_s18 + $0x10] sm:$0xff]  ;;  %v381_v10 = vld [vmem:[%s357_s18 + $0x38] sm:$0xff]  ;;  %v378_v12 = vld [vmem:[%s357_s18 + $0x20] sm:$0xff] }
  0x13   : > { %v377_v11 = vld [vmem:[%s357_s18 + $0x18] sm:$0xff]  ;;  %v379_v13 = vld [vmem:[%s357_s18 + $0x28] sm:$0xff]  ;;  %v380_v14 = vld [vmem:[%s357_s18 + $0x30] sm:$0xff] }
  0x14   : > { %v384_v15 = vld [vmem:[%s357_s18 + $0x50] sm:$0xff]  ;;  %v383_v21 = vld [vmem:[%s357_s18 + $0x48] sm:$0xff]  ;;  %v382_v32 = vld [vmem:[%s357_s18 + $0x40] sm:$0xff] }
  0x15   : > { %399 = vperm.xlu0 %1610, %v387_v3   ;;  %409 = vperm.xlu1 %1611, %v389_v4   ;;  %v385_v33 = vld [vmem:[%s357_s18 + $0x58] sm:$0xff]  ;;  %v391_v62 = vld [vmem:[%s367_s25 + $0x8] sm:$0xff]  ;;  %v390_v1 = vld [vmem:[%s367_s25] sm:$0xff] }
  0x16   : > { %v995_v2 = vld [vmem:[%s2292_s7] sm:$0xff] }
  0x90   : > { %v395_v5 = vpop.permute.xlu0 %394  ;;  %v405_v7 = vpop.permute.xlu1 %404 }
  0x91   : > { %v412_v16 = vmul.f32 %v395_v5, %v374_v6  ;;  %v413_v17 = vmul.f32 %v395_v5, %v375_v8  ;;  %v419_v18 = vmul.f32 %v405_v7, %v381_v10  ;;  %v414_v22 = vmul.f32 %v395_v5, %v376_v9 }
  0x92   : > { %v418_v26 = vmul.f32 %v405_v7, %v380_v14  ;;  %v420_v35 = vmul.f32 %v405_v7, %v382_v32 }
  0x94   : > { %v400_v19 = vpop.permute.xlu0 %399  ;;  %v410_v20 = vpop.permute.xlu1 %409 }
  0x95   : > { %v415_v23 = vmul.f32 %v400_v19, %v377_v11  ;;  %v416_v24 = vmul.f32 %v400_v19, %v378_v12  ;;  %v417_v25 = vmul.f32 %v400_v19, %v379_v13  ;;  %v422_v27 = vmul.f32 %v410_v20, %v384_v15 }
  0x96   : > { %v421_v28 = vmul.f32 %v410_v20, %v383_v21  ;;  %v423_v36 = vmul.f32 %v410_v20, %v385_v33 }
  0x97   : > { %v426_v29 = vpack.c.bf16 %v417_v25, %v414_v22  ;;  %v425_v30 = vpack.c.bf16 %v416_v24, %v413_v17  ;;  %v424_v31 = vpack.c.bf16 %v415_v23, %v412_v16  ;;  %v428_v34 = vpack.c.bf16 %v422_v27, %v419_v18  ;;  %v1612_v17 = vld [vmem:[%s2287_s2] sm:$0xff]  }
  0x98   : > { %v427_v37 = vpack.c.bf16 %v421_v28, %v418_v26  ;;  %v429_v38 = vpack.c.bf16 %v423_v36, %v420_v35  ;;  %v1613_v22 = vld [vmem:[%s2286_s1] sm:$0xff]  }
  0x99   : > { %461 = vrot.lane.b32.xlu1 %v426_v29, %s1625_s19  ;;  %459 = vrot.lane.b32.xlu0 %v425_v30, %s1625_s19  ;;  %v1614_v28 = vld [vmem:[%s2289_s4] sm:$0xff]  }
  0x9a   : > { %507 = vmatprep.subr.bf16.mxu0 %v425_v30 }
  0x9b   : > { %508 = vmatpush1.bf16.msra.mxu0 %v424_v31 }
  0x9c   : > { %509 = vmatprep.subr.bf16.mxu0 %v428_v34 }
  0x9d   : > { %465 = vrot.lane.b32.xlu1 %v428_v34, %s1625_s19  ;;  %457 = vrot.lane.b32.xlu0 %v424_v31, %s1625_s19 }
  0x9f   : > { %510 = vmatpush1.bf16.msra.mxu0 %v427_v37 }
  0xa1   : > { %463 = vrot.lane.b32.xlu1 %v427_v37, %s1625_s19  ;;  %467 = vrot.lane.b32.xlu0 %v429_v38, %s1625_s19 }
  0xa5   : > { %440 = vrot.lane.b32.xlu1 %v426_v29, %s1626_s20  ;;  %438 = vrot.lane.b32.xlu0 %v425_v30, %s1626_s20 }
  0xa9   : > { %444 = vrot.lane.b32.xlu1 %v428_v34, %s1626_s20  ;;  %436 = vrot.lane.b32.xlu0 %v424_v31, %s1626_s20 }
  0xad   : > { %442 = vrot.lane.b32.xlu1 %v427_v37, %s1626_s20  ;;  %446 = vrot.lane.b32.xlu0 %v429_v38, %s1626_s20 }
  0xb1   : > { %482 = vrot.lane.b32.xlu1 %v426_v29, %s1627_s21  ;;  %480 = vrot.lane.b32.xlu0 %v425_v30, %s1627_s21 }
 0x10b   : > { %v462_v39 = vpop.permute.xlu1 %461  ;;  %v460_v40 = vpop.permute.xlu0 %459 }
 0x10c   : > { %575 = vrot.lane.b32.xlu1 %v462_v39, %s1626_s20  ;;  %v1726_v48 = vsel %vm469_vm0, %v460_v40, %v462_v39 }
 0x10f   : > { %v466_v41 = vpop.permute.xlu1 %465  ;;  %v458_v42 = vpop.permute.xlu0 %457 }
 0x110   : > { %486 = vrot.lane.b32.xlu1 %v428_v34, %s1627_s21  ;;  %v1737_v53 = vsel %vm469_vm0, %v458_v42, %v460_v40 }
 0x113   : > { %v464_v43 = vpop.permute.xlu1 %463  ;;  %v468_v44 = vpop.permute.xlu0 %467 }
 0x114   : > { %581 = vrot.lane.b32.xlu0 %v468_v44, %s1626_s20  ;;  %v1721_v45 = vsel %vm469_vm0, %v466_v41, %v468_v44  ;;  %v1731_v49 = vsel %vm469_vm0, %v464_v43, %v466_v41 }
 0x115   : > { %579 = vrot.lane.b32.xlu1 %v1721_v45, %s1626_s20 }
 0x117   : > { %v441_v46 = vpop.permute.xlu1 %440  ;;  %v439_v47 = vpop.permute.xlu0 %438 }
 0x118   : > { %573 = vrot.lane.b32.xlu0 %v1726_v48, %s1626_s20  ;;  %v450_v50 = vsel %vm448_vm1, %v439_v47, %v441_v46 }
 0x119   : > { %577 = vrot.lane.b32.xlu1 %v1731_v49, %s1626_s20  ;;  %511 = vmatprep.subr.bf16.mxu0 %v450_v50 }
 0x11a   : > { %595 = vmatprep.subr.bf16.mxu1 %v450_v50 }
 0x11b   : > { %v445_v51 = vpop.permute.xlu1 %444  ;;  %v437_v52 = vpop.permute.xlu0 %436 }
 0x11c   : > { %571 = vrot.lane.b32.xlu0 %v1737_v53, %s1626_s20  ;;  %v449_v54 = vsel %vm448_vm1, %v437_v52, %v439_v47 }
 0x11d   : > { %484 = vrot.lane.b32.xlu1 %v427_v37, %s1627_s21  ;;  %512 = vmatpush1.bf16.msra.mxu0 %v449_v54 }
 0x11e   : > { %596 = vmatpush1.bf16.msra.mxu1 %v449_v54 }
 0x11f   : > { %v443_v55 = vpop.permute.xlu1 %442  ;;  %v447_v56 = vpop.permute.xlu0 %446 }
 0x120   : > { %478 = vrot.lane.b32.xlu0 %v424_v31, %s1627_s21  ;;  %v452_v57 = vsel %vm448_vm1, %v445_v51, %v447_v56  ;;  %v451_v58 = vsel %vm448_vm1, %v443_v55, %v445_v51 }
 0x121   : > { %653 = vrot.lane.b32.xlu1 %v441_v46, %s1625_s19  ;;  %513 = vmatprep.subr.bf16.mxu0 %v452_v57 }
 0x122   : > { %597 = vmatprep.subr.bf16.mxu1 %v452_v57  ;;  %514 = vmatpush1.bf16.msra.mxu0 %v451_v58 }
 0x123   : > { %598 = vmatpush1.bf16.msra.mxu1 %v451_v58  ;;  %515 = vmatprep.subr.bf16.mxu0 %v1726_v48  ;;  %v483_v59 = vpop.permute.xlu1 %482  ;;  %v481_v60 = vpop.permute.xlu0 %480 }
 0x124   : > { %488 = vrot.lane.b32.xlu0 %v429_v38, %s1627_s21  ;;  %v492_v61 = vsel %vm490_vm2, %v481_v60, %v483_v59 }
 0x125   : > { %657 = vrot.lane.b32.xlu1 %v452_v57, %s1625_s19 }
 0x126   : > { %516 = vmatpush1.bf16.msra.mxu0 %v1737_v53 }
 0x127   : > { %517 = vmatprep.subr.bf16.mxu0 %v1721_v45 }
 0x128   : > { %651 = vrot.lane.b32.xlu0 %v450_v50, %s1625_s19 }
 0x129   : > { %655 = vrot.lane.b32.xlu1 %v451_v58, %s1625_s19 }
 0x12a   : > { %518 = vmatpush1.bf16.msra.mxu0 %v1731_v49 }
 0x12b   : > { %519 = vmatprep.subr.bf16.mxu0 %v492_v61 }
 0x12c   : > { %649 = vrot.lane.b32.xlu0 %v449_v54, %s1625_s19 }
 0x12d   : > { %557 = vperm.xlu1 %1611, %v391_v62  }
 0x130   : > { %659 = vrot.lane.b32.xlu0 %v447_v56, %s1625_s19 }
 0x131   : > { %1083 = vperm.xlu1 %1611, %v996_v63  }
 0x134   : > { %552 = vperm.xlu0 %1610, %v390_v1  }
 0x138   : > { %1078 = vperm.xlu0 %1610, %v995_v2  }
 0x17e   : > { %v576_v3 = vpop.permute.xlu1 %575 }
 0x182   : > { %v487_v4 = vpop.permute.xlu1 %486 }
 0x186   : > { %v582_v5 = vpop.permute.xlu0 %581 }
 0x187   : > { %v580_v6 = vpop.permute.xlu1 %579 }
 0x188   : > { %v586_v13 = vsel %vm448_vm1, %v580_v6, %v582_v5 }
 0x18a   : > { %v574_v7 = vpop.permute.xlu0 %573 }
 0x18b   : > { %v578_v8 = vpop.permute.xlu1 %577  ;;  %v584_v9 = vsel %vm448_vm1, %v574_v7, %v576_v3 }
 0x18c   : > { %599 = vmatprep.subr.bf16.mxu1 %v584_v9  ;;  %v585_v16 = vsel %vm448_vm1, %v578_v8, %v580_v6 }
 0x18e   : > { %v572_v10 = vpop.permute.xlu0 %571 }
 0x18f   : > { %v485_v11 = vpop.permute.xlu1 %484  ;;  %v583_v12 = vsel %vm448_vm1, %v572_v10, %v574_v7 }
 0x190   : > { %600 = vmatpush1.bf16.msra.mxu1 %v583_v12  ;;  %v493_v21 = vsel %vm490_vm2, %v485_v11, %v487_v4 }
 0x191   : > { %601 = vmatprep.subr.bf16.mxu1 %v586_v13 }
 0x192   : > { %v479_v14 = vpop.permute.xlu0 %478 }
 0x193   : > { %v491_v15 = vsel %vm490_vm2, %v479_v14, %v481_v60  ;;  %v654_v18 = vpop.permute.xlu1 %653 }
 0x194   : > { %520 = vmatpush1.bf16.msra.mxu0 %v491_v15  ;;  %602 = vmatpush1.bf16.msra.mxu1 %v585_v16 }
 0x195   : > { %672 = vmatprep.subr.bf16.mxu1 %v1726_v48 }
 0x196   : > { %v489_v19 = vpop.permute.xlu0 %488 }
 0x197   : > { %1558 = vmatmul.mubr.msk.bf16.vlgmr.msra.gmra.mrb[0].mxu1 %vm591_vm3, %v1612_v17  ;;  %v494_v20 = vsel %vm490_vm2, %v487_v4, %v489_v19  ;;  %v658_v24 = vpop.permute.xlu1 %657 }
 0x198   : > { %521 = vmatprep.subr.bf16.mxu0 %v494_v20  ;;  %673 = vmatpush1.bf16.msra.mxu1 %v1737_v53 }
 0x199   : > { %522 = vmatpush1.bf16.msra.mxu0 %v493_v21  ;;  %674 = vmatprep.subr.bf16.mxu1 %v1721_v45 }
 0x19a   : > { %v652_v23 = vpop.permute.xlu0 %651  ;;  %730 = vmatprep.subr.bf16.mxu0 %v492_v61  ;;  %704 = vmatprep.mubr.bf16.mxu1 %v1624_v0 }
 0x19b   : > { %v662_v25 = vsel %vm469_vm0, %v652_v23, %v654_v18  ;;  %v656_v29 = vpop.permute.xlu1 %655 }
 0x19c   : > { %540 = vmatmul.mubr.bf16.vlgmr.msra.gmra.mrb[0].mxu0 %v1613_v22  ;;  %675 = vmatpush1.bf16.msra.mxu1 %v1731_v49  ;;  %v663_v32 = vsel %vm469_vm0, %v656_v29, %v658_v24  ;;  %v1568_v29 = vld [vmem:[%s2293_s8 + $0x1] ss:$0 sm:$0xff] }
 0x19d   : > { %676 = vmatprep.subr.bf16.mxu1 %v662_v25  ;;  %731 = vmatpush1.bf16.msra.mxu0 %v491_v15 }
 0x19e   : > { %v650_v26 = vpop.permute.xlu0 %649  ;;  %732 = vmatprep.subr.bf16.mxu0 %v494_v20  ;;  %762 = vmatprep.mubr.bf16.mxu0 %v1624_v0  ;;  %v1615_v0 = vld [vmem:[%s2288_s3] sm:$0xff]  }
 0x19f   : > { %v661_v27 = vsel %vm469_vm0, %v650_v26, %v652_v23 }
 0x1a0   : > { %677 = vmatpush1.bf16.msra.mxu1 %v661_v27 }
 0x1a1   : > { %733 = vmatpush1.bf16.msra.mxu0 %v493_v21 }
 0x1a2   : > { %v660_v30 = vpop.permute.xlu0 %659 }
 0x1a3   : > { %v664_v31 = vsel %vm469_vm0, %v658_v24, %v660_v30 }
 0x1a4   : > { %678 = vmatprep.subr.bf16.mxu1 %v664_v31  ;;  %1562 = vmatmul.mubr.msk.bf16.vlgmr.msra.gmra.mrb[4].mxu0 %vm726_vm4, %v1614_v28  ;;  %v1563_v28 = vld [vmem:[%s2293_s8] ss:$0 sm:$0xff] }
 0x1a5   : > { %679 = vmatpush1.bf16.msra.mxu1 %v663_v32 }
 0x1a8   : > { %1560 = vmatmul.mubr.msk.bf16.vlgmr.msra.gmra.mrb[4].mxu1 %vm591_vm3, %v1615_v0 }
 0x1ac   : > { %v1809_v46 = vpop.permute.xlu1 %557 }
 0x1b0   : > { %v1925_v31 = vpop.permute.xlu1 %1083 }
 0x1b3   : > { %v1799_v37 = vpop.permute.xlu0 %552 }
 0x1b7   : > { %v1923_v30 = vpop.permute.xlu0 %1078 }
 0x26a   : > { %v629_v33 = vpop.f32.mrb[0].mxu1 }
 0x26b   : > { %v631_v34 = vpop.f32.mrb[1].mxu1  ;;  %v1858_v8 = vmul.f32 %v629_v33, %v1799_v37 }
 0x26c   : > { %v633_v35 = vpop.f32.mrb[2].mxu1  ;;  %v1861_v9 = vmul.f32 %v631_v34, %v1799_v37 }
 0x26d   : > { %v635_v36 = vpop.f32.mrb[3].mxu1  ;;  %v808_v10 = vmul.f32 0.25, %v1858_v8  ;;  %v1868_v12 = vmul.f32 %v633_v35, %v1809_v46 }
 0x26e   : > { %v809_v11 = vmul.f32 0.25, %v1861_v9  ;;  %v1871_v13 = vmul.f32 %v635_v36, %v1809_v46 }
 0x26f   : > { %v541_v38 = vpop.f32.mrb[0].mxu0  ;;  %v810_v14 = vmul.f32 0.25, %v1868_v12 }
 0x270   : > { %v560_v39 = vmul.f32 %v1799_v37, %v541_v38  ;;  %v543_v40 = vpop.f32.mrb[1].mxu0  ;;  %v811_v15 = vmul.f32 0.25, %v1871_v13 }
 0x271   : > { %v561_v41 = vmul.f32 %v1799_v37, %v543_v40  ;;  %v545_v42 = vpop.f32.mrb[2].mxu0 }
 0x272   : > { %v1803_v43 = vmul.f32 0.25, %v560_v39  ;;  %v547_v44 = vpop.f32.mrb[3].mxu0  ;;  %v1813_v47 = vmul.f32 0.75, %v560_v39  ;;  %v562_v48 = vmul.f32 %v1809_v46, %v545_v42 }
 0x273   : > { %v1805_v45 = vmul.f32 0.25, %v561_v41  ;;  %v1816_v49 = vmul.f32 0.75, %v561_v41  ;;  %v563_v50 = vmul.f32 %v1809_v46, %v547_v44 }
 0x274   : > { %789 = vrot.lane.b32.xlu0 %v1803_v43, %s1626_s20  ;;  %v1823_v54 = vmul.f32 0.25, %v562_v48  ;;  %v1831_v60 = vmul.f32 0.75, %v562_v48 }
 0x275   : > { %791 = vrot.lane.b32.xlu1 %v1805_v45, %s1626_s20  ;;  %v1825_v56 = vmul.f32 0.25, %v563_v50  ;;  %v1836_v63 = vmul.f32 0.75, %v563_v50 }
 0x277   : > { %v764_v51 = vpop.f32.mrb[4].mxu0 }
 0x278   : > { %847 = vrot.lane.b32.xlu0 %v1813_v47, %s1626_s20  ;;  %v766_v52 = vpop.f32.mrb[5].mxu0  ;;  %v1834_v61 = vmul.f32 %v764_v51, %v1799_v37 }
 0x279   : > { %849 = vrot.lane.b32.xlu1 %v1816_v49, %s1626_s20  ;;  %v768_v53 = vpop.f32.mrb[6].mxu0  ;;  %v1839_v1 = vmul.f32 %v766_v52, %v1799_v37 }
 0x27a   : > { %v770_v55 = vpop.f32.mrb[7].mxu0  ;;  %v917_v2 = vmul.f32 0.25, %v1834_v61  ;;  %v1848_v4 = vmul.f32 %v768_v53, %v1809_v46 }
 0x27b   : > { %v706_v57 = vpop.f32.mrb[4].mxu1  ;;  %v918_v3 = vmul.f32 0.25, %v1839_v1  ;;  %v1851_v5 = vmul.f32 %v770_v55, %v1809_v46 }
 0x27c   : > { %v708_v58 = vpop.f32.mrb[5].mxu1  ;;  %793 = vrot.lane.b32.xlu0 %v1823_v54, %s1626_s20  ;;  %v919_v6 = vmul.f32 0.25, %v1848_v4  ;;  %v715_v16 = vmul.f32 %v706_v57, %v1799_v37 }
 0x27d   : > { %v710_v59 = vpop.f32.mrb[6].mxu1  ;;  %795 = vrot.lane.b32.xlu1 %v1825_v56, %s1626_s20  ;;  %v920_v7 = vmul.f32 0.25, %v1851_v5  ;;  %v716_v17 = vmul.f32 %v708_v58, %v1799_v37  ;;  %v835_v58 = vmul.f32 0.75, %v1858_v8 }
 0x27e   : > { %v712_v62 = vpop.f32.mrb[7].mxu1  ;;  %v1881_v18 = vmul.f32 0.25, %v715_v16  ;;  %v1889_v20 = vmul.f32 0.75, %v715_v16  ;;  %v717_v21 = vmul.f32 %v710_v59, %v1809_v46 }
 0x27f   : > { %v1883_v19 = vmul.f32 0.25, %v716_v17  ;;  %v1892_v22 = vmul.f32 0.75, %v716_v17  ;;  %v718_v23 = vmul.f32 %v712_v62, %v1809_v46 }
 0x280   : > { %851 = vrot.lane.b32.xlu0 %v1831_v60, %s1626_s20  ;;  %v1899_v24 = vmul.f32 0.25, %v717_v21  ;;  %v1907_v26 = vmul.f32 0.75, %v717_v21 }
 0x281   : > { %853 = vrot.lane.b32.xlu1 %v1836_v63, %s1626_s20  ;;  %v1901_v25 = vmul.f32 0.25, %v718_v23  ;;  %v1909_v27 = vmul.f32 0.75, %v718_v23 }
 0x284   : > { %925 = vrot.lane.b32.xlu0 %v917_v2, %s1628_s22 }
 0x285   : > { %927 = vrot.lane.b32.xlu1 %v918_v3, %s1628_s22 }
 0x288   : > { %977 = vrot.lane.b32.xlu0 %v917_v2, %s1626_s20 }
 0x289   : > { %979 = vrot.lane.b32.xlu1 %v918_v3, %s1626_s20  ;;  %v836_v3 = vmul.f32 0.75, %v1861_v9 }
 0x28c   : > { %929 = vrot.lane.b32.xlu0 %v919_v6, %s1628_s22 }
 0x28d   : > { %931 = vrot.lane.b32.xlu1 %v920_v7, %s1628_s22 }
 0x290   : > { %981 = vrot.lane.b32.xlu0 %v919_v6, %s1626_s20 }
 0x291   : > { %983 = vrot.lane.b32.xlu1 %v920_v7, %s1626_s20 }
 0x294   : > { %816 = vrot.lane.b32.xlu0 %v808_v10, %s1628_s22 }
 0x295   : > { %818 = vrot.lane.b32.xlu1 %v809_v11, %s1628_s22 }
 0x298   : > { %869 = vrot.lane.b32.xlu0 %v808_v10, %s1626_s20 }
 0x299   : > { %871 = vrot.lane.b32.xlu1 %v809_v11, %s1626_s20 }
 0x29c   : > { %820 = vrot.lane.b32.xlu0 %v810_v14, %s1628_s22 }
 0x29d   : > { %822 = vrot.lane.b32.xlu1 %v811_v15, %s1628_s22 }
 0x2a0   : > { %873 = vrot.lane.b32.xlu0 %v810_v14, %s1626_s20 }
 0x2a1   : > { %875 = vrot.lane.b32.xlu1 %v811_v15, %s1626_s20 }
 0x2a4   : > { %899 = vrot.lane.b32.xlu0 %v1881_v18, %s1626_s20 }
 0x2a5   : > { %901 = vrot.lane.b32.xlu1 %v1883_v19, %s1626_s20 }
 0x2a8   : > { %955 = vrot.lane.b32.xlu0 %v1889_v20, %s1626_s20 }
 0x2a9   : > { %957 = vrot.lane.b32.xlu1 %v1892_v22, %s1626_s20 }
 0x2ac   : > { %903 = vrot.lane.b32.xlu0 %v1899_v24, %s1626_s20 }
 0x2ad   : > { %905 = vrot.lane.b32.xlu1 %v1901_v25, %s1626_s20 }
 0x2b0   : > { %959 = vrot.lane.b32.xlu0 %v1907_v26, %s1626_s20 }
 0x2b1   : > { %961 = vrot.lane.b32.xlu1 %v1909_v27, %s1626_s20  ;;  %s1630_s20 = smov 11  }
 0x2b4   : > { %1069 = vrot.lane.b32.xlu0 %v1563_v28, %s1629_s27  ;;  %v838_v28 = vmul.f32 0.75, %v1871_v13 }
 0x2b5   : > { %1203 = vrot.lane.b32.xlu1 %v1568_v29, %s1629_s27 }
 0x2e6   : > { %v790_v32 = vpop.permute.xlu0 %789 }
 0x2e7   : > { %v792_v0 = vpop.permute.xlu1 %791 }
 0x2e8   : > { %v798_v48 = vsel %vm448_vm1, %v790_v32, %v792_v0 }
 0x2e9   : > { %v804_v53 = vadd.f32 %v798_v48, %v1813_v47 }
 0x2ea   : > { %v848_v33 = vpop.permute.xlu0 %847 }
 0x2eb   : > { %v850_v34 = vpop.permute.xlu1 %849 }
 0x2ec   : > { %v855_v52 = vsel %vm448_vm1, %v848_v33, %v850_v34  ;;  %v862_v55 = vadd.f32 %v850_v34, %v1805_v45 }
 0x2ed   : > { %v861_v59 = vadd.f32 %v855_v52, %v1803_v43 }
 0x2ee   : > { %v794_v35 = vpop.permute.xlu0 %793  ;;  %v866_v10 = vadd.f32 %v862_v55, %v836_v3 }
 0x2ef   : > { %v1927_v36 = vpop.permute.xlu1 %795  ;;  %v865_v11 = vadd.f32 %v861_v59, %v835_v58 }
 0x2f0   : > { %v799_v43 = vsel %vm448_vm1, %v794_v35, %v1927_v36 }
 0x2f1   : > { %v806_v29 = vadd.f32 %v799_v43, %v1831_v60  ;;  %v837_v60 = vmul.f32 0.75, %v1868_v12 }
 0x2f2   : > { %v852_v37 = vpop.permute.xlu0 %851 }
 0x2f3   : > { %v854_v38 = vpop.permute.xlu1 %853 }
 0x2f4   : > { %v864_v8 = vadd.f32 %v854_v38, %v1825_v56  ;;  %v856_v32 = vsel %vm448_vm1, %v852_v37, %v854_v38 }
 0x2f5   : > { %v863_v37 = vadd.f32 %v856_v32, %v1823_v54 }
 0x2f6   : > { %v1929_v39 = vpop.permute.xlu0 %925  ;;  %v868_v34 = vadd.f32 %v864_v8, %v838_v28 }
 0x2f7   : > { %v1931_v40 = vpop.permute.xlu1 %927 }
 0x2fa   : > { %v1933_v41 = vpop.permute.xlu0 %977 }
 0x2fb   : > { %v1935_v42 = vpop.permute.xlu1 %979 }
 0x2fe   : > { %v1937_v44 = vpop.permute.xlu0 %929 }
 0x2ff   : > { %v1939_v46 = vpop.permute.xlu1 %931 }
 0x302   : > { %v1942_v50 = vpop.permute.xlu0 %981 }
 0x303   : > { %v1944_v51 = vpop.permute.xlu1 %983 }
 0x306   : > { %v817_v57 = vpop.permute.xlu0 %816 }
 0x307   : > { %v831_v62 = vadd.f32 %v817_v57, %v804_v53  ;;  %v819_v2 = vpop.permute.xlu1 %818  ;;  %v805_v53 = vadd.f32 %v792_v0, %v1816_v49  ;;  %v867_v0 = vadd.f32 %v863_v37, %v837_v60 }
 0x308   : > { %v825_v35 = vsel %vm824_vm5, %v817_v57, %v819_v2 }
 0x309   : > { %v839_v6 = vadd.f32 %v835_v58, %v831_v62  ;;  %v832_v38 = vadd.f32 %v825_v35, %v805_v53 }
 0x30a   : > { %v870_v7 = vpop.permute.xlu0 %869 }
 0x30b   : > { %v872_v14 = vpop.permute.xlu1 %871  ;;  %v1952_v15 = vmul.f32 0.25, %v839_v6  ;;  %v1974_v13 = vmul.f32 0.75, %v839_v6  ;;  %v840_v54 = vadd.f32 %v836_v3, %v832_v38 }
 0x30c   : > { %v877_v47 = vsel %vm448_vm1, %v870_v7, %v872_v14  ;;  %v884_v16 = vadd.f32 %v872_v14, %v866_v10 }
 0x30d   : > { %v883_v45 = vadd.f32 %v877_v47, %v865_v11  ;;  %1009 = vrot.lane.b32.xlu0 %v1952_v15, %s1625_s19  ;;  %v807_v11 = vadd.f32 %v1927_v36, %v1836_v63 }
 0x30e   : > { %v1960_v9 = vmul.f32 0.25, %v884_v16  ;;  %v821_v17 = vpop.permute.xlu0 %820  ;;  %v1971_v56 = vmul.f32 0.75, %v884_v16 }
 0x30f   : > { %v823_v21 = vpop.permute.xlu1 %822  ;;  %v1962_v23 = vmul.f32 0.25, %v883_v45  ;;  %v833_v48 = vadd.f32 %v821_v17, %v806_v29  ;;  %v1985_v2 = vmul.f32 0.75, %v883_v45  ;;  %v2004_v45 = vmul.f32 0.25, %v840_v54 }
 0x310   : > { %1147 = vrot.lane.b32.xlu1 %v1960_v9, %s1625_s19  ;;  %v826_v6 = vsel %vm824_vm5, %v821_v17, %v823_v21  ;;  %v2015_v21 = vmul.f32 0.75, %v840_v54 }
 0x311   : > { %1145 = vrot.lane.b32.xlu0 %v1962_v23, %s1625_s19  ;;  %v841_v57 = vadd.f32 %v837_v60, %v833_v48  ;;  %v834_v3 = vadd.f32 %v826_v6, %v807_v11 }
 0x312   : > { %v874_v33 = vpop.permute.xlu0 %873 }
 0x313   : > { %v876_v52 = vpop.permute.xlu1 %875  ;;  %v1995_v10 = vmul.f32 0.25, %v841_v57  ;;  %v842_v63 = vadd.f32 %v838_v28, %v834_v3 }
 0x314   : > { %v886_v55 = vadd.f32 %v876_v52, %v868_v34  ;;  %1367 = vrot.lane.b32.xlu1 %v1971_v56, %s1625_s19  ;;  %v878_v49 = vsel %vm448_vm1, %v874_v33, %v876_v52  ;;  %v943_v33 = vmul.f32 0.75, %v1834_v61  ;;  %v933_v34 = vsel %vm824_vm5, %v1929_v39, %v1931_v40 }
 0x315   : > { %1261 = vrot.lane.b32.xlu0 %v1974_v13, %s1625_s19  ;;  %v885_v7 = vadd.f32 %v878_v49, %v867_v0  ;;  %v2030_v35 = vmul.f32 0.25, %v842_v63  ;;  %v944_v61 = vmul.f32 0.75, %v1839_v1  ;;  %v2046_v60 = vmul.f32 0.75, %v842_v63 }
 0x316   : > { %v1983_v58 = vmul.f32 0.25, %v886_v55  ;;  %v900_v59 = vpop.permute.xlu0 %899  ;;  %v1992_v12 = vmul.f32 0.75, %v886_v55 }
 0x317   : > { %v902_v62 = vpop.permute.xlu1 %901  ;;  %v2007_v8 = vmul.f32 0.25, %v885_v7  ;;  %v2032_v53 = vmul.f32 0.75, %v885_v7 }
 0x318   : > { %1151 = vrot.lane.b32.xlu1 %v1983_v58, %s1625_s19  ;;  %v907_v14 = vsel %vm448_vm1, %v900_v59, %v902_v62  ;;  %v914_v36 = vadd.f32 %v902_v62, %v1892_v22 }
 0x319   : > { %1365 = vrot.lane.b32.xlu0 %v1985_v2, %s1625_s19  ;;  %v913_v43 = vadd.f32 %v907_v14, %v1889_v20  ;;  %v2019_v20 = vmul.f32 0.75, %v841_v57  ;;  %v934_v14 = vsel %vm824_vm5, %v1937_v44, %v1939_v46 }
 0x31a   : > { %v956_v47 = vpop.permute.xlu0 %955  ;;  %v940_v22 = vadd.f32 %v933_v34, %v914_v36  ;;  %v1582_v36 = vld [vmem:[%s2293_s8 + $0x3] ss:$0 sm:$0xff] }
 0x31b   : > { %v958_v16 = vpop.permute.xlu1 %957  ;;  %v939_v29 = vadd.f32 %v1929_v39, %v913_v43  ;;  %v946_v43 = vmul.f32 0.75, %v1851_v5 }
 0x31c   : > { %1371 = vrot.lane.b32.xlu1 %v1992_v12, %s1625_s19  ;;  %v963_v17 = vsel %vm448_vm1, %v956_v47, %v958_v16  ;;  %v970_v28 = vadd.f32 %v958_v16, %v1883_v19  ;;  %v985_v19 = vsel %vm448_vm1, %v1933_v41, %v1935_v42  ;;  %v2044_v39 = vadd.f32 %v944_v61, %v940_v22 }
 0x31d   : > { %1013 = vrot.lane.b32.xlu0 %v1995_v10, %s1625_s19  ;;  %v969_v32 = vadd.f32 %v963_v17, %v1881_v18  ;;  %v2034_v55 = vadd.f32 %v943_v33, %v939_v29 }
 0x31e   : > { %v904_v48 = vpop.permute.xlu0 %903  ;;  %v974_v40 = vadd.f32 %v970_v28, %v944_v61  ;;  %v1029_v62 = vmul.f32 0.25, %v2044_v39 }
 0x31f   : > { %v973_v18 = vadd.f32 %v969_v32, %v943_v33  ;;  %v906_v52 = vpop.permute.xlu1 %905  ;;  %v1028_v37 = vmul.f32 0.25, %v2034_v55 }
 0x320   : > { %1011 = vrot.lane.b32.xlu1 %v2004_v45, %s1625_s19  ;;  %v908_v1 = vsel %vm448_vm1, %v904_v48, %v906_v52  ;;  %v2056_v41 = vadd.f32 %v1935_v42, %v974_v40  ;;  %v916_v6 = vadd.f32 %v906_v52, %v1909_v27 }
 0x321   : > { %1149 = vrot.lane.b32.xlu0 %v2007_v8, %s1625_s19  ;;  %v2049_v38 = vadd.f32 %v985_v19, %v973_v18  ;;  %v915_v49 = vadd.f32 %v908_v1, %v1907_v26  ;;  %v945_v26 = vmul.f32 0.75, %v1848_v4  ;;  %v986_v4 = vsel %vm448_vm1, %v1942_v50, %v1944_v51 }
 0x322   : > { %v960_v57 = vpop.permute.xlu0 %959  ;;  %v1164_v7 = vmul.f32 0.25, %v2056_v41  ;;  %v942_v47 = vadd.f32 %v934_v14, %v916_v6 }
 0x323   : > { %v962_v59 = vpop.permute.xlu1 %961  ;;  %v1163_v0 = vmul.f32 0.25, %v2049_v38  ;;  %v941_v11 = vadd.f32 %v1937_v44, %v915_v49 }
 0x324   : > { %1263 = vrot.lane.b32.xlu1 %v2015_v21, %s1625_s19  ;;  %v964_v54 = vsel %vm448_vm1, %v960_v57, %v962_v59  ;;  %v972_v16 = vadd.f32 %v962_v59, %v1901_v25 }
 0x325   : > { %1265 = vrot.lane.b32.xlu0 %v2019_v20, %s1625_s19  ;;  %v971_v42 = vadd.f32 %v964_v54, %v1899_v24  ;;  %v2075_v3 = vadd.f32 %v945_v26, %v941_v11  ;;  %v2083_v24 = vadd.f32 %v946_v43, %v942_v47 }
 0x326   : > { %v976_v44 = vadd.f32 %v972_v16, %v946_v43  ;;  %v2105_v29 = vpop.permute.xlu0 %1069 }
 0x327   : > { %v975_v27 = vadd.f32 %v971_v42, %v945_v26  ;;  %v1030_v17 = vmul.f32 0.25, %v2075_v3  ;;  %v1031_v25 = vmul.f32 0.25, %v2083_v24  ;;  %v2107_v32 = vpop.permute.xlu1 %1203 }
 0x328   : > { %1015 = vrot.lane.b32.xlu1 %v2030_v35, %s1625_s19  ;;  %v994_v5 = vadd.f32 %v1944_v51, %v976_v44  ;;  %v1575_v51 = vld [vmem:[%s2293_s8 + $0x2] ss:$0 sm:$0xff] }
 0x329   : > { %1369 = vrot.lane.b32.xlu0 %v2032_v53, %s1625_s19  ;;  %v993_v46 = vadd.f32 %v986_v4, %v975_v27  ;;  %v2135_v27 = vmul.f32 0.75, %v2034_v55  ;;  %v2144_v55 = vmul.f32 0.75, %v2049_v38 }
 0x32a   : > { %v1166_v50 = vmul.f32 0.25, %v994_v5  ;;  %v2119_v1 = vmul.f32 0.75, %v994_v5 }
 0x32b   : > { %v1165_v63 = vmul.f32 0.25, %v993_v46  ;;  %v1191_v42 = vmul.f32 0.75, %v993_v46 }
 0x32c   : > { %1267 = vrot.lane.b32.xlu1 %v2046_v60, %s1625_s19 }
 0x32d   : > { %1036 = vrot.lane.b32.xlu0 %v1028_v37, %s1630_s20 }
 0x330   : > { %1038 = vrot.lane.b32.xlu1 %v1029_v62, %s1630_s20 }
 0x331   : > { %1171 = vrot.lane.b32.xlu0 %v1163_v0, %s1630_s20 }
 0x334   : > { %1173 = vrot.lane.b32.xlu1 %v1164_v7, %s1630_s20 }
 0x335   : > { %1283 = vrot.lane.b32.xlu0 %v1028_v37, %s1625_s19 }
 0x338   : > { %1285 = vrot.lane.b32.xlu1 %v1029_v62, %s1625_s19 }
 0x339   : > { %1387 = vrot.lane.b32.xlu0 %v1163_v0, %s1625_s19 }
 0x33c   : > { %1389 = vrot.lane.b32.xlu1 %v1164_v7, %s1625_s19 }
 0x33d   : > { %1040 = vrot.lane.b32.xlu0 %v1030_v17, %s1630_s20 }
 0x340   : > { %1042 = vrot.lane.b32.xlu1 %v1031_v25, %s1630_s20 }
 0x341   : > { %1175 = vrot.lane.b32.xlu0 %v1165_v63, %s1630_s20 }
 0x344   : > { %1177 = vrot.lane.b32.xlu1 %v1166_v50, %s1630_s20 }
 0x345   : > { %1287 = vrot.lane.b32.xlu0 %v1030_v17, %s1625_s19 }
 0x348   : > { %1289 = vrot.lane.b32.xlu1 %v1031_v25, %s1625_s19 }
 0x349   : > { %1391 = vrot.lane.b32.xlu0 %v1165_v63, %s1625_s19 }
 0x34c   : > { %1393 = vrot.lane.b32.xlu1 %v1166_v50, %s1625_s19  ;;  %s1593_s19 = sshll.u32 %s2296_s10, 6 }
 0x34d   : > { %1307 = vrot.lane.b32.xlu0 %v1575_v51, %s1629_s27  ;;  %s2264_s15 = scalar_lea.vmem %s2294_s9, %s1593_s19 }
 0x350   : > { %1411 = vrot.lane.b32.xlu1 %v1582_v36, %s1629_s27 }
 0x37f   : > { %v1010_v33 = vpop.permute.xlu0 %1009 }
 0x382   : > { %v1148_v34 = vpop.permute.xlu1 %1147 }
 0x383   : > { %v1146_v22 = vpop.permute.xlu0 %1145  ;;  %v1160_v51 = vadd.f32 %v1148_v34, %v1971_v56 }
 0x384   : > { %v1153_v28 = vsel %vm469_vm0, %v1146_v22, %v1148_v34 }
 0x385   : > { %v1159_v4 = vadd.f32 %v1153_v28, %v1985_v2 }
 0x386   : > { %v2110_v18 = vpop.permute.xlu1 %1367 }
 0x387   : > { %v2112_v48 = vpop.permute.xlu0 %1261 }
 0x38a   : > { %v2114_v52 = vpop.permute.xlu1 %1151 }
 0x38b   : > { %v2116_v61 = vpop.permute.xlu0 %1365 }
 0x38e   : > { %v1372_v19 = vpop.permute.xlu1 %1371 }
 0x38f   : > { %v1382_v40 = vadd.f32 %v1372_v19, %v1983_v58  ;;  %v1014_v37 = vpop.permute.xlu0 %1013 }
 0x391   : > { %v2122_v57 = vadd.f32 %v1382_v40, %v2119_v1 }
 0x392   : > { %v1012_v59 = vpop.permute.xlu1 %1011 }
 0x393   : > { %v1150_v62 = vpop.permute.xlu0 %1149  ;;  %v1018_v6 = vsel %vm469_vm0, %v1010_v33, %v1012_v59  ;;  %v1025_v44 = vadd.f32 %v1012_v59, %v2015_v21 }
 0x394   : > { %v1024_v26 = vadd.f32 %v1018_v6, %v1974_v13 }
 0x396   : > { %v2124_v49 = vpop.permute.xlu1 %1263 }
 0x397   : > { %v2126_v0 = vpop.permute.xlu0 %1265 }
 0x39a   : > { %v1016_v54 = vpop.permute.xlu1 %1015 }
 0x39b   : > { %v1370_v7 = vpop.permute.xlu0 %1369  ;;  %v1019_v56 = vsel %vm469_vm0, %v1014_v37, %v1016_v54 }
 0x39c   : > { %v1374_v11 = vsel %vm469_vm0, %v1370_v7, %v1372_v19  ;;  %v1190_v19 = vmul.f32 0.75, %v2056_v41  ;;  %v1026_v7 = vadd.f32 %v1019_v56, %v2019_v20  ;;  %v1058_v20 = vmul.f32 0.75, %v2083_v24 }
 0x39d   : > { %v1381_v58 = vadd.f32 %v1374_v11, %v2007_v8  ;;  %v1056_v8 = vmul.f32 0.75, %v2044_v39 }
 0x39e   : > { %v1268_v14 = vpop.permute.xlu1 %1267 }
 0x39f   : > { %v1037_v47 = vpop.permute.xlu0 %1036  ;;  %v2132_v16 = vadd.f32 %v1381_v58, %v1191_v42  ;;  %v1154_v58 = vsel %vm469_vm0, %v1150_v62, %v2114_v52 }
 0x3a0   : > { %v1051_v43 = vadd.f32 %v1037_v47, %v1024_v26  ;;  %v1161_v41 = vadd.f32 %v1154_v58, %v2032_v53  ;;  %v1162_v53 = vadd.f32 %v2114_v52, %v1992_v12 }
 0x3a2   : > { %v1059_v17 = vadd.f32 %v2135_v27, %v1051_v43  ;;  %v1039_v5 = vpop.permute.xlu1 %1038 }
 0x3a3   : > { %v1045_v13 = vsel %vm1044_vm6, %v1037_v47, %v1039_v5  ;;  %v1172_v46 = vpop.permute.xlu0 %1171  ;;  %v1057_v47 = vmul.f32 0.75, %v2075_v3  ;;  %v1269_v3 = vsel %vm469_vm0, %v2112_v48, %v2124_v49 }
 0x3a4   : > { %v1072_v25 = vadd.f32 %v2105_v29, %v1059_v17  ;;  %v1052_v63 = vadd.f32 %v1045_v13, %v1025_v44  ;;  %v1185_v50 = vadd.f32 %v1172_v46, %v1159_v4  ;;  %v1027_v4 = vadd.f32 %v1016_v54, %v2046_v60 }
 0x3a6   : > { %v1060_v2 = vadd.f32 %v1056_v8, %v1052_v63  ;;  %v1193_v21 = vadd.f32 %v2144_v55, %v1185_v50  ;;  %v1174_v36 = vpop.permute.xlu1 %1173  ;;  %v1373_v50 = vsel %vm469_vm0, %v2116_v61, %v2110_v18  ;;  %v1278_v61 = vadd.f32 %v1268_v14, %v2030_v35 }
 0x3a7   : > { %v1179_v33 = vsel %vm1044_vm6, %v1172_v46, %v1174_v36  ;;  %v1284_v22 = vpop.permute.xlu0 %1283  ;;  %v1086_v56 = vadd.f32 %v1923_v30, %v1072_v25 }
 0x3a8   : > { %v2150_v39 = vadd.f32 %v2105_v29, %v1060_v2  ;;  %v2153_v28 = vadd.f32 %v2107_v32, %v1193_v21  ;;  %v1186_v38 = vadd.f32 %v1179_v33, %v1160_v51  ;;  %v1276_v51 = vadd.f32 %v2124_v49, %v2004_v45 }
 0x3a9   : > { %v1275_v21 = vadd.f32 %v1269_v3, %v1952_v15  ;;  %v1380_v49 = vadd.f32 %v2110_v18, %v1960_v9  ;;  %v1379_v15 = vadd.f32 %v1373_v50, %v1962_v23  ;;  %vm1090_vm7 = vcmp.ge.f32.partialorder %v1086_v56, 0.0 }
 0x3aa   : > { %v1194_v40 = vadd.f32 %v1190_v19, %v1186_v38  ;;  %v1286_v59 = vpop.permute.xlu1 %1285  ;;  %v1280_v33 = vadd.f32 %v1276_v51, %v1056_v8 }
 0x3ab   : > { %v1388_v34 = vpop.permute.xlu0 %1387  ;;  %v1383_v18 = vadd.f32 %v1379_v15, %v2144_v55  ;;  %v1384_v8 = vadd.f32 %v1380_v49, %v1190_v19 }
 0x3ac   : > { %v2158_v6 = vadd.f32 %v2107_v32, %v1194_v40 }
 0x3ae   : > { %v1390_v11 = vpop.permute.xlu1 %1389 }
 0x3af   : > { %v1041_v26 = vpop.permute.xlu0 %1040  ;;  %v1395_v9 = vsel %vm469_vm0, %v1388_v34, %v1390_v11 }
 0x3b0   : > { %v1053_v43 = vadd.f32 %v1041_v26, %v1026_v7  ;;  %v1298_v7 = vadd.f32 %v1286_v59, %v1280_v33 }
 0x3b2   : > { %v1061_v44 = vadd.f32 %v1057_v47, %v1053_v43  ;;  %v1043_v37 = vpop.permute.xlu1 %1042 }
 0x3b3   : > { %v1046_v17 = vsel %vm1044_vm6, %v1041_v26, %v1043_v37  ;;  %v1176_v5 = vpop.permute.xlu0 %1175 }
 0x3b4   : > { %v2168_v13 = vadd.f32 %v2105_v29, %v1061_v44  ;;  %v1054_v46 = vadd.f32 %v1046_v17, %v1027_v4  ;;  %v1187_v62 = vadd.f32 %v1176_v5, %v1161_v41  ;;  %v1402_v41 = vadd.f32 %v1390_v11, %v1384_v8 }
 0x3b6   : > { %v1062_v60 = vadd.f32 %v1058_v20, %v1054_v46  ;;  %v1195_v54 = vadd.f32 %v1191_v42, %v1187_v62  ;;  %v1178_v63 = vpop.permute.xlu1 %1177  ;;  %v1270_v42 = vsel %vm469_vm0, %v2126_v0, %v1268_v14  ;;  %v1279_v0 = vadd.f32 %v1275_v21, %v2135_v27 }
 0x3b7   : > { %v1180_v24 = vsel %vm1044_vm6, %v1176_v5, %v1178_v63  ;;  %v1288_v2 = vpop.permute.xlu0 %1287  ;;  %v1277_v40 = vadd.f32 %v1270_v42, %v1995_v10  ;;  %v1094_v10 = vmul.f32 0.2, %v1086_v56  ;;  %v1401_v27 = vadd.f32 %v1395_v9, %v1383_v18 }
 0x3b8   : > { %v2184_v48 = vadd.f32 %v2105_v29, %v1062_v60  ;;  %v2187_v12 = vadd.f32 %v2107_v32, %v1195_v54  ;;  %v1188_v52 = vadd.f32 %v1180_v24, %v1162_v53  ;;  %v1291_v29 = vsel %vm469_vm0, %v1284_v22, %v1286_v59 }
 0x3b9   : > { %v1297_v14 = vadd.f32 %v1291_v29, %v1279_v0  ;;  %v1281_v26 = vadd.f32 %v1277_v40, %v1057_v47  ;;  %v1210_v59 = vadd.f32 %v2153_v28, %v1923_v30  ;;  %v1098_v62 = vsel %vm1090_vm7, %v1086_v56, %v1094_v10 }
 0x3ba   : > { %v1196_v36 = vadd.f32 %v2119_v1, %v1188_v52  ;;  %v1290_v45 = vpop.permute.xlu1 %1289  ;;  %v1282_v1 = vadd.f32 %v1278_v61, %v1058_v20  ;;  %v1087_v20 = vadd.f32 %v1923_v30, %v2150_v39  ;;  %v1211_v52 = vadd.f32 %v2158_v6, %v1923_v30 }
 0x3bb   : > { %v2197_v38 = vpop.permute.xlu0 %1391  ;;  %v1218_v3 = vmul.f32 0.2, %v1210_v59  ;;  %vm1214_vm13 = vcmp.ge.f32.partialorder %v1210_v59, 0.0  ;;  %v1102_v6 = vmul.f32 1.4142135, %v1098_v62 }
 0x3bc   : > { %v2203_v35 = vadd.f32 %v2107_v32, %v1196_v36  ;;  %v1300_v22 = vadd.f32 %v1290_v45, %v1282_v1  ;;  %v1292_v32 = vsel %vm469_vm0, %v1288_v2, %v1290_v45  ;;  %v1095_v39 = vmul.f32 0.2, %v1087_v20 }
 0x3bd   : > { %v1299_v11 = vadd.f32 %v1292_v32, %v1281_v26  ;;  %vm1091_vm14 = vcmp.ge.f32.partialorder %v1087_v20, 0.0  ;;  %v1222_v0 = vsel %vm1214_vm13, %v1210_v59, %v1218_v3  ;;  %v1219_v1 = vmul.f32 0.2, %v1211_v52 }
 0x3be   : > { %v2206_v23 = vpop.permute.xlu1 %1393  ;;  %v1099_v9 = vsel %vm1091_vm14, %v1087_v20, %v1095_v39  ;;  %vm1215_vm15 = vcmp.ge.f32.partialorder %v1211_v52, 0.0 }
 0x3bf   : > { %v1308_v58 = vpop.permute.xlu0 %1307  ;;  %v1396_v40 = vsel %vm469_vm0, %v2197_v38, %v2206_v23  ;;  %v1404_v38 = vadd.f32 %v2206_v23, %v2122_v57  ;;  %v1103_v10 = vmul.f32 1.4142135, %v1099_v9  ;;  %v1223_v26 = vsel %vm1215_vm15, %v1211_v52, %v1219_v1 }
 0x3c0   : > { %v1310_v25 = vadd.f32 %v1308_v58, %v1297_v14  ;;  %v1311_v43 = vadd.f32 %v1308_v58, %v1298_v7  ;;  %v1313_v4 = vadd.f32 %v1308_v58, %v1300_v22  ;;  %v1312_v53 = vadd.f32 %v1308_v58, %v1299_v11 }
 0x3c1   : > { %v1088_v14 = vadd.f32 %v1925_v31, %v2168_v13  ;;  %v1089_v7 = vadd.f32 %v1925_v31, %v2184_v48  ;;  %v1403_v18 = vadd.f32 %v1396_v40, %v2132_v16  ;;  %v1564_v22 = vclamps-f32 %v1102_v6, 256.0 }
 0x3c2   : > { %v1314_v34 = vadd.f32 %v1310_v25, %v1923_v30  ;;  %v1315_v44 = vadd.f32 %v1311_v43, %v1923_v30  ;;  %v2214_v55 = vpop.permute.xlu1 %1411  ;;  %v1317_v19 = vadd.f32 %v1313_v4, %v1925_v31  ;;  %v1316_v33 = vadd.f32 %v1312_v53, %v1925_v31 }
 0x3c3   : > { %v1414_v47 = vadd.f32 %v2214_v55, %v1401_v27  ;;  %v1415_v37 = vadd.f32 %v2214_v55, %v1402_v41  ;;  %v1226_v13 = vmul.f32 1.4142135, %v1222_v0  ;;  %v1096_v25 = vmul.f32 0.2, %v1088_v14 }
 0x3c4   : > { %v1322_v17 = vmul.f32 0.2, %v1314_v34  ;;  %v1323_v5 = vmul.f32 0.2, %v1315_v44  ;;  %vm1319_vm8 = vcmp.ge.f32.partialorder %v1315_v44, 0.0  ;;  %vm1318_vm9 = vcmp.ge.f32.partialorder %v1314_v34, 0.0 }
 0x3c5   : > { %v1418_v28 = vadd.f32 %v1414_v47, %v1923_v30  ;;  %v1419_v46 = vadd.f32 %v1415_v37, %v1923_v30  ;;  %v1325_v60 = vmul.f32 0.2, %v1317_v19  ;;  %vm1321_vm11 = vcmp.ge.f32.partialorder %v1317_v19, 0.0 }
 0x3c6   : > { %v1327_v50 = vsel %vm1319_vm8, %v1315_v44, %v1323_v5  ;;  %v1326_v24 = vsel %vm1318_vm9, %v1314_v34, %v1322_v17  ;;  %v1324_v8 = vmul.f32 0.2, %v1316_v33  ;;  %vm1320_vm0 = vcmp.ge.f32.partialorder %v1316_v33, 0.0 }
 0x3c7   : > { %v1426_v54 = vmul.f32 0.2, %v1418_v28  ;;  %v1427_v63 = vmul.f32 0.2, %v1419_v46  ;;  %v1331_v51 = vmul.f32 1.4142135, %v1327_v50  ;;  %v1329_v15 = vsel %vm1321_vm11, %v1317_v19, %v1325_v60 }
 0x3c8   : > { %vm1423_vm10 = vcmp.ge.f32.partialorder %v1419_v46, 0.0  ;;  %v1330_v2 = vmul.f32 1.4142135, %v1326_v24  ;;  %vm1422_vm12 = vcmp.ge.f32.partialorder %v1418_v28, 0.0  ;;  %v1333_v56 = vmul.f32 1.4142135, %v1329_v15 }
 0x3c9   : > { %v1431_v21 = vsel %vm1423_vm10, %v1419_v46, %v1427_v63  ;;  %v1577_v42 = vclamps-f32 %v1331_v51, 256.0  ;;  %v1430_v36 = vsel %vm1422_vm12, %v1418_v28, %v1426_v54  ;;  %v1213_v48 = vadd.f32 %v2203_v35, %v1925_v31 }
 0x3ca   : > { %v1435_v61 = vmul.f32 1.4142135, %v1431_v21  ;;  %v1576_v45 = vclamps-f32 %v1330_v2, 256.0  ;;  %v1434_v49 = vmul.f32 1.4142135, %v1430_v36  ;;  %v1579_v58 = vclamps-f32 %v1333_v56, 256.0 }
 0x3cb   : > { %1348 = vrot.lane.b32.xlu1 %v1577_v42, %s1627_s21  ;;  %v1417_v16 = vadd.f32 %v2214_v55, %v1404_v38  ;;  %v1097_v43 = vmul.f32 0.2, %v1089_v7  ;;  %v1212_v27 = vadd.f32 %v2187_v12, %v1925_v31  ;;  %v1416_v57 = vadd.f32 %v2214_v55, %v1403_v18 }
 0x3cc   : > { %v1584_v29 = vclamps-f32 %v1435_v61, 256.0  ;;  %1346 = vrot.lane.b32.xlu0 %v1576_v45, %s1627_s21  ;;  %v1583_v30 = vclamps-f32 %v1434_v49, 256.0  ;;  %v1328_v23 = vsel %vm1320_vm0, %v1316_v33, %v1324_v8  ;;  %vm1093_vm1 = vcmp.ge.f32.partialorder %v1089_v7, 0.0 }
 0x3cd   : > { %vm1092_vm3 = vcmp.ge.f32.partialorder %v1088_v14, 0.0  ;;  %v1565_v41 = vclamps-f32 %v1103_v10, 256.0  ;;  %v1569_v32 = vclamps-f32 %v1226_v13, 256.0  ;;  %v1227_v4 = vmul.f32 1.4142135, %v1223_v26 }
 0x3ce   : > { %v1421_v35 = vadd.f32 %v1417_v16, %v1925_v31  ;;  %v1332_v59 = vmul.f32 1.4142135, %v1328_v23  ;;  %v1101_v34 = vsel %vm1093_vm1, %v1089_v7, %v1097_v43  ;;  %v1221_v44 = vmul.f32 0.2, %v1213_v48 }
 0x3cf   : > { %1452 = vrot.lane.b32.xlu1 %v1584_v29, %s1627_s21  ;;  %v1220_v19 = vmul.f32 0.2, %v1212_v27  ;;  %v1420_v12 = vadd.f32 %v1416_v57, %v1925_v31  ;;  %v1100_v55 = vsel %vm1092_vm3, %v1088_v14, %v1096_v25  ;;  %vm1217_vm4 = vcmp.ge.f32.partialorder %v1213_v48, 0.0 }
 0x3d0   : > { %1450 = vrot.lane.b32.xlu0 %v1583_v30, %s1627_s21  ;;  %vm1216_vm5 = vcmp.ge.f32.partialorder %v1212_v27, 0.0  ;;  %v1570_v47 = vclamps-f32 %v1227_v4, 256.0  ;;  %v1105_v37 = vmul.f32 1.4142135, %v1101_v34  ;;  %v1429_v11 = vmul.f32 0.2, %v1421_v35 }
 0x3d1   : > { %v1578_v17 = vclamps-f32 %v1332_v59, 256.0  ;;  %v1104_v5 = vmul.f32 1.4142135, %v1100_v55  ;;  %v1225_v20 = vsel %vm1217_vm4, %v1213_v48, %v1221_v44  ;;  %v1428_v28 = vmul.f32 0.2, %v1420_v12 }
 0x3d2   : > { %v1224_v46 = vsel %vm1216_vm5, %v1212_v27, %v1220_v19  ;;  %vm1425_vm6 = vcmp.ge.f32.partialorder %v1421_v35, 0.0  ;;  %vm1424_vm7 = vcmp.ge.f32.partialorder %v1420_v12, 0.0  ;;  %v1567_v31 = vclamps-f32 %v1105_v37, 256.0 }
 0x3d3   : > { %1352 = vrot.lane.b32.xlu1 %v1579_v58, %s1627_s21  ;;  %v1229_v62 = vmul.f32 1.4142135, %v1225_v20  ;;  %v1566_v3 = vclamps-f32 %v1104_v5, 256.0  ;;  %v1228_v53 = vmul.f32 1.4142135, %v1224_v46  ;;  %v1433_v60 = vsel %vm1425_vm6, %v1421_v35, %v1429_v11 }
 0x3d4   : > { %1118 = vrot.lane.b32.xlu0 %v1564_v22, %s1627_s21  ;;  %v1432_v54 = vsel %vm1424_vm7, %v1420_v12, %v1428_v28  ;;  %v1437_v50 = vmul.f32 1.4142135, %v1433_v60 }
 0x3d5   : > { %v1572_v63 = vclamps-f32 %v1229_v62, 256.0  ;;  %v1571_v51 = vclamps-f32 %v1228_v53, 256.0  ;;  %v1436_v24 = vmul.f32 1.4142135, %v1432_v54 }
 0x3d6   : > { %v1586_v2 = vclamps-f32 %v1437_v50, 256.0 }
 0x3d7   : > { %1120 = vrot.lane.b32.xlu1 %v1565_v41, %s1627_s21  ;;  %v1585_v21 = vclamps-f32 %v1436_v24, 256.0 }
 0x3d8   : > { %1242 = vrot.lane.b32.xlu0 %v1569_v32, %s1627_s21 }
 0x3db   : > { %1244 = vrot.lane.b32.xlu1 %v1570_v47, %s1627_s21 }
 0x3dc   : > { %1350 = vrot.lane.b32.xlu0 %v1578_v17, %s1627_s21 }
 0x3df   : > { %1124 = vrot.lane.b32.xlu1 %v1567_v31, %s1627_s21 }
 0x3e0   : > { %1122 = vrot.lane.b32.xlu0 %v1566_v3, %s1627_s21 }
 0x3e3   : > { %1248 = vrot.lane.b32.xlu1 %v1572_v63, %s1627_s21 }
 0x3e4   : > { %1246 = vrot.lane.b32.xlu0 %v1571_v51, %s1627_s21 }
 0x3e7   : > { %1456 = vrot.lane.b32.xlu1 %v1586_v2, %s1627_s21 }
 0x3e8   : > { %1454 = vrot.lane.b32.xlu0 %v1585_v21, %s1627_s21 }
 0x43d   : > { %v1349_v39 = vpop.permute.xlu1 %1348 }
 0x43e   : > { %v1347_v52 = vpop.permute.xlu0 %1346 }
 0x43f   : > { %v1354_v42 = vsel %vm490_vm2, %v1347_v52, %v1349_v39 }
 0x440   : > { %1580 = vst [vmem:[%s2264_s15 + $0x20] sm:$0xff] %v1354_v42 }
 0x441   : > { %v1453_v61 = vpop.permute.xlu1 %1452 }
 0x442   : > { %v1451_v36 = vpop.permute.xlu0 %1450 }
 0x443   : > { %v1458_v45 = vsel %vm490_vm2, %v1451_v36, %v1453_v61 }
 0x444   : > { %1587 = vst [vmem:[%s2264_s15 + $0x30] sm:$0xff] %v1458_v45 }
 0x445   : > { %v1353_v49 = vpop.permute.xlu1 %1352 }
 0x446   : > { %v1119_v15 = vpop.permute.xlu0 %1118 }
 0x449   : > { %v1121_v33 = vpop.permute.xlu1 %1120 }
 0x44a   : > { %v1243_v29 = vpop.permute.xlu0 %1242  ;;  %v1127_v40 = vsel %vm490_vm2, %v1119_v15, %v1121_v33 }
 0x44b   : > { %1131 = vst [vmem:[%s2264_s15] sm:$0xff] %v1127_v40 }
 0x44d   : > { %v1245_v30 = vpop.permute.xlu1 %1244 }
 0x44e   : > { %v1351_v6 = vpop.permute.xlu0 %1350  ;;  %v1250_v56 = vsel %vm490_vm2, %v1243_v29, %v1245_v30 }
 0x44f   : > { %v1355_v0 = vsel %vm490_vm2, %v1351_v6, %v1353_v49  ;;  %1573 = vst [vmem:[%s2264_s15 + $0x10] sm:$0xff] %v1250_v56 }
 0x450   : > { %1581 = vst [vmem:[%s2264_s15 + $0x28] sm:$0xff] %v1355_v0 }
 0x451   : > { %v1125_v1 = vpop.permute.xlu1 %1124 }
 0x452   : > { %v1123_v14 = vpop.permute.xlu0 %1122 }
 0x453   : > { %v1128_v7 = vsel %vm490_vm2, %v1123_v14, %v1125_v1 }
 0x454   : > { %1132 = vst [vmem:[%s2264_s15 + $0x8] sm:$0xff] %v1128_v7 }
 0x455   : > { %v1249_v9 = vpop.permute.xlu1 %1248 }
 0x456   : > { %v1247_v18 = vpop.permute.xlu0 %1246 }
 0x457   : > { %v1251_v8 = vsel %vm490_vm2, %v1247_v18, %v1249_v9 }
 0x458   : > { %1574 = vst [vmem:[%s2264_s15 + $0x18] sm:$0xff] %v1251_v8 }
 0x459   : > { %v1457_v38 = vpop.permute.xlu1 %1456 }
 0x45a   : > { %v1455_v22 = vpop.permute.xlu0 %1454 }
 0x45b   : > { %v1459_v58 = vsel %vm490_vm2, %v1455_v22, %v1457_v38 }
 0x45c   : > { %1588 = vst [vmem:[%s2264_s15 + $0x38] sm:$0xff] %v1459_v58 }
 0x45d PF: > { %s19_s30 = sadd.s32 1, %s1622_s30  }
 0x45e   : > { %p16_p4 = scmp.ge.s32.totalorder %s19_s30, 4  }
 0x460   :  { %18 = sbr.rel (!%p16_p4) target bundleno = 1 (0x1), region = 95 }

// kernel: _lambda_.12
= control target key start
LH: loop header
LB: loop body
LE: loop exit
PB: predicated region body
PF: predicated region fallthrough
CT: control target
= control target key end

     0   :  { %16 = vsyncpa [#allocation3], 0  ;;  %s1460_s0 = inlined_call_operand.vmem [shape: f32[2,16,432], index: 0, kind: input, shape index: {}]   ;;  %s1461_s1 = inlined_call_operand.vmem [shape: bf16[16,144], index: 1, kind: input, shape index: {}]   ;;  %s1462_s2 = inlined_call_operand.vmem [shape: f32[2,16,1], index: 2, kind: input, shape index: {}]   ;;  %s1463_s3 = inlined_call_operand.vmem [shape: f32[2,16,1], index: 3, kind: input, shape index: {}]   ;;  %s1464_s4 = inlined_call_operand.vmem [shape: f32[16,1], index: 4, kind: input, shape index: {}]   ;;  %s1465_s5 = inlined_call_operand.vmem [shape: f32[1,384], index: 5, kind: input, shape index: {}]   ;;  %s1466_s6 = inlined_call_operand.vmem [shape: f32[4,16], index: 6, kind: input, shape index: {}]   ;;  %s1467_s7 = inlined_call_operand.vmem [shape: f32[2,1,16], index: 7, kind: input, shape index: {}]   ;;  %s1468_s8 = inlined_call_operand.vmem [shape: f32[4,1], index: 8, kind: input, shape index: {}]   ;;  %s1469_s9 = inlined_call_operand.hbm [shape: f32[2,16,384], index: 9, kind: output, shape index: {0}]   ;;  %s1470_s10 = inlined_call_operand.vmem [shape: f32[2,4,384], index: 10, kind: output, shape index: {1}]  }
   0x1   :  { %18 = vsyncpa [#allocation3 + $0x1], 0  ;;  %s1273_s13 = smov 0   ;;  %s1275_s14 = smov 0  }
   0x2   :  { %s1277_s15 = smov 0   ;;  %s1279_s16 = smov 0  }
   0x3 LB: > { %s1294_s17 = sadd.s32 4294967295, %s1202_s16   ;;  %s1039_s18 = sadd.s32 4294967294, %s1202_s16   ;;  %s1202_s16 = sphi %s1279_s16, %s1476_s16   ;;  %s1198_s15 = sphi %s1277_s15, %s1475_s15   ;;  %s1194_s14 = sphi %s1275_s14, %s1474_s14   ;;  %s1190_s13 = sphi %s1273_s13, %s1473_s13  }
   0x4   : > { %s1298_s19 = sadd.s32 1, %s1202_s16   ;;  %s240_s20 = sadd.s32 1, %s1198_s15 }
   0x5   : > { %s237_s21 = ssub.s32 %s1202_s16, %s1298_s19  ;;  %p250_p0 = scmp.ne.s32.totalorder %s1198_s15, %s1194_s14 }
   0x6   : > { %p238_p1 = scmp.eq.s32.totalorder %s237_s21, 0  ;;  %p251_p2 = scmp.eq.s32.totalorder %s1294_s17, 1 }
   0x7   : > { %p256_p3 = scmp.ne.s32.totalorder %s1194_s14, %s1190_s13  ;;  %p257_p4 = scmp.eq.s32.totalorder %s1039_s18, 1 }
   0x8   : > { %s1309_s22 = scalar_select %p238_p1, %s1198_s15, %s240_s20  }
   0x9   : > { %p1311_p5 = por %p251_p2, %p250_p0  ;;  %p1315_p6 = por %p257_p4, %p256_p3 }
   0xa   : > { %p1042_p7 = scmp.ge.s32.totalorder %s1202_s16, 1  ;;  %p346_p8 = scmp.lt.s32.totalorder %s1202_s16, 3 }
   0xc   : > { %p347_p9 = pnand %p1042_p7, %p346_p8 }
   0xd   : > { %p402_p10 = scmp.lt.s32.totalorder (!%p347_p9), %s1294_s17, 1  ;;  %v1204_v0 = vmov (!%p347_p9), 0   ;;  %s1205_s20 = smov (!%p347_p9), 127   ;;  %v1139_v25 = vld [vmem:[%s1461_s1 + $0x4] ss:$8 sps:$4 sm:$0xff] (!%p347_p9)   ;;  %vm608_vm0 = vcmask (!%p347_p9), 130048  }
   0xe   : > { %350 = sbr.rel (%p347_p9) target bundleno = 795 (0x31b), region = 56  ;;  %1135 = vset.pattern.permute.xlu0 (!%p347_p9), %v1204_v0  ;;  %655 = vmatprep.subr.bf16.mxu1 (!%p347_p9), %v1204_v0  ;;  %s1206_s21 = smov (!%p347_p9), 126   ;;  %v472_v27 = vld [vmem:[%s1464_s4] sm:$0xff] (!%p347_p9)  ;;  %v473_v30 = vld [vmem:[%s1464_s4 + $0x8] sm:$0xff] (!%p347_p9)  ;;  %vm487_vm1 = vcmask (!%p347_p9), 1039360   ;;  %vm502_vm2 = vcmask (!%p347_p9), 1031168  }
   0xf   : > { %1136 = vset.pattern.permute.xlu1 (!%p347_p9), %v1204_v0  ;;  %s1207_s27 = smov (!%p347_p9), 110   ;;  %s1208_s28 = smov (!%p347_p9), 109   ;;  %1053 = vmatprep.mubr.msk.bf16.mxu0 (!%p347_p9), %vm608_vm0, %v1139_v25  ;;  %v474_v28 = vld [vmem:[%s1468_s8] sm:$0xf] (!%p347_p9)  ;;  %vm517_vm3 = vcmask (!%p347_p9), 900096   ;;  %vm532_vm4 = vcmask (!%p347_p9), 891904  }
  0x10   : > { %s1211_s11 = smov (!%p347_p9), 91   ;;  %1054 = vmatprep.mubr.msk.bf16.mxu1 (!%p347_p9), %vm608_vm0, %v1139_v25  ;;  %vm547_vm5 = vcmask (!%p347_p9), 883712   ;;  %vm562_vm6 = vcmask (!%p347_p9), 752640   ;;  %vm577_vm7 = vcmask (!%p347_p9), 744448   ;;  %vm592_vm8 = vcmask (!%p347_p9), 736256  }
  0x11   : > { %v1213_v25 = vmov (!%p347_p9), 0.0   ;;  %vm1214_vm9 = vmmov (!%p347_p9), 0  }
  0x15   : > { %s1325_s25 = scalar_select %p402_p10, %s1294_s17, 1 }
  0x17   : > { %s1070_s26 = sshll.u32 %s1325_s25, 4  ;;  %s1069_s30 = sshll.u32 %s1325_s25, 6 }
  0x18   : > { %s411_s29 = scalar_lea.vmem %s1462_s2, %s1070_s26  ;;  %s406_s18 = scalar_lea.vmem %s1460_s0, %s1069_s30 }
  0x19   : > { %v434_v1 = vld [vmem:[%s411_s29] sm:$0xff]  ;;  %v435_v2 = vld [vmem:[%s411_s29 + $0x8] sm:$0xff]  ;;  %v428_v6 = vld [vmem:[%s406_s18 + $0x10] sm:$0xff]  ;;  %s1209_s29 = smov 108   ;;  %s1210_s30 = smov 92  }
  0x1a   : > { %440 = vperm.xlu0 %1135, %v434_v1   ;;  %v426_v4 = vld [vmem:[%s406_s18] sm:$0xff]  ;;  %v427_v5 = vld [vmem:[%s406_s18 + $0x8] sm:$0xff]  ;;  %v432_v9 = vld [vmem:[%s406_s18 + $0x30] sm:$0xff] }
  0x1b   : > { %v430_v7 = vld [vmem:[%s406_s18 + $0x20] sm:$0xff]  ;;  %v431_v8 = vld [vmem:[%s406_s18 + $0x28] sm:$0xff]  ;;  %v433_v20 = vld [vmem:[%s406_s18 + $0x38] sm:$0xff] }
  0x1c   : > { %v429_v21 = vld [vmem:[%s406_s18 + $0x18] sm:$0xff] }
  0x1e   : > { %445 = vperm.xlu0 %1135, %v435_v2  }
  0x99   : > { %v441_v3 = vpop.permute.xlu0 %440 }
  0x9a   : > { %v448_v10 = vmul.f32 %v441_v3, %v426_v4  ;;  %v449_v11 = vmul.f32 %v441_v3, %v427_v5  ;;  %v450_v13 = vmul.f32 %v441_v3, %v428_v6  ;;  %v451_v23 = vmul.f32 %v441_v3, %v429_v21 }
  0x9d   : > { %v446_v12 = vpop.permute.xlu0 %445 }
  0x9e   : > { %v452_v14 = vmul.f32 %v446_v12, %v430_v7  ;;  %v453_v15 = vmul.f32 %v446_v12, %v431_v8  ;;  %v454_v16 = vmul.f32 %v446_v12, %v432_v9  ;;  %v455_v22 = vmul.f32 %v446_v12, %v433_v20 }
  0xa0   : > { %v456_v17 = vpack.c.bf16 %v452_v14, %v448_v10  ;;  %v457_v18 = vpack.c.bf16 %v453_v15, %v449_v11  ;;  %v458_v19 = vpack.c.bf16 %v454_v16, %v450_v13  ;;  %v459_v24 = vpack.c.bf16 %v455_v22, %v451_v23  ;;  %v1137_v22 = vld [vmem:[%s1461_s1] ss:$8 sps:$4 sm:$0xff]  }
  0xa2   : > { %656 = vmatpush1.bf16.msra.mxu1 %v458_v19  ;;  %481 = vrot.lane.b32.xlu1 %v457_v18, %s1205_s20 }
  0xa3   : > { %612 = vmatprep.subr.bf16.mxu0 %v457_v18  ;;  %479 = vrot.lane.b32.xlu0 %v456_v17, %s1205_s20 }
  0xa4   : > { %613 = vmatpush1.bf16.msra.mxu0 %v456_v17  ;;  %657 = vmatprep.subr.bf16.mxu1 %v1204_v0 }
  0xa6   : > { %483 = vrot.lane.b32.xlu1 %v458_v19, %s1205_s20 }
  0xa7   : > { %498 = vrot.lane.b32.xlu0 %v458_v19, %s1206_s21 }
  0xaa   : > { %496 = vrot.lane.b32.xlu1 %v457_v18, %s1206_s21 }
  0xab   : > { %485 = vrot.lane.b32.xlu0 %v459_v24, %s1205_s20  ;;  %s1212_s20 = smov 90  }
  0xae   : > { %494 = vrot.lane.b32.xlu1 %v456_v17, %s1206_s21 }
  0xaf   : > { %513 = vrot.lane.b32.xlu0 %v458_v19, %s1207_s27 }
  0xb2   : > { %511 = vrot.lane.b32.xlu1 %v457_v18, %s1207_s27 }
  0xb3   : > { %500 = vrot.lane.b32.xlu0 %v459_v24, %s1206_s21  ;;  %s419_s21 = scalar_lea.vmem %s1467_s7, %s1325_s25 }
  0xb6   : > { %509 = vrot.lane.b32.xlu1 %v456_v17, %s1207_s27 }
  0xb7   : > { %528 = vrot.lane.b32.xlu0 %v458_v19, %s1208_s28 }
  0xba   : > { %526 = vrot.lane.b32.xlu1 %v457_v18, %s1208_s28 }
  0xbb   : > { %515 = vrot.lane.b32.xlu0 %v459_v24, %s1207_s27  ;;  %s1082_s27 = smul.u32 768, %s1294_s17  ;;  %s1215_s17 = smov [#allocation2]  }
  0xbd   : > { %s1409_s18 = scalar_lea.hbm %s1469_s9, %s1082_s27 }
  0xbe   : > { %524 = vrot.lane.b32.xlu1 %v456_v17, %s1208_s28 }
  0xbf   : > { %543 = vrot.lane.b32.xlu0 %v458_v19, %s1209_s29 }
  0xc2   : > { %541 = vrot.lane.b32.xlu1 %v457_v18, %s1209_s29 }
  0xc3   : > { %530 = vrot.lane.b32.xlu0 %v459_v24, %s1208_s28  ;;  %s416_s28 = scalar_lea.vmem %s1463_s3, %s1070_s26 }
  0xc4   : > { %v436_v26 = vld [vmem:[%s416_s28] sm:$0xff]  ;;  %v437_v29 = vld [vmem:[%s416_s28 + $0x8] sm:$0xff] }
  0xc6   : > { %539 = vrot.lane.b32.xlu1 %v456_v17, %s1209_s29 }
  0xc7   : > { %558 = vrot.lane.b32.xlu0 %v458_v19, %s1210_s30 }
  0xca   : > { %556 = vrot.lane.b32.xlu1 %v457_v18, %s1210_s30 }
  0xcb   : > { %545 = vrot.lane.b32.xlu0 %v459_v24, %s1209_s29  ;;  %s392_s29 = sand.u32 1, %s1194_s14  }
  0xcc   : > { %s1393_s12 = smul.u32 48, %s392_s29 }
  0xce   : > { %554 = vrot.lane.b32.xlu1 %v456_v17, %s1210_s30 }
  0xcf   : > { %573 = vrot.lane.b32.xlu0 %v458_v19, %s1211_s11 }
  0xd2   : > { %571 = vrot.lane.b32.xlu1 %v457_v18, %s1211_s11 }
  0xd3   : > { %560 = vrot.lane.b32.xlu0 %v459_v24, %s1210_s30 }
  0xd6   : > { %569 = vrot.lane.b32.xlu1 %v456_v17, %s1211_s11 }
  0xd7   : > { %588 = vrot.lane.b32.xlu0 %v458_v19, %s1212_s20 }
  0xda   : > { %586 = vrot.lane.b32.xlu1 %v457_v18, %s1212_s20 }
  0xdb   : > { %575 = vrot.lane.b32.xlu0 %v459_v24, %s1211_s11  ;;  %s1144_s11 = sshll.u32 %s1215_s17, 4  ;;  %s1145_s11 = int_to_ptr.vmem [resolvable:$false] %s1144_s11 }
  0xde   : > { %584 = vrot.lane.b32.xlu1 %v456_v17, %s1212_s20 }
  0xdf   : > { %698 = vperm.xlu0 %1135, %v436_v26   ;;  %v714_v26 = vlaneseq }
  0xe2   : > { %590 = vrot.lane.b32.xlu1 %v459_v24, %s1212_s20  ;;  %s394_s20 = scalar_lea.vmem [#allocation2], %s1393_s12 }
  0xe3   : > { %737 = vperm.xlu0 %1135, %v472_v27   ;;  %v715_v27 = vshrl.u32 %v714_v26, 7  ;;  %s916_s28 = sshll.u32 %s394_s20, 4  ;;  %s1411_s28 = int_to_ptr.vmem [resolvable:$true] %s916_s28 }
  0xe4   : > { %s1140_s26 = scalar_lea.vmem %s1411_s28, 768  ;;  %p1147_p0 = scmp.lt.s32.totalorder %s1411_s28, %s1145_s11 }
  0xe5   : > { %p1141_p11 = scmp.ne.s32.totalorder %s1411_s28, %s1140_s26 }
  0xe6   : > { %703 = vperm.xlu1 %1136, %v437_v29   ;;  %v712_v29 = vld [vmem:[%s1465_s5] sm:$0x7] }
  0xe7   : > { %798 = vperm.xlu0 %1135, %v474_v28   ;;  %v716_v28 = vsub.s32 0, %v715_v27  ;;  %p1142_p12 = pnand %p1141_p11, %p1311_p5 }
  0xe9   : > { %p1143_p13 = pneg %p1142_p12 }
  0xea   : > { %742 = vperm.xlu1 %1136, %v473_v30   ;;  %v720_v30 = vsub.s32 1, %v715_v27 }
 0x114   : > { %v482_v31 = vpop.permute.xlu1 %481 }
 0x115   : > { %v480_v32 = vpop.permute.xlu0 %479 }
 0x116   : > { %v488_v36 = vsel %vm487_vm1, %v480_v32, %v482_v31  ;;  %v717_v32 = vrot.slane %v712_v29, %v716_v28 }
 0x118   : > { %v484_v33 = vpop.permute.xlu1 %483 }
 0x119   : > { %v499_v34 = vpop.permute.xlu0 %498  ;;  %v489_v35 = vsel %vm487_vm1, %v482_v31, %v484_v33 }
 0x11a   : > { %614 = vmatprep.subr.bf16.mxu0 %v489_v35 }
 0x11b   : > { %615 = vmatpush1.bf16.msra.mxu0 %v488_v36 }
 0x11c   : > { %v497_v37 = vpop.permute.xlu1 %496 }
 0x11d   : > { %v486_v38 = vpop.permute.xlu0 %485  ;;  %v504_v39 = vsel %vm502_vm2, %v497_v37, %v499_v34 }
 0x11e   : > { %616 = vmatprep.subr.bf16.mxu0 %v504_v39  ;;  %v490_v40 = vsel %vm487_vm1, %v484_v33, %v486_v38  ;;  %v724_v33 = vsub.s32 2, %v715_v27 }
 0x11f   : > { %658 = vmatpush1.bf16.msra.mxu1 %v490_v40 }
 0x120   : > { %v495_v41 = vpop.permute.xlu1 %494  ;;  %659 = vmatprep.subr.bf16.mxu1 %v1204_v0 }
 0x121   : > { %v514_v42 = vpop.permute.xlu0 %513  ;;  %v503_v43 = vsel %vm502_vm2, %v495_v41, %v497_v37 }
 0x122   : > { %617 = vmatpush1.bf16.msra.mxu0 %v503_v43  ;;  %v725_v43 = vrot.slane %v712_v29, %v724_v33 }
 0x124   : > { %v512_v44 = vpop.permute.xlu1 %511 }
 0x125   : > { %v501_v45 = vpop.permute.xlu0 %500  ;;  %v519_v46 = vsel %vm517_vm3, %v512_v44, %v514_v42 }
 0x126   : > { %618 = vmatprep.subr.bf16.mxu0 %v519_v46  ;;  %v505_v47 = vsel %vm502_vm2, %v499_v34, %v501_v45 }
 0x127   : > { %660 = vmatpush1.bf16.msra.mxu1 %v505_v47 }
 0x128   : > { %v510_v48 = vpop.permute.xlu1 %509  ;;  %661 = vmatprep.subr.bf16.mxu1 %v1204_v0 }
 0x129   : > { %v529_v49 = vpop.permute.xlu0 %528  ;;  %v518_v50 = vsel %vm517_vm3, %v510_v48, %v512_v44 }
 0x12a   : > { %619 = vmatpush1.bf16.msra.mxu0 %v518_v50 }
 0x12c   : > { %v527_v51 = vpop.permute.xlu1 %526 }
 0x12d   : > { %v516_v52 = vpop.permute.xlu0 %515  ;;  %v534_v53 = vsel %vm532_vm4, %v527_v51, %v529_v49 }
 0x12e   : > { %620 = vmatprep.subr.bf16.mxu0 %v534_v53  ;;  %v520_v54 = vsel %vm517_vm3, %v514_v42, %v516_v52 }
 0x12f   : > { %662 = vmatpush1.bf16.msra.mxu1 %v520_v54 }
 0x130   : > { %v525_v55 = vpop.permute.xlu1 %524  ;;  %663 = vmatprep.subr.bf16.mxu1 %v1204_v0 }
 0x131   : > { %v544_v56 = vpop.permute.xlu0 %543  ;;  %v533_v57 = vsel %vm532_vm4, %v525_v55, %v527_v51 }
 0x132   : > { %621 = vmatpush1.bf16.msra.mxu0 %v533_v57 }
 0x134   : > { %v542_v58 = vpop.permute.xlu1 %541 }
 0x135   : > { %v531_v59 = vpop.permute.xlu0 %530  ;;  %v549_v60 = vsel %vm547_vm5, %v542_v58, %v544_v56 }
 0x136   : > { %622 = vmatprep.subr.bf16.mxu0 %v549_v60  ;;  %v535_v61 = vsel %vm532_vm4, %v529_v49, %v531_v59 }
 0x137   : > { %664 = vmatpush1.bf16.msra.mxu1 %v535_v61 }
 0x138   : > { %v540_v62 = vpop.permute.xlu1 %539  ;;  %665 = vmatprep.subr.bf16.mxu1 %v1204_v0 }
 0x139   : > { %v559_v63 = vpop.permute.xlu0 %558  ;;  %v548_v1 = vsel %vm547_vm5, %v540_v62, %v542_v58 }
 0x13a   : > { %623 = vmatpush1.bf16.msra.mxu0 %v548_v1 }
 0x13c   : > { %v557_v2 = vpop.permute.xlu1 %556 }
 0x13d   : > { %v546_v3 = vpop.permute.xlu0 %545  ;;  %v564_v4 = vsel %vm562_vm6, %v557_v2, %v559_v63 }
 0x13e   : > { %624 = vmatprep.subr.bf16.mxu0 %v564_v4  ;;  %v550_v5 = vsel %vm547_vm5, %v544_v56, %v546_v3 }
 0x13f   : > { %666 = vmatpush1.bf16.msra.mxu1 %v550_v5 }
 0x140   : > { %v555_v6 = vpop.permute.xlu1 %554  ;;  %667 = vmatprep.subr.bf16.mxu1 %v1204_v0 }
 0x141   : > { %v574_v7 = vpop.permute.xlu0 %573  ;;  %v563_v8 = vsel %vm562_vm6, %v555_v6, %v557_v2 }
 0x142   : > { %625 = vmatpush1.bf16.msra.mxu0 %v563_v8 }
 0x144   : > { %v572_v9 = vpop.permute.xlu1 %571 }
 0x145   : > { %v561_v10 = vpop.permute.xlu0 %560  ;;  %v579_v11 = vsel %vm577_vm7, %v572_v9, %v574_v7 }
 0x146   : > { %626 = vmatprep.subr.bf16.mxu0 %v579_v11  ;;  %v565_v12 = vsel %vm562_vm6, %v559_v63, %v561_v10 }
 0x147   : > { %668 = vmatpush1.bf16.msra.mxu1 %v565_v12 }
 0x148   : > { %v570_v13 = vpop.permute.xlu1 %569  ;;  %669 = vmatprep.subr.bf16.mxu1 %v1204_v0 }
 0x149   : > { %v589_v14 = vpop.permute.xlu0 %588  ;;  %v578_v15 = vsel %vm577_vm7, %v570_v13, %v572_v9  ;;  %v462_v9 = vld [vmem:[%s1466_s6] sm:$0xf] }
 0x14a   : > { %627 = vmatpush1.bf16.msra.mxu0 %v578_v15 }
 0x14c   : > { %v587_v16 = vpop.permute.xlu1 %586 }
 0x14d   : > { %v576_v17 = vpop.permute.xlu0 %575  ;;  %v594_v18 = vsel %vm592_vm8, %v587_v16, %v589_v14 }
 0x14e   : > { %628 = vmatprep.subr.bf16.mxu0 %v594_v18  ;;  %v580_v19 = vsel %vm577_vm7, %v574_v7, %v576_v17 }
 0x14f   : > { %670 = vmatpush1.bf16.msra.mxu1 %v580_v19 }
 0x150   : > { %v585_v20 = vpop.permute.xlu1 %584  ;;  %671 = vmatprep.subr.bf16.mxu1 %v1204_v0 }
 0x151   : > { %v593_v21 = vsel %vm592_vm8, %v585_v20, %v587_v16 }
 0x152   : > { %629 = vmatpush1.bf16.msra.mxu0 %v593_v21 }
 0x154   : > { %v591_v23 = vpop.permute.xlu1 %590 }
 0x155   : > { %645 = vmatmul.mubr.bf16.vlgmr.msra.gmra.mrb[0].mxu0 %v1137_v22  ;;  %v595_v24 = vsel %vm592_vm8, %v589_v14, %v591_v23  ;;  %v1050_v14 = vld [vmem:[%s419_s21] ss:$0 sm:$0xff]  ;;  %s1415_s21 = scalar_lea.sflag [#allocation3], %s392_s29 }
 0x156   : > { %672 = vmatpush1.bf16.msra.mxu1 %v595_v24  ;;  %836 = vmatprep.mubr.bf16.mxu0 %v1204_v0  ;;  %v721_v0 = vrot.slane %v712_v29, %v720_v30  ;;  %v470_v23 = vmul.f32 %v1050_v14, %v462_v9 }
 0x157   : > { %1074 = vmatprep.subr.bf16.mxu1 %v1213_v25 }
 0x158   : > { %v471_v30 = vpack.c.bf16 %v470_v23, %v470_v23 }
 0x159   : > { %688 = vmatmul.mubr.bf16.vlgmr.msra.gmra.mrb[0].mxu1 %v1137_v22 }
 0x15a   : > { %1076 = vmatprep.mubr.msk.bf16.mxu1 %vm1214_vm9, %v1213_v25 }
 0x15e   : > { %v699_v31 = vpop.permute.xlu0 %698 }
 0x162   : > { %v738_v44 = vpop.permute.xlu0 %737 }
 0x165   : > { %v704_v34 = vpop.permute.xlu1 %703 }
 0x169   : > { %v743_v53 = vpop.permute.xlu1 %742 }
 0x228   : > { %v646_v35 = vpop.f32.mrb[0].mxu0 }
 0x229   : > { %v706_v36 = vmul.f32 %v699_v31, %v646_v35  ;;  %v648_v37 = vpop.f32.mrb[1].mxu0 }
 0x22a   : > { %v707_v38 = vmul.f32 %v699_v31, %v648_v37  ;;  %v650_v39 = vpop.f32.mrb[2].mxu0 }
 0x22b   : > { %v729_v40 = vadd.f32 %v717_v32, %v706_v36  ;;  %v709_v41 = vmul.f32 %v704_v34, %v650_v39  ;;  %v652_v42 = vpop.f32.mrb[3].mxu0 }
 0x22c   : > { %v730_v45 = vadd.f32 %v721_v0, %v707_v38  ;;  %v710_v46 = vmul.f32 %v704_v34, %v652_v42  ;;  %v689_v47 = vpop.f32.mrb[0].mxu1 }
 0x22d   : > { %v745_v48 = vadd.f32 %v738_v44, %v729_v40  ;;  %v732_v49 = vadd.f32 %v717_v32, %v709_v41  ;;  %v708_v50 = vmul.f32 %v699_v31, %v689_v47  ;;  %v691_v51 = vpop.f32.mrb[1].mxu1 }
 0x22e   : > { %v746_v52 = vadd.f32 %v738_v44, %v730_v45  ;;  %v733_v54 = vadd.f32 %v721_v0, %v710_v46  ;;  %v692_v55 = vpop.f32.mrb[2].mxu1 }
 0x22f   : > { %vm751_vm10 = vcmp.ge.f32.partialorder %v745_v48, 0.0  ;;  %v757_v56 = vmul.f32 0.2, %v745_v48  ;;  %v748_v57 = vadd.f32 %v743_v53, %v732_v49  ;;  %v731_v58 = vadd.f32 %v725_v43, %v708_v50  ;;  %v694_v59 = vpop.f32.mrb[3].mxu1 }
 0x230   : > { %v758_v60 = vmul.f32 0.2, %v746_v52  ;;  %v749_v61 = vadd.f32 %v743_v53, %v733_v54  ;;  %v711_v62 = vmul.f32 %v704_v34, %v692_v55  ;;  %vm752_vm11 = vcmp.ge.f32.partialorder %v746_v52, 0.0 }
 0x231   : > { %v763_v63 = vsel %vm751_vm10, %v745_v48, %v757_v56  ;;  %vm754_vm12 = vcmp.ge.f32.partialorder %v748_v57, 0.0  ;;  %v760_v1 = vmul.f32 0.2, %v748_v57  ;;  %v747_v2 = vadd.f32 %v738_v44, %v731_v58 }
 0x232   : > { %v769_v3 = vmul.f32 1.4142135, %v763_v63  ;;  %v761_v4 = vmul.f32 0.2, %v749_v61  ;;  %v734_v5 = vadd.f32 %v725_v43, %v711_v62  ;;  %vm755_vm13 = vcmp.ge.f32.partialorder %v749_v61, 0.0 }
 0x233   : > { %v766_v6 = vsel %vm754_vm12, %v748_v57, %v760_v1  ;;  %vm753_vm14 = vcmp.ge.f32.partialorder %v747_v2, 0.0  ;;  %v759_v7 = vmul.f32 0.2, %v747_v2  ;;  %v764_v8 = vsel %vm752_vm11, %v746_v52, %v758_v60 }
 0x234   : > { %v772_v10 = vmul.f32 1.4142135, %v766_v6  ;;  %v750_v11 = vadd.f32 %v743_v53, %v734_v5  ;;  %v767_v12 = vsel %vm755_vm13, %v749_v61, %v761_v4  ;;  %v770_v13 = vmul.f32 1.4142135, %v764_v8 }
 0x235   : > { %v765_v15 = vsel %vm753_vm14, %v747_v2, %v759_v7  ;;  %v773_v16 = vmul.f32 1.4142135, %v767_v12  ;;  %v1055_v17 = vclamps-f32 %v769_v3, 256.0 }
 0x236   : > { %v1058_v18 = vclamps-f32 %v772_v10, 256.0  ;;  %v771_v19 = vmul.f32 1.4142135, %v765_v15  ;;  %vm756_vm15 = vcmp.ge.f32.partialorder %v750_v11, 0.0  ;;  %v762_v20 = vmul.f32 0.2, %v750_v11 }
 0x237   : > { %v1056_v21 = vclamps-f32 %v770_v13, 256.0  ;;  %v1059_v22 = vclamps-f32 %v773_v16, 256.0  ;;  %787 = vst [vmem:[%s394_s20] sm:$0xff] %v1055_v17 }
 0x238   : > { %790 = vst [vmem:[%s394_s20 + $0x18] sm:$0xff] %v1058_v18  ;;  %v768_v24 = vsel %vm756_vm15, %v750_v11, %v762_v20  ;;  %v793_v25 = vpack.c.bf16 %v1058_v18, %v1055_v17  ;;  %v1057_v26 = vclamps-f32 %v771_v19, 256.0 }
 0x239   : > { %v774_v27 = vmul.f32 1.4142135, %v768_v24  ;;  %788 = vst [vmem:[%s394_s20 + $0x8] sm:$0xff] %v1056_v21  ;;  %791 = vst [vmem:[%s394_s20 + $0x20] sm:$0xff] %v1059_v22  ;;  %v794_v28 = vpack.c.bf16 %v1059_v22, %v1056_v21 }
 0x23a   : > { %789 = vst [vmem:[%s394_s20 + $0x10] sm:$0xff] %v1057_v26 }
 0x23b   : > { %804 = vmatprep.subr.bf16.mxu0 %v794_v28  ;;  %v1060_v29 = vclamps-f32 %v774_v27, 256.0 }
 0x23c   : > { %805 = vmatpush1.bf16.msra.mxu0 %v793_v25 }
 0x23d   : > { %792 = vst [vmem:[%s394_s20 + $0x28] sm:$0xff] %v1060_v29  ;;  %v795_v31 = vpack.c.bf16 %v1060_v29, %v1057_v26  ;;  %s1146_s20 = scalar_lea.vmem %s1145_s11, 1536 }
 0x23e   : > { %p1148_p1 = scmp.lt.s32.totalorder %s1146_s20, %s1140_s26 }
 0x23f   : > { %1075 = vmatpush3.bf16.msra.mxu1 %v795_v31  ;;  %1061 = vmatmul.mubr.msk.bf16.vlgmr.msra.gmra.mrb[4].mxu0 %vm608_vm0, %v471_v30 }
 0x240   : > { %p1149_p2 = por %p1148_p1, %p1147_p0 }
 0x242   : > { %1077 = vmatmul.mubr.msk.bf16.vlgmr.msra.gmra.mrb[4].mxu1 %vm608_vm0, %v471_v30  ;;  %p1150_p3 = pnand %p1149_p2, %p1143_p13 }
 0x244   : > { %1153 = shalt.err (!%p1150_p3)
}
 0x245   : > { %s1154_s29 = scalar_lea.hbm %s1409_s18, 768  ;;  %s1158_s30 = scalar_lea.hbm %s1469_s9, 1536 }
 0x246   : > { %p1155_p4 = scmp.ne.s32.totalorder %s1409_s18, %s1154_s29  ;;  %p1159_p9 = scmp.lt.u32.totalorder %s1409_s18, %s1469_s9 }
 0x247   : > { %p1160_p10 = scmp.lt.u32.totalorder %s1158_s30, %s1154_s29  ;;  %p1162_p12 = scmp.lt.u32.totalorder %s1154_s29, %s1409_s18 }
 0x248   : > { %p1156_p7 = pnand %p1155_p4, %p1311_p5 }
 0x249   : > { %p1161_p11 = por %p1160_p10, %p1159_p9 }
 0x24a   : > { %p1157_p8 = pneg %p1156_p7 }
 0x24b   : > { %p1163_p13 = por %p1162_p12, %p1161_p11 }
 0x24d   : > { %p1164_p0 = pnand %p1163_p13, %p1157_p8 }
 0x24f   : > { %1167 = shalt.err (!%p1164_p0)
}
 0x250   : > { %s1216_s26 = smov 384   ;;  %s1217_s20 = smov 24   ;;  %v799_v32 = vpop.permute.xlu0 %798 }
 0x251   : > { %1083 = dma.vmem_to_hbm [thread:$0]  (%p1311_p5), %s1411_s28, 768, %s1409_s18, %s1415_s21, %s1216_s26, %s1216_s26, %s1217_s20  }
 0x252   : > { %s1081_s27 = smul.u32 12, %s1325_s25 }
 0x254   : > { %s424_s30 = scalar_lea.vmem %s1470_s10, %s1081_s27 }
 0x312   : > { %v838_v33 = vpop.f32.mrb[4].mxu0 }
 0x313   : > { %v839_v34 = vadd.f32 %v838_v33, %v799_v32  ;;  %v840_v35 = vpop.f32.mrb[5].mxu0 }
 0x314   : > { %v841_v0 = vadd.f32 %v840_v35, %v799_v32  ;;  %v842_v36 = vpop.f32.mrb[6].mxu0 }
 0x315   : > { %v1063_v37 = vclamps-f32 %v839_v34, 256.0  ;;  %v879_v38 = vpop.f32.mrb[4].mxu1  ;;  %v843_v39 = vpop.f32.mrb[7].mxu0 }
 0x316   : > { %v1064_v40 = vclamps-f32 %v841_v0, 256.0  ;;  %v880_v41 = vadd.f32 %v879_v38, %v799_v32  ;;  %v1078_v42 = vpop.f32.mrb[5].mxu1 }
 0x317   : > { %v882_v43 = vpop.f32.mrb[6].mxu1 }
 0x318   : > { %v893_v44 = vcombine.low %v1063_v37, %v1064_v40  ;;  %v1065_v45 = vclamps-f32 %v880_v41, 256.0  ;;  %v1079_v46 = vpop.f32.mrb[7].mxu1 }
 0x31a   : > { %895 = vst [vmem:[%s424_s30] sm:$0xff] %v893_v44  ;;  %896 = vst [vmem:[%s424_s30 + $0x8] sm:$0xf] %v1065_v45 }
 0x31b PF: > { %p1089_p5 = scmp.ge.s32.totalorder %s1202_s16, 2  ;;  %s934_s23 = sand.u32 1, %s1190_s13  }
 0x31c   : > { %s935_s25 = scalar_lea.sflag [#allocation3], %s934_s23 }
 0x31d   : > { %p1086_p1 = pnand %p1089_p5, %p1315_p6 }
 0x31f   : > { %1185 = dma.done.wait (!%p1086_p1), %s935_s25, 768  }
 0x320   : > { %1187 = vsyncadd (!%p1086_p1), %s935_s25, 4294966528  ;;  %p21_p2 = scmp.ge.s32.totalorder %s1298_s19, 4   ;;  %s1473_s13 = smov %s1194_s14 }
 0x321   : > { %s1474_s14 = smov %s1198_s15  ;;  %s1475_s15 = smov %s1309_s22 }
 0x322   : > { %s1476_s16 = smov %s1298_s19  ;;  %23 = sbr.rel (!%p21_p2) target bundleno = 3 (0x3), region = 112 }
 0x329   :  { %948 = vsyncpa [#allocation3], 1 }
 0x32a   :  { %950 = vsyncpa [#allocation3 + $0x1], 1 }

// kernel: _lambda_.10
= control target key start
LH: loop header
LB: loop body
LE: loop exit
PB: predicated region body
PF: predicated region fallthrough
CT: control target
= control target key end

     0   :  { %s318_s6 = smov 0   ;;  %s366_s0 = inlined_call_operand.vmem [shape: f32[2,4,144], index: 0, kind: input, shape index: {}]   ;;  %s367_s1 = inlined_call_operand.vmem [shape: f32[2,4,4,128], index: 1, kind: output, shape index: {}]  }
   0x1 LB: > { %s270_s7 = sadd.s32 4294967295, %s303_s6   ;;  %p274_p0 = scmp.ge.s32.totalorder %s303_s6, 1  ;;  %s303_s6 = sphi %s318_s6, %s11_s6  }
   0x2   : > { %p87_p1 = scmp.lt.s32.totalorder %s303_s6, 3 }
   0x4   : > { %p88_p2 = pnand %p274_p0, %p87_p1 }
   0x5   : > { %p107_p3 = scmp.lt.s32.totalorder (!%p88_p2), %s270_s7, 1  ;;  %s305_s12 = smov (!%p88_p2), 127   ;;  %vm124_vm0 = vcmask (!%p88_p2), 1039360   ;;  %vm131_vm1 = vcmask (!%p88_p2), 998400   ;;  %vm140_vm2 = vcmask (!%p88_p2), 990208  }
   0x6   : > { %91 = sbr.rel (%p88_p2) target bundleno = 278 (0x116), region = 24  ;;  %s306_s13 = smov (!%p88_p2), 122  }
   0x7   : > { %s307_s14 = smov (!%p88_p2), 121  }
   0xd   : > { %s369_s7 = smov (!%p107_p3, %s270_s7), 1 }
   0xe   : > { %s284_s8 = sshll.u32 %s369_s7, 3  ;;  %s285_s15 = sshll.u32 %s369_s7, 4 }
   0xf   : > { %s111_s11 = scalar_lea.vmem %s366_s0, %s284_s8  ;;  %s116_s18 = scalar_lea.vmem %s367_s1, %s285_s15 }
  0x10   : > { %v117_v0 = vld [vmem:[%s111_s11] sm:$0xff] }
  0x11   : > { %v135_v1 = vmul.f32 0.5625, %v117_v0  ;;  %v119_v2 = vmul.f32 0.1875, %v117_v0  ;;  %v118_v3 = vmul.f32 0.0625, %v117_v0 }
  0x13   : > { %174 = vrot.lane.b32.xlu1 %v135_v1, %s305_s12  ;;  %121 = vrot.lane.b32.xlu0 %v119_v2, %s305_s12 }
  0x17   : > { %128 = vrot.lane.b32.xlu1 %v119_v2, %s306_s13  ;;  %146 = vrot.lane.b32.xlu0 %v118_v3, %s305_s12 }
  0x1b   : > { %180 = vrot.lane.b32.xlu1 %v118_v3, %s306_s13  ;;  %152 = vrot.lane.b32.xlu0 %v135_v1, %s306_s13 }
  0x1f   : > { %199 = vrot.lane.b32.xlu1 %v118_v3, %s307_s14  ;;  %158 = vrot.lane.b32.xlu0 %v119_v2, %s307_s14 }
  0x23   : > { %137 = vrot.lane.b32.xlu0 %v135_v1, %s307_s14 }
  0x85   : > { %v175_v4 = vpop.permute.xlu1 %174  ;;  %v122_v5 = vpop.permute.xlu0 %121 }
  0x86   : > { %v176_v9 = vrot.slane %v175_v4, 4  ;;  %v123_v12 = vrot.slane %v122_v5, 4 }
  0x88   : > { %v177_v16 = vsel %vm124_vm0, %v175_v4, %v176_v9  ;;  %v125_v22 = vsel %vm124_vm0, %v122_v5, %v123_v12 }
  0x89   : > { %v129_v6 = vpop.permute.xlu1 %128  ;;  %v147_v7 = vpop.permute.xlu0 %146  ;;  %v179_v25 = vadd.f32 %v177_v16, %v119_v2  ;;  %v127_v30 = vadd.f32 %v125_v22, %v118_v3  ;;  %v197_v35 = vadd.f32 %v135_v1, %v125_v22 }
  0x8a   : > { %v148_v8 = vrot.slane %v147_v7, 4  ;;  %v130_v17 = vrot.slane %v129_v6, 4 }
  0x8c   : > { %v149_v13 = vsel %vm124_vm0, %v147_v7, %v148_v8  ;;  %v132_v27 = vsel %vm131_vm1, %v129_v6, %v130_v17 }
  0x8d   : > { %v181_v10 = vpop.permute.xlu1 %180  ;;  %v153_v11 = vpop.permute.xlu0 %152  ;;  %v151_v19 = vadd.f32 %v149_v13, %v119_v2  ;;  %v134_v36 = vadd.f32 %v132_v27, %v127_v30  ;;  %v198_v41 = vadd.f32 %v197_v35, %v132_v27 }
  0x8e   : > { %v182_v14 = vrot.slane %v181_v10, 4  ;;  %v154_v15 = vrot.slane %v153_v11, 4 }
  0x90   : > { %v155_v18 = vsel %vm131_vm1, %v153_v11, %v154_v15  ;;  %v183_v23 = vsel %vm131_vm1, %v181_v10, %v182_v14 }
  0x91   : > { %v200_v20 = vpop.permute.xlu1 %199  ;;  %v159_v21 = vpop.permute.xlu0 %158  ;;  %v157_v26 = vadd.f32 %v155_v18, %v151_v19  ;;  %v185_v31 = vadd.f32 %v183_v23, %v179_v25 }
  0x92   : > { %v160_v24 = vrot.slane %v159_v21, 4  ;;  %v201_v28 = vrot.slane %v200_v20, 4 }
  0x94   : > { %v161_v29 = vsel %vm140_vm2, %v159_v21, %v160_v24  ;;  %v202_v39 = vsel %vm140_vm2, %v200_v20, %v201_v28 }
  0x95   : > { %v163_v32 = vadd.f32 %v161_v29, %v157_v26  ;;  %v138_v33 = vpop.permute.xlu0 %137  ;;  %v186_v37 = vadd.f32 %v185_v31, %v161_v29  ;;  %v204_v43 = vadd.f32 %v202_v39, %v198_v41 }
  0x96   : > { %v139_v34 = vrot.slane %v138_v33, 4 }
  0x97   : > { %166 = vrot.lane.b32.xlu1 %v163_v32, %s305_s12  ;;  %v165_v38 = vcombine.high %v163_v32, %v163_v32  ;;  %v188_v44 = vcombine.high %v186_v37, %v186_v37  ;;  %v206_v45 = vcombine.high %v204_v43, %v204_v43 }
  0x98   : > { %v141_v40 = vsel %vm140_vm2, %v138_v33, %v139_v34 }
  0x99   : > { %v143_v42 = vadd.f32 %v141_v40, %v134_v36  ;;  %168 = vrot.lane.b32.xlu0 %v165_v38, %s305_s12 }
  0x9b   : > { %144 = vst [vmem:[%s116_s18] sm:$0xf] %v143_v42  ;;  %189 = vrot.lane.b32.xlu1 %v186_v37, %s306_s13 }
  0x9d   : > { %191 = vrot.lane.b32.xlu0 %v188_v44, %s306_s13 }
  0x9f   : > { %207 = vrot.lane.b32.xlu1 %v204_v43, %s307_s14 }
  0xa1   : > { %209 = vrot.lane.b32.xlu0 %v206_v45, %s307_s14 }
 0x109   : > { %v167_v46 = vpop.permute.xlu1 %166 }
 0x10b   : > { %v169_v47 = vpop.permute.xlu0 %168 }
 0x10c   : > { %v170_v48 = vsel %vm124_vm0, %v167_v46, %v169_v47 }
 0x10d   : > { %279 = vst [vmem:[%s116_s18 + $0x4] sm:$0xf] %v170_v48  ;;  %v190_v49 = vpop.permute.xlu1 %189 }
 0x10f   : > { %v192_v50 = vpop.permute.xlu0 %191 }
 0x110   : > { %v193_v51 = vsel %vm131_vm1, %v190_v49, %v192_v50 }
 0x111   : > { %280 = vst [vmem:[%s116_s18 + $0x8] sm:$0xf] %v193_v51  ;;  %v208_v52 = vpop.permute.xlu1 %207 }
 0x113   : > { %v210_v53 = vpop.permute.xlu0 %209 }
 0x114   : > { %v211_v54 = vsel %vm140_vm2, %v208_v52, %v210_v53 }
 0x115   : > { %281 = vst [vmem:[%s116_s18 + $0xc] sm:$0xf] %v211_v54 }
 0x116 PF: > { %s11_s6 = sadd.s32 1, %s303_s6  }
 0x117   : > { %p8_p4 = scmp.ge.s32.totalorder %s11_s6, 4  }
 0x119   :  { %10 = sbr.rel (!%p8_p4) target bundleno = 1 (0x1), region = 57 }

// kernel: _lambda_.13
= control target key start
LH: loop header
LB: loop body
LE: loop exit
PB: predicated region body
PF: predicated region fallthrough
CT: control target
= control target key end

     0   :  { %s318_s6 = smov 0   ;;  %s366_s0 = inlined_call_operand.vmem [shape: f32[2,4,160], index: 0, kind: input, shape index: {}]   ;;  %s367_s1 = inlined_call_operand.vmem [shape: f32[2,4,4,128], index: 1, kind: output, shape index: {}]  }
   0x1 LB: > { %s270_s7 = sadd.s32 4294967295, %s303_s6   ;;  %p274_p0 = scmp.ge.s32.totalorder %s303_s6, 1  ;;  %s303_s6 = sphi %s318_s6, %s11_s6  }
   0x2   : > { %p87_p1 = scmp.lt.s32.totalorder %s303_s6, 3 }
   0x4   : > { %p88_p2 = pnand %p274_p0, %p87_p1 }
   0x5   : > { %p107_p3 = scmp.lt.s32.totalorder (!%p88_p2), %s270_s7, 1  ;;  %s305_s12 = smov (!%p88_p2), 127   ;;  %vm124_vm0 = vcmask (!%p88_p2), 1039360   ;;  %vm131_vm1 = vcmask (!%p88_p2), 965632   ;;  %vm140_vm2 = vcmask (!%p88_p2), 957440  }
   0x6   : > { %91 = sbr.rel (%p88_p2) target bundleno = 278 (0x116), region = 24  ;;  %s306_s13 = smov (!%p88_p2), 118  }
   0x7   : > { %s307_s14 = smov (!%p88_p2), 117  }
   0xd   : > { %s369_s7 = smov (!%p107_p3, %s270_s7), 1 }
   0xe   : > { %s284_s8 = sshll.u32 %s369_s7, 3  ;;  %s285_s15 = sshll.u32 %s369_s7, 4 }
   0xf   : > { %s111_s11 = scalar_lea.vmem %s366_s0, %s284_s8  ;;  %s116_s18 = scalar_lea.vmem %s367_s1, %s285_s15 }
  0x10   : > { %v117_v0 = vld [vmem:[%s111_s11] sm:$0xff] }
  0x11   : > { %v135_v1 = vmul.f32 0.5625, %v117_v0  ;;  %v119_v2 = vmul.f32 0.1875, %v117_v0  ;;  %v118_v3 = vmul.f32 0.0625, %v117_v0 }
  0x13   : > { %174 = vrot.lane.b32.xlu1 %v135_v1, %s305_s12  ;;  %121 = vrot.lane.b32.xlu0 %v119_v2, %s305_s12 }
  0x17   : > { %128 = vrot.lane.b32.xlu1 %v119_v2, %s306_s13  ;;  %146 = vrot.lane.b32.xlu0 %v118_v3, %s305_s12 }
  0x1b   : > { %180 = vrot.lane.b32.xlu1 %v118_v3, %s306_s13  ;;  %152 = vrot.lane.b32.xlu0 %v135_v1, %s306_s13 }
  0x1f   : > { %199 = vrot.lane.b32.xlu1 %v118_v3, %s307_s14  ;;  %158 = vrot.lane.b32.xlu0 %v119_v2, %s307_s14 }
  0x23   : > { %137 = vrot.lane.b32.xlu0 %v135_v1, %s307_s14 }
  0x85   : > { %v175_v4 = vpop.permute.xlu1 %174  ;;  %v122_v5 = vpop.permute.xlu0 %121 }
  0x86   : > { %v176_v9 = vrot.slane %v175_v4, 4  ;;  %v123_v12 = vrot.slane %v122_v5, 4 }
  0x88   : > { %v177_v16 = vsel %vm124_vm0, %v175_v4, %v176_v9  ;;  %v125_v22 = vsel %vm124_vm0, %v122_v5, %v123_v12 }
  0x89   : > { %v129_v6 = vpop.permute.xlu1 %128  ;;  %v147_v7 = vpop.permute.xlu0 %146  ;;  %v179_v25 = vadd.f32 %v177_v16, %v119_v2  ;;  %v127_v30 = vadd.f32 %v125_v22, %v118_v3  ;;  %v197_v35 = vadd.f32 %v135_v1, %v125_v22 }
  0x8a   : > { %v148_v8 = vrot.slane %v147_v7, 4  ;;  %v130_v17 = vrot.slane %v129_v6, 4 }
  0x8c   : > { %v149_v13 = vsel %vm124_vm0, %v147_v7, %v148_v8  ;;  %v132_v27 = vsel %vm131_vm1, %v129_v6, %v130_v17 }
  0x8d   : > { %v181_v10 = vpop.permute.xlu1 %180  ;;  %v153_v11 = vpop.permute.xlu0 %152  ;;  %v151_v19 = vadd.f32 %v149_v13, %v119_v2  ;;  %v134_v36 = vadd.f32 %v132_v27, %v127_v30  ;;  %v198_v41 = vadd.f32 %v197_v35, %v132_v27 }
  0x8e   : > { %v182_v14 = vrot.slane %v181_v10, 4  ;;  %v154_v15 = vrot.slane %v153_v11, 4 }
  0x90   : > { %v155_v18 = vsel %vm131_vm1, %v153_v11, %v154_v15  ;;  %v183_v23 = vsel %vm131_vm1, %v181_v10, %v182_v14 }
  0x91   : > { %v200_v20 = vpop.permute.xlu1 %199  ;;  %v159_v21 = vpop.permute.xlu0 %158  ;;  %v157_v26 = vadd.f32 %v155_v18, %v151_v19  ;;  %v185_v31 = vadd.f32 %v183_v23, %v179_v25 }
  0x92   : > { %v160_v24 = vrot.slane %v159_v21, 4  ;;  %v201_v28 = vrot.slane %v200_v20, 4 }
  0x94   : > { %v161_v29 = vsel %vm140_vm2, %v159_v21, %v160_v24  ;;  %v202_v39 = vsel %vm140_vm2, %v200_v20, %v201_v28 }
  0x95   : > { %v163_v32 = vadd.f32 %v161_v29, %v157_v26  ;;  %v138_v33 = vpop.permute.xlu0 %137  ;;  %v186_v37 = vadd.f32 %v185_v31, %v161_v29  ;;  %v204_v43 = vadd.f32 %v202_v39, %v198_v41 }
  0x96   : > { %v139_v34 = vrot.slane %v138_v33, 4 }
  0x97   : > { %166 = vrot.lane.b32.xlu1 %v163_v32, %s305_s12  ;;  %v165_v38 = vcombine.high %v163_v32, %v163_v32  ;;  %v188_v44 = vcombine.high %v186_v37, %v186_v37  ;;  %v206_v45 = vcombine.high %v204_v43, %v204_v43 }
  0x98   : > { %v141_v40 = vsel %vm140_vm2, %v138_v33, %v139_v34 }
  0x99   : > { %v143_v42 = vadd.f32 %v141_v40, %v134_v36  ;;  %168 = vrot.lane.b32.xlu0 %v165_v38, %s305_s12 }
  0x9b   : > { %144 = vst [vmem:[%s116_s18] sm:$0xf] %v143_v42  ;;  %189 = vrot.lane.b32.xlu1 %v186_v37, %s306_s13 }
  0x9d   : > { %191 = vrot.lane.b32.xlu0 %v188_v44, %s306_s13 }
  0x9f   : > { %207 = vrot.lane.b32.xlu1 %v204_v43, %s307_s14 }
  0xa1   : > { %209 = vrot.lane.b32.xlu0 %v206_v45, %s307_s14 }
 0x109   : > { %v167_v46 = vpop.permute.xlu1 %166 }
 0x10b   : > { %v169_v47 = vpop.permute.xlu0 %168 }
 0x10c   : > { %v170_v48 = vsel %vm124_vm0, %v167_v46, %v169_v47 }
 0x10d   : > { %279 = vst [vmem:[%s116_s18 + $0x4] sm:$0xf] %v170_v48  ;;  %v190_v49 = vpop.permute.xlu1 %189 }
 0x10f   : > { %v192_v50 = vpop.permute.xlu0 %191 }
 0x110   : > { %v193_v51 = vsel %vm131_vm1, %v190_v49, %v192_v50 }
 0x111   : > { %280 = vst [vmem:[%s116_s18 + $0x8] sm:$0xf] %v193_v51  ;;  %v208_v52 = vpop.permute.xlu1 %207 }
 0x113   : > { %v210_v53 = vpop.permute.xlu0 %209 }
 0x114   : > { %v211_v54 = vsel %vm140_vm2, %v208_v52, %v210_v53 }
 0x115   : > { %281 = vst [vmem:[%s116_s18 + $0xc] sm:$0xf] %v211_v54 }
 0x116 PF: > { %s11_s6 = sadd.s32 1, %s303_s6  }
 0x117   : > { %p8_p4 = scmp.ge.s32.totalorder %s11_s6, 4  }
 0x119   :  { %10 = sbr.rel (!%p8_p4) target bundleno = 1 (0x1), region = 57 }

</bundles_post_ra>
